<compile_context>
chip_gen: v7x
topology: tpu7x:2x2x1
jax: 0.10.0
libtpu: 0.0.40
codegen_flags: <defaults>
</compile_context>

<pallas_src>
import functools

import jax
import jax.numpy as jnp
import numpy as np
from jax.experimental import pallas as pl
from jax.experimental.pallas import tpu as pltpu


# ------------------------------ fused kernel ------------------------------- #

def _numid_kernel(x_ref, w1_ref, b1_ref, w2_ref, b2_ref, s1_ref, s2_ref,
                  w3_ref, b3_ref, w4_ref, b4_ref, w5_ref, b5_ref, out_ref,
                  *, batch):
    B = batch
    n1 = B * 28 * 28            # flat input width,  n = b*784 + h*28 + w
    wa = n1 - 116               # conv1 working width (max shift 4*28+4)
    wp1 = n1 - 145              # pool1 working width (conv + pool shift 29)
    n2 = B * 12 * 12            # flat width after pool1, m = b*144 + h*12 + w
    wc2 = n2 - 52               # conv2 working width (max shift 4*12+4)
    wp2 = n2 - 65               # pool2 working width
    f32 = jnp.float32

    x = x_ref[...]              # (1, n1)
    w1 = w1_ref[...]            # (6, 25)   [co, kh*5+kw]

    # conv1 (1 -> 6 ch, 5x5 valid): 25 lane-shifted scaled adds (Cin == 1).
    c1 = jnp.zeros((6, wa), f32)
    for kh in range(5):
        for kw in range(5):
            j = kh * 5 + kw
            s = kh * 28 + kw
            c1 = c1 + w1[:, j:j + 1] * x[:, s:s + wa]
    a1 = jnp.maximum(c1 + b1_ref[...], 0.0)                        # (6, wa)

    # maxpool 2x2/2 on the 28-grid: max of 4 lane shifts + 0/1 selection matmul.
    m1 = jnp.maximum(jnp.maximum(a1[:, 0:wp1], a1[:, 1:wp1 + 1]),
                     jnp.maximum(a1[:, 28:wp1 + 28], a1[:, 29:wp1 + 29]))
    p1 = jnp.dot(m1, s1_ref[...], preferred_element_type=f32)      # (6, n2)

    # conv2 (6 -> 16 ch, 5x5 valid): 25 accumulated (16,6)@(6,.) MXU matmuls.
    w2 = w2_ref[...]            # (25, 16, 6)  [kh*5+kw, co, c]
    c2 = jnp.zeros((16, wc2), f32)
    for kh in range(5):
        for kw in range(5):
            j = kh * 5 + kw
            s = kh * 12 + kw
            c2 = c2 + jnp.dot(w2[j], p1[:, s:s + wc2],
                              preferred_element_type=f32)
    a2 = jnp.maximum(c2 + b2_ref[...], 0.0)                        # (16, wc2)

    # maxpool 2x2/2 on the 12-grid.
    m2 = jnp.maximum(jnp.maximum(a2[:, 0:wp2], a2[:, 1:wp2 + 1]),
                     jnp.maximum(a2[:, 12:wp2 + 12], a2[:, 13:wp2 + 13]))
    p2 = jnp.dot(m2, s2_ref[...], preferred_element_type=f32)      # (16, 16*B)

    # classifier: torch's (C,H,W) flatten order is folded into w3's layout.
    # p2 columns are q = p*B + b with p = h*4 + w; one tiny 2-D transpose, then
    # 16 accumulated (B,16)@(16,120) matmuls over the spatial position p.
    t2 = p2.T                                                      # (16*B, 16)
    w3 = w3_ref[...]            # (16, 16, 120) = [spatial p, channel c, out j]
    acc = jnp.zeros((B, 120), f32)
    for p in range(16):
        acc = acc + jnp.dot(t2[p * B:(p + 1) * B, :], w3[p],
                            preferred_element_type=f32)
    x1 = jnp.maximum(acc + b3_ref[...], 0.0)                       # (B, 120)
    x2 = jnp.maximum(jnp.dot(x1, w4_ref[...], preferred_element_type=f32)
                     + b4_ref[...], 0.0)                           # (B, 84)
    out_ref[...] = (jnp.dot(x2, w5_ref[...], preferred_element_type=f32)
                    + b5_ref[...])                                 # (B, 10)


# -------------------------- host-side preparation -------------------------- #

def _pool1_select(batch):
    """0/1 matrix selecting pooled (even h, even w) columns of the 28-grid."""
    s = np.zeros((batch * 784 - 145, batch * 144), np.float32)
    for b in range(batch):
        for hp in range(12):
            for wp in range(12):
                s[b * 784 + 2 * hp * 28 + 2 * wp, b * 144 + hp * 12 + wp] = 1.0
    return s


def _pool2_select(batch):
    """0/1 matrix selecting pooled columns of the 12-grid; output q = p*B + b."""
    s = np.zeros((batch * 144 - 65, 16 * batch), np.float32)
    for b in range(batch):
        for hp in range(4):
            for wp in range(4):
                s[b * 144 + 2 * hp * 12 + 2 * wp, (hp * 4 + wp) * batch + b] = 1.0
    return s


def pack_params(params, batch):
    """One-time weight re-layout (kept out of the per-call path)."""
    return {
        "w1": params["w1"].reshape(6, 25),                             # [co, kh*5+kw]
        "b1": params["b1"].reshape(6, 1),
        "w2": jnp.transpose(params["w2"], (2, 3, 0, 1)).reshape(25, 16, 6),
        "b2": params["b2"].reshape(16, 1),
        "s1": jnp.asarray(_pool1_select(batch)),
        "s2": jnp.asarray(_pool2_select(batch)),
        "w3": jnp.transpose(params["w3"].reshape(120, 16, 16), (2, 1, 0)),  # [p, c, j]
        "b3": params["b3"].reshape(1, 120),
        "w4": params["w4"].T,                                          # (120, 84)
        "b4": params["b4"].reshape(1, 84),
        "w5": params["w5"].T,                                          # (84, 10)
        "b5": params["b5"].reshape(1, 10),
    }


@jax.jit
def numid_forward(packed, x):
    """x: (B, 1, 28, 28) float32 NCHW -> (B, 10)."""
    batch = x.shape[0]
    xflat = x.reshape(1, batch * 28 * 28)     # free reshape (Cin == 1)
    vmem = pl.BlockSpec(memory_space=pltpu.MemorySpace.VMEM)
    return pl.pallas_call(
        functools.partial(_numid_kernel, batch=batch),
        out_shape=jax.ShapeDtypeStruct((batch, 10), jnp.float32),
        in_specs=[vmem] * 13,
        out_specs=vmem,
    )(xflat, packed["w1"], packed["b1"], packed["w2"], packed["b2"],
      packed["s1"], packed["s2"], packed["w3"], packed["b3"],
      packed["w4"], packed["b4"], packed["w5"], packed["b5"])


# ------------------------------ init / checks ------------------------------ #

def init_params(key):
    """Deterministic PyTorch-default-style uniform(-1/sqrt(fan_in)) init."""
    ks = jax.random.split(key, 10)

    def u(k, shape, fan_in):
        bound = 1.0 / (fan_in ** 0.5)
        return jax.random.uniform(k, shape, jnp.float32, -bound, bound)

    p = {}
    p["w1"], p["b1"] = u(ks[0], (6, 1, 5, 5), 25), u(ks[1], (6,), 25)
    p["w2"], p["b2"] = u(ks[2], (16, 6, 5, 5), 150), u(ks[3], (16,), 150)
    p["w3"], p["b3"] = u(ks[4], (120, 256), 256), u(ks[5], (120,), 256)
    p["w4"], p["b4"] = u(ks[6], (84, 120), 120), u(ks[7], (84,), 120)
    p["w5"], p["b5"] = u(ks[8], (10, 84), 84), u(ks[9], (10,), 84)
    return p


def _reference_forward(params, x):
    """Pure-JAX (XLA) reference of the PyTorch module, for a sanity check."""
    dn = ("NCHW", "OIHW", "NCHW")
    y = jax.lax.conv_general_dilated(x, params["w1"], (1, 1), "VALID",
                                     dimension_numbers=dn)
    y = jnp.maximum(y + params["b1"][None, :, None, None], 0.0)
    y = jax.lax.reduce_window(y, -jnp.inf, jax.lax.max,
                              (1, 1, 2, 2), (1, 1, 2, 2), "VALID")
    y = jax.lax.conv_general_dilated(y, params["w2"], (1, 1), "VALID",
                                     dimension_numbers=dn)
    y = jnp.maximum(y + params["b2"][None, :, None, None], 0.0)
    y = jax.lax.reduce_window(y, -jnp.inf, jax.lax.max,
                              (1, 1, 2, 2), (1, 1, 2, 2), "VALID")
    y = y.reshape(y.shape[0], -1)
    y = jnp.maximum(y @ params["w3"].T + params["b3"], 0.0)
    y = jnp.maximum(y @ params["w4"].T + params["b4"], 0.0)
    return y @ params["w5"].T + params["b5"]


if __name__ == "__main__":
    x = jax.random.normal(jax.random.PRNGKey(0), (2, 1, 28, 28), jnp.float32)
    params = init_params(jax.random.PRNGKey(1))
    packed = pack_params(params, batch=x.shape[0])

    out = numid_forward(packed, x)
    jax.block_until_ready(out)
    assert out.shape == (2, 10) and out.dtype == jnp.float32

    ref = _reference_forward(params, x)
    err = float(jnp.max(jnp.abs(out - ref)))
    assert err < 5e-2, f"kernel/reference mismatch: max abs err = {err}"
    print("KERNEL_OK")
</pallas_src>

<mosaic_0001>
module attributes {stable_mosaic.version = 11 : i64} {
  func.func @_numid_kernel(%arg0: memref<1x1568xf32, #tpu.memory_space<vmem>>, %arg1: memref<6x25xf32, #tpu.memory_space<vmem>>, %arg2: memref<6x1xf32, #tpu.memory_space<vmem>>, %arg3: memref<25x16x6xf32, #tpu.memory_space<vmem>>, %arg4: memref<16x1xf32, #tpu.memory_space<vmem>>, %arg5: memref<1423x288xf32, #tpu.memory_space<vmem>>, %arg6: memref<223x32xf32, #tpu.memory_space<vmem>>, %arg7: memref<16x16x120xf32, #tpu.memory_space<vmem>>, %arg8: memref<1x120xf32, #tpu.memory_space<vmem>>, %arg9: memref<120x84xf32, #tpu.memory_space<vmem>>, %arg10: memref<1x84xf32, #tpu.memory_space<vmem>>, %arg11: memref<84x10xf32, #tpu.memory_space<vmem>>, %arg12: memref<1x10xf32, #tpu.memory_space<vmem>>, %arg13: memref<2x10xf32, #tpu.memory_space<vmem>>) attributes {dimension_semantics = [], scalar_prefetch = 0 : i64, scratch_operands = 0 : i64, tpu.core_type = #tpu.core_type<tc>} {
    %c0 = arith.constant 0 : index
    %c0_0 = arith.constant 0 : index
    %0 = vector.load %arg0[%c0, %c0_0] : memref<1x1568xf32, #tpu.memory_space<vmem>>, vector<1x1568xf32>
    %c0_1 = arith.constant 0 : index
    %c0_2 = arith.constant 0 : index
    %1 = vector.load %arg1[%c0_1, %c0_2] : memref<6x25xf32, #tpu.memory_space<vmem>>, vector<6x25xf32>
    %cst = arith.constant 0.000000e+00 : f32
    %2 = vector.broadcast %cst : f32 to vector<6x1452xf32>
    %3 = vector.extract_strided_slice %1 {offsets = [0, 0], sizes = [6, 1], strides = [1, 1]} : vector<6x25xf32> to vector<6x1xf32>
    %4 = vector.extract_strided_slice %0 {offsets = [0, 0], sizes = [1, 1452], strides = [1, 1]} : vector<1x1568xf32> to vector<1x1452xf32>
    %5 = vector.broadcast %3 : vector<6x1xf32> to vector<6x1452xf32>
    %6 = vector.broadcast %4 : vector<1x1452xf32> to vector<6x1452xf32>
    %7 = arith.mulf %5, %6 : vector<6x1452xf32>
    %8 = arith.addf %2, %7 : vector<6x1452xf32>
    %9 = vector.extract_strided_slice %1 {offsets = [0, 1], sizes = [6, 1], strides = [1, 1]} : vector<6x25xf32> to vector<6x1xf32>
    %10 = vector.extract_strided_slice %0 {offsets = [0, 1], sizes = [1, 1452], strides = [1, 1]} : vector<1x1568xf32> to vector<1x1452xf32>
    %11 = vector.broadcast %9 : vector<6x1xf32> to vector<6x1452xf32>
    %12 = vector.broadcast %10 : vector<1x1452xf32> to vector<6x1452xf32>
    %13 = arith.mulf %11, %12 : vector<6x1452xf32>
    %14 = arith.addf %8, %13 : vector<6x1452xf32>
    %15 = vector.extract_strided_slice %1 {offsets = [0, 2], sizes = [6, 1], strides = [1, 1]} : vector<6x25xf32> to vector<6x1xf32>
    %16 = vector.extract_strided_slice %0 {offsets = [0, 2], sizes = [1, 1452], strides = [1, 1]} : vector<1x1568xf32> to vector<1x1452xf32>
    %17 = vector.broadcast %15 : vector<6x1xf32> to vector<6x1452xf32>
    %18 = vector.broadcast %16 : vector<1x1452xf32> to vector<6x1452xf32>
    %19 = arith.mulf %17, %18 : vector<6x1452xf32>
    %20 = arith.addf %14, %19 : vector<6x1452xf32>
    %21 = vector.extract_strided_slice %1 {offsets = [0, 3], sizes = [6, 1], strides = [1, 1]} : vector<6x25xf32> to vector<6x1xf32>
    %22 = vector.extract_strided_slice %0 {offsets = [0, 3], sizes = [1, 1452], strides = [1, 1]} : vector<1x1568xf32> to vector<1x1452xf32>
    %23 = vector.broadcast %21 : vector<6x1xf32> to vector<6x1452xf32>
    %24 = vector.broadcast %22 : vector<1x1452xf32> to vector<6x1452xf32>
    %25 = arith.mulf %23, %24 : vector<6x1452xf32>
    %26 = arith.addf %20, %25 : vector<6x1452xf32>
    %27 = vector.extract_strided_slice %1 {offsets = [0, 4], sizes = [6, 1], strides = [1, 1]} : vector<6x25xf32> to vector<6x1xf32>
    %28 = vector.extract_strided_slice %0 {offsets = [0, 4], sizes = [1, 1452], strides = [1, 1]} : vector<1x1568xf32> to vector<1x1452xf32>
    %29 = vector.broadcast %27 : vector<6x1xf32> to vector<6x1452xf32>
    %30 = vector.broadcast %28 : vector<1x1452xf32> to vector<6x1452xf32>
    %31 = arith.mulf %29, %30 : vector<6x1452xf32>
    %32 = arith.addf %26, %31 : vector<6x1452xf32>
    %33 = vector.extract_strided_slice %1 {offsets = [0, 5], sizes = [6, 1], strides = [1, 1]} : vector<6x25xf32> to vector<6x1xf32>
    %34 = vector.extract_strided_slice %0 {offsets = [0, 28], sizes = [1, 1452], strides = [1, 1]} : vector<1x1568xf32> to vector<1x1452xf32>
    %35 = vector.broadcast %33 : vector<6x1xf32> to vector<6x1452xf32>
    %36 = vector.broadcast %34 : vector<1x1452xf32> to vector<6x1452xf32>
    %37 = arith.mulf %35, %36 : vector<6x1452xf32>
    %38 = arith.addf %32, %37 : vector<6x1452xf32>
    %39 = vector.extract_strided_slice %1 {offsets = [0, 6], sizes = [6, 1], strides = [1, 1]} : vector<6x25xf32> to vector<6x1xf32>
    %40 = vector.extract_strided_slice %0 {offsets = [0, 29], sizes = [1, 1452], strides = [1, 1]} : vector<1x1568xf32> to vector<1x1452xf32>
    %41 = vector.broadcast %39 : vector<6x1xf32> to vector<6x1452xf32>
    %42 = vector.broadcast %40 : vector<1x1452xf32> to vector<6x1452xf32>
    %43 = arith.mulf %41, %42 : vector<6x1452xf32>
    %44 = arith.addf %38, %43 : vector<6x1452xf32>
    %45 = vector.extract_strided_slice %1 {offsets = [0, 7], sizes = [6, 1], strides = [1, 1]} : vector<6x25xf32> to vector<6x1xf32>
    %46 = vector.extract_strided_slice %0 {offsets = [0, 30], sizes = [1, 1452], strides = [1, 1]} : vector<1x1568xf32> to vector<1x1452xf32>
    %47 = vector.broadcast %45 : vector<6x1xf32> to vector<6x1452xf32>
    %48 = vector.broadcast %46 : vector<1x1452xf32> to vector<6x1452xf32>
    %49 = arith.mulf %47, %48 : vector<6x1452xf32>
    %50 = arith.addf %44, %49 : vector<6x1452xf32>
    %51 = vector.extract_strided_slice %1 {offsets = [0, 8], sizes = [6, 1], strides = [1, 1]} : vector<6x25xf32> to vector<6x1xf32>
    %52 = vector.extract_strided_slice %0 {offsets = [0, 31], sizes = [1, 1452], strides = [1, 1]} : vector<1x1568xf32> to vector<1x1452xf32>
    %53 = vector.broadcast %51 : vector<6x1xf32> to vector<6x1452xf32>
    %54 = vector.broadcast %52 : vector<1x1452xf32> to vector<6x1452xf32>
    %55 = arith.mulf %53, %54 : vector<6x1452xf32>
    %56 = arith.addf %50, %55 : vector<6x1452xf32>
    %57 = vector.extract_strided_slice %1 {offsets = [0, 9], sizes = [6, 1], strides = [1, 1]} : vector<6x25xf32> to vector<6x1xf32>
    %58 = vector.extract_strided_slice %0 {offsets = [0, 32], sizes = [1, 1452], strides = [1, 1]} : vector<1x1568xf32> to vector<1x1452xf32>
    %59 = vector.broadcast %57 : vector<6x1xf32> to vector<6x1452xf32>
    %60 = vector.broadcast %58 : vector<1x1452xf32> to vector<6x1452xf32>
    %61 = arith.mulf %59, %60 : vector<6x1452xf32>
    %62 = arith.addf %56, %61 : vector<6x1452xf32>
    %63 = vector.extract_strided_slice %1 {offsets = [0, 10], sizes = [6, 1], strides = [1, 1]} : vector<6x25xf32> to vector<6x1xf32>
    %64 = vector.extract_strided_slice %0 {offsets = [0, 56], sizes = [1, 1452], strides = [1, 1]} : vector<1x1568xf32> to vector<1x1452xf32>
    %65 = vector.broadcast %63 : vector<6x1xf32> to vector<6x1452xf32>
    %66 = vector.broadcast %64 : vector<1x1452xf32> to vector<6x1452xf32>
    %67 = arith.mulf %65, %66 : vector<6x1452xf32>
    %68 = arith.addf %62, %67 : vector<6x1452xf32>
    %69 = vector.extract_strided_slice %1 {offsets = [0, 11], sizes = [6, 1], strides = [1, 1]} : vector<6x25xf32> to vector<6x1xf32>
    %70 = vector.extract_strided_slice %0 {offsets = [0, 57], sizes = [1, 1452], strides = [1, 1]} : vector<1x1568xf32> to vector<1x1452xf32>
    %71 = vector.broadcast %69 : vector<6x1xf32> to vector<6x1452xf32>
    %72 = vector.broadcast %70 : vector<1x1452xf32> to vector<6x1452xf32>
    %73 = arith.mulf %71, %72 : vector<6x1452xf32>
    %74 = arith.addf %68, %73 : vector<6x1452xf32>
    %75 = vector.extract_strided_slice %1 {offsets = [0, 12], sizes = [6, 1], strides = [1, 1]} : vector<6x25xf32> to vector<6x1xf32>
    %76 = vector.extract_strided_slice %0 {offsets = [0, 58], sizes = [1, 1452], strides = [1, 1]} : vector<1x1568xf32> to vector<1x1452xf32>
    %77 = vector.broadcast %75 : vector<6x1xf32> to vector<6x1452xf32>
    %78 = vector.broadcast %76 : vector<1x1452xf32> to vector<6x1452xf32>
    %79 = arith.mulf %77, %78 : vector<6x1452xf32>
    %80 = arith.addf %74, %79 : vector<6x1452xf32>
    %81 = vector.extract_strided_slice %1 {offsets = [0, 13], sizes = [6, 1], strides = [1, 1]} : vector<6x25xf32> to vector<6x1xf32>
    %82 = vector.extract_strided_slice %0 {offsets = [0, 59], sizes = [1, 1452], strides = [1, 1]} : vector<1x1568xf32> to vector<1x1452xf32>
    %83 = vector.broadcast %81 : vector<6x1xf32> to vector<6x1452xf32>
    %84 = vector.broadcast %82 : vector<1x1452xf32> to vector<6x1452xf32>
    %85 = arith.mulf %83, %84 : vector<6x1452xf32>
    %86 = arith.addf %80, %85 : vector<6x1452xf32>
    %87 = vector.extract_strided_slice %1 {offsets = [0, 14], sizes = [6, 1], strides = [1, 1]} : vector<6x25xf32> to vector<6x1xf32>
    %88 = vector.extract_strided_slice %0 {offsets = [0, 60], sizes = [1, 1452], strides = [1, 1]} : vector<1x1568xf32> to vector<1x1452xf32>
    %89 = vector.broadcast %87 : vector<6x1xf32> to vector<6x1452xf32>
    %90 = vector.broadcast %88 : vector<1x1452xf32> to vector<6x1452xf32>
    %91 = arith.mulf %89, %90 : vector<6x1452xf32>
    %92 = arith.addf %86, %91 : vector<6x1452xf32>
    %93 = vector.extract_strided_slice %1 {offsets = [0, 15], sizes = [6, 1], strides = [1, 1]} : vector<6x25xf32> to vector<6x1xf32>
    %94 = vector.extract_strided_slice %0 {offsets = [0, 84], sizes = [1, 1452], strides = [1, 1]} : vector<1x1568xf32> to vector<1x1452xf32>
    %95 = vector.broadcast %93 : vector<6x1xf32> to vector<6x1452xf32>
    %96 = vector.broadcast %94 : vector<1x1452xf32> to vector<6x1452xf32>
    %97 = arith.mulf %95, %96 : vector<6x1452xf32>
    %98 = arith.addf %92, %97 : vector<6x1452xf32>
    %99 = vector.extract_strided_slice %1 {offsets = [0, 16], sizes = [6, 1], strides = [1, 1]} : vector<6x25xf32> to vector<6x1xf32>
    %100 = vector.extract_strided_slice %0 {offsets = [0, 85], sizes = [1, 1452], strides = [1, 1]} : vector<1x1568xf32> to vector<1x1452xf32>
    %101 = vector.broadcast %99 : vector<6x1xf32> to vector<6x1452xf32>
    %102 = vector.broadcast %100 : vector<1x1452xf32> to vector<6x1452xf32>
    %103 = arith.mulf %101, %102 : vector<6x1452xf32>
    %104 = arith.addf %98, %103 : vector<6x1452xf32>
    %105 = vector.extract_strided_slice %1 {offsets = [0, 17], sizes = [6, 1], strides = [1, 1]} : vector<6x25xf32> to vector<6x1xf32>
    %106 = vector.extract_strided_slice %0 {offsets = [0, 86], sizes = [1, 1452], strides = [1, 1]} : vector<1x1568xf32> to vector<1x1452xf32>
    %107 = vector.broadcast %105 : vector<6x1xf32> to vector<6x1452xf32>
    %108 = vector.broadcast %106 : vector<1x1452xf32> to vector<6x1452xf32>
    %109 = arith.mulf %107, %108 : vector<6x1452xf32>
    %110 = arith.addf %104, %109 : vector<6x1452xf32>
    %111 = vector.extract_strided_slice %1 {offsets = [0, 18], sizes = [6, 1], strides = [1, 1]} : vector<6x25xf32> to vector<6x1xf32>
    %112 = vector.extract_strided_slice %0 {offsets = [0, 87], sizes = [1, 1452], strides = [1, 1]} : vector<1x1568xf32> to vector<1x1452xf32>
    %113 = vector.broadcast %111 : vector<6x1xf32> to vector<6x1452xf32>
    %114 = vector.broadcast %112 : vector<1x1452xf32> to vector<6x1452xf32>
    %115 = arith.mulf %113, %114 : vector<6x1452xf32>
    %116 = arith.addf %110, %115 : vector<6x1452xf32>
    %117 = vector.extract_strided_slice %1 {offsets = [0, 19], sizes = [6, 1], strides = [1, 1]} : vector<6x25xf32> to vector<6x1xf32>
    %118 = vector.extract_strided_slice %0 {offsets = [0, 88], sizes = [1, 1452], strides = [1, 1]} : vector<1x1568xf32> to vector<1x1452xf32>
    %119 = vector.broadcast %117 : vector<6x1xf32> to vector<6x1452xf32>
    %120 = vector.broadcast %118 : vector<1x1452xf32> to vector<6x1452xf32>
    %121 = arith.mulf %119, %120 : vector<6x1452xf32>
    %122 = arith.addf %116, %121 : vector<6x1452xf32>
    %123 = vector.extract_strided_slice %1 {offsets = [0, 20], sizes = [6, 1], strides = [1, 1]} : vector<6x25xf32> to vector<6x1xf32>
    %124 = vector.extract_strided_slice %0 {offsets = [0, 112], sizes = [1, 1452], strides = [1, 1]} : vector<1x1568xf32> to vector<1x1452xf32>
    %125 = vector.broadcast %123 : vector<6x1xf32> to vector<6x1452xf32>
    %126 = vector.broadcast %124 : vector<1x1452xf32> to vector<6x1452xf32>
    %127 = arith.mulf %125, %126 : vector<6x1452xf32>
    %128 = arith.addf %122, %127 : vector<6x1452xf32>
    %129 = vector.extract_strided_slice %1 {offsets = [0, 21], sizes = [6, 1], strides = [1, 1]} : vector<6x25xf32> to vector<6x1xf32>
    %130 = vector.extract_strided_slice %0 {offsets = [0, 113], sizes = [1, 1452], strides = [1, 1]} : vector<1x1568xf32> to vector<1x1452xf32>
    %131 = vector.broadcast %129 : vector<6x1xf32> to vector<6x1452xf32>
    %132 = vector.broadcast %130 : vector<1x1452xf32> to vector<6x1452xf32>
    %133 = arith.mulf %131, %132 : vector<6x1452xf32>
    %134 = arith.addf %128, %133 : vector<6x1452xf32>
    %135 = vector.extract_strided_slice %1 {offsets = [0, 22], sizes = [6, 1], strides = [1, 1]} : vector<6x25xf32> to vector<6x1xf32>
    %136 = vector.extract_strided_slice %0 {offsets = [0, 114], sizes = [1, 1452], strides = [1, 1]} : vector<1x1568xf32> to vector<1x1452xf32>
    %137 = vector.broadcast %135 : vector<6x1xf32> to vector<6x1452xf32>
    %138 = vector.broadcast %136 : vector<1x1452xf32> to vector<6x1452xf32>
    %139 = arith.mulf %137, %138 : vector<6x1452xf32>
    %140 = arith.addf %134, %139 : vector<6x1452xf32>
    %141 = vector.extract_strided_slice %1 {offsets = [0, 23], sizes = [6, 1], strides = [1, 1]} : vector<6x25xf32> to vector<6x1xf32>
    %142 = vector.extract_strided_slice %0 {offsets = [0, 115], sizes = [1, 1452], strides = [1, 1]} : vector<1x1568xf32> to vector<1x1452xf32>
    %143 = vector.broadcast %141 : vector<6x1xf32> to vector<6x1452xf32>
    %144 = vector.broadcast %142 : vector<1x1452xf32> to vector<6x1452xf32>
    %145 = arith.mulf %143, %144 : vector<6x1452xf32>
    %146 = arith.addf %140, %145 : vector<6x1452xf32>
    %147 = vector.extract_strided_slice %1 {offsets = [0, 24], sizes = [6, 1], strides = [1, 1]} : vector<6x25xf32> to vector<6x1xf32>
    %148 = vector.extract_strided_slice %0 {offsets = [0, 116], sizes = [1, 1452], strides = [1, 1]} : vector<1x1568xf32> to vector<1x1452xf32>
    %149 = vector.broadcast %147 : vector<6x1xf32> to vector<6x1452xf32>
    %150 = vector.broadcast %148 : vector<1x1452xf32> to vector<6x1452xf32>
    %151 = arith.mulf %149, %150 : vector<6x1452xf32>
    %152 = arith.addf %146, %151 : vector<6x1452xf32>
    %c0_3 = arith.constant 0 : index
    %c0_4 = arith.constant 0 : index
    %153 = vector.load %arg2[%c0_3, %c0_4] : memref<6x1xf32, #tpu.memory_space<vmem>>, vector<6x1xf32>
    %154 = vector.broadcast %153 : vector<6x1xf32> to vector<6x1452xf32>
    %155 = arith.addf %152, %154 : vector<6x1452xf32>
    %cst_5 = arith.constant 0.000000e+00 : f32
    %156 = vector.broadcast %cst_5 : f32 to vector<6x1452xf32>
    %157 = arith.maximumf %155, %156 : vector<6x1452xf32>
    %158 = vector.extract_strided_slice %157 {offsets = [0, 0], sizes = [6, 1423], strides = [1, 1]} : vector<6x1452xf32> to vector<6x1423xf32>
    %159 = vector.extract_strided_slice %157 {offsets = [0, 1], sizes = [6, 1423], strides = [1, 1]} : vector<6x1452xf32> to vector<6x1423xf32>
    %160 = arith.maximumf %158, %159 : vector<6x1423xf32>
    %161 = vector.extract_strided_slice %157 {offsets = [0, 28], sizes = [6, 1423], strides = [1, 1]} : vector<6x1452xf32> to vector<6x1423xf32>
    %162 = vector.extract_strided_slice %157 {offsets = [0, 29], sizes = [6, 1423], strides = [1, 1]} : vector<6x1452xf32> to vector<6x1423xf32>
    %163 = arith.maximumf %161, %162 : vector<6x1423xf32>
    %164 = arith.maximumf %160, %163 : vector<6x1423xf32>
    %c0_6 = arith.constant 0 : index
    %c0_7 = arith.constant 0 : index
    %165 = vector.load %arg5[%c0_6, %c0_7] : memref<1423x288xf32, #tpu.memory_space<vmem>>, vector<1423x288xf32>
    %cst_8 = arith.constant dense<0.000000e+00> : vector<6x288xf32>
    %166 = tpu.matmul %164, %165, %cst_8 {dimension_numbers = #tpu.dot_dimension_numbers<[1], [0], [0], [1], [0, 0, 1, 1], [], []>} : vector<6x1423xf32>, vector<1423x288xf32>, vector<6x288xf32> -> vector<6x288xf32>
    %c0_9 = arith.constant 0 : index
    %c0_10 = arith.constant 0 : index
    %c0_11 = arith.constant 0 : index
    %167 = vector.load %arg3[%c0_9, %c0_10, %c0_11] : memref<25x16x6xf32, #tpu.memory_space<vmem>>, vector<25x16x6xf32>
    %cst_12 = arith.constant 0.000000e+00 : f32
    %168 = vector.broadcast %cst_12 : f32 to vector<16x236xf32>
    %169 = vector.extract_strided_slice %167 {offsets = [0, 0, 0], sizes = [1, 16, 6], strides = [1, 1, 1]} : vector<25x16x6xf32> to vector<1x16x6xf32>
    %170 = vector.shape_cast %169 : vector<1x16x6xf32> to vector<16x6xf32>
    %171 = vector.extract_strided_slice %166 {offsets = [0, 0], sizes = [6, 236], strides = [1, 1]} : vector<6x288xf32> to vector<6x236xf32>
    %cst_13 = arith.constant dense<0.000000e+00> : vector<16x236xf32>
    %172 = tpu.matmul %170, %171, %cst_13 {dimension_numbers = #tpu.dot_dimension_numbers<[1], [0], [0], [1], [0, 0, 1, 1], [], []>} : vector<16x6xf32>, vector<6x236xf32>, vector<16x236xf32> -> vector<16x236xf32>
    %173 = arith.addf %168, %172 : vector<16x236xf32>
    %174 = vector.extract_strided_slice %167 {offsets = [1, 0, 0], sizes = [1, 16, 6], strides = [1, 1, 1]} : vector<25x16x6xf32> to vector<1x16x6xf32>
    %175 = vector.shape_cast %174 : vector<1x16x6xf32> to vector<16x6xf32>
    %176 = vector.extract_strided_slice %166 {offsets = [0, 1], sizes = [6, 236], strides = [1, 1]} : vector<6x288xf32> to vector<6x236xf32>
    %cst_14 = arith.constant dense<0.000000e+00> : vector<16x236xf32>
    %177 = tpu.matmul %175, %176, %cst_14 {dimension_numbers = #tpu.dot_dimension_numbers<[1], [0], [0], [1], [0, 0, 1, 1], [], []>} : vector<16x6xf32>, vector<6x236xf32>, vector<16x236xf32> -> vector<16x236xf32>
    %178 = arith.addf %173, %177 : vector<16x236xf32>
    %179 = vector.extract_strided_slice %167 {offsets = [2, 0, 0], sizes = [1, 16, 6], strides = [1, 1, 1]} : vector<25x16x6xf32> to vector<1x16x6xf32>
    %180 = vector.shape_cast %179 : vector<1x16x6xf32> to vector<16x6xf32>
    %181 = vector.extract_strided_slice %166 {offsets = [0, 2], sizes = [6, 236], strides = [1, 1]} : vector<6x288xf32> to vector<6x236xf32>
    %cst_15 = arith.constant dense<0.000000e+00> : vector<16x236xf32>
    %182 = tpu.matmul %180, %181, %cst_15 {dimension_numbers = #tpu.dot_dimension_numbers<[1], [0], [0], [1], [0, 0, 1, 1], [], []>} : vector<16x6xf32>, vector<6x236xf32>, vector<16x236xf32> -> vector<16x236xf32>
    %183 = arith.addf %178, %182 : vector<16x236xf32>
    %184 = vector.extract_strided_slice %167 {offsets = [3, 0, 0], sizes = [1, 16, 6], strides = [1, 1, 1]} : vector<25x16x6xf32> to vector<1x16x6xf32>
    %185 = vector.shape_cast %184 : vector<1x16x6xf32> to vector<16x6xf32>
    %186 = vector.extract_strided_slice %166 {offsets = [0, 3], sizes = [6, 236], strides = [1, 1]} : vector<6x288xf32> to vector<6x236xf32>
    %cst_16 = arith.constant dense<0.000000e+00> : vector<16x236xf32>
    %187 = tpu.matmul %185, %186, %cst_16 {dimension_numbers = #tpu.dot_dimension_numbers<[1], [0], [0], [1], [0, 0, 1, 1], [], []>} : vector<16x6xf32>, vector<6x236xf32>, vector<16x236xf32> -> vector<16x236xf32>
    %188 = arith.addf %183, %187 : vector<16x236xf32>
    %189 = vector.extract_strided_slice %167 {offsets = [4, 0, 0], sizes = [1, 16, 6], strides = [1, 1, 1]} : vector<25x16x6xf32> to vector<1x16x6xf32>
    %190 = vector.shape_cast %189 : vector<1x16x6xf32> to vector<16x6xf32>
    %191 = vector.extract_strided_slice %166 {offsets = [0, 4], sizes = [6, 236], strides = [1, 1]} : vector<6x288xf32> to vector<6x236xf32>
    %cst_17 = arith.constant dense<0.000000e+00> : vector<16x236xf32>
    %192 = tpu.matmul %190, %191, %cst_17 {dimension_numbers = #tpu.dot_dimension_numbers<[1], [0], [0], [1], [0, 0, 1, 1], [], []>} : vector<16x6xf32>, vector<6x236xf32>, vector<16x236xf32> -> vector<16x236xf32>
    %193 = arith.addf %188, %192 : vector<16x236xf32>
    %194 = vector.extract_strided_slice %167 {offsets = [5, 0, 0], sizes = [1, 16, 6], strides = [1, 1, 1]} : vector<25x16x6xf32> to vector<1x16x6xf32>
    %195 = vector.shape_cast %194 : vector<1x16x6xf32> to vector<16x6xf32>
    %196 = vector.extract_strided_slice %166 {offsets = [0, 12], sizes = [6, 236], strides = [1, 1]} : vector<6x288xf32> to vector<6x236xf32>
    %cst_18 = arith.constant dense<0.000000e+00> : vector<16x236xf32>
    %197 = tpu.matmul %195, %196, %cst_18 {dimension_numbers = #tpu.dot_dimension_numbers<[1], [0], [0], [1], [0, 0, 1, 1], [], []>} : vector<16x6xf32>, vector<6x236xf32>, vector<16x236xf32> -> vector<16x236xf32>
    %198 = arith.addf %193, %197 : vector<16x236xf32>
    %199 = vector.extract_strided_slice %167 {offsets = [6, 0, 0], sizes = [1, 16, 6], strides = [1, 1, 1]} : vector<25x16x6xf32> to vector<1x16x6xf32>
    %200 = vector.shape_cast %199 : vector<1x16x6xf32> to vector<16x6xf32>
    %201 = vector.extract_strided_slice %166 {offsets = [0, 13], sizes = [6, 236], strides = [1, 1]} : vector<6x288xf32> to vector<6x236xf32>
    %cst_19 = arith.constant dense<0.000000e+00> : vector<16x236xf32>
    %202 = tpu.matmul %200, %201, %cst_19 {dimension_numbers = #tpu.dot_dimension_numbers<[1], [0], [0], [1], [0, 0, 1, 1], [], []>} : vector<16x6xf32>, vector<6x236xf32>, vector<16x236xf32> -> vector<16x236xf32>
    %203 = arith.addf %198, %202 : vector<16x236xf32>
    %204 = vector.extract_strided_slice %167 {offsets = [7, 0, 0], sizes = [1, 16, 6], strides = [1, 1, 1]} : vector<25x16x6xf32> to vector<1x16x6xf32>
    %205 = vector.shape_cast %204 : vector<1x16x6xf32> to vector<16x6xf32>
    %206 = vector.extract_strided_slice %166 {offsets = [0, 14], sizes = [6, 236], strides = [1, 1]} : vector<6x288xf32> to vector<6x236xf32>
    %cst_20 = arith.constant dense<0.000000e+00> : vector<16x236xf32>
    %207 = tpu.matmul %205, %206, %cst_20 {dimension_numbers = #tpu.dot_dimension_numbers<[1], [0], [0], [1], [0, 0, 1, 1], [], []>} : vector<16x6xf32>, vector<6x236xf32>, vector<16x236xf32> -> vector<16x236xf32>
    %208 = arith.addf %203, %207 : vector<16x236xf32>
    %209 = vector.extract_strided_slice %167 {offsets = [8, 0, 0], sizes = [1, 16, 6], strides = [1, 1, 1]} : vector<25x16x6xf32> to vector<1x16x6xf32>
    %210 = vector.shape_cast %209 : vector<1x16x6xf32> to vector<16x6xf32>
    %211 = vector.extract_strided_slice %166 {offsets = [0, 15], sizes = [6, 236], strides = [1, 1]} : vector<6x288xf32> to vector<6x236xf32>
    %cst_21 = arith.constant dense<0.000000e+00> : vector<16x236xf32>
    %212 = tpu.matmul %210, %211, %cst_21 {dimension_numbers = #tpu.dot_dimension_numbers<[1], [0], [0], [1], [0, 0, 1, 1], [], []>} : vector<16x6xf32>, vector<6x236xf32>, vector<16x236xf32> -> vector<16x236xf32>
    %213 = arith.addf %208, %212 : vector<16x236xf32>
    %214 = vector.extract_strided_slice %167 {offsets = [9, 0, 0], sizes = [1, 16, 6], strides = [1, 1, 1]} : vector<25x16x6xf32> to vector<1x16x6xf32>
    %215 = vector.shape_cast %214 : vector<1x16x6xf32> to vector<16x6xf32>
    %216 = vector.extract_strided_slice %166 {offsets = [0, 16], sizes = [6, 236], strides = [1, 1]} : vector<6x288xf32> to vector<6x236xf32>
    %cst_22 = arith.constant dense<0.000000e+00> : vector<16x236xf32>
    %217 = tpu.matmul %215, %216, %cst_22 {dimension_numbers = #tpu.dot_dimension_numbers<[1], [0], [0], [1], [0, 0, 1, 1], [], []>} : vector<16x6xf32>, vector<6x236xf32>, vector<16x236xf32> -> vector<16x236xf32>
    %218 = arith.addf %213, %217 : vector<16x236xf32>
    %219 = vector.extract_strided_slice %167 {offsets = [10, 0, 0], sizes = [1, 16, 6], strides = [1, 1, 1]} : vector<25x16x6xf32> to vector<1x16x6xf32>
    %220 = vector.shape_cast %219 : vector<1x16x6xf32> to vector<16x6xf32>
    %221 = vector.extract_strided_slice %166 {offsets = [0, 24], sizes = [6, 236], strides = [1, 1]} : vector<6x288xf32> to vector<6x236xf32>
    %cst_23 = arith.constant dense<0.000000e+00> : vector<16x236xf32>
    %222 = tpu.matmul %220, %221, %cst_23 {dimension_numbers = #tpu.dot_dimension_numbers<[1], [0], [0], [1], [0, 0, 1, 1], [], []>} : vector<16x6xf32>, vector<6x236xf32>, vector<16x236xf32> -> vector<16x236xf32>
    %223 = arith.addf %218, %222 : vector<16x236xf32>
    %224 = vector.extract_strided_slice %167 {offsets = [11, 0, 0], sizes = [1, 16, 6], strides = [1, 1, 1]} : vector<25x16x6xf32> to vector<1x16x6xf32>
    %225 = vector.shape_cast %224 : vector<1x16x6xf32> to vector<16x6xf32>
    %226 = vector.extract_strided_slice %166 {offsets = [0, 25], sizes = [6, 236], strides = [1, 1]} : vector<6x288xf32> to vector<6x236xf32>
    %cst_24 = arith.constant dense<0.000000e+00> : vector<16x236xf32>
    %227 = tpu.matmul %225, %226, %cst_24 {dimension_numbers = #tpu.dot_dimension_numbers<[1], [0], [0], [1], [0, 0, 1, 1], [], []>} : vector<16x6xf32>, vector<6x236xf32>, vector<16x236xf32> -> vector<16x236xf32>
    %228 = arith.addf %223, %227 : vector<16x236xf32>
    %229 = vector.extract_strided_slice %167 {offsets = [12, 0, 0], sizes = [1, 16, 6], strides = [1, 1, 1]} : vector<25x16x6xf32> to vector<1x16x6xf32>
    %230 = vector.shape_cast %229 : vector<1x16x6xf32> to vector<16x6xf32>
    %231 = vector.extract_strided_slice %166 {offsets = [0, 26], sizes = [6, 236], strides = [1, 1]} : vector<6x288xf32> to vector<6x236xf32>
    %cst_25 = arith.constant dense<0.000000e+00> : vector<16x236xf32>
    %232 = tpu.matmul %230, %231, %cst_25 {dimension_numbers = #tpu.dot_dimension_numbers<[1], [0], [0], [1], [0, 0, 1, 1], [], []>} : vector<16x6xf32>, vector<6x236xf32>, vector<16x236xf32> -> vector<16x236xf32>
    %233 = arith.addf %228, %232 : vector<16x236xf32>
    %234 = vector.extract_strided_slice %167 {offsets = [13, 0, 0], sizes = [1, 16, 6], strides = [1, 1, 1]} : vector<25x16x6xf32> to vector<1x16x6xf32>
    %235 = vector.shape_cast %234 : vector<1x16x6xf32> to vector<16x6xf32>
    %236 = vector.extract_strided_slice %166 {offsets = [0, 27], sizes = [6, 236], strides = [1, 1]} : vector<6x288xf32> to vector<6x236xf32>
    %cst_26 = arith.constant dense<0.000000e+00> : vector<16x236xf32>
    %237 = tpu.matmul %235, %236, %cst_26 {dimension_numbers = #tpu.dot_dimension_numbers<[1], [0], [0], [1], [0, 0, 1, 1], [], []>} : vector<16x6xf32>, vector<6x236xf32>, vector<16x236xf32> -> vector<16x236xf32>
    %238 = arith.addf %233, %237 : vector<16x236xf32>
    %239 = vector.extract_strided_slice %167 {offsets = [14, 0, 0], sizes = [1, 16, 6], strides = [1, 1, 1]} : vector<25x16x6xf32> to vector<1x16x6xf32>
    %240 = vector.shape_cast %239 : vector<1x16x6xf32> to vector<16x6xf32>
    %241 = vector.extract_strided_slice %166 {offsets = [0, 28], sizes = [6, 236], strides = [1, 1]} : vector<6x288xf32> to vector<6x236xf32>
    %cst_27 = arith.constant dense<0.000000e+00> : vector<16x236xf32>
    %242 = tpu.matmul %240, %241, %cst_27 {dimension_numbers = #tpu.dot_dimension_numbers<[1], [0], [0], [1], [0, 0, 1, 1], [], []>} : vector<16x6xf32>, vector<6x236xf32>, vector<16x236xf32> -> vector<16x236xf32>
    %243 = arith.addf %238, %242 : vector<16x236xf32>
    %244 = vector.extract_strided_slice %167 {offsets = [15, 0, 0], sizes = [1, 16, 6], strides = [1, 1, 1]} : vector<25x16x6xf32> to vector<1x16x6xf32>
    %245 = vector.shape_cast %244 : vector<1x16x6xf32> to vector<16x6xf32>
    %246 = vector.extract_strided_slice %166 {offsets = [0, 36], sizes = [6, 236], strides = [1, 1]} : vector<6x288xf32> to vector<6x236xf32>
    %cst_28 = arith.constant dense<0.000000e+00> : vector<16x236xf32>
    %247 = tpu.matmul %245, %246, %cst_28 {dimension_numbers = #tpu.dot_dimension_numbers<[1], [0], [0], [1], [0, 0, 1, 1], [], []>} : vector<16x6xf32>, vector<6x236xf32>, vector<16x236xf32> -> vector<16x236xf32>
    %248 = arith.addf %243, %247 : vector<16x236xf32>
    %249 = vector.extract_strided_slice %167 {offsets = [16, 0, 0], sizes = [1, 16, 6], strides = [1, 1, 1]} : vector<25x16x6xf32> to vector<1x16x6xf32>
    %250 = vector.shape_cast %249 : vector<1x16x6xf32> to vector<16x6xf32>
    %251 = vector.extract_strided_slice %166 {offsets = [0, 37], sizes = [6, 236], strides = [1, 1]} : vector<6x288xf32> to vector<6x236xf32>
    %cst_29 = arith.constant dense<0.000000e+00> : vector<16x236xf32>
    %252 = tpu.matmul %250, %251, %cst_29 {dimension_numbers = #tpu.dot_dimension_numbers<[1], [0], [0], [1], [0, 0, 1, 1], [], []>} : vector<16x6xf32>, vector<6x236xf32>, vector<16x236xf32> -> vector<16x236xf32>
    %253 = arith.addf %248, %252 : vector<16x236xf32>
    %254 = vector.extract_strided_slice %167 {offsets = [17, 0, 0], sizes = [1, 16, 6], strides = [1, 1, 1]} : vector<25x16x6xf32> to vector<1x16x6xf32>
    %255 = vector.shape_cast %254 : vector<1x16x6xf32> to vector<16x6xf32>
    %256 = vector.extract_strided_slice %166 {offsets = [0, 38], sizes = [6, 236], strides = [1, 1]} : vector<6x288xf32> to vector<6x236xf32>
    %cst_30 = arith.constant dense<0.000000e+00> : vector<16x236xf32>
    %257 = tpu.matmul %255, %256, %cst_30 {dimension_numbers = #tpu.dot_dimension_numbers<[1], [0], [0], [1], [0, 0, 1, 1], [], []>} : vector<16x6xf32>, vector<6x236xf32>, vector<16x236xf32> -> vector<16x236xf32>
    %258 = arith.addf %253, %257 : vector<16x236xf32>
    %259 = vector.extract_strided_slice %167 {offsets = [18, 0, 0], sizes = [1, 16, 6], strides = [1, 1, 1]} : vector<25x16x6xf32> to vector<1x16x6xf32>
    %260 = vector.shape_cast %259 : vector<1x16x6xf32> to vector<16x6xf32>
    %261 = vector.extract_strided_slice %166 {offsets = [0, 39], sizes = [6, 236], strides = [1, 1]} : vector<6x288xf32> to vector<6x236xf32>
    %cst_31 = arith.constant dense<0.000000e+00> : vector<16x236xf32>
    %262 = tpu.matmul %260, %261, %cst_31 {dimension_numbers = #tpu.dot_dimension_numbers<[1], [0], [0], [1], [0, 0, 1, 1], [], []>} : vector<16x6xf32>, vector<6x236xf32>, vector<16x236xf32> -> vector<16x236xf32>
    %263 = arith.addf %258, %262 : vector<16x236xf32>
    %264 = vector.extract_strided_slice %167 {offsets = [19, 0, 0], sizes = [1, 16, 6], strides = [1, 1, 1]} : vector<25x16x6xf32> to vector<1x16x6xf32>
    %265 = vector.shape_cast %264 : vector<1x16x6xf32> to vector<16x6xf32>
    %266 = vector.extract_strided_slice %166 {offsets = [0, 40], sizes = [6, 236], strides = [1, 1]} : vector<6x288xf32> to vector<6x236xf32>
    %cst_32 = arith.constant dense<0.000000e+00> : vector<16x236xf32>
    %267 = tpu.matmul %265, %266, %cst_32 {dimension_numbers = #tpu.dot_dimension_numbers<[1], [0], [0], [1], [0, 0, 1, 1], [], []>} : vector<16x6xf32>, vector<6x236xf32>, vector<16x236xf32> -> vector<16x236xf32>
    %268 = arith.addf %263, %267 : vector<16x236xf32>
    %269 = vector.extract_strided_slice %167 {offsets = [20, 0, 0], sizes = [1, 16, 6], strides = [1, 1, 1]} : vector<25x16x6xf32> to vector<1x16x6xf32>
    %270 = vector.shape_cast %269 : vector<1x16x6xf32> to vector<16x6xf32>
    %271 = vector.extract_strided_slice %166 {offsets = [0, 48], sizes = [6, 236], strides = [1, 1]} : vector<6x288xf32> to vector<6x236xf32>
    %cst_33 = arith.constant dense<0.000000e+00> : vector<16x236xf32>
    %272 = tpu.matmul %270, %271, %cst_33 {dimension_numbers = #tpu.dot_dimension_numbers<[1], [0], [0], [1], [0, 0, 1, 1], [], []>} : vector<16x6xf32>, vector<6x236xf32>, vector<16x236xf32> -> vector<16x236xf32>
    %273 = arith.addf %268, %272 : vector<16x236xf32>
    %274 = vector.extract_strided_slice %167 {offsets = [21, 0, 0], sizes = [1, 16, 6], strides = [1, 1, 1]} : vector<25x16x6xf32> to vector<1x16x6xf32>
    %275 = vector.shape_cast %274 : vector<1x16x6xf32> to vector<16x6xf32>
    %276 = vector.extract_strided_slice %166 {offsets = [0, 49], sizes = [6, 236], strides = [1, 1]} : vector<6x288xf32> to vector<6x236xf32>
    %cst_34 = arith.constant dense<0.000000e+00> : vector<16x236xf32>
    %277 = tpu.matmul %275, %276, %cst_34 {dimension_numbers = #tpu.dot_dimension_numbers<[1], [0], [0], [1], [0, 0, 1, 1], [], []>} : vector<16x6xf32>, vector<6x236xf32>, vector<16x236xf32> -> vector<16x236xf32>
    %278 = arith.addf %273, %277 : vector<16x236xf32>
    %279 = vector.extract_strided_slice %167 {offsets = [22, 0, 0], sizes = [1, 16, 6], strides = [1, 1, 1]} : vector<25x16x6xf32> to vector<1x16x6xf32>
    %280 = vector.shape_cast %279 : vector<1x16x6xf32> to vector<16x6xf32>
    %281 = vector.extract_strided_slice %166 {offsets = [0, 50], sizes = [6, 236], strides = [1, 1]} : vector<6x288xf32> to vector<6x236xf32>
    %cst_35 = arith.constant dense<0.000000e+00> : vector<16x236xf32>
    %282 = tpu.matmul %280, %281, %cst_35 {dimension_numbers = #tpu.dot_dimension_numbers<[1], [0], [0], [1], [0, 0, 1, 1], [], []>} : vector<16x6xf32>, vector<6x236xf32>, vector<16x236xf32> -> vector<16x236xf32>
    %283 = arith.addf %278, %282 : vector<16x236xf32>
    %284 = vector.extract_strided_slice %167 {offsets = [23, 0, 0], sizes = [1, 16, 6], strides = [1, 1, 1]} : vector<25x16x6xf32> to vector<1x16x6xf32>
    %285 = vector.shape_cast %284 : vector<1x16x6xf32> to vector<16x6xf32>
    %286 = vector.extract_strided_slice %166 {offsets = [0, 51], sizes = [6, 236], strides = [1, 1]} : vector<6x288xf32> to vector<6x236xf32>
    %cst_36 = arith.constant dense<0.000000e+00> : vector<16x236xf32>
    %287 = tpu.matmul %285, %286, %cst_36 {dimension_numbers = #tpu.dot_dimension_numbers<[1], [0], [0], [1], [0, 0, 1, 1], [], []>} : vector<16x6xf32>, vector<6x236xf32>, vector<16x236xf32> -> vector<16x236xf32>
    %288 = arith.addf %283, %287 : vector<16x236xf32>
    %289 = vector.extract_strided_slice %167 {offsets = [24, 0, 0], sizes = [1, 16, 6], strides = [1, 1, 1]} : vector<25x16x6xf32> to vector<1x16x6xf32>
    %290 = vector.shape_cast %289 : vector<1x16x6xf32> to vector<16x6xf32>
    %291 = vector.extract_strided_slice %166 {offsets = [0, 52], sizes = [6, 236], strides = [1, 1]} : vector<6x288xf32> to vector<6x236xf32>
    %cst_37 = arith.constant dense<0.000000e+00> : vector<16x236xf32>
    %292 = tpu.matmul %290, %291, %cst_37 {dimension_numbers = #tpu.dot_dimension_numbers<[1], [0], [0], [1], [0, 0, 1, 1], [], []>} : vector<16x6xf32>, vector<6x236xf32>, vector<16x236xf32> -> vector<16x236xf32>
    %293 = arith.addf %288, %292 : vector<16x236xf32>
    %c0_38 = arith.constant 0 : index
    %c0_39 = arith.constant 0 : index
    %294 = vector.load %arg4[%c0_38, %c0_39] : memref<16x1xf32, #tpu.memory_space<vmem>>, vector<16x1xf32>
    %295 = vector.broadcast %294 : vector<16x1xf32> to vector<16x236xf32>
    %296 = arith.addf %293, %295 : vector<16x236xf32>
    %cst_40 = arith.constant 0.000000e+00 : f32
    %297 = vector.broadcast %cst_40 : f32 to vector<16x236xf32>
    %298 = arith.maximumf %296, %297 : vector<16x236xf32>
    %299 = vector.extract_strided_slice %298 {offsets = [0, 0], sizes = [16, 223], strides = [1, 1]} : vector<16x236xf32> to vector<16x223xf32>
    %300 = vector.extract_strided_slice %298 {offsets = [0, 1], sizes = [16, 223], strides = [1, 1]} : vector<16x236xf32> to vector<16x223xf32>
    %301 = arith.maximumf %299, %300 : vector<16x223xf32>
    %302 = vector.extract_strided_slice %298 {offsets = [0, 12], sizes = [16, 223], strides = [1, 1]} : vector<16x236xf32> to vector<16x223xf32>
    %303 = vector.extract_strided_slice %298 {offsets = [0, 13], sizes = [16, 223], strides = [1, 1]} : vector<16x236xf32> to vector<16x223xf32>
    %304 = arith.maximumf %302, %303 : vector<16x223xf32>
    %305 = arith.maximumf %301, %304 : vector<16x223xf32>
    %c0_41 = arith.constant 0 : index
    %c0_42 = arith.constant 0 : index
    %306 = vector.load %arg6[%c0_41, %c0_42] : memref<223x32xf32, #tpu.memory_space<vmem>>, vector<223x32xf32>
    %cst_43 = arith.constant dense<0.000000e+00> : vector<16x32xf32>
    %307 = tpu.matmul %305, %306, %cst_43 {dimension_numbers = #tpu.dot_dimension_numbers<[1], [0], [0], [1], [0, 0, 1, 1], [], []>} : vector<16x223xf32>, vector<223x32xf32>, vector<16x32xf32> -> vector<16x32xf32>
    %308 = tpu.transpose %307, [1, 0] : vector<16x32xf32> -> vector<32x16xf32>
    %c0_44 = arith.constant 0 : index
    %c0_45 = arith.constant 0 : index
    %c0_46 = arith.constant 0 : index
    %309 = vector.load %arg7[%c0_44, %c0_45, %c0_46] : memref<16x16x120xf32, #tpu.memory_space<vmem>>, vector<16x16x120xf32>
    %cst_47 = arith.constant 0.000000e+00 : f32
    %310 = vector.broadcast %cst_47 : f32 to vector<2x120xf32>
    %311 = vector.extract_strided_slice %308 {offsets = [0, 0], sizes = [2, 16], strides = [1, 1]} : vector<32x16xf32> to vector<2x16xf32>
    %312 = vector.extract_strided_slice %309 {offsets = [0, 0, 0], sizes = [1, 16, 120], strides = [1, 1, 1]} : vector<16x16x120xf32> to vector<1x16x120xf32>
    %313 = vector.shape_cast %312 : vector<1x16x120xf32> to vector<16x120xf32>
    %cst_48 = arith.constant dense<0.000000e+00> : vector<2x120xf32>
    %314 = tpu.matmul %311, %313, %cst_48 {dimension_numbers = #tpu.dot_dimension_numbers<[1], [0], [0], [1], [0, 0, 1, 1], [], []>} : vector<2x16xf32>, vector<16x120xf32>, vector<2x120xf32> -> vector<2x120xf32>
    %315 = arith.addf %310, %314 : vector<2x120xf32>
    %316 = vector.extract_strided_slice %308 {offsets = [2, 0], sizes = [2, 16], strides = [1, 1]} : vector<32x16xf32> to vector<2x16xf32>
    %317 = vector.extract_strided_slice %309 {offsets = [1, 0, 0], sizes = [1, 16, 120], strides = [1, 1, 1]} : vector<16x16x120xf32> to vector<1x16x120xf32>
    %318 = vector.shape_cast %317 : vector<1x16x120xf32> to vector<16x120xf32>
    %cst_49 = arith.constant dense<0.000000e+00> : vector<2x120xf32>
    %319 = tpu.matmul %316, %318, %cst_49 {dimension_numbers = #tpu.dot_dimension_numbers<[1], [0], [0], [1], [0, 0, 1, 1], [], []>} : vector<2x16xf32>, vector<16x120xf32>, vector<2x120xf32> -> vector<2x120xf32>
    %320 = arith.addf %315, %319 : vector<2x120xf32>
    %321 = vector.extract_strided_slice %308 {offsets = [4, 0], sizes = [2, 16], strides = [1, 1]} : vector<32x16xf32> to vector<2x16xf32>
    %322 = vector.extract_strided_slice %309 {offsets = [2, 0, 0], sizes = [1, 16, 120], strides = [1, 1, 1]} : vector<16x16x120xf32> to vector<1x16x120xf32>
    %323 = vector.shape_cast %322 : vector<1x16x120xf32> to vector<16x120xf32>
    %cst_50 = arith.constant dense<0.000000e+00> : vector<2x120xf32>
    %324 = tpu.matmul %321, %323, %cst_50 {dimension_numbers = #tpu.dot_dimension_numbers<[1], [0], [0], [1], [0, 0, 1, 1], [], []>} : vector<2x16xf32>, vector<16x120xf32>, vector<2x120xf32> -> vector<2x120xf32>
    %325 = arith.addf %320, %324 : vector<2x120xf32>
    %326 = vector.extract_strided_slice %308 {offsets = [6, 0], sizes = [2, 16], strides = [1, 1]} : vector<32x16xf32> to vector<2x16xf32>
    %327 = vector.extract_strided_slice %309 {offsets = [3, 0, 0], sizes = [1, 16, 120], strides = [1, 1, 1]} : vector<16x16x120xf32> to vector<1x16x120xf32>
    %328 = vector.shape_cast %327 : vector<1x16x120xf32> to vector<16x120xf32>
    %cst_51 = arith.constant dense<0.000000e+00> : vector<2x120xf32>
    %329 = tpu.matmul %326, %328, %cst_51 {dimension_numbers = #tpu.dot_dimension_numbers<[1], [0], [0], [1], [0, 0, 1, 1], [], []>} : vector<2x16xf32>, vector<16x120xf32>, vector<2x120xf32> -> vector<2x120xf32>
    %330 = arith.addf %325, %329 : vector<2x120xf32>
    %331 = vector.extract_strided_slice %308 {offsets = [8, 0], sizes = [2, 16], strides = [1, 1]} : vector<32x16xf32> to vector<2x16xf32>
    %332 = vector.extract_strided_slice %309 {offsets = [4, 0, 0], sizes = [1, 16, 120], strides = [1, 1, 1]} : vector<16x16x120xf32> to vector<1x16x120xf32>
    %333 = vector.shape_cast %332 : vector<1x16x120xf32> to vector<16x120xf32>
    %cst_52 = arith.constant dense<0.000000e+00> : vector<2x120xf32>
    %334 = tpu.matmul %331, %333, %cst_52 {dimension_numbers = #tpu.dot_dimension_numbers<[1], [0], [0], [1], [0, 0, 1, 1], [], []>} : vector<2x16xf32>, vector<16x120xf32>, vector<2x120xf32> -> vector<2x120xf32>
    %335 = arith.addf %330, %334 : vector<2x120xf32>
    %336 = vector.extract_strided_slice %308 {offsets = [10, 0], sizes = [2, 16], strides = [1, 1]} : vector<32x16xf32> to vector<2x16xf32>
    %337 = vector.extract_strided_slice %309 {offsets = [5, 0, 0], sizes = [1, 16, 120], strides = [1, 1, 1]} : vector<16x16x120xf32> to vector<1x16x120xf32>
    %338 = vector.shape_cast %337 : vector<1x16x120xf32> to vector<16x120xf32>
    %cst_53 = arith.constant dense<0.000000e+00> : vector<2x120xf32>
    %339 = tpu.matmul %336, %338, %cst_53 {dimension_numbers = #tpu.dot_dimension_numbers<[1], [0], [0], [1], [0, 0, 1, 1], [], []>} : vector<2x16xf32>, vector<16x120xf32>, vector<2x120xf32> -> vector<2x120xf32>
    %340 = arith.addf %335, %339 : vector<2x120xf32>
    %341 = vector.extract_strided_slice %308 {offsets = [12, 0], sizes = [2, 16], strides = [1, 1]} : vector<32x16xf32> to vector<2x16xf32>
    %342 = vector.extract_strided_slice %309 {offsets = [6, 0, 0], sizes = [1, 16, 120], strides = [1, 1, 1]} : vector<16x16x120xf32> to vector<1x16x120xf32>
    %343 = vector.shape_cast %342 : vector<1x16x120xf32> to vector<16x120xf32>
    %cst_54 = arith.constant dense<0.000000e+00> : vector<2x120xf32>
    %344 = tpu.matmul %341, %343, %cst_54 {dimension_numbers = #tpu.dot_dimension_numbers<[1], [0], [0], [1], [0, 0, 1, 1], [], []>} : vector<2x16xf32>, vector<16x120xf32>, vector<2x120xf32> -> vector<2x120xf32>
    %345 = arith.addf %340, %344 : vector<2x120xf32>
    %346 = vector.extract_strided_slice %308 {offsets = [14, 0], sizes = [2, 16], strides = [1, 1]} : vector<32x16xf32> to vector<2x16xf32>
    %347 = vector.extract_strided_slice %309 {offsets = [7, 0, 0], sizes = [1, 16, 120], strides = [1, 1, 1]} : vector<16x16x120xf32> to vector<1x16x120xf32>
    %348 = vector.shape_cast %347 : vector<1x16x120xf32> to vector<16x120xf32>
    %cst_55 = arith.constant dense<0.000000e+00> : vector<2x120xf32>
    %349 = tpu.matmul %346, %348, %cst_55 {dimension_numbers = #tpu.dot_dimension_numbers<[1], [0], [0], [1], [0, 0, 1, 1], [], []>} : vector<2x16xf32>, vector<16x120xf32>, vector<2x120xf32> -> vector<2x120xf32>
    %350 = arith.addf %345, %349 : vector<2x120xf32>
    %351 = vector.extract_strided_slice %308 {offsets = [16, 0], sizes = [2, 16], strides = [1, 1]} : vector<32x16xf32> to vector<2x16xf32>
    %352 = vector.extract_strided_slice %309 {offsets = [8, 0, 0], sizes = [1, 16, 120], strides = [1, 1, 1]} : vector<16x16x120xf32> to vector<1x16x120xf32>
    %353 = vector.shape_cast %352 : vector<1x16x120xf32> to vector<16x120xf32>
    %cst_56 = arith.constant dense<0.000000e+00> : vector<2x120xf32>
    %354 = tpu.matmul %351, %353, %cst_56 {dimension_numbers = #tpu.dot_dimension_numbers<[1], [0], [0], [1], [0, 0, 1, 1], [], []>} : vector<2x16xf32>, vector<16x120xf32>, vector<2x120xf32> -> vector<2x120xf32>
    %355 = arith.addf %350, %354 : vector<2x120xf32>
    %356 = vector.extract_strided_slice %308 {offsets = [18, 0], sizes = [2, 16], strides = [1, 1]} : vector<32x16xf32> to vector<2x16xf32>
    %357 = vector.extract_strided_slice %309 {offsets = [9, 0, 0], sizes = [1, 16, 120], strides = [1, 1, 1]} : vector<16x16x120xf32> to vector<1x16x120xf32>
    %358 = vector.shape_cast %357 : vector<1x16x120xf32> to vector<16x120xf32>
    %cst_57 = arith.constant dense<0.000000e+00> : vector<2x120xf32>
    %359 = tpu.matmul %356, %358, %cst_57 {dimension_numbers = #tpu.dot_dimension_numbers<[1], [0], [0], [1], [0, 0, 1, 1], [], []>} : vector<2x16xf32>, vector<16x120xf32>, vector<2x120xf32> -> vector<2x120xf32>
    %360 = arith.addf %355, %359 : vector<2x120xf32>
    %361 = vector.extract_strided_slice %308 {offsets = [20, 0], sizes = [2, 16], strides = [1, 1]} : vector<32x16xf32> to vector<2x16xf32>
    %362 = vector.extract_strided_slice %309 {offsets = [10, 0, 0], sizes = [1, 16, 120], strides = [1, 1, 1]} : vector<16x16x120xf32> to vector<1x16x120xf32>
    %363 = vector.shape_cast %362 : vector<1x16x120xf32> to vector<16x120xf32>
    %cst_58 = arith.constant dense<0.000000e+00> : vector<2x120xf32>
    %364 = tpu.matmul %361, %363, %cst_58 {dimension_numbers = #tpu.dot_dimension_numbers<[1], [0], [0], [1], [0, 0, 1, 1], [], []>} : vector<2x16xf32>, vector<16x120xf32>, vector<2x120xf32> -> vector<2x120xf32>
    %365 = arith.addf %360, %364 : vector<2x120xf32>
    %366 = vector.extract_strided_slice %308 {offsets = [22, 0], sizes = [2, 16], strides = [1, 1]} : vector<32x16xf32> to vector<2x16xf32>
    %367 = vector.extract_strided_slice %309 {offsets = [11, 0, 0], sizes = [1, 16, 120], strides = [1, 1, 1]} : vector<16x16x120xf32> to vector<1x16x120xf32>
    %368 = vector.shape_cast %367 : vector<1x16x120xf32> to vector<16x120xf32>
    %cst_59 = arith.constant dense<0.000000e+00> : vector<2x120xf32>
    %369 = tpu.matmul %366, %368, %cst_59 {dimension_numbers = #tpu.dot_dimension_numbers<[1], [0], [0], [1], [0, 0, 1, 1], [], []>} : vector<2x16xf32>, vector<16x120xf32>, vector<2x120xf32> -> vector<2x120xf32>
    %370 = arith.addf %365, %369 : vector<2x120xf32>
    %371 = vector.extract_strided_slice %308 {offsets = [24, 0], sizes = [2, 16], strides = [1, 1]} : vector<32x16xf32> to vector<2x16xf32>
    %372 = vector.extract_strided_slice %309 {offsets = [12, 0, 0], sizes = [1, 16, 120], strides = [1, 1, 1]} : vector<16x16x120xf32> to vector<1x16x120xf32>
    %373 = vector.shape_cast %372 : vector<1x16x120xf32> to vector<16x120xf32>
    %cst_60 = arith.constant dense<0.000000e+00> : vector<2x120xf32>
    %374 = tpu.matmul %371, %373, %cst_60 {dimension_numbers = #tpu.dot_dimension_numbers<[1], [0], [0], [1], [0, 0, 1, 1], [], []>} : vector<2x16xf32>, vector<16x120xf32>, vector<2x120xf32> -> vector<2x120xf32>
    %375 = arith.addf %370, %374 : vector<2x120xf32>
    %376 = vector.extract_strided_slice %308 {offsets = [26, 0], sizes = [2, 16], strides = [1, 1]} : vector<32x16xf32> to vector<2x16xf32>
    %377 = vector.extract_strided_slice %309 {offsets = [13, 0, 0], sizes = [1, 16, 120], strides = [1, 1, 1]} : vector<16x16x120xf32> to vector<1x16x120xf32>
    %378 = vector.shape_cast %377 : vector<1x16x120xf32> to vector<16x120xf32>
    %cst_61 = arith.constant dense<0.000000e+00> : vector<2x120xf32>
    %379 = tpu.matmul %376, %378, %cst_61 {dimension_numbers = #tpu.dot_dimension_numbers<[1], [0], [0], [1], [0, 0, 1, 1], [], []>} : vector<2x16xf32>, vector<16x120xf32>, vector<2x120xf32> -> vector<2x120xf32>
    %380 = arith.addf %375, %379 : vector<2x120xf32>
    %381 = vector.extract_strided_slice %308 {offsets = [28, 0], sizes = [2, 16], strides = [1, 1]} : vector<32x16xf32> to vector<2x16xf32>
    %382 = vector.extract_strided_slice %309 {offsets = [14, 0, 0], sizes = [1, 16, 120], strides = [1, 1, 1]} : vector<16x16x120xf32> to vector<1x16x120xf32>
    %383 = vector.shape_cast %382 : vector<1x16x120xf32> to vector<16x120xf32>
    %cst_62 = arith.constant dense<0.000000e+00> : vector<2x120xf32>
    %384 = tpu.matmul %381, %383, %cst_62 {dimension_numbers = #tpu.dot_dimension_numbers<[1], [0], [0], [1], [0, 0, 1, 1], [], []>} : vector<2x16xf32>, vector<16x120xf32>, vector<2x120xf32> -> vector<2x120xf32>
    %385 = arith.addf %380, %384 : vector<2x120xf32>
    %386 = vector.extract_strided_slice %308 {offsets = [30, 0], sizes = [2, 16], strides = [1, 1]} : vector<32x16xf32> to vector<2x16xf32>
    %387 = vector.extract_strided_slice %309 {offsets = [15, 0, 0], sizes = [1, 16, 120], strides = [1, 1, 1]} : vector<16x16x120xf32> to vector<1x16x120xf32>
    %388 = vector.shape_cast %387 : vector<1x16x120xf32> to vector<16x120xf32>
    %cst_63 = arith.constant dense<0.000000e+00> : vector<2x120xf32>
    %389 = tpu.matmul %386, %388, %cst_63 {dimension_numbers = #tpu.dot_dimension_numbers<[1], [0], [0], [1], [0, 0, 1, 1], [], []>} : vector<2x16xf32>, vector<16x120xf32>, vector<2x120xf32> -> vector<2x120xf32>
    %390 = arith.addf %385, %389 : vector<2x120xf32>
    %c0_64 = arith.constant 0 : index
    %c0_65 = arith.constant 0 : index
    %391 = vector.load %arg8[%c0_64, %c0_65] : memref<1x120xf32, #tpu.memory_space<vmem>>, vector<1x120xf32>
    %392 = vector.broadcast %391 : vector<1x120xf32> to vector<2x120xf32>
    %393 = arith.addf %390, %392 : vector<2x120xf32>
    %cst_66 = arith.constant 0.000000e+00 : f32
    %394 = vector.broadcast %cst_66 : f32 to vector<2x120xf32>
    %395 = arith.maximumf %393, %394 : vector<2x120xf32>
    %c0_67 = arith.constant 0 : index
    %c0_68 = arith.constant 0 : index
    %396 = vector.load %arg9[%c0_67, %c0_68] : memref<120x84xf32, #tpu.memory_space<vmem>>, vector<120x84xf32>
    %cst_69 = arith.constant dense<0.000000e+00> : vector<2x84xf32>
    %397 = tpu.matmul %395, %396, %cst_69 {dimension_numbers = #tpu.dot_dimension_numbers<[1], [0], [0], [1], [0, 0, 1, 1], [], []>} : vector<2x120xf32>, vector<120x84xf32>, vector<2x84xf32> -> vector<2x84xf32>
    %c0_70 = arith.constant 0 : index
    %c0_71 = arith.constant 0 : index
    %398 = vector.load %arg10[%c0_70, %c0_71] : memref<1x84xf32, #tpu.memory_space<vmem>>, vector<1x84xf32>
    %399 = vector.broadcast %398 : vector<1x84xf32> to vector<2x84xf32>
    %400 = arith.addf %397, %399 : vector<2x84xf32>
    %cst_72 = arith.constant 0.000000e+00 : f32
    %401 = vector.broadcast %cst_72 : f32 to vector<2x84xf32>
    %402 = arith.maximumf %400, %401 : vector<2x84xf32>
    %c0_73 = arith.constant 0 : index
    %c0_74 = arith.constant 0 : index
    %403 = vector.load %arg11[%c0_73, %c0_74] : memref<84x10xf32, #tpu.memory_space<vmem>>, vector<84x10xf32>
    %cst_75 = arith.constant dense<0.000000e+00> : vector<2x10xf32>
    %404 = tpu.matmul %402, %403, %cst_75 {dimension_numbers = #tpu.dot_dimension_numbers<[1], [0], [0], [1], [0, 0, 1, 1], [], []>} : vector<2x84xf32>, vector<84x10xf32>, vector<2x10xf32> -> vector<2x10xf32>
    %c0_76 = arith.constant 0 : index
    %c0_77 = arith.constant 0 : index
    %405 = vector.load %arg12[%c0_76, %c0_77] : memref<1x10xf32, #tpu.memory_space<vmem>>, vector<1x10xf32>
    %406 = vector.broadcast %405 : vector<1x10xf32> to vector<2x10xf32>
    %407 = arith.addf %404, %406 : vector<2x10xf32>
    %c0_78 = arith.constant 0 : index
    %c0_79 = arith.constant 0 : index
    %408 = vector.load %arg13[%c0_78, %c0_79] : memref<2x10xf32, #tpu.memory_space<vmem>>, vector<2x10xf32>
    tpu.vector_store %arg13[%c0_78, %c0_79], %407 {strides = array<i32>} : memref<2x10xf32, #tpu.memory_space<vmem>>, vector<2x10xf32>,
    return
  }
}

</mosaic_0001>

<bundles_post_ra>
// kernel: numid_forward.1
= control target key start
LH: loop header
LB: loop body
LE: loop exit
PB: predicated region body
PF: predicated region fallthrough
CT: control target
= control target key end

     0   :  { %s14745_s0 = inlined_call_operand.vmem [shape: f32[1,1568], index: 0, kind: input, shape index: {}]   ;;  %s14746_s1 = inlined_call_operand.vmem [shape: f32[6,25], index: 1, kind: input, shape index: {}]   ;;  %s14747_s2 = inlined_call_operand.vmem [shape: f32[6,1], index: 2, kind: input, shape index: {}]   ;;  %s14748_s3 = inlined_call_operand.vmem [shape: f32[25,16,6], index: 3, kind: input, shape index: {}]   ;;  %s14749_s4 = inlined_call_operand.vmem [shape: f32[16,1], index: 4, kind: input, shape index: {}]   ;;  %s14750_s5 = inlined_call_operand.vmem [shape: f32[1423,288], index: 5, kind: input, shape index: {}]   ;;  %s14751_s6 = inlined_call_operand.vmem [shape: f32[223,32], index: 6, kind: input, shape index: {}]   ;;  %s14752_s7 = inlined_call_operand.vmem [shape: f32[16,16,120], index: 7, kind: input, shape index: {}]   ;;  %s14753_s8 = inlined_call_operand.vmem [shape: f32[1,120], index: 8, kind: input, shape index: {}]   ;;  %s14754_s9 = inlined_call_operand.vmem [shape: f32[120,84], index: 9, kind: input, shape index: {}]   ;;  %s14755_s10 = inlined_call_operand.vmem [shape: f32[1,84], index: 10, kind: input, shape index: {}]   ;;  %s14756_s11 = inlined_call_operand.vmem [shape: f32[84,10], index: 11, kind: input, shape index: {}]   ;;  %s14757_s12 = inlined_call_operand.vmem [shape: f32[1,10], index: 12, kind: input, shape index: {}]   ;;  %s14758_s13 = inlined_call_operand.hbm [shape: f32[2,10], index: 13, kind: output, shape index: {}]  }
   0x1   :  { %15033 = sst [smem:[#allocation95_spill]] %s14748_s3 }
   0x2   :  { %15034 = sst [smem:[#allocation96_spill]] %s14749_s4 }
   0x3   :  { %15035 = sst [smem:[#allocation97_spill]] %s14751_s6 }
   0x4   :  { %15036 = sst [smem:[#allocation98_spill]] %s14752_s7 }
   0x5   :  { %15037 = sst [smem:[#allocation99_spill]] %s14753_s8 }
   0x6   :  { %15038 = sst [smem:[#allocation100_spill]] %s14754_s9 }
   0x7   :  { %15039 = sst [smem:[#allocation101_spill]] %s14755_s10 }
   0x8   :  { %15040 = sst [smem:[#allocation102_spill]] %s14756_s11 }
   0x9   :  { %15041 = sst [smem:[#allocation103_spill]] %s14757_s12 }
   0xa   :  { %15042 = sst [smem:[#allocation104_spill]] %s14758_s13 }
   0xb   :  { %v9663_v0 = vld [vmem:[%s14746_s1] sm:$0x3f]  ;;  %v9517_v1 = vmov 1   ;;  %v9518_v2 = vmov 3  }
   0xc   :  { %9416 = vset.pattern.permute.xlu0 %v9517_v1  ;;  %9418 = vset.pattern.permute.xlu1 %v9518_v2 }
   0xd   :  { %140 = vperm.xlu0 %9416, %v9663_v0   ;;  %316 = vperm.xlu1 %9418, %v9663_v0  }
   0xe   :  { %18 = vsyncpa [#allocation3], 0  ;;  %v9519_v3 = vmov 2   ;;  %v9520_v4 = vmov 4   ;;  %v55_v5 = vlaneseq  ;;  %v9674_v7 = vld [vmem:[%s14745_s0] sm:$0xff]  ;;  %v9521_v8 = vmov 5  }
   0xf   :  { %v9522_v9 = vmov 6   ;;  %v9523_v16 = vmov 7   ;;  %v9524_v17 = vmov 9   ;;  %v9525_v18 = vmov 8   ;;  %s14933_s28 = smov 127   ;;  %s14930_s29 = smov 126  }
  0x10   :  { %v9669_v6 = vshrl.u32 %v55_v5, 7  ;;  %v9526_v19 = vmov 12   ;;  %v9527_v20 = vmov 10   ;;  %v9528_v21 = vmov 15   ;;  %s14928_s30 = smov 125   ;;  %s14926_s14 = smov 124  }
  0x11   :  { %9417 = vset.pattern.permute.xlu0 %v9519_v3  ;;  %9419 = vset.pattern.permute.xlu1 %v9520_v4  ;;  %v9529_v22 = vmov 11   ;;  %v9530_v23 = vmov 18   ;;  %v9531_v24 = vmov 13   ;;  %v9532_v25 = vmov 21   ;;  %s14935_s15 = smov 100   ;;  %s14924_s16 = smov 99  }
  0x12   :  { %228 = vperm.xlu0 %9417, %v9663_v0   ;;  %404 = vperm.xlu1 %9419, %v9663_v0   ;;  %15043 = vst [vmem:[#allocation5_spill] sm:$0xff] %v9669_v6  ;;  %v81_v10 = vsub.s32 6, %v9669_v6  ;;  %v77_v11 = vsub.s32 5, %v9669_v6  ;;  %v85_v12 = vsub.s32 7, %v9669_v6  ;;  %v9533_v26 = vmov 14   ;;  %s14922_s17 = smov 98  }
  0x13   :  { %v9534_v27 = vmov 24   ;;  %v9535_v28 = vmov 16   ;;  %v9536_v29 = vmov 0   ;;  %v9537_v30 = vmov 17   ;;  %s14918_s18 = smov 97   ;;  %s14912_s19 = smov 96  }
  0x14   :  { %v9682_v13 = vrot.slane %v9674_v7, %v81_v10  ;;  %v9685_v14 = vrot.slane %v9674_v7, %v77_v11  ;;  %v9688_v15 = vrot.slane %v9674_v7, %v85_v12  ;;  %v9538_v31 = vmov 19   ;;  %s14880_s20 = smov 72   ;;  %s14877_s21 = smov 71  }
  0x15   :  { %v9539_v32 = vmov 20   ;;  %v9540_v33 = vmov 22   ;;  %v9541_v34 = vmov 23   ;;  %v14761_v35 = vsub.s32 2, %v9669_v6  ;;  %s14856_s22 = smov 70   ;;  %s14844_s23 = smov 69  }
  0x16   :  { %9420 = vset.pattern.permute.xlu1 %v9521_v8  ;;  %9421 = vset.pattern.permute.xlu0 %v9522_v9  ;;  %15044 = vst [vmem:[#allocation6_spill] sm:$0xff] %v9682_v13  ;;  %15045 = vst [vmem:[#allocation7_spill] sm:$0xff] %v9688_v15  ;;  %v14762_v36 = vsub.s32 1, %v9669_v6  ;;  %v14759_v39 = vsub.s32 4, %v9669_v6  ;;  %v14760_v40 = vsub.s32 3, %v9669_v6  ;;  %v14763_v42 = vsub.s32 0, %v9669_v6 }
  0x17   :  { %492 = vperm.xlu1 %9420, %v9663_v0   ;;  %580 = vperm.xlu0 %9421, %v9663_v0   ;;  %v9714_v37 = vrot.slane %v9674_v7, %v14761_v35  ;;  %s14849_s24 = smov 68   ;;  %s14794_s25 = smov 44   ;;  %vm15032_vm0 = vcmask 1039360   ;;  %vm15006_vm1 = vcmask 1031168   ;;  %vm15007_vm2 = vcmask 1022976  }
  0x18   :  { %v9719_v38 = vrot.slane %v9674_v7, %v14762_v36  ;;  %v9733_v45 = vrot.slane %v9674_v7, %v14759_v39  ;;  %v9738_v46 = vrot.slane %v9674_v7, %v14760_v40  ;;  %v9751_v50 = vrot.slane %v9674_v7, %v14763_v42  ;;  %s14792_s26 = smov 43   ;;  %s14771_s1 = smov 42  }
  0x19   :  { %s14777_s27 = smov 41   ;;  %vm14958_vm3 = vcmask 1014784   ;;  %vm14957_vm4 = vcmask 818176   ;;  %vm14887_vm5 = vcmask 809984   ;;  %vm14884_vm6 = vcmask 801792   ;;  %s15299_s10 = smov 100  }
  0x1a   :  { %15047 = vst [vmem:[#allocation9_spill] sm:$0xff] %v9733_v45  ;;  %vm14885_vm7 = vcmask 793600   ;;  %vm14886_vm8 = vcmask 785408   ;;  %vm14890_vm9 = vcmask 588800   ;;  %vm14888_vm10 = vcmask 580608   ;;  %s15315_s13 = smov 124  }
  0x1b   :  { %9422 = vset.pattern.permute.xlu1 %v9523_v16  ;;  %9424 = vset.pattern.permute.xlu0 %v9524_v17  ;;  %vm14889_vm11 = vcmask 572416   ;;  %vm1247_vm12 = vcmask 564224   ;;  %vm14891_vm13 = vcmask 556032   ;;  %vm1423_vm14 = vcmask 359424   ;;  %s15318_s12 = smov 99   ;;  %s15320_s8 = smov 98  }
  0x1c   :  { %668 = vperm.xlu1 %9422, %v9663_v0   ;;  %844 = vperm.xlu0 %9424, %v9663_v0   ;;  %vm1520_vm15 = vcmask 351232   ;;  %s15322_s11 = smov 97   ;;  %s15420_s4 = smov 16  }
  0x1d   :  { %s15421_s7 = smov 15  }
  0x20   :  { %9423 = vset.pattern.permute.xlu1 %v9525_v18  ;;  %9427 = vset.pattern.permute.xlu0 %v9526_v19 }
  0x21   :  { %756 = vperm.xlu1 %9423, %v9663_v0   ;;  %1108 = vperm.xlu0 %9427, %v9663_v0  }
  0x25   :  { %9425 = vset.pattern.permute.xlu1 %v9527_v20  ;;  %9430 = vset.pattern.permute.xlu0 %v9528_v21 }
  0x26   :  { %932 = vperm.xlu1 %9425, %v9663_v0   ;;  %1372 = vperm.xlu0 %9430, %v9663_v0  }
  0x2a   :  { %9426 = vset.pattern.permute.xlu1 %v9529_v22  ;;  %9433 = vset.pattern.permute.xlu0 %v9530_v23 }
  0x2b   :  { %1020 = vperm.xlu1 %9426, %v9663_v0   ;;  %1651 = vperm.xlu0 %9433, %v9663_v0  }
  0x2f   :  { %9428 = vset.pattern.permute.xlu1 %v9531_v24  ;;  %9436 = vset.pattern.permute.xlu0 %v9532_v25 }
  0x30   :  { %1196 = vperm.xlu1 %9428, %v9663_v0   ;;  %1930 = vperm.xlu0 %9436, %v9663_v0  }
  0x34   :  { %9429 = vset.pattern.permute.xlu1 %v9533_v26  ;;  %9439 = vset.pattern.permute.xlu0 %v9534_v27 }
  0x35   :  { %1284 = vperm.xlu1 %9429, %v9663_v0   ;;  %2209 = vperm.xlu0 %9439, %v9663_v0  }
  0x39   :  { %9431 = vset.pattern.permute.xlu1 %v9535_v28  ;;  %9441 = vset.pattern.permute.xlu0 %v9536_v29 }
  0x3a   :  { %1460 = vperm.xlu1 %9431, %v9663_v0  }
  0x3e   :  { %9432 = vset.pattern.permute.xlu1 %v9537_v30 }
  0x3f   :  { %1558 = vperm.xlu1 %9432, %v9663_v0  }
  0x43   :  { %9434 = vset.pattern.permute.xlu1 %v9538_v31 }
  0x44   :  { %1744 = vperm.xlu1 %9434, %v9663_v0  }
  0x48   :  { %9435 = vset.pattern.permute.xlu1 %v9539_v32 }
  0x49   :  { %1837 = vperm.xlu1 %9435, %v9663_v0  }
  0x4d   :  { %9437 = vset.pattern.permute.xlu1 %v9540_v33 }
  0x4e   :  { %2023 = vperm.xlu1 %9437, %v9663_v0  }
  0x52   :  { %9438 = vset.pattern.permute.xlu1 %v9541_v34 }
  0x53   :  { %2116 = vperm.xlu1 %9438, %v9663_v0  }
  0x57   :  { %9440 = vset.pattern.permute.xlu1 %v9536_v29 }
  0x58   :  { %50 = vperm.xlu1 %9440, %v9663_v0  }
  0x8c   :  { %v9723_v41 = vpop.permute.xlu0 %140  ;;  %v9767_v55 = vpop.permute.xlu1 %316 }
  0x8d   :  { %15046 = vst [vmem:[#allocation8_spill] sm:$0xff] %v9723_v41  ;;  %v145_v43 = vmul.f32 %v9723_v41, %v9714_v37  ;;  %v144_v44 = vmul.f32 %v9723_v41, %v9719_v38  ;;  %v147_v47 = vmul.f32 %v9723_v41, %v9733_v45  ;;  %v146_v48 = vmul.f32 %v9723_v41, %v9738_v46 }
  0x8e   :  { %v143_v52 = vmul.f32 %v9723_v41, %v9751_v50  ;;  %15049 = vst [vmem:[#allocation11_spill] sm:$0xff] %v9767_v55  ;;  %v321_v58 = vmul.f32 %v9767_v55, %v9714_v37  ;;  %v320_v59 = vmul.f32 %v9767_v55, %v9719_v38  ;;  %v323_v61 = vmul.f32 %v9767_v55, %v9733_v45 }
  0x8f   :  { %171 = vrot.lane.b32.xlu0 %v145_v43, %s14933_s28  ;;  %169 = vrot.lane.b32.xlu1 %v144_v44, %s14933_s28  ;;  %v322_v62 = vmul.f32 %v9767_v55, %v9738_v46  ;;  %v319_v0 = vmul.f32 %v9767_v55, %v9751_v50 }
  0x91   :  { %v9746_v49 = vpop.permute.xlu0 %228  ;;  %v9781_v60 = vpop.permute.xlu1 %404 }
  0x92   :  { %15048 = vst [vmem:[#allocation10_spill] sm:$0xff] %v9746_v49  ;;  %v232_v51 = vmul.f32 %v9746_v49, %v9719_v38  ;;  %v234_v53 = vmul.f32 %v9746_v49, %v9738_v46  ;;  %v233_v54 = vmul.f32 %v9746_v49, %v9714_v37  ;;  %v231_v56 = vmul.f32 %v9746_v49, %v9751_v50 }
  0x93   :  { %175 = vrot.lane.b32.xlu0 %v147_v47, %s14933_s28  ;;  %173 = vrot.lane.b32.xlu1 %v146_v48, %s14933_s28  ;;  %v235_v57 = vmul.f32 %v9746_v49, %v9733_v45  ;;  %15050 = vst [vmem:[#allocation12_spill] sm:$0xff] %v9781_v60  ;;  %v408_v63 = vmul.f32 %v9781_v60, %v9719_v38 }
  0x94   :  { %v410_v1 = vmul.f32 %v9781_v60, %v9738_v46  ;;  %v409_v2 = vmul.f32 %v9781_v60, %v9714_v37  ;;  %v407_v4 = vmul.f32 %v9781_v60, %v9751_v50  ;;  %v411_v5 = vmul.f32 %v9781_v60, %v9733_v45 }
  0x96   :  { %v9801_v3 = vpop.permute.xlu1 %492  ;;  %v9817_v10 = vpop.permute.xlu0 %580 }
  0x97   :  { %257 = vrot.lane.b32.xlu0 %v232_v51, %s14930_s29  ;;  %167 = vrot.lane.b32.xlu1 %v143_v52, %s14933_s28  ;;  %15051 = vst [vmem:[#allocation13_spill] sm:$0xff] %v9801_v3  ;;  %v497_v7 = vmul.f32 %v9801_v3, %v9714_v37  ;;  %v496_v8 = vmul.f32 %v9801_v3, %v9719_v38  ;;  %15053 = vst [vmem:[#allocation15_spill] sm:$0xff] %v9817_v10 }
  0x98   :  { %v499_v11 = vmul.f32 %v9801_v3, %v9733_v45  ;;  %v498_v12 = vmul.f32 %v9801_v3, %v9738_v46  ;;  %v584_v17 = vmul.f32 %v9817_v10, %v9719_v38  ;;  %v495_v18 = vmul.f32 %v9801_v3, %v9751_v50 }
  0x99   :  { %v586_v20 = vmul.f32 %v9817_v10, %v9738_v46  ;;  %v585_v21 = vmul.f32 %v9817_v10, %v9714_v37  ;;  %v583_v22 = vmul.f32 %v9817_v10, %v9751_v50  ;;  %v587_v23 = vmul.f32 %v9817_v10, %v9733_v45 }
  0x9b   :  { %261 = vrot.lane.b32.xlu0 %v234_v53, %s14930_s29  ;;  %259 = vrot.lane.b32.xlu1 %v233_v54, %s14930_s29  ;;  %v9813_v9 = vpop.permute.xlu1 %668  ;;  %v9879_v44 = vpop.permute.xlu0 %844 }
  0x9c   :  { %15052 = vst [vmem:[#allocation14_spill] sm:$0xff] %v9813_v9  ;;  %v673_v25 = vmul.f32 %v9813_v9, %v9714_v37  ;;  %v672_v26 = vmul.f32 %v9813_v9, %v9719_v38  ;;  %v675_v28 = vmul.f32 %v9813_v9, %v9733_v45  ;;  %v674_v29 = vmul.f32 %v9813_v9, %v9738_v46 }
  0x9d   :  { %v671_v31 = vmul.f32 %v9813_v9, %v9751_v50  ;;  %15060 = vst [vmem:[#allocation22_spill] sm:$0xff] %v9879_v44  ;;  %v849_v51 = vmul.f32 %v9879_v44, %v9714_v37  ;;  %v848_v52 = vmul.f32 %v9879_v44, %v9719_v38  ;;  %v851_v54 = vmul.f32 %v9879_v44, %v9733_v45 }
  0x9f   :  { %255 = vrot.lane.b32.xlu0 %v231_v56, %s14930_s29  ;;  %263 = vrot.lane.b32.xlu1 %v235_v57, %s14930_s29  ;;  %v850_v56 = vmul.f32 %v9879_v44, %v9738_v46 }
  0xa0   :  { %v9823_v16 = vpop.permute.xlu1 %756 }
  0xa1   :  { %15054 = vst [vmem:[#allocation16_spill] sm:$0xff] %v9823_v16  ;;  %v760_v30 = vmul.f32 %v9823_v16, %v9719_v38  ;;  %v762_v33 = vmul.f32 %v9823_v16, %v9738_v46  ;;  %v761_v34 = vmul.f32 %v9823_v16, %v9714_v37  ;;  %v759_v47 = vmul.f32 %v9823_v16, %v9751_v50 }
  0xa2   :  { %v763_v48 = vmul.f32 %v9823_v16, %v9733_v45 }
  0xa3   :  { %347 = vrot.lane.b32.xlu0 %v321_v58, %s14928_s30  ;;  %345 = vrot.lane.b32.xlu1 %v320_v59, %s14928_s30  ;;  %v9903_v58 = vpop.permute.xlu0 %1108 }
  0xa4   :  { %15063 = vst [vmem:[#allocation25_spill] sm:$0xff] %v9903_v58 }
  0xa5   :  { %v9833_v19 = vpop.permute.xlu1 %932 }
  0xa6   :  { %15055 = vst [vmem:[#allocation17_spill] sm:$0xff] %v9833_v19  ;;  %v936_v59 = vmul.f32 %v9833_v19, %v9719_v38 }
  0xa7   :  { %351 = vrot.lane.b32.xlu0 %v323_v61, %s14928_s30  ;;  %349 = vrot.lane.b32.xlu1 %v322_v62, %s14928_s30  ;;  %v847_v61 = vmul.f32 %v9879_v44, %v9751_v50  ;;  %v938_v62 = vmul.f32 %v9833_v19, %v9738_v46 }
  0xaa   :  { %v9845_v24 = vpop.permute.xlu1 %1020 }
  0xab   :  { %433 = vrot.lane.b32.xlu0 %v408_v63, %s14926_s14  ;;  %343 = vrot.lane.b32.xlu1 %v319_v0, %s14928_s30  ;;  %15056 = vst [vmem:[#allocation18_spill] sm:$0xff] %v9845_v24  ;;  %v937_v63 = vmul.f32 %v9833_v19, %v9714_v37 }
  0xaf   :  { %437 = vrot.lane.b32.xlu0 %v410_v1, %s14926_s14  ;;  %435 = vrot.lane.b32.xlu1 %v409_v2, %s14926_s14  ;;  %v9855_v27 = vpop.permute.xlu1 %1196  ;;  %v9917_v1 = vpop.permute.xlu0 %1372  ;;  %v935_v2 = vmul.f32 %v9833_v19, %v9751_v50 }
  0xb0   :  { %15057 = vst [vmem:[#allocation19_spill] sm:$0xff] %v9855_v27  ;;  %15065 = vst [vmem:[#allocation27_spill] sm:$0xff] %v9917_v1 }
  0xb3   :  { %431 = vrot.lane.b32.xlu0 %v407_v4, %s14926_s14  ;;  %439 = vrot.lane.b32.xlu1 %v411_v5, %s14926_s14  ;;  %v939_v4 = vmul.f32 %v9833_v19, %v9733_v45 }
  0xb4   :  { %v9867_v32 = vpop.permute.xlu1 %1284 }
  0xb5   :  { %15058 = vst [vmem:[#allocation20_spill] sm:$0xff] %v9867_v32 }
  0xb7   :  { %523 = vrot.lane.b32.xlu0 %v497_v7, %s14935_s15  ;;  %521 = vrot.lane.b32.xlu1 %v496_v8, %s14935_s15  ;;  %v9929_v7 = vpop.permute.xlu0 %1651  ;;  %v1025_v8 = vmul.f32 %v9845_v24, %v9714_v37 }
  0xb8   :  { %15066 = vst [vmem:[#allocation28_spill] sm:$0xff] %v9929_v7 }
  0xb9   :  { %v9877_v43 = vpop.permute.xlu1 %1460 }
  0xba   :  { %15059 = vst [vmem:[#allocation21_spill] sm:$0xff] %v9877_v43 }
  0xbb   :  { %527 = vrot.lane.b32.xlu0 %v499_v11, %s14935_s15  ;;  %525 = vrot.lane.b32.xlu1 %v498_v12, %s14935_s15  ;;  %v1024_v11 = vmul.f32 %v9845_v24, %v9719_v38  ;;  %v1027_v12 = vmul.f32 %v9845_v24, %v9733_v45 }
  0xbe   :  { %v9891_v53 = vpop.permute.xlu1 %1558 }
  0xbf   :  { %609 = vrot.lane.b32.xlu0 %v584_v17, %s14924_s16  ;;  %519 = vrot.lane.b32.xlu1 %v495_v18, %s14935_s15  ;;  %15061 = vst [vmem:[#allocation23_spill] sm:$0xff] %v9891_v53  ;;  %v1026_v17 = vmul.f32 %v9845_v24, %v9738_v46  ;;  %v1564_v42 = vmul.f32 %v9891_v53, %v9738_v46 }
  0xc3   :  { %613 = vrot.lane.b32.xlu0 %v586_v20, %s14924_s16  ;;  %611 = vrot.lane.b32.xlu1 %v585_v21, %s14924_s16  ;;  %v9901_v57 = vpop.permute.xlu1 %1744  ;;  %v9943_v20 = vpop.permute.xlu0 %1930  ;;  %v1112_v21 = vmul.f32 %v9903_v58, %v9719_v38 }
  0xc4   :  { %15062 = vst [vmem:[#allocation24_spill] sm:$0xff] %v9901_v57  ;;  %15068 = vst [vmem:[#allocation30_spill] sm:$0xff] %v9943_v20 }
  0xc7   :  { %607 = vrot.lane.b32.xlu0 %v583_v22, %s14924_s16  ;;  %615 = vrot.lane.b32.xlu1 %v587_v23, %s14924_s16  ;;  %v1023_v22 = vmul.f32 %v9845_v24, %v9751_v50 }
  0xc8   :  { %v9915_v0 = vpop.permute.xlu1 %1837 }
  0xc9   :  { %15064 = vst [vmem:[#allocation26_spill] sm:$0xff] %v9915_v0 }
  0xcb   :  { %699 = vrot.lane.b32.xlu0 %v673_v25, %s14922_s17  ;;  %697 = vrot.lane.b32.xlu1 %v672_v26, %s14922_s17  ;;  %v9955_v25 = vpop.permute.xlu0 %2209  ;;  %v1114_v26 = vmul.f32 %v9903_v58, %v9738_v46 }
  0xcc   :  { %15070 = vst [vmem:[#allocation32_spill] sm:$0xff] %v9955_v25 }
  0xcd   :  { %v9927_v5 = vpop.permute.xlu1 %2023 }
  0xcf   :  { %703 = vrot.lane.b32.xlu0 %v675_v28, %s14922_s17  ;;  %701 = vrot.lane.b32.xlu1 %v674_v29, %s14922_s17  ;;  %v1113_v28 = vmul.f32 %v9903_v58, %v9714_v37 }
  0xd2   :  { %v9941_v18 = vpop.permute.xlu1 %2116 }
  0xd3   :  { %785 = vrot.lane.b32.xlu0 %v760_v30, %s14918_s18  ;;  %695 = vrot.lane.b32.xlu1 %v671_v31, %s14922_s17  ;;  %15067 = vst [vmem:[#allocation29_spill] sm:$0xff] %v9941_v18  ;;  %v1111_v31 = vmul.f32 %v9903_v58, %v9751_v50 }
  0xd7   :  { %789 = vrot.lane.b32.xlu0 %v762_v33, %s14918_s18  ;;  %787 = vrot.lane.b32.xlu1 %v761_v34, %s14918_s18  ;;  %v9953_v23 = vpop.permute.xlu1 %50  ;;  %v1115_v33 = vmul.f32 %v9903_v58, %v9733_v45 }
  0xd8   :  { %15069 = vst [vmem:[#allocation31_spill] sm:$0xff] %v9953_v23 }
  0xdb   :  { %783 = vrot.lane.b32.xlu0 %v759_v47, %s14918_s18  ;;  %791 = vrot.lane.b32.xlu1 %v763_v48, %s14918_s18  ;;  %v1201_v48 = vmul.f32 %v9855_v27, %v9714_v37 }
  0xdf   :  { %875 = vrot.lane.b32.xlu0 %v849_v51, %s14912_s19  ;;  %873 = vrot.lane.b32.xlu1 %v848_v52, %s14912_s19  ;;  %v1200_v51 = vmul.f32 %v9855_v27, %v9719_v38 }
  0xe3   :  { %879 = vrot.lane.b32.xlu0 %v851_v54, %s14912_s19  ;;  %877 = vrot.lane.b32.xlu1 %v850_v56, %s14912_s19  ;;  %v1203_v56 = vmul.f32 %v9855_v27, %v9733_v45 }
  0xe7   :  { %961 = vrot.lane.b32.xlu0 %v936_v59, %s14880_s20  ;;  %871 = vrot.lane.b32.xlu1 %v847_v61, %s14912_s19  ;;  %v1202_v59 = vmul.f32 %v9855_v27, %v9738_v46 }
  0xeb   :  { %965 = vrot.lane.b32.xlu0 %v938_v62, %s14880_s20  ;;  %963 = vrot.lane.b32.xlu1 %v937_v63, %s14880_s20  ;;  %v1288_v63 = vmul.f32 %v9867_v32, %v9719_v38 }
  0xef   :  { %959 = vrot.lane.b32.xlu0 %v935_v2, %s14880_s20  ;;  %967 = vrot.lane.b32.xlu1 %v939_v4, %s14880_s20  ;;  %v1199_v2 = vmul.f32 %v9855_v27, %v9751_v50 }
  0xf3   :  { %1051 = vrot.lane.b32.xlu0 %v1025_v8, %s14877_s21  ;;  %1049 = vrot.lane.b32.xlu1 %v1024_v11, %s14877_s21  ;;  %v1290_v11 = vmul.f32 %v9867_v32, %v9738_v46 }
  0xf7   :  { %1055 = vrot.lane.b32.xlu0 %v1027_v12, %s14877_s21  ;;  %1053 = vrot.lane.b32.xlu1 %v1026_v17, %s14877_s21  ;;  %v1289_v12 = vmul.f32 %v9867_v32, %v9714_v37 }
  0xfb   :  { %1137 = vrot.lane.b32.xlu0 %v1112_v21, %s14856_s22  ;;  %1047 = vrot.lane.b32.xlu1 %v1023_v22, %s14877_s21  ;;  %v1287_v22 = vmul.f32 %v9867_v32, %v9751_v50 }
  0xff   :  { %1141 = vrot.lane.b32.xlu0 %v1114_v26, %s14856_s22  ;;  %1139 = vrot.lane.b32.xlu1 %v1113_v28, %s14856_s22  ;;  %v1291_v26 = vmul.f32 %v9867_v32, %v9733_v45 }
 0x101   :  { %v9963_v29 = vpop.permute.xlu0 %171  ;;  %v9965_v30 = vpop.permute.xlu1 %169 }
 0x103   :  { %1135 = vrot.lane.b32.xlu0 %v1111_v31, %s14856_s22  ;;  %1143 = vrot.lane.b32.xlu1 %v1115_v33, %s14856_s22  ;;  %v1377_v33 = vmul.f32 %v9917_v1, %v9714_v37 }
 0x105   :  { %v9973_v34 = vpop.permute.xlu0 %175  ;;  %v9975_v47 = vpop.permute.xlu1 %173 }
 0x107   :  { %1227 = vrot.lane.b32.xlu0 %v1201_v48, %s14844_s23  ;;  %1225 = vrot.lane.b32.xlu1 %v1200_v51, %s14844_s23  ;;  %v1376_v48 = vmul.f32 %v9917_v1, %v9719_v38 }
 0x109   :  { %v9983_v52 = vpop.permute.xlu0 %257  ;;  %v9985_v54 = vpop.permute.xlu1 %167 }
 0x10b   :  { %1231 = vrot.lane.b32.xlu0 %v1203_v56, %s14844_s23  ;;  %1229 = vrot.lane.b32.xlu1 %v1202_v59, %s14844_s23  ;;  %v1379_v59 = vmul.f32 %v9917_v1, %v9733_v45 }
 0x10d   :  { %v9993_v61 = vpop.permute.xlu0 %261  ;;  %v9995_v62 = vpop.permute.xlu1 %259 }
 0x10f   :  { %1313 = vrot.lane.b32.xlu0 %v1288_v63, %s14849_s24  ;;  %1223 = vrot.lane.b32.xlu1 %v1199_v2, %s14844_s23  ;;  %v1378_v63 = vmul.f32 %v9917_v1, %v9738_v46 }
 0x111   :  { %v10003_v4 = vpop.permute.xlu0 %255  ;;  %v10005_v8 = vpop.permute.xlu1 %263 }
 0x113   :  { %1317 = vrot.lane.b32.xlu0 %v1290_v11, %s14849_s24  ;;  %1315 = vrot.lane.b32.xlu1 %v1289_v12, %s14849_s24  ;;  %v1469_v12 = vmul.f32 %v9877_v43, %v9719_v38 }
 0x115   :  { %v10013_v17 = vpop.permute.xlu0 %347  ;;  %v10015_v21 = vpop.permute.xlu1 %345 }
 0x117   :  { %1311 = vrot.lane.b32.xlu0 %v1287_v22, %s14849_s24  ;;  %1319 = vrot.lane.b32.xlu1 %v1291_v26, %s14849_s24  ;;  %v1375_v22 = vmul.f32 %v9917_v1, %v9751_v50 }
 0x119   :  { %v10023_v28 = vpop.permute.xlu0 %351  ;;  %v10025_v31 = vpop.permute.xlu1 %349 }
 0x11b   :  { %1403 = vrot.lane.b32.xlu0 %v1377_v33, %s14794_s25  ;;  %1401 = vrot.lane.b32.xlu1 %v1376_v48, %s14794_s25  ;;  %v1471_v48 = vmul.f32 %v9877_v43, %v9738_v46 }
 0x11d   :  { %v10033_v51 = vpop.permute.xlu0 %433  ;;  %v10035_v56 = vpop.permute.xlu1 %343 }
 0x11f   :  { %1407 = vrot.lane.b32.xlu0 %v1379_v59, %s14794_s25  ;;  %1405 = vrot.lane.b32.xlu1 %v1378_v63, %s14794_s25  ;;  %v1470_v59 = vmul.f32 %v9877_v43, %v9714_v37 }
 0x121   :  { %v10043_v2 = vpop.permute.xlu0 %437  ;;  %v10045_v11 = vpop.permute.xlu1 %435 }
 0x123   :  { %1496 = vrot.lane.b32.xlu0 %v1469_v12, %s14792_s26  ;;  %1399 = vrot.lane.b32.xlu1 %v1375_v22, %s14794_s25  ;;  %v1468_v12 = vmul.f32 %v9877_v43, %v9751_v50  ;;  %v1472_v22 = vmul.f32 %v9877_v43, %v9733_v45  ;;  %s14892_s25 = smov 12  }
 0x125   :  { %v10053_v26 = vpop.permute.xlu0 %431  ;;  %v10055_v33 = vpop.permute.xlu1 %439 }
 0x127   :  { %1500 = vrot.lane.b32.xlu0 %v1471_v48, %s14792_s26  ;;  %1498 = vrot.lane.b32.xlu1 %v1470_v59, %s14792_s26  ;;  %v1563_v48 = vmul.f32 %v9891_v53, %v9714_v37  ;;  %v1562_v59 = vmul.f32 %v9891_v53, %v9719_v38 }
 0x129   :  { %v10063_v63 = vpop.permute.xlu0 %523  ;;  %v10065_v39 = vpop.permute.xlu1 %521 }
 0x12b   :  { %1494 = vrot.lane.b32.xlu0 %v1468_v12, %s14792_s26  ;;  %1502 = vrot.lane.b32.xlu1 %v1472_v22, %s14792_s26  ;;  %v1565_v22 = vmul.f32 %v9891_v53, %v9733_v45  ;;  %s15126_s26 = smov 44  }
 0x12d   :  { %v10073_v40 = vpop.permute.xlu0 %527  ;;  %v10075_v35 = vpop.permute.xlu1 %525 }
 0x12e   :  { %15071 = vst [vmem:[#allocation33_spill] sm:$0xff] %v10073_v40  ;;  %15072 = vst [vmem:[#allocation34_spill] sm:$0xff] %v10075_v35 }
 0x12f   :  { %1591 = vrot.lane.b32.xlu0 %v1563_v48, %s14771_s1  ;;  %1589 = vrot.lane.b32.xlu1 %v1562_v59, %s14771_s1  ;;  %v1655_v48 = vmul.f32 %v9929_v7, %v9719_v38  ;;  %v1561_v59 = vmul.f32 %v9891_v53, %v9751_v50 }
 0x131   :  { %v10083_v36 = vpop.permute.xlu0 %609  ;;  %v10085_v12 = vpop.permute.xlu1 %519 }
 0x132   :  { %15073 = vst [vmem:[#allocation35_spill] sm:$0xff] %v10085_v12 }
 0x133   :  { %1595 = vrot.lane.b32.xlu0 %v1565_v22, %s14771_s1  ;;  %1593 = vrot.lane.b32.xlu1 %v1564_v42, %s14771_s1  ;;  %v1657_v42 = vmul.f32 %v9929_v7, %v9738_v46 }
 0x135   :  { %v10093_v6 = vpop.permute.xlu0 %613  ;;  %v10095_v15 = vpop.permute.xlu1 %611 }
 0x136   :  { %15074 = vst [vmem:[#allocation36_spill] sm:$0xff] %v10093_v6  ;;  %v1656_v6 = vmul.f32 %v9929_v7, %v9714_v37 }
 0x137   :  { %1682 = vrot.lane.b32.xlu0 %v1655_v48, %s14777_s27  ;;  %1587 = vrot.lane.b32.xlu1 %v1561_v59, %s14771_s1  ;;  %v1654_v48 = vmul.f32 %v9929_v7, %v9751_v50  ;;  %v1658_v59 = vmul.f32 %v9929_v7, %v9733_v45  ;;  %s14783_s1 = smov 40  }
 0x139   :  { %v10103_v12 = vpop.permute.xlu0 %607  ;;  %v10105_v22 = vpop.permute.xlu1 %615 }
 0x13a   :  { %15075 = vst [vmem:[#allocation37_spill] sm:$0xff] %v10103_v12  ;;  %15076 = vst [vmem:[#allocation38_spill] sm:$0xff] %v10105_v22 }
 0x13b   :  { %1686 = vrot.lane.b32.xlu0 %v1657_v42, %s14777_s27  ;;  %1684 = vrot.lane.b32.xlu1 %v1656_v6, %s14777_s27  ;;  %v1749_v6 = vmul.f32 %v9901_v57, %v9714_v37  ;;  %v1748_v42 = vmul.f32 %v9901_v57, %v9719_v38 }
 0x13d   :  { %v10113_v40 = vpop.permute.xlu0 %699  ;;  %v10115_v35 = vpop.permute.xlu1 %697 }
 0x13e   :  { %15077 = vst [vmem:[#allocation39_spill] sm:$0xff] %v10113_v40  ;;  %15078 = vst [vmem:[#allocation40_spill] sm:$0xff] %v10115_v35 }
 0x13f   :  { %1680 = vrot.lane.b32.xlu0 %v1654_v48, %s14777_s27  ;;  %1688 = vrot.lane.b32.xlu1 %v1658_v59, %s14777_s27  ;;  %v1751_v59 = vmul.f32 %v9901_v57, %v9733_v45  ;;  %s14789_s27 = smov 16  }
 0x141   :  { %v10123_v12 = vpop.permute.xlu0 %703  ;;  %v10125_v22 = vpop.permute.xlu1 %701 }
 0x142   :  { %15079 = vst [vmem:[#allocation41_spill] sm:$0xff] %v10123_v12  ;;  %15080 = vst [vmem:[#allocation42_spill] sm:$0xff] %v10125_v22  ;;  %v1750_v12 = vmul.f32 %v9901_v57, %v9738_v46 }
 0x143   :  { %1777 = vrot.lane.b32.xlu0 %v1749_v6, %s14783_s1  ;;  %1775 = vrot.lane.b32.xlu1 %v1748_v42, %s14783_s1  ;;  %v1841_v6 = vmul.f32 %v9915_v0, %v9719_v38  ;;  %v1747_v42 = vmul.f32 %v9901_v57, %v9751_v50 }
 0x145   :  { %v10133_v35 = vpop.permute.xlu0 %785  ;;  %v10135_v48 = vpop.permute.xlu1 %695 }
 0x146   :  { %15081 = vst [vmem:[#allocation43_spill] sm:$0xff] %v10133_v35  ;;  %15082 = vst [vmem:[#allocation44_spill] sm:$0xff] %v10135_v48 }
 0x147   :  { %1781 = vrot.lane.b32.xlu0 %v1751_v59, %s14783_s1  ;;  %1779 = vrot.lane.b32.xlu1 %v1750_v12, %s14783_s1  ;;  %v1843_v12 = vmul.f32 %v9915_v0, %v9738_v46 }
 0x149   :  { %v10143_v22 = vpop.permute.xlu0 %789  ;;  %v10145_v40 = vpop.permute.xlu1 %787 }
 0x14a   :  { %15083 = vst [vmem:[#allocation45_spill] sm:$0xff] %v10143_v22  ;;  %15084 = vst [vmem:[#allocation46_spill] sm:$0xff] %v10145_v40  ;;  %v1842_v22 = vmul.f32 %v9915_v0, %v9714_v37 }
 0x14b   :  { %1868 = vrot.lane.b32.xlu0 %v1841_v6, %s14789_s27  ;;  %1773 = vrot.lane.b32.xlu1 %v1747_v42, %s14783_s1  ;;  %v1840_v6 = vmul.f32 %v9915_v0, %v9751_v50  ;;  %v1844_v42 = vmul.f32 %v9915_v0, %v9733_v45  ;;  %s14940_s1 = smov 15  }
 0x14d   :  { %v10153_v48 = vpop.permute.xlu0 %783  ;;  %v10155_v59 = vpop.permute.xlu1 %791 }
 0x14e   :  { %15085 = vst [vmem:[#allocation47_spill] sm:$0xff] %v10153_v48  ;;  %15086 = vst [vmem:[#allocation48_spill] sm:$0xff] %v10155_v59 }
 0x14f   :  { %1872 = vrot.lane.b32.xlu0 %v1843_v12, %s14789_s27  ;;  %1870 = vrot.lane.b32.xlu1 %v1842_v22, %s14789_s27  ;;  %v1935_v22 = vmul.f32 %v9943_v20, %v9714_v37  ;;  %v1934_v12 = vmul.f32 %v9943_v20, %v9719_v38 }
 0x151   :  { %v10163_v35 = vpop.permute.xlu0 %875  ;;  %v10165_v40 = vpop.permute.xlu1 %873 }
 0x152   :  { %15087 = vst [vmem:[#allocation49_spill] sm:$0xff] %v10163_v35  ;;  %15088 = vst [vmem:[#allocation50_spill] sm:$0xff] %v10165_v40 }
 0x153   :  { %1866 = vrot.lane.b32.xlu0 %v1840_v6, %s14789_s27  ;;  %1874 = vrot.lane.b32.xlu1 %v1844_v42, %s14789_s27  ;;  %v1937_v42 = vmul.f32 %v9943_v20, %v9733_v45  ;;  %s14938_s27 = smov 14  }
 0x155   :  { %v10173_v48 = vpop.permute.xlu0 %879  ;;  %v10175_v59 = vpop.permute.xlu1 %877 }
 0x156   :  { %15089 = vst [vmem:[#allocation51_spill] sm:$0xff] %v10173_v48  ;;  %15090 = vst [vmem:[#allocation52_spill] sm:$0xff] %v10175_v59  ;;  %v1936_v48 = vmul.f32 %v9943_v20, %v9738_v46 }
 0x157   :  { %1963 = vrot.lane.b32.xlu0 %v1935_v22, %s14940_s1  ;;  %1961 = vrot.lane.b32.xlu1 %v1934_v12, %s14940_s1  ;;  %v2027_v22 = vmul.f32 %v9927_v5, %v9719_v38  ;;  %v1933_v12 = vmul.f32 %v9943_v20, %v9751_v50 }
 0x159   :  { %v10183_v40 = vpop.permute.xlu0 %961  ;;  %v10185_v6 = vpop.permute.xlu1 %871 }
 0x15a   :  { %15091 = vst [vmem:[#allocation53_spill] sm:$0xff] %v10183_v40  ;;  %15092 = vst [vmem:[#allocation54_spill] sm:$0xff] %v10185_v6 }
 0x15b   :  { %1967 = vrot.lane.b32.xlu0 %v1937_v42, %s14940_s1  ;;  %1965 = vrot.lane.b32.xlu1 %v1936_v48, %s14940_s1  ;;  %v2029_v48 = vmul.f32 %v9927_v5, %v9738_v46 }
 0x15d   :  { %v10193_v59 = vpop.permute.xlu0 %965  ;;  %v10195_v35 = vpop.permute.xlu1 %963 }
 0x15e   :  { %15093 = vst [vmem:[#allocation55_spill] sm:$0xff] %v10193_v59  ;;  %15094 = vst [vmem:[#allocation56_spill] sm:$0xff] %v10195_v35  ;;  %v2028_v59 = vmul.f32 %v9927_v5, %v9714_v37 }
 0x15f   :  { %2054 = vrot.lane.b32.xlu0 %v2027_v22, %s14938_s27  ;;  %1959 = vrot.lane.b32.xlu1 %v1933_v12, %s14940_s1  ;;  %v2301_v22 = vld [vmem:[%s14747_s2] sm:$0x3f]  ;;  %s14894_s2 = smov 13  }
 0x161   :  { %v10203_v6 = vpop.permute.xlu0 %959  ;;  %v10205_v42 = vpop.permute.xlu1 %967 }
 0x162   :  { %15095 = vst [vmem:[#allocation57_spill] sm:$0xff] %v10203_v6  ;;  %15096 = vst [vmem:[#allocation58_spill] sm:$0xff] %v10205_v42  ;;  %v2030_v6 = vmul.f32 %v9927_v5, %v9733_v45 }
 0x163   :  { %2058 = vrot.lane.b32.xlu0 %v2029_v48, %s14938_s27  ;;  %2056 = vrot.lane.b32.xlu1 %v2028_v59, %s14938_s27  ;;  %v2121_v59 = vmul.f32 %v9941_v18, %v9714_v37  ;;  %v2026_v48 = vmul.f32 %v9927_v5, %v9751_v50 }
 0x165   :  { %v10216_v40 = vpop.permute.xlu0 %1051  ;;  %v10218_v12 = vpop.permute.xlu1 %1049 }
 0x166   :  { %15097 = vst [vmem:[#allocation59_spill] sm:$0xff] %v10216_v40  ;;  %15098 = vst [vmem:[#allocation60_spill] sm:$0xff] %v10218_v12 }
 0x167   :  { %2304 = vperm.xlu0 %9441, %v2301_v22   ;;  %2060 = vrot.lane.b32.xlu1 %v2030_v6, %s14938_s27  ;;  %v2123_v6 = vmul.f32 %v9941_v18, %v9733_v45 }
 0x169   :  { %v10223_v42 = vpop.permute.xlu0 %1055  ;;  %v10225_v35 = vpop.permute.xlu1 %1053 }
 0x16a   :  { %15099 = vst [vmem:[#allocation61_spill] sm:$0xff] %v10223_v42  ;;  %15100 = vst [vmem:[#allocation62_spill] sm:$0xff] %v10225_v35  ;;  %v2120_v42 = vmul.f32 %v9941_v18, %v9719_v38 }
 0x16b   :  { %2149 = vrot.lane.b32.xlu0 %v2121_v59, %s14894_s2  ;;  %2052 = vrot.lane.b32.xlu1 %v2026_v48, %s14938_s27  ;;  %v2213_v59 = vmul.f32 %v9955_v25, %v9719_v38  ;;  %v2122_v48 = vmul.f32 %v9941_v18, %v9738_v46 }
 0x16d   :  { %v10233_v12 = vpop.permute.xlu0 %1137  ;;  %v10235_v22 = vpop.permute.xlu1 %1047 }
 0x16e   :  { %15101 = vst [vmem:[#allocation63_spill] sm:$0xff] %v10233_v12  ;;  %15102 = vst [vmem:[#allocation64_spill] sm:$0xff] %v10235_v22 }
 0x16f   :  { %2153 = vrot.lane.b32.xlu0 %v2123_v6, %s14894_s2  ;;  %2147 = vrot.lane.b32.xlu1 %v2120_v42, %s14894_s2  ;;  %v2215_v42 = vmul.f32 %v9955_v25, %v9738_v46 }
 0x171   :  { %v10243_v35 = vpop.permute.xlu0 %1141  ;;  %v10245_v40 = vpop.permute.xlu1 %1139 }
 0x172   :  { %15103 = vst [vmem:[#allocation65_spill] sm:$0xff] %v10243_v35  ;;  %15104 = vst [vmem:[#allocation66_spill] sm:$0xff] %v10245_v40  ;;  %v2119_v35 = vmul.f32 %v9941_v18, %v9751_v50 }
 0x173   :  { %2240 = vrot.lane.b32.xlu0 %v2213_v59, %s14892_s25  ;;  %2151 = vrot.lane.b32.xlu1 %v2122_v48, %s14894_s2  ;;  %v2212_v59 = vmul.f32 %v9955_v25, %v9751_v50  ;;  %v2214_v48 = vmul.f32 %v9955_v25, %v9714_v37 }
 0x175   :  { %v10253_v22 = vpop.permute.xlu0 %1135  ;;  %v10255_v6 = vpop.permute.xlu1 %1143 }
 0x176   :  { %15105 = vst [vmem:[#allocation67_spill] sm:$0xff] %v10253_v22  ;;  %15106 = vst [vmem:[#allocation68_spill] sm:$0xff] %v10255_v6 }
 0x177   :  { %2244 = vrot.lane.b32.xlu0 %v2215_v42, %s14892_s25  ;;  %2145 = vrot.lane.b32.xlu1 %v2119_v35, %s14894_s2  ;;  %v149_v35 = vmul.f32 %v9723_v41, %v9682_v13  ;;  %v2216_v42 = vmul.f32 %v9955_v25, %v9733_v45 }
 0x179   :  { %v10263_v12 = vpop.permute.xlu0 %1227  ;;  %v10265_v40 = vpop.permute.xlu1 %1225 }
 0x17a   :  { %15107 = vst [vmem:[#allocation69_spill] sm:$0xff] %v10263_v12  ;;  %15108 = vst [vmem:[#allocation70_spill] sm:$0xff] %v10265_v40 }
 0x17b   :  { %2238 = vrot.lane.b32.xlu0 %v2212_v59, %s14892_s25  ;;  %2242 = vrot.lane.b32.xlu1 %v2214_v48, %s14892_s25  ;;  %v237_v59 = vmul.f32 %v9746_v49, %v9682_v13  ;;  %v148_v48 = vmul.f32 %v9723_v41, %v9685_v14 }
 0x17d   :  { %v10273_v22 = vpop.permute.xlu0 %1231  ;;  %v10275_v6 = vpop.permute.xlu1 %1229 }
 0x17e   :  { %15109 = vst [vmem:[#allocation71_spill] sm:$0xff] %v10273_v22 }
 0x17f   :  { %179 = vrot.lane.b32.xlu0 %v149_v35, %s14933_s28  ;;  %2246 = vrot.lane.b32.xlu1 %v2216_v42, %s14892_s25  ;;  %v325_v35 = vmul.f32 %v9767_v55, %v9682_v13  ;;  %v236_v42 = vmul.f32 %v9746_v49, %v9685_v14 }
 0x181   :  { %v10283_v40 = vpop.permute.xlu0 %1313  ;;  %v10285_v12 = vpop.permute.xlu1 %1223 }
 0x182   :  { %15110 = vst [vmem:[#allocation72_spill] sm:$0xff] %v10285_v12 }
 0x183   :  { %267 = vrot.lane.b32.xlu0 %v237_v59, %s14930_s29  ;;  %177 = vrot.lane.b32.xlu1 %v148_v48, %s14933_s28  ;;  %v413_v59 = vmul.f32 %v9781_v60, %v9682_v13  ;;  %v324_v48 = vmul.f32 %v9767_v55, %v9685_v14 }
 0x185   :  { %v10293_v22 = vpop.permute.xlu0 %1317  ;;  %v10295_v45 = vpop.permute.xlu1 %1315 }
 0x186   :  { %15111 = vst [vmem:[#allocation73_spill] sm:$0xff] %v10293_v22 }
 0x187   :  { %355 = vrot.lane.b32.xlu0 %v325_v35, %s14928_s30  ;;  %265 = vrot.lane.b32.xlu1 %v236_v42, %s14930_s29  ;;  %v501_v35 = vmul.f32 %v9801_v3, %v9682_v13  ;;  %v412_v42 = vmul.f32 %v9781_v60, %v9685_v14 }
 0x189   :  { %v10303_v12 = vpop.permute.xlu0 %1311  ;;  %v10305_v41 = vpop.permute.xlu1 %1319 }
 0x18a   :  { %15112 = vst [vmem:[#allocation74_spill] sm:$0xff] %v10303_v12  ;;  %15113 = vst [vmem:[#allocation75_spill] sm:$0xff] %v10305_v41 }
 0x18b   :  { %443 = vrot.lane.b32.xlu0 %v413_v59, %s14926_s14  ;;  %353 = vrot.lane.b32.xlu1 %v324_v48, %s14928_s30  ;;  %v589_v59 = vmul.f32 %v9817_v10, %v9682_v13  ;;  %v500_v48 = vmul.f32 %v9801_v3, %v9685_v14 }
 0x18d   :  { %v10313_v22 = vpop.permute.xlu0 %1403  ;;  %v10315_v49 = vpop.permute.xlu1 %1401 }
 0x18f   :  { %531 = vrot.lane.b32.xlu0 %v501_v35, %s14935_s15  ;;  %441 = vrot.lane.b32.xlu1 %v412_v42, %s14926_s14  ;;  %v677_v35 = vmul.f32 %v9813_v9, %v9682_v13  ;;  %v588_v42 = vmul.f32 %v9817_v10, %v9685_v14 }
 0x191   :  { %v10323_v12 = vpop.permute.xlu0 %1407  ;;  %v10325_v55 = vpop.permute.xlu1 %1405 }
 0x192   :  { %15114 = vst [vmem:[#allocation76_spill] sm:$0xff] %v10323_v12 }
 0x193   :  { %619 = vrot.lane.b32.xlu0 %v589_v59, %s14924_s16  ;;  %529 = vrot.lane.b32.xlu1 %v500_v48, %s14935_s15  ;;  %v765_v59 = vmul.f32 %v9823_v16, %v9682_v13  ;;  %v676_v48 = vmul.f32 %v9813_v9, %v9685_v14 }
 0x195   :  { %v10333_v41 = vpop.permute.xlu0 %1496  ;;  %v10335_v60 = vpop.permute.xlu1 %1399 }
 0x196   :  { %15115 = vst [vmem:[#allocation77_spill] sm:$0xff] %v10335_v60 }
 0x197   :  { %707 = vrot.lane.b32.xlu0 %v677_v35, %s14922_s17  ;;  %617 = vrot.lane.b32.xlu1 %v588_v42, %s14924_s16  ;;  %v853_v35 = vmul.f32 %v9879_v44, %v9682_v13  ;;  %v764_v42 = vmul.f32 %v9823_v16, %v9685_v14 }
 0x199   :  { %v10343_v12 = vpop.permute.xlu0 %1500  ;;  %v10345_v3 = vpop.permute.xlu1 %1498 }
 0x19a   :  { %15116 = vst [vmem:[#allocation78_spill] sm:$0xff] %v10343_v12 }
 0x19b   :  { %795 = vrot.lane.b32.xlu0 %v765_v59, %s14918_s18  ;;  %705 = vrot.lane.b32.xlu1 %v676_v48, %s14922_s17  ;;  %v941_v59 = vmul.f32 %v9833_v19, %v9682_v13  ;;  %v852_v48 = vmul.f32 %v9879_v44, %v9685_v14 }
 0x19d   :  { %v10353_v60 = vpop.permute.xlu0 %1494  ;;  %v10355_v10 = vpop.permute.xlu1 %1502 }
 0x19e   :  { %15117 = vst [vmem:[#allocation79_spill] sm:$0xff] %v10353_v60  ;;  %15118 = vst [vmem:[#allocation80_spill] sm:$0xff] %v10355_v10 }
 0x19f   :  { %883 = vrot.lane.b32.xlu0 %v853_v35, %s14912_s19  ;;  %793 = vrot.lane.b32.xlu1 %v764_v42, %s14918_s18  ;;  %v1029_v35 = vmul.f32 %v9845_v24, %v9682_v13  ;;  %v940_v42 = vmul.f32 %v9833_v19, %v9685_v14 }
 0x1a1   :  { %v10363_v12 = vpop.permute.xlu0 %1591  ;;  %v10365_v9 = vpop.permute.xlu1 %1589 }
 0x1a3   :  { %971 = vrot.lane.b32.xlu0 %v941_v59, %s14880_s20  ;;  %881 = vrot.lane.b32.xlu1 %v852_v48, %s14912_s19  ;;  %v1117_v59 = vmul.f32 %v9903_v58, %v9682_v13  ;;  %v1028_v48 = vmul.f32 %v9845_v24, %v9685_v14 }
 0x1a5   :  { %v10373_v60 = vpop.permute.xlu0 %1595  ;;  %v10375_v16 = vpop.permute.xlu1 %1593 }
 0x1a6   :  { %15119 = vst [vmem:[#allocation81_spill] sm:$0xff] %v10373_v60 }
 0x1a7   :  { %1059 = vrot.lane.b32.xlu0 %v1029_v35, %s14877_s21  ;;  %969 = vrot.lane.b32.xlu1 %v940_v42, %s14880_s20  ;;  %v1205_v35 = vmul.f32 %v9855_v27, %v9682_v13  ;;  %v1116_v42 = vmul.f32 %v9903_v58, %v9685_v14  ;;  %s15138_s20 = smov 16  }
 0x1a9   :  { %v10383_v10 = vpop.permute.xlu0 %1682  ;;  %v10385_v44 = vpop.permute.xlu1 %1587 }
 0x1aa   :  { %15120 = vst [vmem:[#allocation82_spill] sm:$0xff] %v10385_v44 }
 0x1ab   :  { %1147 = vrot.lane.b32.xlu0 %v1117_v59, %s14856_s22  ;;  %1057 = vrot.lane.b32.xlu1 %v1028_v48, %s14877_s21  ;;  %v1293_v59 = vmul.f32 %v9867_v32, %v9682_v13  ;;  %v1204_v48 = vmul.f32 %v9855_v27, %v9685_v14  ;;  %s15137_s21 = smov 40  }
 0x1ad   :  { %v10393_v60 = vpop.permute.xlu0 %1686  ;;  %v10395_v19 = vpop.permute.xlu1 %1684 }
 0x1ae   :  { %15121 = vst [vmem:[#allocation83_spill] sm:$0xff] %v10393_v60 }
 0x1af   :  { %1235 = vrot.lane.b32.xlu0 %v1205_v35, %s14844_s23  ;;  %1145 = vrot.lane.b32.xlu1 %v1116_v42, %s14856_s22  ;;  %v1381_v35 = vmul.f32 %v9917_v1, %v9682_v13  ;;  %v1292_v42 = vmul.f32 %v9867_v32, %v9685_v14  ;;  %s15134_s22 = smov 41  }
 0x1b1   :  { %v10403_v44 = vpop.permute.xlu0 %1680  ;;  %v10405_v24 = vpop.permute.xlu1 %1688 }
 0x1b2   :  { %15122 = vst [vmem:[#allocation84_spill] sm:$0xff] %v10403_v44  ;;  %15123 = vst [vmem:[#allocation85_spill] sm:$0xff] %v10405_v24 }
 0x1b3   :  { %1323 = vrot.lane.b32.xlu0 %v1293_v59, %s14849_s24  ;;  %1233 = vrot.lane.b32.xlu1 %v1204_v48, %s14844_s23  ;;  %v1474_v59 = vmul.f32 %v9877_v43, %v9682_v13  ;;  %v1380_v48 = vmul.f32 %v9917_v1, %v9685_v14  ;;  %s15129_s23 = smov 43   ;;  %v1566_v1 = vmul.f32 %v9891_v53, %v9685_v14 }
 0x1b5   :  { %v10413_v60 = vpop.permute.xlu0 %1777  ;;  %v10415_v58 = vpop.permute.xlu1 %1775 }
 0x1b6   :  { %15124 = vst [vmem:[#allocation86_spill] sm:$0xff] %v10413_v60  ;;  %15125 = vst [vmem:[#allocation87_spill] sm:$0xff] %v10415_v58  ;;  %v10506_v60 = vmul.f32 %v9927_v5, %v9685_v14 }
 0x1b7   :  { %1411 = vrot.lane.b32.xlu0 %v1381_v35, %s15126_s26  ;;  %1321 = vrot.lane.b32.xlu1 %v1292_v42, %s14849_s24  ;;  %v1567_v35 = vmul.f32 %v9891_v53, %v9682_v13  ;;  %v1473_v42 = vmul.f32 %v9877_v43, %v9685_v14  ;;  %s15132_s24 = smov 42   ;;  %v116_v43 = vmul.f32 %v9719_v38, %v9953_v23 }
 0x1b8   :  { %v10468_v38 = vmul.f32 %v9955_v25, %v9682_v13 }
 0x1b9   :  { %v10423_v44 = vpop.permute.xlu0 %1781  ;;  %v10425_v27 = vpop.permute.xlu1 %1779 }
 0x1ba   :  { %15127 = vst [vmem:[#allocation88_spill] sm:$0xff] %v10423_v44  ;;  %15128 = vst [vmem:[#allocation89_spill] sm:$0xff] %v10425_v27  ;;  %v193_v44 = vsel %vm15032_vm0, %v9965_v30, %v9963_v29  ;;  %v1753_v27 = vmul.f32 %v9901_v57, %v9682_v13 }
 0x1bb   :  { %1506 = vrot.lane.b32.xlu0 %v1474_v59, %s15129_s23  ;;  %1409 = vrot.lane.b32.xlu1 %v1380_v48, %s15126_s26  ;;  %v1660_v48 = vmul.f32 %v9929_v7, %v9682_v13  ;;  %v216_v58 = vadd.f32 %v193_v44, %v116_v43  ;;  %v115_v44 = vmul.f32 %v9751_v50, %v9953_v23 }
 0x1bc   :  { %v457_v50 = vsel %vm14958_vm3, %v10033_v51, %v10045_v11 }
 0x1bd   :  { %v10433_v24 = vpop.permute.xlu1 %1773  ;;  %v10439_v32 = vpop.permute.xlu0 %1868 }
 0x1be   :  { %15130 = vst [vmem:[#allocation90_spill] sm:$0xff] %v10433_v24  ;;  %15131 = vst [vmem:[#allocation91_spill] sm:$0xff] %v10439_v32  ;;  %v10459_v24 = vmul.f32 %v9943_v20, %v9685_v14 }
 0x1bf   :  { %1599 = vrot.lane.b32.xlu0 %v1567_v35, %s15132_s24  ;;  %1504 = vrot.lane.b32.xlu1 %v1473_v42, %s15129_s23  ;;  %v1659_v35 = vmul.f32 %v9929_v7, %v9685_v14  ;;  %v10455_v42 = vmul.f32 %v9943_v20, %v9682_v13  ;;  %v10472_v7 = vmul.f32 %v9955_v25, %v9685_v14 }
 0x1c0   :  { %v117_v20 = vmul.f32 %v9714_v37, %v9953_v23  ;;  %v194_v25 = vsel %vm15032_vm0, %v9963_v29, %v9975_v47  ;;  %v281_v37 = vsel %vm15006_vm1, %v9983_v52, %v9995_v62  ;;  %v10502_v29 = vmul.f32 %v9941_v18, %v9682_v13 }
 0x1c1   :  { %v10443_v59 = vpop.permute.xlu1 %1870  ;;  %v10476_v53 = vpop.permute.xlu0 %1872 }
 0x1c2   :  { %15133 = vst [vmem:[#allocation92_spill] sm:$0xff] %v10443_v59  ;;  %15135 = vst [vmem:[#allocation93_spill] sm:$0xff] %v10476_v53  ;;  %v1845_v53 = vmul.f32 %v9915_v0, %v9685_v14  ;;  %v10496_v59 = vmul.f32 %v9927_v5, %v9682_v13  ;;  %v217_v43 = vadd.f32 %v194_v25, %v117_v20 }
 0x1c3   :  { %1692 = vrot.lane.b32.xlu0 %v1660_v48, %s15134_s22  ;;  %1597 = vrot.lane.b32.xlu1 %v1566_v1, %s15132_s24  ;;  %v1846_v1 = vmul.f32 %v9915_v0, %v9682_v13  ;;  %v1752_v48 = vmul.f32 %v9901_v57, %v9685_v14  ;;  %v118_v57 = vmul.f32 %v9738_v46, %v9953_v23 }
 0x1c4   :  { %v195_v0 = vsel %vm15032_vm0, %v9975_v47, %v9973_v34  ;;  %v369_v46 = vsel %vm15007_vm2, %v10015_v21, %v10013_v17  ;;  %v304_v13 = vadd.f32 %v281_v37, %v216_v58  ;;  %v10523_v47 = vmul.f32 %v9941_v18, %v9685_v14 }
 0x1c5   :  { %v10490_v32 = vpop.permute.xlu1 %1874  ;;  %v283_v20 = vsel %vm15006_vm1, %v9993_v61, %v10005_v8  ;;  %v218_v25 = vadd.f32 %v195_v0, %v118_v57  ;;  %v10542_v37 = vpop.permute.xlu0 %1866  ;;  %v545_v57 = vsel %vm14957_vm4, %v10065_v39, %v10063_v63 }
 0x1c6   :  { %15136 = vst [vmem:[#allocation94_spill] sm:$0xff] %v10490_v32  ;;  %v192_v32 = vsel %vm15032_vm0, %v9985_v54, %v9965_v30  ;;  %v282_v30 = vsel %vm15006_vm1, %v9995_v62, %v9993_v61  ;;  %v370_v62 = vsel %vm15007_vm2, %v10013_v17, %v10025_v31  ;;  %v368_v61 = vsel %vm15007_vm2, %v10035_v56, %v10015_v21 }
 0x1c7   :  { %1785 = vrot.lane.b32.xlu0 %v1753_v27, %s15137_s21  ;;  %1690 = vrot.lane.b32.xlu1 %v1659_v35, %s15134_s22  ;;  %v280_v27 = vsel %vm15006_vm1, %v10003_v4, %v9983_v52  ;;  %v215_v54 = vadd.f32 %v192_v32, %v115_v44  ;;  %v392_v35 = vadd.f32 %v369_v46, %v304_v13 }
 0x1c8   :  { %v371_v52 = vsel %vm15007_vm2, %v10025_v31, %v10023_v28  ;;  %v305_v13 = vadd.f32 %v282_v30, %v217_v43  ;;  %v306_v0 = vadd.f32 %v283_v20, %v218_v25  ;;  %v458_v17 = vsel %vm14958_vm3, %v10045_v11, %v10043_v2  ;;  %v15139_v30 = vld [vmem:[#allocation34_spill] sm:$0xff] }
 0x1c9   :  { %v10537_v58 = vpop.permute.xlu1 %1961  ;;  %v303_v32 = vadd.f32 %v280_v27, %v215_v54  ;;  %v480_v4 = vadd.f32 %v457_v50, %v392_v35  ;;  %v456_v21 = vsel %vm14958_vm3, %v10053_v26, %v10033_v51  ;;  %v459_v31 = vsel %vm14958_vm3, %v10043_v2, %v10055_v33  ;;  %v15140_v27 = vld [vmem:[#allocation33_spill] sm:$0xff]  ;;  %v15141_v26 = vld [vmem:[#allocation39_spill] sm:$0xff]  ;;  %v15142_v2 = vld [vmem:[#allocation40_spill] sm:$0xff] }
 0x1ca   :  { %v633_v56 = vsel %vm14887_vm5, %v10083_v36, %v10095_v15  ;;  %v394_v46 = vadd.f32 %v371_v52, %v306_v0  ;;  %v546_v11 = vsel %vm14957_vm4, %v10063_v63, %v15139_v30  ;;  %v547_v51 = vsel %vm14957_vm4, %v15139_v30, %v15140_v27  ;;  %v10581_v63 = vpop.permute.xlu0 %1963  ;;  %v15152_v30 = vld [vmem:[#allocation50_spill] sm:$0xff] }
 0x1cb   :  { %1878 = vrot.lane.b32.xlu0 %v1846_v1, %s15138_s20  ;;  %1783 = vrot.lane.b32.xlu1 %v1752_v48, %s15137_s21  ;;  %v393_v48 = vadd.f32 %v370_v62, %v305_v13  ;;  %v391_v43 = vadd.f32 %v368_v61, %v303_v32  ;;  %v568_v44 = vadd.f32 %v545_v57, %v480_v4  ;;  %v15143_v62 = vld [vmem:[#allocation35_spill] sm:$0xff]  ;;  %v15144_v61 = vld [vmem:[#allocation36_spill] sm:$0xff]  ;;  %v15145_v13 = vld [vmem:[#allocation38_spill] sm:$0xff] }
 0x1cc   :  { %v721_v20 = vsel %vm14884_vm6, %v15142_v2, %v15141_v26  ;;  %v482_v54 = vadd.f32 %v459_v31, %v394_v46  ;;  %v544_v52 = vsel %vm14957_vm4, %v15143_v62, %v10065_v39  ;;  %v634_v57 = vsel %vm14887_vm5, %v10095_v15, %v15144_v61  ;;  %v15147_v32 = vld [vmem:[#allocation43_spill] sm:$0xff]  ;;  %v15148_v31 = vld [vmem:[#allocation37_spill] sm:$0xff] }
 0x1cd   :  { %v10567_v1 = vpop.permute.xlu1 %1965  ;;  %v481_v50 = vadd.f32 %v458_v17, %v393_v48  ;;  %v479_v25 = vadd.f32 %v456_v21, %v391_v43  ;;  %v656_v35 = vadd.f32 %v633_v56, %v568_v44  ;;  %v632_v39 = vsel %vm14887_vm5, %v15148_v31, %v10083_v36  ;;  %v15149_v48 = vld [vmem:[#allocation42_spill] sm:$0xff]  ;;  %v15150_v46 = vld [vmem:[#allocation41_spill] sm:$0xff]  ;;  %v15156_v31 = vld [vmem:[#allocation56_spill] sm:$0xff] }
 0x1ce   :  { %v570_v21 = vadd.f32 %v547_v51, %v482_v54  ;;  %v722_v15 = vsel %vm14884_vm6, %v15141_v26, %v15149_v48  ;;  %v723_v43 = vsel %vm14884_vm6, %v15149_v48, %v15150_v46  ;;  %v15151_v44 = vld [vmem:[#allocation49_spill] sm:$0xff]  ;;  %v15153_v26 = vld [vmem:[#allocation44_spill] sm:$0xff] }
 0x1cf   :  { %1971 = vrot.lane.b32.xlu0 %v10455_v42, %s14940_s1  ;;  %1876 = vrot.lane.b32.xlu1 %v1845_v53, %s15138_s20  ;;  %v635_v42 = vsel %vm14887_vm5, %v15144_v61, %v15145_v13  ;;  %v15146_v53 = vld [vmem:[#allocation46_spill] sm:$0xff]  ;;  %v569_v17 = vadd.f32 %v546_v11, %v481_v50  ;;  %v744_v56 = vadd.f32 %v721_v20, %v656_v35  ;;  %v15154_v54 = vld [vmem:[#allocation45_spill] sm:$0xff]  ;;  %v15155_v61 = vld [vmem:[#allocation48_spill] sm:$0xff]  ;;  %vm1892_vm5 = vcmask 130048  }
 0x1d0   :  { %v809_v0 = vsel %vm14885_vm7, %v15147_v32, %v15146_v53  ;;  %v897_v62 = vsel %vm14886_vm8, %v15152_v30, %v15151_v44  ;;  %v567_v36 = vadd.f32 %v544_v52, %v479_v25  ;;  %v658_v51 = vadd.f32 %v635_v42, %v570_v21  ;;  %v15157_v48 = vld [vmem:[#allocation53_spill] sm:$0xff]  ;;  %v15160_v21 = vld [vmem:[#allocation51_spill] sm:$0xff] }
 0x1d1   :  { %v10595_v4 = vpop.permute.xlu1 %1959  ;;  %v657_v11 = vadd.f32 %v634_v57, %v569_v17  ;;  %v832_v20 = vadd.f32 %v809_v0, %v744_v56  ;;  %v720_v50 = vsel %vm14884_vm6, %v15153_v26, %v15142_v2  ;;  %v810_v35 = vsel %vm14885_vm7, %v15146_v53, %v15154_v54  ;;  %v10627_v17 = vpop.permute.xlu0 %1967  ;;  %v15159_v2 = vld [vmem:[#allocation52_spill] sm:$0xff]  ;;  %v15161_v26 = vld [vmem:[#allocation59_spill] sm:$0xff] }
 0x1d2   :  { %v655_v52 = vadd.f32 %v632_v39, %v567_v36  ;;  %v746_v42 = vadd.f32 %v723_v43, %v658_v51  ;;  %15158 = vst [vmem:[#allocation34_spill] sm:$0xff] %v10627_v17  ;;  %v898_v53 = vsel %vm14886_vm8, %v15151_v44, %v15159_v2  ;;  %v899_v56 = vsel %vm14886_vm8, %v15159_v2, %v15160_v21  ;;  %v15163_v44 = vld [vmem:[#allocation47_spill] sm:$0xff]  ;;  %v15166_v2 = vld [vmem:[#allocation66_spill] sm:$0xff] }
 0x1d3   :  { %2064 = vrot.lane.b32.xlu0 %v10496_v59, %s14938_s27  ;;  %1969 = vrot.lane.b32.xlu1 %v10459_v24, %s14940_s1  ;;  %v811_v59 = vsel %vm14885_vm7, %v15154_v54, %v15155_v61  ;;  %v985_v24 = vsel %vm14890_vm9, %v15157_v48, %v15156_v31  ;;  %v745_v57 = vadd.f32 %v722_v15, %v657_v11  ;;  %v15162_v54 = vld [vmem:[#allocation60_spill] sm:$0xff]  ;;  %vm1613_vm6 = vcmask 343040   ;;  %v15164_v11 = vld [vmem:[#allocation55_spill] sm:$0xff]  ;;  %s15311_s1 = smov 126  }
 0x1d4   :  { %v920_v0 = vadd.f32 %v897_v62, %v832_v20  ;;  %v1073_v18 = vsel %vm14888_vm10, %v15162_v54, %v15161_v26  ;;  %v743_v39 = vadd.f32 %v720_v50, %v655_v52  ;;  %v834_v43 = vadd.f32 %v811_v59, %v746_v42  ;;  %v15165_v20 = vld [vmem:[#allocation58_spill] sm:$0xff]  ;;  %v15167_v21 = vld [vmem:[#allocation63_spill] sm:$0xff]  ;;  %v15171_v42 = vld [vmem:[#allocation61_spill] sm:$0xff] }
 0x1d5   :  { %v10625_v25 = vpop.permute.xlu1 %2056  ;;  %v833_v15 = vadd.f32 %v810_v35, %v745_v57  ;;  %v808_v36 = vsel %vm14885_vm7, %v15163_v44, %v15147_v32  ;;  %v986_v51 = vsel %vm14890_vm9, %v15156_v31, %v15164_v11  ;;  %v15170_v57 = vld [vmem:[#allocation62_spill] sm:$0xff]  ;;  %v15172_v44 = vld [vmem:[#allocation69_spill] sm:$0xff]  ;;  %vm1706_vm7 = vcmask 334848  }
 0x1d6   :  { %v1008_v62 = vadd.f32 %v985_v24, %v920_v0  ;;  %v922_v59 = vadd.f32 %v899_v56, %v834_v43  ;;  %v15169_v24 = vld [vmem:[#allocation54_spill] sm:$0xff]  ;;  %v1074_v31 = vsel %vm14888_vm10, %v15161_v26, %v15170_v57  ;;  %v1075_v0 = vsel %vm14888_vm10, %v15170_v57, %v15171_v42  ;;  %v10672_v26 = vpop.permute.xlu0 %2054  ;;  %v15176_v57 = vld [vmem:[#allocation68_spill] sm:$0xff] }
 0x1d7   :  { %2157 = vrot.lane.b32.xlu0 %v10502_v29, %s14894_s2  ;;  %2062 = vrot.lane.b32.xlu1 %v10506_v60, %s14938_s27  ;;  %v987_v29 = vsel %vm14890_vm9, %v15164_v11, %v15165_v20  ;;  %v1161_v60 = vsel %vm14889_vm11, %v15167_v21, %v15166_v2  ;;  %v921_v35 = vadd.f32 %v898_v53, %v833_v15  ;;  %v15173_v11 = vld [vmem:[#allocation70_spill] sm:$0xff]  ;;  %v15174_v15 = vld [vmem:[#allocation57_spill] sm:$0xff]  ;;  %s15313_s27 = smov 125  }
 0x1d8   :  { %v896_v32 = vsel %vm14886_vm8, %v15169_v24, %v15152_v30  ;;  %v1096_v52 = vadd.f32 %v1073_v18, %v1008_v62  ;;  %v1249_v20 = vsel %vm1247_vm12, %v15173_v11, %v15172_v44  ;;  %v831_v18 = vadd.f32 %v808_v36, %v743_v39  ;;  %v15175_v62 = vld [vmem:[#allocation65_spill] sm:$0xff] }
 0x1d9   :  { %v10654_v50 = vpop.permute.xlu1 %2060  ;;  %v1009_v30 = vadd.f32 %v986_v51, %v921_v35  ;;  %v1010_v53 = vadd.f32 %v987_v29, %v922_v59  ;;  %vm1799_vm8 = vcmask 326656   ;;  %v984_v43 = vsel %vm14890_vm9, %v15174_v15, %v15157_v48  ;;  %v15177_v48 = vld [vmem:[#allocation64_spill] sm:$0xff]  ;;  %v15178_v59 = vld [vmem:[#allocation71_spill] sm:$0xff] }
 0x1da   :  { %15168 = vst [vmem:[#allocation33_spill] sm:$0xff] %v10654_v50  ;;  %v1184_v56 = vadd.f32 %v1161_v60, %v1096_v52  ;;  %v1162_v24 = vsel %vm14889_vm11, %v15166_v2, %v15175_v62  ;;  %v919_v36 = vadd.f32 %v896_v32, %v831_v18  ;;  %v1072_v35 = vsel %vm14888_vm10, %v15177_v48, %v15162_v54  ;;  %v15179_v54 = vld [vmem:[#allocation67_spill] sm:$0xff] }
 0x1db   :  { %2250 = vrot.lane.b32.xlu0 %v10468_v38, %s14892_s25  ;;  %2155 = vrot.lane.b32.xlu1 %v10523_v47, %s14894_s2  ;;  %v1163_v38 = vsel %vm14889_vm11, %v15175_v62, %v15176_v57  ;;  %v1337_v47 = vsel %vm14891_vm13, %v10283_v40, %v10295_v45  ;;  %v1097_v51 = vadd.f32 %v1074_v31, %v1009_v30  ;;  %vm1985_vm10 = vcmask 121856   ;;  %v15180_v30 = vld [vmem:[#allocation73_spill] sm:$0xff]  ;;  %s15227_s2 = smov 72  }
 0x1dc   :  { %v1098_v29 = vadd.f32 %v1075_v0, %v1010_v53  ;;  %v1272_v60 = vadd.f32 %v1249_v20, %v1184_v56  ;;  %v1250_v2 = vsel %vm1247_vm12, %v15172_v44, %v10275_v6  ;;  %v1251_v52 = vsel %vm1247_vm12, %v10275_v6, %v15178_v59  ;;  %v15181_v53 = vld [vmem:[#allocation75_spill] sm:$0xff] }
 0x1dd   :  { %v10686_v39 = vpop.permute.xlu1 %2052  ;;  %v1425_v32 = vsel %vm1423_vm14, %v10315_v49, %v10313_v22  ;;  %v1007_v20 = vadd.f32 %v984_v43, %v919_v36  ;;  %v1185_v31 = vadd.f32 %v1162_v24, %v1097_v51  ;;  %v1160_v44 = vsel %vm14889_vm11, %v15179_v54, %v15167_v21  ;;  %v15182_v21 = vld [vmem:[#allocation72_spill] sm:$0xff] }
 0x1de   :  { %v1186_v0 = vadd.f32 %v1163_v38, %v1098_v29  ;;  %v1360_v18 = vadd.f32 %v1337_v47, %v1272_v60  ;;  %v1338_v6 = vsel %vm14891_vm13, %v10295_v45, %v15180_v30  ;;  %v1339_v56 = vsel %vm14891_vm13, %v15180_v30, %v15181_v53  ;;  %v10716_v47 = vpop.permute.xlu0 %2058  ;;  %v15183_v51 = vld [vmem:[#allocation76_spill] sm:$0xff] }
 0x1df   :  { %2248 = vrot.lane.b32.xlu1 %v10472_v7, %s14892_s25  ;;  %v1522_v7 = vsel %vm1520_vm15, %v10333_v41, %v10345_v3  ;;  %v1095_v43 = vadd.f32 %v1072_v35, %v1007_v20  ;;  %v1273_v62 = vadd.f32 %v1250_v2, %v1185_v31  ;;  %vm2078_vm11 = vcmask 113664   ;;  %v15185_v20 = vld [vmem:[#allocation78_spill] sm:$0xff]  ;;  %v15186_v31 = vld [vmem:[#allocation80_spill] sm:$0xff]  ;;  %s15229_s25 = smov 71  }
 0x1e0   :  { %v1274_v24 = vadd.f32 %v1251_v52, %v1186_v0  ;;  %v1448_v38 = vadd.f32 %v1425_v32, %v1360_v18  ;;  %v1248_v45 = vsel %vm1247_vm12, %v15182_v21, %v15173_v11  ;;  %v1426_v36 = vsel %vm1423_vm14, %v10313_v22, %v10325_v55  ;;  %v15184_v32 = vld [vmem:[#allocation74_spill] sm:$0xff] }
 0x1e1   :  { %v10714_v15 = vpop.permute.xlu1 %2147  ;;  %v1427_v29 = vsel %vm1423_vm14, %v10325_v55, %v15183_v51  ;;  %v1615_v60 = vsel %vm1613_vm6, %v10365_v9, %v10363_v12  ;;  %v1183_v48 = vadd.f32 %v1160_v44, %v1095_v43  ;;  %v1361_v35 = vadd.f32 %v1338_v6, %v1273_v62  ;;  %v15189_v43 = vld [vmem:[#allocation81_spill] sm:$0xff] }
 0x1e2   :  { %v1362_v2 = vadd.f32 %v1339_v56, %v1274_v24  ;;  %v1546_v52 = vadd.f32 %v1522_v7, %v1448_v38  ;;  %vm2171_vm9 = vcmask 105472   ;;  %v1336_v11 = vsel %vm14891_vm13, %v15184_v32, %v10283_v40  ;;  %v15188_v40 = vld [vmem:[#allocation77_spill] sm:$0xff]  ;;  %v15190_v24 = vld [vmem:[#allocation86_spill] sm:$0xff]  ;;  %v15191_v38 = vld [vmem:[#allocation87_spill] sm:$0xff] }
 0x1e3   :  { %v1523_v22 = vsel %vm1520_vm15, %v10345_v3, %v15185_v20  ;;  %v1524_v55 = vsel %vm1520_vm15, %v15185_v20, %v15186_v31  ;;  %v1708_v0 = vsel %vm1706_vm7, %v10383_v10, %v10395_v19  ;;  %v1271_v54 = vadd.f32 %v1248_v45, %v1183_v48  ;;  %v15192_v48 = vld [vmem:[#allocation79_spill] sm:$0xff] }
 0x1e4   :  { %v1449_v44 = vadd.f32 %v1426_v36, %v1361_v35  ;;  %v1450_v30 = vadd.f32 %v1427_v29, %v1362_v2  ;;  %v1639_v6 = vadd.f32 %v1615_v60, %v1546_v52  ;;  %v1424_v3 = vsel %vm1423_vm14, %v15188_v40, %v10315_v49  ;;  %v15193_v35 = vld [vmem:[#allocation83_spill] sm:$0xff]  ;;  %v15194_v2 = vld [vmem:[#allocation85_spill] sm:$0xff]  ;;  %v15195_v52 = vld [vmem:[#allocation92_spill] sm:$0xff] }
 0x1e5   :  { %v10742_v18 = vpop.permute.xlu1 %2151  ;;  %v1616_v7 = vsel %vm1613_vm6, %v10363_v12, %v10375_v16  ;;  %v1617_v62 = vsel %vm1613_vm6, %v10375_v16, %v15189_v43  ;;  %v1801_v21 = vsel %vm1799_vm8, %v15191_v38, %v15190_v24  ;;  %v1359_v45 = vadd.f32 %v1336_v11, %v1271_v54  ;;  %v15196_v32 = vld [vmem:[#allocation91_spill] sm:$0xff]  ;;  %v15199_v40 = vld [vmem:[#allocation88_spill] sm:$0xff] }
 0x1e6   :  { %v10744_v56 = vpop.permute.xlu0 %2304  ;;  %v1547_v36 = vadd.f32 %v1523_v22, %v1449_v44  ;;  %v1548_v29 = vadd.f32 %v1524_v55, %v1450_v30  ;;  %v1732_v60 = vadd.f32 %v1708_v0, %v1639_v6  ;;  %vm2264_vm13 = vcmask 97280   ;;  %v15198_v6 = vld [vmem:[#allocation89_spill] sm:$0xff] }
 0x1e7   :  { %15187 = vst [vmem:[#allocation39_spill] sm:$0xff] %v10744_v56  ;;  %v1521_v49 = vsel %vm1520_vm15, %v15192_v48, %v10333_v41  ;;  %v1709_v12 = vsel %vm1706_vm7, %v10395_v19, %v15193_v35  ;;  %v1710_v16 = vsel %vm1706_vm7, %v15193_v35, %v15194_v2  ;;  %v1894_v11 = vsel %vm1892_vm5, %v15196_v32, %v15195_v52  ;;  %v15197_v41 = vld [vmem:[#allocation82_spill] sm:$0xff] }
 0x1e8   :  { %v1447_v22 = vadd.f32 %v1424_v3, %v1359_v45  ;;  %v1640_v55 = vadd.f32 %v1616_v7, %v1547_v36  ;;  %v1641_v0 = vadd.f32 %v1617_v62, %v1548_v29  ;;  %v1825_v54 = vadd.f32 %v1801_v21, %v1732_v60  ;;  %v15200_v36 = vld [vmem:[#allocation84_spill] sm:$0xff]  ;;  %v15201_v29 = vld [vmem:[#allocation93_spill] sm:$0xff]  ;;  %v15202_v60 = vld [vmem:[#allocation94_spill] sm:$0xff] }
 0x1e9   :  { %v2146_v20 = vpop.permute.xlu1 %2145  ;;  %v1614_v30 = vsel %vm1613_vm6, %v15197_v41, %v10365_v9  ;;  %v1802_v19 = vsel %vm1799_vm8, %v15190_v24, %v15198_v6  ;;  %v1803_v48 = vsel %vm1799_vm8, %v15198_v6, %v15199_v40  ;;  %v1987_v3 = vsel %vm1985_vm10, %v10537_v58, %v10581_v63 }
 0x1ea   :  { %v2150_v44 = vpop.permute.xlu0 %2149  ;;  %v1545_v7 = vadd.f32 %v1521_v49, %v1447_v22  ;;  %v1733_v62 = vadd.f32 %v1709_v12, %v1640_v55  ;;  %v1734_v21 = vadd.f32 %v1710_v16, %v1641_v0  ;;  %v1918_v45 = vadd.f32 %v1894_v11, %v1825_v54 }
 0x1eb   :  { %v1707_v9 = vsel %vm1706_vm7, %v15200_v36, %v10383_v10  ;;  %v1895_v24 = vsel %vm1892_vm5, %v15195_v52, %v15201_v29  ;;  %v1896_v35 = vsel %vm1892_vm5, %v15201_v29, %v15202_v60  ;;  %v2080_v41 = vsel %vm2078_vm11, %v10672_v26, %v10625_v25  ;;  %v15204_v10 = vld [vmem:[#allocation90_spill] sm:$0xff] }
 0x1ec   :  { %v1638_v12 = vadd.f32 %v1614_v30, %v1545_v7  ;;  %v1826_v16 = vadd.f32 %v1802_v19, %v1733_v62  ;;  %v1827_v11 = vadd.f32 %v1803_v48, %v1734_v21  ;;  %v2011_v22 = vadd.f32 %v1987_v3, %v1918_v45 }
 0x1ed   :  { %v2243_v49 = vpop.permute.xlu1 %2242  ;;  %v1800_v0 = vsel %vm1799_vm8, %v15204_v10, %v15191_v38  ;;  %v1988_v52 = vsel %vm1985_vm10, %v10581_v63, %v10567_v1  ;;  %v1989_v54 = vsel %vm1985_vm10, %v10567_v1, %v10627_v17  ;;  %v2173_v30 = vsel %vm2171_vm9, %v10714_v15, %v2150_v44 }
 0x1ee   :  { %v10794_v55 = vpop.permute.xlu0 %2153  ;;  %v1731_v6 = vadd.f32 %v1707_v9, %v1638_v12  ;;  %v1919_v19 = vadd.f32 %v1895_v24, %v1826_v16  ;;  %v1920_v48 = vadd.f32 %v1896_v35, %v1827_v11  ;;  %v2104_v3 = vadd.f32 %v2080_v41, %v2011_v22 }
 0x1ef   :  { %15203 = vst [vmem:[#allocation40_spill] sm:$0xff] %v10794_v55  ;;  %v1893_v7 = vsel %vm1892_vm5, %v10542_v37, %v15196_v32  ;;  %v2081_v38 = vsel %vm2078_vm11, %v10625_v25, %v10716_v47  ;;  %v2082_v63 = vsel %vm2078_vm11, %v10716_v47, %v10654_v50  ;;  %v1986_v29 = vsel %vm1985_vm10, %v10595_v4, %v10537_v58 }
 0x1f0   :  { %v1824_v62 = vadd.f32 %v1800_v0, %v1731_v6  ;;  %v2012_v21 = vadd.f32 %v1988_v52, %v1919_v19  ;;  %v2013_v45 = vadd.f32 %v1989_v54, %v1920_v48  ;;  %v2197_v36 = vadd.f32 %v2173_v30, %v2104_v3 }
 0x1f1   :  { %v10816_v1 = vpop.permute.xlu1 %2246  ;;  %v2174_v37 = vsel %vm2171_vm9, %v2150_v44, %v10742_v18  ;;  %v2175_v25 = vsel %vm2171_vm9, %v10742_v18, %v10794_v55  ;;  %v2079_v12 = vsel %vm2078_vm11, %v10686_v39, %v10672_v26  ;;  %v2172_v22 = vsel %vm2171_vm9, %v2146_v20, %v10714_v15 }
 0x1f2   :  { %15205 = vst [vmem:[#allocation35_spill] sm:$0xff] %v10816_v1  ;;  %v2241_v9 = vpop.permute.xlu0 %2240  ;;  %v1917_v32 = vadd.f32 %v1893_v7, %v1824_v62  ;;  %v2105_v24 = vadd.f32 %v2081_v38, %v2012_v21  ;;  %v2106_v35 = vadd.f32 %v2082_v63, %v2013_v45  ;;  %v10865_v21 = vld [vmem:[%s14745_s0 + $0x8] sm:$0x1f] }
 0x1f3   :  { %v2266_v47 = vsel %vm2264_vm13, %v2241_v9, %v2243_v49  ;;  %15211 = vst [vmem:[#allocation42_spill] sm:$0xff] %v10865_v21 }
 0x1f4   :  { %v2290_v41 = vadd.f32 %v2266_v47, %v2197_v36  ;;  %v2010_v58 = vadd.f32 %v1986_v29, %v1917_v32  ;;  %v2198_v4 = vadd.f32 %v2174_v37, %v2105_v24  ;;  %v2199_v11 = vadd.f32 %v2175_v25, %v2106_v35  ;;  %v15213_v25 = vld [vmem:[#allocation7_spill] sm:$0xff]  ;;  %v15214_v47 = vld [vmem:[#allocation8_spill] sm:$0xff]  ;;  %v15215_v24 = vld [vmem:[#allocation5_spill] sm:$0xff] }
 0x1f5   :  { %v10830_v16 = vpop.permute.xlu1 %177  ;;  %v150_v32 = vmul.f32 %v15214_v47, %v15213_v25  ;;  %v15216_v35 = vsub.s32 0, %v15215_v24 }
 0x1f6   :  { %v2245_v44 = vpop.permute.xlu0 %2244  ;;  %v2103_v0 = vadd.f32 %v2079_v12, %v2010_v58  ;;  %v10838_v52 = vadd.f32 %v10744_v56, %v2290_v41 }
 0x1f7   :  { %v2267_v18 = vsel %vm2264_vm13, %v2243_v49, %v2245_v44  ;;  %v2268_v10 = vsel %vm2264_vm13, %v2245_v44, %v10816_v1  ;;  %v10883_v41 = vrot.slane %v10865_v21, %v15216_v35 }
 0x1f8   :  { %15206 = vst [vmem:[#allocation36_spill] sm:$0xff] %v10838_v52  ;;  %v2291_v54 = vadd.f32 %v2267_v18, %v2198_v4  ;;  %v2292_v26 = vadd.f32 %v2268_v10, %v2199_v11  ;;  %v2196_v30 = vadd.f32 %v2172_v22, %v2103_v0  ;;  %v14899_v20 = vmax.f32 %v10838_v52, 0.0  ;;  %v15218_v4 = vld [vmem:[#allocation10_spill] sm:$0xff]  ;;  %v15219_v10 = vld [vmem:[#allocation11_spill] sm:$0xff] }
 0x1f9   :  { %v10840_v39 = vpop.permute.xlu1 %265  ;;  %15217 = vst [vmem:[#allocation49_spill] sm:$0xff] %v10883_v41  ;;  %v238_v11 = vmul.f32 %v15218_v4, %v15213_v25  ;;  %v151_v44 = vmul.f32 %v15214_v47, %v10883_v41  ;;  %v326_v0 = vmul.f32 %v15219_v10, %v15213_v25  ;;  %v2473_v52 = vld [vmem:[%s14750_s5] sm:$0xff] }
 0x1fa   :  { %v10843_v6 = vadd.f32 %v10744_v56, %v2291_v54  ;;  %v2239_v19 = vpop.permute.xlu0 %2238  ;;  %v10848_v49 = vadd.f32 %v10744_v56, %v2292_v26  ;;  %v239_v54 = vmul.f32 %v15218_v4, %v10883_v41 }
 0x1fb   :  { %v2265_v15 = vsel %vm2264_vm13, %v2239_v19, %v2241_v9  ;;  %v15220_v19 = vld [vmem:[#allocation12_spill] sm:$0xff] }
 0x1fc   :  { %15207 = vst [vmem:[#allocation38_spill] sm:$0xff] %v10843_v6  ;;  %15208 = vst [vmem:[#allocation46_spill] sm:$0xff] %v10848_v49  ;;  %v14898_v48 = vmax.f32 %v10843_v6, 0.0  ;;  %v2289_v3 = vadd.f32 %v2265_v15, %v2196_v30  ;;  %v14896_v45 = vmax.f32 %v10848_v49, 0.0  ;;  %v414_v15 = vmul.f32 %v15220_v19, %v15213_v25 }
 0x1fd   :  { %v10851_v7 = vpop.permute.xlu1 %353 }
 0x1fe   :  { %v10854_v38 = vadd.f32 %v10744_v56, %v2289_v3  ;;  %v10856_v63 = vpop.permute.xlu0 %179  ;;  %v9442_v62 = vpack.i.bf16 %v14898_v48, %v14899_v20  ;;  %v327_v3 = vmul.f32 %v15219_v10, %v10883_v41 }
 0x1ff   :  { %15210 = vst [vmem:[#allocation37_spill] sm:$0xff] %v10856_v63 }
 0x200   :  { %15209 = vst [vmem:[#allocation43_spill] sm:$0xff] %v10854_v38  ;;  %v14897_v36 = vmax.f32 %v10854_v38, 0.0  ;;  %9443 = vrot.lane.b32.xlu1 %v9442_v62, %s14933_s28 }
 0x201   :  { %v10870_v9 = vpop.permute.xlu1 %441 }
 0x202   :  { %v9447_v29 = vpack.i.bf16 %v14897_v36, %v14896_v45  ;;  %v10876_v37 = vpop.permute.xlu0 %267 }
 0x203   :  { %15212 = vst [vmem:[#allocation41_spill] sm:$0xff] %v10876_v37 }
 0x204   :  { %181 = vrot.lane.b32.xlu1 %v150_v32, %s14933_s28  ;;  %9448 = vrot.lane.b32.xlu0 %v9447_v29, %s14933_s28  ;;  %v15221_v32 = vld [vmem:[#allocation13_spill] sm:$0xff] }
 0x205   :  { %v10887_v12 = vpop.permute.xlu1 %529  ;;  %v502_v35 = vmul.f32 %v15221_v32, %v15213_v25 }
 0x206   :  { %v10889_v58 = vpop.permute.xlu0 %355 }
 0x208   :  { %269 = vrot.lane.b32.xlu1 %v238_v11, %s14930_s29  ;;  %183 = vrot.lane.b32.xlu0 %v151_v44, %s14933_s28  ;;  %v415_v11 = vmul.f32 %v15220_v19, %v10883_v41  ;;  %s15253_s28 = smov 15  }
 0x209   :  { %v10897_v22 = vpop.permute.xlu1 %617 }
 0x20a   :  { %v10899_v18 = vpop.permute.xlu0 %443 }
 0x20c   :  { %357 = vrot.lane.b32.xlu1 %v326_v0, %s14928_s30  ;;  %271 = vrot.lane.b32.xlu0 %v239_v54, %s14930_s29  ;;  %v15222_v54 = vld [vmem:[#allocation15_spill] sm:$0xff]  ;;  %s15324_s29 = smov 96  }
 0x20d   :  { %v10907_v26 = vpop.permute.xlu1 %705  ;;  %v591_v48 = vmul.f32 %v15222_v54, %v10883_v41 }
 0x20e   :  { %v10909_v30 = vpop.permute.xlu0 %531 }
 0x210   :  { %445 = vrot.lane.b32.xlu1 %v414_v15, %s14926_s14  ;;  %359 = vrot.lane.b32.xlu0 %v327_v3, %s14928_s30  ;;  %v590_v15 = vmul.f32 %v15222_v54, %v15213_v25  ;;  %v503_v3 = vmul.f32 %v15221_v32, %v10883_v41  ;;  %s15305_s30 = smov 12  }
 0x211   :  { %v10917_v62 = vpop.permute.xlu1 %793 }
 0x212   :  { %v10919_v29 = vpop.permute.xlu0 %619 }
 0x214   :  { %533 = vrot.lane.b32.xlu1 %v502_v35, %s14935_s15  ;;  %447 = vrot.lane.b32.xlu0 %v415_v11, %s14926_s14  ;;  %v15223_v35 = vld [vmem:[#allocation14_spill] sm:$0xff]  ;;  %s15307_s14 = smov 127  }
 0x215   :  { %v10927_v44 = vpop.permute.xlu1 %881  ;;  %v678_v11 = vmul.f32 %v15223_v35, %v15213_v25 }
 0x216   :  { %v10929_v0 = vpop.permute.xlu0 %707 }
 0x218   :  { %621 = vrot.lane.b32.xlu1 %v590_v15, %s14924_s16  ;;  %535 = vrot.lane.b32.xlu0 %v503_v3, %s14935_s15  ;;  %v15224_v15 = vld [vmem:[#allocation16_spill] sm:$0xff]  ;;  %v679_v3 = vmul.f32 %v15223_v35, %v10883_v41  ;;  %s15267_s15 = smov 13  }
 0x219   :  { %v10937_v45 = vpop.permute.xlu1 %969  ;;  %v766_v49 = vmul.f32 %v15224_v15, %v15213_v25 }
 0x21a   :  { %v10939_v36 = vpop.permute.xlu0 %795 }
 0x21c   :  { %709 = vrot.lane.b32.xlu1 %v678_v11, %s14922_s17  ;;  %623 = vrot.lane.b32.xlu0 %v591_v48, %s14924_s16  ;;  %v15225_v11 = vld [vmem:[#allocation22_spill] sm:$0xff]  ;;  %v767_v48 = vmul.f32 %v15224_v15, %v10883_v41  ;;  %s15259_s16 = smov 14  }
 0x21d   :  { %v10953_v32 = vpop.permute.xlu1 %1057  ;;  %v854_v54 = vmul.f32 %v15225_v11, %v15213_v25 }
 0x21e   :  { %v10947_v20 = vpop.permute.xlu0 %883 }
 0x220   :  { %797 = vrot.lane.b32.xlu1 %v766_v49, %s14918_s18  ;;  %711 = vrot.lane.b32.xlu0 %v679_v3, %s14922_s17  ;;  %v15226_v49 = vld [vmem:[#allocation17_spill] sm:$0xff]  ;;  %v855_v3 = vmul.f32 %v15225_v11, %v10883_v41  ;;  %s15235_s17 = smov 68  }
 0x221   :  { %v10965_v10 = vpop.permute.xlu1 %1145  ;;  %v942_v4 = vmul.f32 %v15226_v49, %v15213_v25  ;;  %v15230_v11 = vld [vmem:[#allocation25_spill] sm:$0xff] }
 0x222   :  { %v10957_v19 = vpop.permute.xlu0 %971  ;;  %v1118_v24 = vmul.f32 %v15230_v11, %v15213_v25 }
 0x224   :  { %885 = vrot.lane.b32.xlu1 %v854_v54, %s14912_s19  ;;  %799 = vrot.lane.b32.xlu0 %v767_v48, %s14918_s18  ;;  %v15228_v54 = vld [vmem:[#allocation18_spill] sm:$0xff]  ;;  %v943_v48 = vmul.f32 %v15226_v49, %v10883_v41  ;;  %v15232_v49 = vld [vmem:[#allocation19_spill] sm:$0xff]  ;;  %s15233_s18 = smov 69  }
 0x225   :  { %v1030_v15 = vmul.f32 %v15228_v54, %v15213_v25  ;;  %v10981_v21 = vpop.permute.xlu1 %1233  ;;  %v1206_v38 = vmul.f32 %v15232_v49, %v15213_v25 }
 0x226   :  { %v10967_v35 = vpop.permute.xlu0 %1059 }
 0x228   :  { %973 = vrot.lane.b32.xlu1 %v942_v4, %s15227_s2  ;;  %887 = vrot.lane.b32.xlu0 %v855_v3, %s14912_s19  ;;  %v1031_v4 = vmul.f32 %v15228_v54, %v10883_v41  ;;  %s15231_s19 = smov 70   ;;  %v15234_v54 = vld [vmem:[#allocation20_spill] sm:$0xff] }
 0x229   :  { %v10993_v56 = vpop.permute.xlu1 %1321  ;;  %v1294_v6 = vmul.f32 %v15234_v54, %v15213_v25  ;;  %v1295_v1 = vmul.f32 %v15234_v54, %v10883_v41 }
 0x22a   :  { %v10975_v47 = vpop.permute.xlu0 %1147 }
 0x22c   :  { %1061 = vrot.lane.b32.xlu1 %v1030_v15, %s15229_s25  ;;  %975 = vrot.lane.b32.xlu0 %v943_v48, %s15227_s2  ;;  %v1119_v15 = vmul.f32 %v15230_v11, %v10883_v41 }
 0x22e   :  { %v10989_v3 = vpop.permute.xlu0 %1235 }
 0x230   :  { %1149 = vrot.lane.b32.xlu1 %v1118_v24, %s15231_s19  ;;  %1063 = vrot.lane.b32.xlu0 %v1031_v4, %s15229_s25  ;;  %v1207_v24 = vmul.f32 %v15232_v49, %v10883_v41  ;;  %v11007_v4 = vpop.permute.xlu1 %1409  ;;  %v2476_v49 = vld [vmem:[%s14750_s5 + $0x18] sm:$0xff] }
 0x231   :  { %v8566_v55 = vpack.c.bf16 %v2476_v49, %v2473_v52  ;;  %v2479_v52 = vld [vmem:[%s14750_s5 + $0x30] sm:$0xff] }
 0x232   :  { %v11001_v48 = vpop.permute.xlu0 %1323 }
 0x234   :  { %1237 = vrot.lane.b32.xlu1 %v1206_v38, %s15233_s18  ;;  %1151 = vrot.lane.b32.xlu0 %v1119_v15, %s15231_s19  ;;  %v2474_v38 = vld [vmem:[%s14750_s5 + $0x8] sm:$0xff]  ;;  %v2477_v15 = vld [vmem:[%s14750_s5 + $0x20] sm:$0xff]  ;;  %v11043_v49 = vpop.permute.xlu1 %1504 }
 0x235   :  { %v8564_v11 = vpack.c.bf16 %v2477_v15, %v2474_v38  ;;  %v2480_v38 = vld [vmem:[%s14750_s5 + $0x38] sm:$0xff]  ;;  %v2483_v15 = vld [vmem:[%s14750_s5 + $0x50] sm:$0xff] }
 0x236   :  { %v11027_v50 = vpop.permute.xlu0 %1411  ;;  %v8568_v17 = vpack.c.bf16 %v2483_v15, %v2480_v38  ;;  %v2489_v38 = vld [vmem:[%s14750_s5 + $0x80] sm:$0xff] }
 0x237   :  { %8565 = vmatprep.subr.bf16.mxu0 %v8564_v11  ;;  %v2482_v11 = vld [vmem:[%s14750_s5 + $0x48] sm:$0xff] }
 0x238   :  { %1325 = vrot.lane.b32.xlu1 %v1294_v6, %s15235_s17  ;;  %1239 = vrot.lane.b32.xlu0 %v1207_v24, %s15233_s18  ;;  %v15236_v6 = vld [vmem:[#allocation27_spill] sm:$0xff]  ;;  %v8570_v60 = vpack.c.bf16 %v2482_v11, %v2479_v52 }
 0x239   :  { %v1382_v24 = vmul.f32 %v15236_v6, %v15213_v25  ;;  %8567 = vmatpush1.bf16.msra.mxu0 %v8566_v55  ;;  %v1383_v54 = vmul.f32 %v15236_v6, %v10883_v41  ;;  %v2486_v55 = vld [vmem:[%s14750_s5 + $0x68] sm:$0xff]  ;;  %v2485_v6 = vld [vmem:[%s14750_s5 + $0x60] sm:$0xff] }
 0x23a   :  { %8569 = vmatprep.subr.bf16.mxu0 %v8568_v17  ;;  %v8572_v15 = vpack.c.bf16 %v2489_v38, %v2486_v55  ;;  %v2488_v17 = vld [vmem:[%s14750_s5 + $0x78] sm:$0xff]  ;;  %v11063_v52 = vpop.permute.xlu0 %1506  ;;  %v2495_v38 = vld [vmem:[%s14750_s5 + $0xb0] sm:$0xff] }
 0x23b   :  { %15238 = vst [vmem:[#allocation50_spill] sm:$0xff] %v11063_v52  ;;  %v8574_v40 = vpack.c.bf16 %v2488_v17, %v2485_v6  ;;  %v2492_v55 = vld [vmem:[%s14750_s5 + $0x98] sm:$0xff]  ;;  %v2491_v6 = vld [vmem:[%s14750_s5 + $0x90] sm:$0xff]  ;;  %v15241_v17 = vld [vmem:[#allocation28_spill] sm:$0xff] }
 0x23c   :  { %1413 = vrot.lane.b32.xlu1 %v1382_v24, %s15126_s26  ;;  %1327 = vrot.lane.b32.xlu0 %v1295_v1, %s15235_s17  ;;  %v15237_v1 = vld [vmem:[#allocation21_spill] sm:$0xff]  ;;  %v8576_v2 = vpack.c.bf16 %v2495_v38, %v2492_v55  ;;  %v197_v55 = vsel %vm15032_vm0, %v10830_v16, %v10856_v63  ;;  %v15244_v63 = vld [vmem:[#allocation24_spill] sm:$0xff] }
 0x23d   :  { %v1475_v24 = vmul.f32 %v15237_v1, %v15213_v25  ;;  %8571 = vmatpush1.bf16.msra.mxu0 %v8570_v60  ;;  %v11069_v60 = vpop.permute.xlu1 %1597  ;;  %v15242_v38 = vld [vmem:[#allocation9_spill] sm:$0xff] }
 0x23e   :  { %8573 = vmatprep.subr.bf16.mxu0 %v8572_v15  ;;  %15240 = vst [vmem:[#allocation44_spill] sm:$0xff] %v11069_v60  ;;  %v2494_v15 = vld [vmem:[%s14750_s5 + $0xa8] sm:$0xff]  ;;  %v119_v43 = vmul.f32 %v15242_v38, %v9953_v23  ;;  %v120_v60 = vmul.f32 %v9685_v14, %v9953_v23  ;;  %v11099_v52 = vpop.permute.xlu0 %1599  ;;  %v285_v14 = vsel %vm15006_vm1, %v10840_v39, %v10876_v37 }
 0x23f   :  { %15243 = vst [vmem:[#allocation45_spill] sm:$0xff] %v11099_v52 }
 0x240   :  { %1508 = vrot.lane.b32.xlu1 %v1475_v24, %s15129_s23  ;;  %1415 = vrot.lane.b32.xlu0 %v1383_v54, %s15126_s26  ;;  %v15239_v54 = vld [vmem:[#allocation23_spill] sm:$0xff]  ;;  %v1476_v24 = vmul.f32 %v15237_v1, %v10883_v41  ;;  %v8578_v1 = vpack.c.bf16 %v2494_v15, %v2491_v6  ;;  %v1662_v6 = vmul.f32 %v15241_v17, %v10883_v41 }
 0x241   :  { %v1568_v11 = vmul.f32 %v15239_v54, %v15213_v25  ;;  %8575 = vmatpush1.bf16.msra.mxu0 %v8574_v40  ;;  %v196_v40 = vsel %vm15032_vm0, %v9973_v34, %v10830_v16  ;;  %v2498_v34 = vld [vmem:[%s14750_s5 + $0xc8] sm:$0xff]  ;;  %v284_v16 = vsel %vm15006_vm1, %v10005_v8, %v10840_v39  ;;  %v220_v23 = vadd.f32 %v197_v55, %v120_v60  ;;  %v11123_v8 = vpop.permute.xlu1 %1690  ;;  %v2507_v60 = vld [vmem:[%s14750_s5 + $0x110] sm:$0xff] }
 0x242   :  { %8577 = vmatprep.subr.bf16.mxu0 %v8576_v2  ;;  %v2501_v2 = vld [vmem:[%s14750_s5 + $0xe0] sm:$0xff]  ;;  %v219_v38 = vadd.f32 %v196_v40, %v119_v43  ;;  %v1754_v39 = vmul.f32 %v15244_v63, %v15213_v25  ;;  %v2504_v43 = vld [vmem:[%s14750_s5 + $0xf8] sm:$0xff]  ;;  %v2503_v55 = vld [vmem:[%s14750_s5 + $0xf0] sm:$0xff] }
 0x243   :  { %v8580_v15 = vpack.c.bf16 %v2501_v2, %v2498_v34  ;;  %v373_v34 = vsel %vm15007_vm2, %v10851_v7, %v10889_v58  ;;  %v8584_v40 = vpack.c.bf16 %v2507_v60, %v2504_v43 }
 0x244   :  { %1601 = vrot.lane.b32.xlu1 %v1568_v11, %s15132_s24  ;;  %1510 = vrot.lane.b32.xlu0 %v1476_v24, %s15129_s23  ;;  %v1661_v11 = vmul.f32 %v15241_v17, %v15213_v25  ;;  %v1569_v24 = vmul.f32 %v15239_v54, %v10883_v41  ;;  %v307_v2 = vadd.f32 %v284_v16, %v219_v38  ;;  %v2506_v16 = vld [vmem:[%s14750_s5 + $0x108] sm:$0xff] }
 0x245   :  { %8579 = vmatpush1.bf16.msra.mxu0 %v8578_v1  ;;  %v372_v1 = vsel %vm15007_vm2, %v10023_v28, %v10851_v7  ;;  %v308_v17 = vadd.f32 %v285_v14, %v220_v23  ;;  %v460_v28 = vsel %vm14958_vm3, %v10055_v33, %v10870_v9  ;;  %v461_v23 = vsel %vm14958_vm3, %v10870_v9, %v10899_v18  ;;  %v11155_v33 = vpop.permute.xlu0 %1692  ;;  %v11165_v43 = vpop.permute.xlu1 %1783 }
 0x246   :  { %8581 = vmatprep.subr.bf16.mxu0 %v8580_v15  ;;  %v1755_v7 = vmul.f32 %v15244_v63, %v10883_v41  ;;  %v395_v14 = vadd.f32 %v372_v1, %v307_v2  ;;  %15245 = vst [vmem:[#allocation48_spill] sm:$0xff] %v11155_v33  ;;  %v15246_v15 = vld [vmem:[#allocation26_spill] sm:$0xff] }
 0x247   :  { %v1847_v9 = vmul.f32 %v15246_v15, %v15213_v25 }
 0x248   :  { %1694 = vrot.lane.b32.xlu1 %v1661_v11, %s15134_s22  ;;  %1603 = vrot.lane.b32.xlu0 %v1569_v24, %s15132_s24  ;;  %v2497_v11 = vld [vmem:[%s14750_s5 + $0xc0] sm:$0xff]  ;;  %v2500_v24 = vld [vmem:[%s14750_s5 + $0xd8] sm:$0xff]  ;;  %v483_v38 = vadd.f32 %v460_v28, %v395_v14 }
 0x249   :  { %v8582_v37 = vpack.c.bf16 %v2500_v24, %v2497_v11  ;;  %v8586_v11 = vpack.c.bf16 %v2506_v16, %v2503_v55  ;;  %v549_v24 = vsel %vm14957_vm4, %v10887_v12, %v10909_v30  ;;  %v2509_v28 = vld [vmem:[%s14750_s5 + $0x120] sm:$0xff] }
 0x24b   :  { %8583 = vmatpush1.bf16.msra.mxu0 %v8582_v37  ;;  %v548_v37 = vsel %vm14957_vm4, %v15140_v27, %v10887_v12  ;;  %v2513_v27 = vld [vmem:[%s14750_s5 + $0x140] sm:$0xff]  ;;  %vm15247_vm4 = vcmask 809984  }
 0x24c   :  { %1787 = vrot.lane.b32.xlu1 %v1754_v39, %s15137_s21  ;;  %1696 = vrot.lane.b32.xlu0 %v1662_v6, %s15134_s22  ;;  %v396_v6 = vadd.f32 %v373_v34, %v308_v17  ;;  %v2510_v17 = vld [vmem:[%s14750_s5 + $0x128] sm:$0xff]  ;;  %v636_v12 = vsel %vm15247_vm4, %v15145_v13, %v10897_v22  ;;  %vm15248_vm3 = vmmov %vm15247_vm4  ;;  %v15249_v34 = vld [vmem:[#allocation30_spill] sm:$0xff]  ;;  %v1848_v13 = vmul.f32 %v15246_v15, %v10883_v41 }
 0x24d   :  { %8585 = vmatprep.subr.bf16.mxu0 %v8584_v40  ;;  %v637_v1 = vsel %vm15248_vm3, %v10897_v22, %v10919_v29  ;;  %v1940_v2 = vmul.f32 %v15249_v34, %v15213_v25  ;;  %v8588_v60 = vpack.c.bf16 %v2513_v27, %v2510_v17  ;;  %vm15250_vm3 = vcmask 801792   ;;  %v2518_v17 = vld [vmem:[%s14750_s5 + $0x168] sm:$0xff] }
 0x24e   :  { %v484_v39 = vadd.f32 %v461_v23, %v396_v6  ;;  %v2512_v23 = vld [vmem:[%s14750_s5 + $0x138] sm:$0xff]  ;;  %v724_v22 = vsel %vm15250_vm3, %v15150_v46, %v10907_v26  ;;  %vm15251_vm4 = vmmov %vm15250_vm3  ;;  %v2519_v46 = vld [vmem:[%s14750_s5 + $0x170] sm:$0xff]  ;;  %vm15254_vm3 = vcmask 793600  }
 0x24f   :  { %8587 = vmatpush1.bf16.msra.mxu0 %v8586_v11  ;;  %v8590_v55 = vpack.c.bf16 %v2512_v23, %v2509_v28  ;;  %v725_v16 = vsel %vm15251_vm4, %v10907_v26, %v10929_v0  ;;  %v2516_v11 = vld [vmem:[%s14750_s5 + $0x158] sm:$0xff]  ;;  %v812_v26 = vsel %vm15254_vm3, %v15155_v61, %v10917_v62  ;;  %vm15255_vm4 = vmmov %vm15254_vm3  ;;  %v11221_v61 = vpop.permute.xlu1 %1876  ;;  %v2523_v28 = vld [vmem:[%s14750_s5 + $0x190] sm:$0xff]  ;;  %vm15257_vm3 = vcmask 785408  }
 0x250   :  { %1880 = vrot.lane.b32.xlu1 %v1847_v9, %s15138_s20  ;;  %1789 = vrot.lane.b32.xlu0 %v1755_v7, %s15137_s21  ;;  %v571_v7 = vadd.f32 %v548_v37, %v483_v38  ;;  %v572_v40 = vadd.f32 %v549_v24, %v484_v39  ;;  %v11197_v9 = vpop.permute.xlu0 %1785  ;;  %v813_v37 = vsel %vm15255_vm4, %v10917_v62, %v10939_v36  ;;  %v2515_v39 = vld [vmem:[%s14750_s5 + $0x150] sm:$0xff]  ;;  %v15256_v23 = vld [vmem:[#allocation51_spill] sm:$0xff]  ;;  %vm15258_vm4 = vmmov %vm15257_vm3 }
 0x251   :  { %8589 = vmatprep.subr.bf16.mxu0 %v8588_v60  ;;  %15252 = vst [vmem:[#allocation56_spill] sm:$0xff] %v11197_v9  ;;  %v1941_v24 = vmul.f32 %v15249_v34, %v10883_v41  ;;  %v8592_v38 = vpack.c.bf16 %v2519_v46, %v2516_v11  ;;  %v2033_v62 = vmul.f32 %v9927_v5, %v15213_v25  ;;  %v2525_v60 = vld [vmem:[%s14750_s5 + $0x1a0] sm:$0xff]  ;;  %v2475_v46 = vld [vmem:[%s14750_s5 + $0x10] sm:$0xff] }
 0x252   :  { %v659_v14 = vadd.f32 %v636_v12, %v571_v7  ;;  %v660_v6 = vadd.f32 %v637_v1, %v572_v40  ;;  %v8594_v1 = vpack.c.bf16 %v2518_v17, %v2515_v39  ;;  %v900_v7 = vsel %vm15257_vm3, %v15256_v23, %v10927_v44  ;;  %v15260_v39 = vld [vmem:[#allocation58_spill] sm:$0xff] }
 0x253   :  { %8591 = vmatpush1.bf16.msra.mxu0 %v8590_v55  ;;  %v901_v40 = vsel %vm15258_vm4, %v10927_v44, %v10947_v20  ;;  %vm15261_vm3 = vcmask 588800  }
 0x254   :  { %1973 = vrot.lane.b32.xlu1 %v1940_v2, %s15253_s28  ;;  %1882 = vrot.lane.b32.xlu0 %v1848_v13, %s15138_s20  ;;  %v747_v27 = vadd.f32 %v724_v22, %v659_v14  ;;  %v748_v12 = vadd.f32 %v725_v16, %v660_v6  ;;  %v2522_v2 = vld [vmem:[%s14750_s5 + $0x188] sm:$0xff]  ;;  %v2034_v13 = vmul.f32 %v9927_v5, %v10883_v41  ;;  %v2521_v16 = vld [vmem:[%s14750_s5 + $0x180] sm:$0xff]  ;;  %vm15262_vm4 = vmmov %vm15261_vm3 }
 0x255   :  { %8593 = vmatprep.subr.bf16.mxu0 %v8592_v38  ;;  %v8596_v55 = vpack.c.bf16 %v2525_v60, %v2522_v2  ;;  %v2526_v22 = vld [vmem:[%s14750_s5 + $0x1a8] sm:$0xff]  ;;  %v2524_v14 = vld [vmem:[%s14750_s5 + $0x198] sm:$0xff]  ;;  %v988_v17 = vsel %vm15261_vm3, %v15260_v39, %v10937_v45  ;;  %vm15265_vm3 = vcmask 580608  }
 0x256   :  { %v835_v6 = vadd.f32 %v812_v26, %v747_v27  ;;  %v836_v11 = vadd.f32 %v813_v37, %v748_v12  ;;  %v8922_v44 = vpack.c.bf16 %v2526_v22, %v2523_v28  ;;  %v2478_v38 = vld [vmem:[%s14750_s5 + $0x28] sm:$0xff]  ;;  %v989_v26 = vsel %vm15262_vm4, %v10937_v45, %v10957_v19  ;;  %v2528_v28 = vld [vmem:[%s14750_s5 + $0x1b8] sm:$0xff]  ;;  %v2531_v45 = vld [vmem:[%s14750_s5 + $0x1d0] sm:$0xff] }
 0x257   :  { %8595 = vmatpush1.bf16.msra.mxu0 %v8594_v1  ;;  %v8598_v37 = vpack.c.bf16 %v2524_v14, %v2521_v16  ;;  %v15264_v2 = vld [vmem:[#allocation29_spill] sm:$0xff]  ;;  %v2529_v1 = vld [vmem:[%s14750_s5 + $0x1c0] sm:$0xff]  ;;  %v1076_v23 = vsel %vm15265_vm3, %v15171_v42, %v10953_v32  ;;  %vm15266_vm4 = vmmov %vm15265_vm3  ;;  %vm15268_vm3 = vcmask 572416  }
 0x258   :  { %2066 = vrot.lane.b32.xlu1 %v2033_v62, %s15259_s16  ;;  %1975 = vrot.lane.b32.xlu0 %v1941_v24, %s15253_s28  ;;  %v8924_v24 = vpack.c.bf16 %v2478_v38, %v2475_v46  ;;  %v923_v27 = vadd.f32 %v900_v7, %v835_v6  ;;  %v924_v12 = vadd.f32 %v901_v40, %v836_v11  ;;  %v11265_v62 = vpop.permute.xlu0 %1878  ;;  %v2527_v22 = vld [vmem:[%s14750_s5 + $0x1b0] sm:$0xff]  ;;  %v2530_v16 = vld [vmem:[%s14750_s5 + $0x1c8] sm:$0xff]  ;;  %v11293_v6 = vpop.permute.xlu1 %1969 }
 0x259   :  { %15263 = vst [vmem:[#allocation53_spill] sm:$0xff] %v11265_v62  ;;  %v2126_v60 = vmul.f32 %v15264_v2, %v15213_v25  ;;  %8597 = vmatprep.subr.bf16.mxu0 %v8596_v55  ;;  %8923 = vmatprep.subr.bf16.mxu1 %v8922_v44  ;;  %v1077_v7 = vsel %vm15266_vm4, %v10953_v32, %v10967_v35  ;;  %v2532_v55 = vld [vmem:[%s14750_s5 + $0x1d8] sm:$0xff]  ;;  %v2481_v11 = vld [vmem:[%s14750_s5 + $0x40] sm:$0xff]  ;;  %vm15269_vm4 = vmmov %vm15268_vm3 }
 0x25a   :  { %8925 = vmatpush3.bf16.msra.mxu1 %v8924_v24  ;;  %v8600_v40 = vpack.c.bf16 %v2531_v45, %v2528_v28  ;;  %v1011_v14 = vadd.f32 %v988_v17, %v923_v27  ;;  %v1012_v42 = vadd.f32 %v989_v26, %v924_v12  ;;  %v8926_v32 = vpack.c.bf16 %v2532_v55, %v2529_v1  ;;  %v2484_v44 = vld [vmem:[%s14750_s5 + $0x58] sm:$0xff]  ;;  %v2534_v27 = vld [vmem:[%s14750_s5 + $0x1e8] sm:$0xff]  ;;  %v2533_v45 = vld [vmem:[%s14750_s5 + $0x1e0] sm:$0xff] }
 0x25b   :  { %v1164_v46 = vsel %vm15268_vm3, %v15176_v57, %v10965_v10  ;;  %v1165_v38 = vsel %vm15269_vm4, %v10965_v10, %v10975_v47  ;;  %8599 = vmatpush1.bf16.msra.mxu0 %v8598_v37  ;;  %v8602_v39 = vpack.c.bf16 %v2530_v16, %v2527_v22  ;;  %v2127_v24 = vmul.f32 %v15264_v2, %v10883_v41  ;;  %v2537_v57 = vld [vmem:[%s14750_s5 + $0x200] sm:$0xff]  ;;  %v2535_v10 = vld [vmem:[%s14750_s5 + $0x1f0] sm:$0xff]  ;;  %v2538_v28 = vld [vmem:[%s14750_s5 + $0x208] sm:$0xff] }
 0x25c   :  { %2159 = vrot.lane.b32.xlu1 %v2126_v60, %s15267_s15  ;;  %2068 = vrot.lane.b32.xlu0 %v2034_v13, %s15259_s16  ;;  %v8928_v13 = vpack.c.bf16 %v2484_v44, %v2481_v11  ;;  %v1099_v17 = vadd.f32 %v1076_v23, %v1011_v14  ;;  %v1100_v26 = vadd.f32 %v1077_v7, %v1012_v42  ;;  %v2536_v1 = vld [vmem:[%s14750_s5 + $0x1f8] sm:$0xff]  ;;  %v11335_v7 = vpop.permute.xlu0 %1971  ;;  %v2490_v55 = vld [vmem:[%s14750_s5 + $0x88] sm:$0xff]  ;;  %vm15271_vm3 = vcmask 556032   ;;  %v11350_v44 = vpop.permute.xlu1 %2062 }
 0x25d   :  { %8601 = vmatprep.subr.bf16.mxu0 %v8600_v40  ;;  %8927 = vmatprep.subr.bf16.mxu1 %v8926_v32  ;;  %v1252_v37 = vsel %vm1247_vm12, %v15178_v59, %v10981_v21  ;;  %v1253_v12 = vsel %vm1247_vm12, %v10981_v21, %v10989_v3  ;;  %v8604_v60 = vpack.c.bf16 %v2537_v57, %v2534_v27  ;;  %v2487_v40 = vld [vmem:[%s14750_s5 + $0x70] sm:$0xff]  ;;  %vm15272_vm4 = vmmov %vm15271_vm3 }
 0x25e   :  { %8929 = vmatpush3.bf16.msra.mxu1 %v8928_v13  ;;  %v1187_v23 = vadd.f32 %v1164_v46, %v1099_v17  ;;  %v1188_v59 = vadd.f32 %v1165_v38, %v1100_v26  ;;  %15270 = vst [vmem:[#allocation52_spill] sm:$0xff] %v11335_v7  ;;  %v8930_v21 = vpack.c.bf16 %v2538_v28, %v2535_v10  ;;  %v2540_v46 = vld [vmem:[%s14750_s5 + $0x218] sm:$0xff]  ;;  %v2539_v26 = vld [vmem:[%s14750_s5 + $0x210] sm:$0xff] }
 0x25f   :  { %v1340_v22 = vsel %vm15271_vm3, %v15181_v53, %v10993_v56  ;;  %v1341_v16 = vsel %vm15272_vm4, %v10993_v56, %v11001_v48  ;;  %8603 = vmatpush1.bf16.msra.mxu0 %v8602_v39  ;;  %v8606_v14 = vpack.c.bf16 %v2536_v1, %v2533_v45  ;;  %v8932_v42 = vpack.c.bf16 %v2490_v55, %v2487_v40  ;;  %v2543_v53 = vld [vmem:[%s14750_s5 + $0x230] sm:$0xff]  ;;  %v2541_v56 = vld [vmem:[%s14750_s5 + $0x220] sm:$0xff]  ;;  %v2544_v17 = vld [vmem:[%s14750_s5 + $0x238] sm:$0xff] }
 0x260   :  { %2161 = vrot.lane.b32.xlu0 %v2127_v24, %s15267_s15  ;;  %v1275_v32 = vadd.f32 %v1252_v37, %v1187_v23  ;;  %v1276_v11 = vadd.f32 %v1253_v12, %v1188_v59  ;;  %8605 = vmatprep.subr.bf16.mxu0 %v8604_v60  ;;  %v1428_v38 = vsel %vm1423_vm14, %v15183_v51, %v11007_v4  ;;  %v2542_v24 = vld [vmem:[%s14750_s5 + $0x228] sm:$0xff]  ;;  %v2496_v10 = vld [vmem:[%s14750_s5 + $0xb8] sm:$0xff]  ;;  %v11388_v59 = vpop.permute.xlu0 %2064  ;;  %vm15341_vm3 = vcmask 1014784  }
 0x261   :  { %8931 = vmatprep.subr.bf16.mxu1 %v8930_v21  ;;  %v1429_v39 = vsel %vm1423_vm14, %v11007_v4, %v11027_v50  ;;  %v8608_v13 = vpack.c.bf16 %v2543_v53, %v2540_v46  ;;  %v8934_v57 = vpack.c.bf16 %v2544_v17, %v2541_v56  ;;  %v2493_v4 = vld [vmem:[%s14750_s5 + $0xa0] sm:$0xff]  ;;  %v1525_v37 = vsel %vm1520_vm15, %v15186_v31, %v11043_v49  ;;  %v15273_v12 = vld [vmem:[#allocation50_spill] sm:$0xff]  ;;  %v2546_v21 = vld [vmem:[%s14750_s5 + $0x248] sm:$0xff]  ;;  %v11411_v46 = vpop.permute.xlu1 %2155 }
 0x262   :  { %8933 = vmatpush3.bf16.msra.mxu1 %v8932_v42  ;;  %v1363_v27 = vadd.f32 %v1340_v22, %v1275_v32  ;;  %v1364_v51 = vadd.f32 %v1341_v16, %v1276_v11  ;;  %v1526_v60 = vsel %vm1520_vm15, %v11043_v49, %v15273_v12  ;;  %v8610_v28 = vpack.c.bf16 %v2542_v24, %v2539_v26  ;;  %v2549_v31 = vld [vmem:[%s14750_s5 + $0x260] sm:$0xff]  ;;  %v2547_v49 = vld [vmem:[%s14750_s5 + $0x250] sm:$0xff]  ;;  %v2550_v16 = vld [vmem:[%s14750_s5 + $0x268] sm:$0xff] }
 0x263   :  { %8607 = vmatpush1.bf16.msra.mxu0 %v8606_v14  ;;  %v8936_v45 = vpack.c.bf16 %v2496_v10, %v2493_v4  ;;  %15274 = vst [vmem:[#allocation59_spill] sm:$0xff] %v11388_v59  ;;  %8935 = vmatprep.subr.bf16.mxu1 %v8934_v57  ;;  %v15275_v40 = vld [vmem:[#allocation44_spill] sm:$0xff]  ;;  %v8612_v22 = vpack.c.bf16 %v2549_v31, %v2546_v21  ;;  %v2548_v42 = vld [vmem:[%s14750_s5 + $0x258] sm:$0xff]  ;;  %v2499_v56 = vld [vmem:[%s14750_s5 + $0xd0] sm:$0xff] }
 0x264   :  { %v1451_v1 = vadd.f32 %v1428_v38, %v1363_v27  ;;  %v1452_v23 = vadd.f32 %v1429_v39, %v1364_v51  ;;  %8609 = vmatprep.subr.bf16.mxu0 %v8608_v13  ;;  %v1619_v55 = vsel %vm1613_vm6, %v15275_v40, %v11099_v52  ;;  %v2545_v14 = vld [vmem:[%s14750_s5 + $0x240] sm:$0xff]  ;;  %v8938_v53 = vpack.c.bf16 %v2550_v16, %v2547_v49  ;;  %v2502_v38 = vld [vmem:[%s14750_s5 + $0xe8] sm:$0xff]  ;;  %v2552_v39 = vld [vmem:[%s14750_s5 + $0x278] sm:$0xff] }
 0x265   :  { %v15276_v13 = vld [vmem:[#allocation81_spill] sm:$0xff]  ;;  %v1712_v26 = vsel %vm1706_vm7, %v11123_v8, %v11155_v33  ;;  %v8614_v24 = vpack.c.bf16 %v2548_v42, %v2545_v14  ;;  %v8940_v27 = vpack.c.bf16 %v2502_v38, %v2499_v56  ;;  %v2553_v57 = vld [vmem:[%s14750_s5 + $0x280] sm:$0xff]  ;;  %v2556_v4 = vld [vmem:[%s14750_s5 + $0x298] sm:$0xff]  ;;  %v1805_v31 = vsel %vm1799_vm8, %v11165_v43, %v11197_v9  ;;  %v2249_v38 = vpop.permute.xlu1 %2248 }
 0x266   :  { %8937 = vmatpush3.bf16.msra.mxu1 %v8936_v45  ;;  %v1549_v32 = vadd.f32 %v1525_v37, %v1451_v1  ;;  %v1550_v11 = vadd.f32 %v1526_v60, %v1452_v23  ;;  %v1618_v17 = vsel %vm1613_vm6, %v15276_v13, %v15275_v40  ;;  %v2555_v51 = vld [vmem:[%s14750_s5 + $0x290] sm:$0xff]  ;;  %v8942_v60 = vpack.c.bf16 %v2556_v4, %v2553_v57  ;;  %v2554_v45 = vld [vmem:[%s14750_s5 + $0x288] sm:$0xff]  ;;  %v2505_v1 = vld [vmem:[%s14750_s5 + $0x100] sm:$0xff] }
 0x267   :  { %8611 = vmatpush1.bf16.msra.mxu0 %v8610_v28  ;;  %8939 = vmatprep.subr.bf16.mxu1 %v8938_v53  ;;  %v8616_v37 = vpack.c.bf16 %v2555_v51, %v2552_v39  ;;  %v2551_v28 = vld [vmem:[%s14750_s5 + $0x270] sm:$0xff]  ;;  %v2508_v49 = vld [vmem:[%s14750_s5 + $0x118] sm:$0xff]  ;;  %v15279_v14 = vld [vmem:[#allocation88_spill] sm:$0xff] }
 0x268   :  { %v1643_v10 = vadd.f32 %v1619_v55, %v1550_v11  ;;  %8613 = vmatprep.subr.bf16.mxu0 %v8612_v22  ;;  %v15277_v23 = vld [vmem:[#allocation85_spill] sm:$0xff]  ;;  %v1642_v40 = vadd.f32 %v1618_v17, %v1549_v32  ;;  %v11455_v22 = vpop.permute.xlu0 %2157  ;;  %v8944_v16 = vpack.c.bf16 %v2508_v49, %v2505_v1  ;;  %v1804_v42 = vsel %vm1799_vm8, %v15279_v14, %v11165_v43  ;;  %v2561_v39 = vld [vmem:[%s14750_s5 + $0x2c0] sm:$0xff]  ;;  %v15280_v13 = vld [vmem:[#allocation94_spill] sm:$0xff] }
 0x269   :  { %v1711_v21 = vsel %vm1706_vm7, %v15277_v23, %v11123_v8  ;;  %15278 = vst [vmem:[#allocation60_spill] sm:$0xff] %v11455_v22  ;;  %v1898_v8 = vsel %vm1892_vm5, %v11221_v61, %v11265_v62  ;;  %v8618_v11 = vpack.c.bf16 %v2554_v45, %v2551_v28  ;;  %v2558_v32 = vld [vmem:[%s14750_s5 + $0x2a8] sm:$0xff]  ;;  %v2559_v43 = vld [vmem:[%s14750_s5 + $0x2b0] sm:$0xff]  ;;  %v1897_v17 = vsel %vm1892_vm5, %v15280_v13, %v11221_v61  ;;  %v2557_v51 = vld [vmem:[%s14750_s5 + $0x2a0] sm:$0xff] }
 0x26a   :  { %8941 = vmatpush3.bf16.msra.mxu1 %v8940_v27  ;;  %v1736_v55 = vadd.f32 %v1712_v26, %v1643_v10  ;;  %v1735_v53 = vadd.f32 %v1711_v21, %v1642_v40  ;;  %v1991_v26 = vsel %vm1985_vm10, %v11293_v6, %v11335_v7  ;;  %v2562_v27 = vld [vmem:[%s14750_s5 + $0x2c8] sm:$0xff]  ;;  %v2560_v57 = vld [vmem:[%s14750_s5 + $0x2b8] sm:$0xff]  ;;  %v2084_v1 = vsel %vm2078_vm11, %v11350_v44, %v11388_v59  ;;  %vm15342_vm4 = vmmov %vm15341_vm3 }
 0x26b   :  { %8943 = vmatprep.subr.bf16.mxu1 %v8942_v60  ;;  %8615 = vmatpush1.bf16.msra.mxu0 %v8614_v24  ;;  %v8620_v24 = vpack.c.bf16 %v2561_v39, %v2558_v32  ;;  %v8946_v10 = vpack.c.bf16 %v2562_v27, %v2559_v43  ;;  %v2514_v60 = vld [vmem:[%s14750_s5 + $0x148] sm:$0xff]  ;;  %v15281_v28 = vld [vmem:[#allocation34_spill] sm:$0xff]  ;;  %v8622_v23 = vpack.c.bf16 %v2560_v57, %v2557_v51 }
 0x26c   :  { %v1829_v56 = vadd.f32 %v1805_v31, %v1736_v55  ;;  %8617 = vmatprep.subr.bf16.mxu0 %v8616_v37  ;;  %v1828_v4 = vadd.f32 %v1804_v42, %v1735_v53  ;;  %v2511_v37 = vld [vmem:[%s14750_s5 + $0x130] sm:$0xff]  ;;  %v1990_v45 = vsel %vm1985_vm10, %v15281_v28, %v11293_v6  ;;  %v2564_v6 = vld [vmem:[%s14750_s5 + $0x2d8] sm:$0xff]  ;;  %v2566_v43 = vld [vmem:[%s14750_s5 + $0x2e8] sm:$0xff] }
 0x26d   :  { %v8948_v21 = vpack.c.bf16 %v2514_v60, %v2511_v37  ;;  %v15282_v49 = vld [vmem:[#allocation33_spill] sm:$0xff]  ;;  %v2568_v32 = vld [vmem:[%s14750_s5 + $0x2f8] sm:$0xff]  ;;  %v15284_v51 = vld [vmem:[#allocation40_spill] sm:$0xff] }
 0x26e   :  { %8945 = vmatpush3.bf16.msra.mxu1 %v8944_v16  ;;  %v1922_v61 = vadd.f32 %v1898_v8, %v1829_v56  ;;  %v1921_v31 = vadd.f32 %v1897_v17, %v1828_v4  ;;  %v2083_v40 = vsel %vm2078_vm11, %v15282_v49, %v11350_v44  ;;  %v11502_v16 = vpop.permute.xlu0 %2250  ;;  %v2567_v42 = vld [vmem:[%s14750_s5 + $0x2f0] sm:$0xff]  ;;  %v2565_v8 = vld [vmem:[%s14750_s5 + $0x2e0] sm:$0xff]  ;;  %v2177_v44 = vsel %vm2171_vm9, %v11411_v46, %v11455_v22  ;;  %v2520_v27 = vld [vmem:[%s14750_s5 + $0x178] sm:$0xff] }
 0x26f   :  { %8619 = vmatpush1.bf16.msra.mxu0 %v8618_v11  ;;  %15283 = vst [vmem:[#allocation47_spill] sm:$0xff] %v11502_v16  ;;  %8947 = vmatprep.subr.bf16.mxu1 %v8946_v10  ;;  %v8624_v56 = vpack.c.bf16 %v2567_v42, %v2564_v6  ;;  %v2563_v39 = vld [vmem:[%s14750_s5 + $0x2d0] sm:$0xff]  ;;  %v2176_v57 = vsel %vm2171_vm9, %v15284_v51, %v11411_v46  ;;  %v15287_v42 = vld [vmem:[#allocation36_spill] sm:$0xff] }
 0x270   :  { %v2015_v55 = vadd.f32 %v1991_v26, %v1922_v61  ;;  %8621 = vmatprep.subr.bf16.mxu0 %v8620_v24  ;;  %v2014_v13 = vadd.f32 %v1990_v45, %v1921_v31  ;;  %v8950_v26 = vpack.c.bf16 %v2568_v32, %v2565_v8  ;;  %v2517_v24 = vld [vmem:[%s14750_s5 + $0x160] sm:$0xff]  ;;  %v2270_v4 = vsel %vm2264_vm13, %v2249_v38, %v11502_v16  ;;  %v15337_v52 = vld [vmem:[#allocation6_spill] sm:$0xff] }
 0x271   :  { %v8626_v61 = vpack.c.bf16 %v2566_v43, %v2563_v39  ;;  %v8952_v10 = vpack.c.bf16 %v2520_v27, %v2517_v24  ;;  %v15288_v8 = vmax.f32 %v15287_v42, 0.0 }
 0x272   :  { %v9444_v14 = vpop.permute.xlu1 %9443  ;;  %8949 = vmatpush3.bf16.msra.mxu1 %v8948_v21  ;;  %v2108_v17 = vadd.f32 %v2084_v1, %v2015_v55  ;;  %v2107_v37 = vadd.f32 %v2083_v40, %v2014_v13  ;;  %v15286_v1 = vld [vmem:[#allocation35_spill] sm:$0xff] }
 0x273   :  { %v9446_v11 = vunpack.i.h.bf16 %v9444_v14  ;;  %v9445_v53 = vunpack.i.l.bf16 %v9444_v14  ;;  %8623 = vmatpush1.bf16.msra.mxu0 %v8622_v23  ;;  %8951 = vmatprep.subr.bf16.mxu1 %v8950_v26  ;;  %v2269_v21 = vsel %vm2264_vm13, %v15286_v1, %v2249_v38  ;;  %v15294_v13 = vld [vmem:[#allocation43_spill] sm:$0xff] }
 0x274   :  { %v2201_v60 = vadd.f32 %v2177_v44, %v2108_v17  ;;  %8625 = vmatprep.subr.bf16.mxu0 %v8624_v56  ;;  %v2200_v23 = vadd.f32 %v2176_v57, %v2107_v37  ;;  %v15290_v44 = vld [vmem:[#allocation38_spill] sm:$0xff]  ;;  %v15297_v26 = vld [vmem:[#allocation39_spill] sm:$0xff] }
 0x275   :  { %v2368_v31 = vsel %vm15032_vm0, %v9445_v53, %v9446_v11  ;;  %v15291_v56 = vmax.f32 %v15290_v44, 0.0 }
 0x276   :  { %v11536_v28 = vpop.permute.xlu1 %181  ;;  %v11538_v45 = vpop.permute.xlu0 %9448  ;;  %8953 = vmatpush3.bf16.msra.mxu1 %v8952_v10  ;;  %v2294_v55 = vadd.f32 %v2270_v4, %v2201_v60  ;;  %v2293_v6 = vadd.f32 %v2269_v21, %v2200_v23  ;;  %v11551_v38 = vmax.f32 %v15288_v8, %v2368_v31  ;;  %v15301_v4 = vld [vmem:[#allocation32_spill] sm:$0xff]  ;;  %v15302_v10 = vld [vmem:[#allocation5_spill] sm:$0xff]  ;;  %v15304_v60 = vld [vmem:[#allocation42_spill] sm:$0xff] }
 0x277   :  { %15285 = vst [vmem:[#allocation55_spill] sm:$0xff] %v11538_v45  ;;  %v9451_v46 = vunpack.i.h.bf16 %v11538_v45  ;;  %v14963_v49 = vunpack.i.l.bf16 %v11538_v45  ;;  %8627 = vmatpush1.bf16.msra.mxu0 %v8626_v61  ;;  %v2220_v61 = vmul.f32 %v15301_v4, %v10883_v41  ;;  %v15303_v37 = vsub.s32 1, %v15302_v10 }
 0x278   :  { %15289 = vst [vmem:[#allocation66_spill] sm:$0xff] %v11551_v38  ;;  %v11573_v27 = vadd.f32 %v15297_v26, %v2293_v6  ;;  %v2219_v31 = vmul.f32 %v15301_v4, %v15213_v25  ;;  %v15308_v42 = vsub.s32 2, %v15302_v10 }
 0x279   :  { %v2367_v40 = vsel %vm15032_vm0, %v9451_v46, %v9445_v53  ;;  %v2369_v14 = vsel %vm15032_vm0, %v9446_v11, %v14963_v49  ;;  %v15295_v53 = vmax.f32 %v15294_v13, 0.0  ;;  %v11566_v11 = vadd.f32 %v15297_v26, %v2294_v55  ;;  %v15310_v13 = vld [vmem:[#allocation10_spill] sm:$0xff]  ;;  %v15316_v49 = vld [vmem:[#allocation13_spill] sm:$0xff] }
 0x27a   :  { %v11555_v32 = vmax.f32 %v15291_v56, %v2369_v14  ;;  %v11557_v39 = vpop.permute.xlu1 %269  ;;  %v11559_v43 = vpop.permute.xlu0 %183  ;;  %15300 = vst [vmem:[#allocation69_spill] sm:$0xff] %v11573_v27  ;;  %v11585_v1 = vrot.slane %v15304_v60, %v15303_v37  ;;  %v14962_v46 = vmax.f32 %v11573_v27, 0.0  ;;  %v11607_v8 = vrot.slane %v15304_v60, %v15308_v42  ;;  %v15312_v60 = vld [vmem:[#allocation11_spill] sm:$0xff] }
 0x27b   :  { %15293 = vst [vmem:[#allocation54_spill] sm:$0xff] %v11559_v43  ;;  %v11563_v17 = vmax.f32 %v15295_v53, %v2367_v40  ;;  %15298 = vst [vmem:[#allocation61_spill] sm:$0xff] %v11566_v11  ;;  %v14961_v21 = vmax.f32 %v11566_v11, 0.0  ;;  %v15306_v40 = vld [vmem:[#allocation8_spill] sm:$0xff] }
 0x27c   :  { %15292 = vst [vmem:[#allocation63_spill] sm:$0xff] %v11555_v32  ;;  %v9452_v24 = vpack.i.bf16 %v11555_v32, %v11551_v38  ;;  %v152_v14 = vmul.f32 %v15306_v40, %v11585_v1  ;;  %15309 = vst [vmem:[#allocation70_spill] sm:$0xff] %v11607_v8  ;;  %v240_v53 = vmul.f32 %v15310_v13, %v11585_v1 }
 0x27d   :  { %15296 = vst [vmem:[#allocation62_spill] sm:$0xff] %v11563_v17  ;;  %2414 = vrot.lane.b32.xlu0 %v11563_v17, %s15299_s10  ;;  %v9457_v6 = vpack.i.bf16 %v14961_v21, %v14962_v46  ;;  %v504_v32 = vmul.f32 %v15316_v49, %v11585_v1 }
 0x27e   :  { %v11575_v51 = vpop.permute.xlu1 %357  ;;  %v11577_v57 = vpop.permute.xlu0 %271  ;;  %9453 = vrot.lane.b32.xlu1 %v9452_v24, %s15299_s10  ;;  %v153_v24 = vmul.f32 %v15306_v40, %v11607_v8 }
 0x281   :  { %2254 = vrot.lane.b32.xlu0 %v2220_v61, %s15305_s30 }
 0x282   :  { %v11592_v23 = vpop.permute.xlu1 %445  ;;  %v11594_v55 = vpop.permute.xlu0 %359  ;;  %2252 = vrot.lane.b32.xlu1 %v2219_v31, %s15305_s30  ;;  %v328_v31 = vmul.f32 %v15312_v60, %v11585_v1 }
 0x285   :  { %185 = vrot.lane.b32.xlu0 %v152_v14, %s15307_s14  ;;  %v241_v14 = vmul.f32 %v15310_v13, %v11607_v8 }
 0x286   :  { %v11609_v44 = vpop.permute.xlu1 %533  ;;  %v11611_v56 = vpop.permute.xlu0 %447  ;;  %9458 = vrot.lane.b32.xlu1 %v9457_v6, %s15307_s14 }
 0x289   :  { %273 = vrot.lane.b32.xlu0 %v240_v53, %s15311_s1  ;;  %v15314_v53 = vld [vmem:[#allocation12_spill] sm:$0xff] }
 0x28a   :  { %v11619_v61 = vpop.permute.xlu1 %621  ;;  %v11621_v37 = vpop.permute.xlu0 %535  ;;  %187 = vrot.lane.b32.xlu1 %v153_v24, %s15307_s14  ;;  %v416_v21 = vmul.f32 %v15314_v53, %v11585_v1  ;;  %v329_v24 = vmul.f32 %v15312_v60, %v11607_v8 }
 0x28d   :  { %361 = vrot.lane.b32.xlu0 %v328_v31, %s15313_s27 }
 0x28e   :  { %v11629_v6 = vpop.permute.xlu1 %709  ;;  %v11631_v42 = vpop.permute.xlu0 %623  ;;  %275 = vrot.lane.b32.xlu1 %v241_v14, %s15311_s1  ;;  %v417_v14 = vmul.f32 %v15314_v53, %v11607_v8 }
 0x291   :  { %449 = vrot.lane.b32.xlu0 %v416_v21, %s15315_s13  ;;  %v15317_v21 = vld [vmem:[#allocation15_spill] sm:$0xff] }
 0x292   :  { %v11639_v46 = vpop.permute.xlu1 %797  ;;  %v11641_v31 = vpop.permute.xlu0 %711  ;;  %363 = vrot.lane.b32.xlu1 %v329_v24, %s15313_s27  ;;  %v592_v41 = vmul.f32 %v15317_v21, %v11585_v1  ;;  %v505_v24 = vmul.f32 %v15316_v49, %v11607_v8 }
 0x295   :  { %537 = vrot.lane.b32.xlu0 %v504_v32, %s15299_s10  ;;  %v15319_v32 = vld [vmem:[#allocation14_spill] sm:$0xff] }
 0x296   :  { %v11649_v11 = vpop.permute.xlu0 %799  ;;  %451 = vrot.lane.b32.xlu1 %v417_v14, %s15315_s13  ;;  %v11654_v60 = vpop.permute.xlu1 %885  ;;  %v680_v53 = vmul.f32 %v15319_v32, %v11585_v1  ;;  %v593_v14 = vmul.f32 %v15317_v21, %v11607_v8 }
 0x299   :  { %625 = vrot.lane.b32.xlu0 %v592_v41, %s15318_s12  ;;  %v15321_v41 = vld [vmem:[#allocation16_spill] sm:$0xff] }
 0x29a   :  { %v11659_v40 = vpop.permute.xlu0 %887  ;;  %539 = vrot.lane.b32.xlu1 %v505_v24, %s15299_s10  ;;  %v11667_v13 = vpop.permute.xlu1 %973  ;;  %v768_v49 = vmul.f32 %v15321_v41, %v11585_v1  ;;  %v681_v24 = vmul.f32 %v15319_v32, %v11607_v8 }
 0x29d   :  { %713 = vrot.lane.b32.xlu0 %v680_v53, %s15320_s8  ;;  %v15323_v53 = vld [vmem:[#allocation22_spill] sm:$0xff] }
 0x29e   :  { %v11669_v10 = vpop.permute.xlu0 %975  ;;  %627 = vrot.lane.b32.xlu1 %v593_v14, %s15318_s12  ;;  %v856_v21 = vmul.f32 %v15323_v53, %v11585_v1  ;;  %v11682_v45 = vpop.permute.xlu1 %1061  ;;  %v769_v14 = vmul.f32 %v15321_v41, %v11607_v8 }
 0x2a1   :  { %801 = vrot.lane.b32.xlu0 %v768_v49, %s15322_s11  ;;  %v15325_v49 = vld [vmem:[#allocation17_spill] sm:$0xff] }
 0x2a2   :  { %v11677_v27 = vpop.permute.xlu0 %1063  ;;  %715 = vrot.lane.b32.xlu1 %v681_v24, %s15320_s8  ;;  %v944_v26 = vmul.f32 %v15325_v49, %v11585_v1  ;;  %v857_v24 = vmul.f32 %v15323_v53, %v11607_v8  ;;  %v11695_v16 = vpop.permute.xlu1 %1149 }
 0x2a5   :  { %889 = vrot.lane.b32.xlu0 %v856_v21, %s15324_s29  ;;  %v15326_v21 = vld [vmem:[#allocation18_spill] sm:$0xff] }
 0x2a6   :  { %803 = vrot.lane.b32.xlu1 %v769_v14, %s15322_s11  ;;  %v11690_v32 = vpop.permute.xlu0 %1151  ;;  %v1032_v17 = vmul.f32 %v15326_v21, %v11585_v1  ;;  %v945_v14 = vmul.f32 %v15325_v49, %v11607_v8  ;;  %v11708_v53 = vpop.permute.xlu1 %1237 }
 0x2a9   :  { %977 = vrot.lane.b32.xlu0 %v944_v26, %s15227_s2  ;;  %v15327_v26 = vld [vmem:[#allocation25_spill] sm:$0xff] }
 0x2aa   :  { %891 = vrot.lane.b32.xlu1 %v857_v24, %s15324_s29  ;;  %v11703_v41 = vpop.permute.xlu0 %1239  ;;  %v1120_v38 = vmul.f32 %v15327_v26, %v11585_v1  ;;  %v1033_v24 = vmul.f32 %v15326_v21, %v11607_v8  ;;  %v11721_v59 = vpop.permute.xlu1 %1325 }
 0x2ad   :  { %1065 = vrot.lane.b32.xlu0 %v1032_v17, %s15229_s25  ;;  %v15328_v17 = vld [vmem:[#allocation19_spill] sm:$0xff] }
 0x2ae   :  { %979 = vrot.lane.b32.xlu1 %v945_v14, %s15227_s2  ;;  %v1208_v22 = vmul.f32 %v15328_v17, %v11585_v1  ;;  %v11716_v49 = vpop.permute.xlu0 %1327  ;;  %v1121_v14 = vmul.f32 %v15327_v26, %v11607_v8  ;;  %v2570_v26 = vld [vmem:[%s14750_s5 + $0x308] sm:$0xff] }
 0x2b1   :  { %1153 = vrot.lane.b32.xlu0 %v1120_v38, %s15231_s19  ;;  %v15329_v38 = vld [vmem:[#allocation20_spill] sm:$0xff] }
 0x2b2   :  { %1067 = vrot.lane.b32.xlu1 %v1033_v24, %s15229_s25  ;;  %v1296_v7 = vmul.f32 %v15329_v38, %v11585_v1  ;;  %v1209_v24 = vmul.f32 %v15328_v17, %v11607_v8  ;;  %v11729_v21 = vpop.permute.xlu0 %1415  ;;  %v1297_v17 = vmul.f32 %v15329_v38, %v11607_v8 }
 0x2b3   :  { %15330 = vst [vmem:[#allocation57_spill] sm:$0xff] %v11729_v21 }
 0x2b5   :  { %1241 = vrot.lane.b32.xlu0 %v1208_v22, %s15233_s18  ;;  %v15331_v22 = vld [vmem:[#allocation27_spill] sm:$0xff] }
 0x2b6   :  { %1155 = vrot.lane.b32.xlu1 %v1121_v14, %s15231_s19  ;;  %v1384_v62 = vmul.f32 %v15331_v22, %v11585_v1  ;;  %v2573_v14 = vld [vmem:[%s14750_s5 + $0x320] sm:$0xff]  ;;  %v11748_v4 = vpop.permute.xlu0 %1510 }
 0x2b7   :  { %v8628_v9 = vpack.c.bf16 %v2573_v14, %v2570_v26  ;;  %15333 = vst [vmem:[#allocation65_spill] sm:$0xff] %v11748_v4  ;;  %v1385_v26 = vmul.f32 %v15331_v22, %v11607_v8  ;;  %v199_v22 = vsel %vm15032_vm0, %v11536_v28, %v11559_v43 }
 0x2b9   :  { %1329 = vrot.lane.b32.xlu0 %v1296_v7, %s15235_s17  ;;  %v11740_v7 = vpop.permute.xlu1 %1413  ;;  %8629 = vmatprep.subr.bf16.mxu0 %v8628_v9  ;;  %v15335_v9 = vld [vmem:[#allocation37_spill] sm:$0xff] }
 0x2ba   :  { %1243 = vrot.lane.b32.xlu1 %v1209_v24, %s15233_s18  ;;  %v15332_v24 = vld [vmem:[#allocation21_spill] sm:$0xff] }
 0x2bb   :  { %v1477_v33 = vmul.f32 %v15332_v24, %v11585_v1  ;;  %v1478_v38 = vmul.f32 %v15332_v24, %v11607_v8 }
 0x2bd   :  { %1417 = vrot.lane.b32.xlu0 %v1384_v62, %s15126_s26  ;;  %v11753_v14 = vpop.permute.xlu1 %1508  ;;  %v1570_v62 = vmul.f32 %v15239_v54, %v11585_v1 }
 0x2be   :  { %1331 = vrot.lane.b32.xlu1 %v1297_v17, %s15235_s17  ;;  %15334 = vst [vmem:[#allocation68_spill] sm:$0xff] %v11753_v14  ;;  %v198_v17 = vsel %vm15032_vm0, %v15335_v9, %v11536_v28  ;;  %v11774_v9 = vpop.permute.xlu0 %1603 }
 0x2bf   :  { %15339 = vst [vmem:[#allocation64_spill] sm:$0xff] %v11774_v9 }
 0x2c1   :  { %1512 = vrot.lane.b32.xlu0 %v1477_v33, %s15129_s23  ;;  %v15336_v33 = vld [vmem:[#allocation31_spill] sm:$0xff]  ;;  %v11785_v43 = vpop.permute.xlu1 %1601 }
 0x2c2   :  { %1419 = vrot.lane.b32.xlu1 %v1385_v26, %s15126_s26  ;;  %v121_v4 = vmul.f32 %v15337_v52, %v15336_v33  ;;  %v15338_v26 = vld [vmem:[#allocation41_spill] sm:$0xff]  ;;  %v122_v14 = vmul.f32 %v15213_v25, %v15336_v33  ;;  %v287_v52 = vsel %vm15006_vm1, %v11557_v39, %v11577_v57  ;;  %v1571_v25 = vmul.f32 %v15239_v54, %v11607_v8 }
 0x2c3   :  { %v286_v12 = vsel %vm15006_vm1, %v15338_v26, %v11557_v39  ;;  %v374_v26 = vsel %vm15007_vm2, %v10889_v58, %v11575_v51  ;;  %v462_v39 = vsel %vm15341_vm3, %v10899_v18, %v11592_v23  ;;  %v1756_v58 = vmul.f32 %v15244_v63, %v11585_v1 }
 0x2c4   :  { %v221_v21 = vadd.f32 %v198_v17, %v121_v4  ;;  %v222_v28 = vadd.f32 %v199_v22, %v122_v14  ;;  %v375_v4 = vsel %vm15007_vm2, %v11575_v51, %v11594_v55  ;;  %vm15343_vm1 = vcmask 818176  }
 0x2c5   :  { %1605 = vrot.lane.b32.xlu0 %v1570_v62, %s15132_s24  ;;  %v15340_v62 = vld [vmem:[#allocation28_spill] sm:$0xff]  ;;  %v550_v51 = vsel %vm15343_vm1, %v10909_v30, %v11609_v44  ;;  %vm15345_vm3 = vmmov %vm15343_vm1  ;;  %v1849_v30 = vmul.f32 %v15246_v15, %v11585_v1  ;;  %vm15350_vm2 = vcmask 793600  }
 0x2c6   :  { %1514 = vrot.lane.b32.xlu1 %v1478_v38, %s15129_s23  ;;  %v1663_v24 = vmul.f32 %v15340_v62, %v11585_v1  ;;  %v309_v38 = vadd.f32 %v286_v12, %v221_v21  ;;  %v310_v17 = vadd.f32 %v287_v52, %v222_v28  ;;  %v11805_v21 = vpop.permute.xlu0 %1696  ;;  %v1664_v18 = vmul.f32 %v15340_v62, %v11607_v8 }
 0x2c7   :  { %15344 = vst [vmem:[#allocation71_spill] sm:$0xff] %v11805_v21  ;;  %v551_v52 = vsel %vm15345_vm3, %v11609_v44, %v11621_v37  ;;  %vm15348_vm3 = vcmask 801792  }
 0x2c8   :  { %v397_v22 = vadd.f32 %v374_v26, %v309_v38  ;;  %v398_v12 = vadd.f32 %v375_v4, %v310_v17  ;;  %v11816_v26 = vpop.permute.xlu1 %1694  ;;  %v726_v44 = vsel %vm15348_vm3, %v10929_v0, %v11629_v6  ;;  %v1942_v0 = vmul.f32 %v15249_v34, %v11585_v1 }
 0x2c9   :  { %1698 = vrot.lane.b32.xlu0 %v1663_v24, %s15134_s22  ;;  %v463_v24 = vsel %vm15342_vm4, %v11592_v23, %v11611_v56  ;;  %vm15346_vm4 = vcmask 809984  }
 0x2ca   :  { %1607 = vrot.lane.b32.xlu1 %v1571_v25, %s15132_s24  ;;  %v485_v14 = vadd.f32 %v462_v39, %v397_v22  ;;  %v486_v28 = vadd.f32 %v463_v24, %v398_v12  ;;  %v638_v23 = vsel %vm15346_vm4, %v10919_v29, %v11619_v61  ;;  %vm15347_vm1 = vmmov %vm15346_vm4  ;;  %v1757_v29 = vmul.f32 %v15244_v63, %v11607_v8  ;;  %v11836_v22 = vpop.permute.xlu0 %1789 }
 0x2cb   :  { %v639_v38 = vsel %vm15347_vm1, %v11619_v61, %v11631_v42  ;;  %vm15349_vm4 = vmmov %vm15348_vm3  ;;  %v814_v61 = vsel %vm15350_vm2, %v10939_v36, %v11639_v46  ;;  %15351 = vst [vmem:[#allocation67_spill] sm:$0xff] %v11836_v22  ;;  %vm15353_vm3 = vcmask 785408   ;;  %v1850_v36 = vmul.f32 %v15246_v15, %v11607_v8 }
 0x2cc   :  { %v573_v25 = vadd.f32 %v550_v51, %v485_v14  ;;  %v574_v4 = vadd.f32 %v551_v52, %v486_v28  ;;  %v727_v39 = vsel %vm15349_vm4, %v11629_v6, %v11641_v31  ;;  %vm15352_vm1 = vmmov %vm15350_vm2  ;;  %v902_v6 = vsel %vm15353_vm3, %v10947_v20, %v11654_v60 }
 0x2cd   :  { %1791 = vrot.lane.b32.xlu0 %v1756_v58, %s15137_s21  ;;  %v815_v12 = vsel %vm15352_vm1, %v11639_v46, %v11649_v11  ;;  %vm15354_vm2 = vmmov %vm15353_vm3  ;;  %vm15355_vm4 = vcmask 588800   ;;  %v2035_v20 = vmul.f32 %v9927_v5, %v11585_v1  ;;  %vm15357_vm3 = vcmask 580608  }
 0x2ce   :  { %1700 = vrot.lane.b32.xlu1 %v1664_v18, %s15134_s22  ;;  %v661_v17 = vadd.f32 %v638_v23, %v573_v25  ;;  %v662_v58 = vadd.f32 %v639_v38, %v574_v4  ;;  %v11847_v18 = vpop.permute.xlu1 %1787  ;;  %v903_v52 = vsel %vm15354_vm2, %v11654_v60, %v11659_v40  ;;  %v990_v46 = vsel %vm15355_vm4, %v10957_v19, %v11667_v13  ;;  %vm15356_vm1 = vmmov %vm15355_vm4  ;;  %v11867_v38 = vpop.permute.xlu0 %1882 }
 0x2cf   :  { %v1078_v60 = vsel %vm15357_vm3, %v10967_v35, %v11682_v45  ;;  %15358 = vst [vmem:[#allocation73_spill] sm:$0xff] %v11867_v38  ;;  %v1943_v19 = vmul.f32 %v15249_v34, %v11607_v8  ;;  %vm15359_vm2 = vmmov %vm15357_vm3  ;;  %vm15360_vm4 = vcmask 572416   ;;  %v2128_v35 = vmul.f32 %v15264_v2, %v11585_v1 }
 0x2d0   :  { %v749_v24 = vadd.f32 %v726_v44, %v661_v17  ;;  %v750_v51 = vadd.f32 %v727_v39, %v662_v58  ;;  %v1079_v44 = vsel %vm15359_vm2, %v11682_v45, %v11677_v27  ;;  %v1254_v45 = vsel %vm1247_vm12, %v10989_v3, %v11708_v53  ;;  %v2619_v3 = vld [vmem:[%s14750_s5 + $0x490] sm:$0xff] }
 0x2d1   :  { %1884 = vrot.lane.b32.xlu0 %v1849_v30, %s15138_s20  ;;  %v991_v30 = vsel %vm15356_vm1, %v11667_v13, %v11669_v10  ;;  %v1166_v13 = vsel %vm15360_vm4, %v10975_v47, %v11695_v16  ;;  %vm15361_vm1 = vmmov %vm15360_vm4  ;;  %v2036_v47 = vmul.f32 %v9927_v5, %v11607_v8  ;;  %vm15362_vm3 = vcmask 556032  }
 0x2d2   :  { %1793 = vrot.lane.b32.xlu1 %v1757_v29, %s15137_s21  ;;  %v837_v14 = vadd.f32 %v814_v61, %v749_v24  ;;  %v838_v28 = vadd.f32 %v815_v12, %v750_v51  ;;  %v1881_v17 = vpop.permute.xlu1 %1880  ;;  %v1167_v58 = vsel %vm15361_vm1, %v11695_v16, %v11690_v32  ;;  %v1255_v24 = vsel %vm1247_vm12, %v11708_v53, %v11703_v41  ;;  %v11896_v51 = vpop.permute.xlu0 %1975  ;;  %vm15364_vm2 = vmmov %vm15362_vm3  ;;  %v2622_v53 = vld [vmem:[%s14750_s5 + $0x4a8] sm:$0xff]  ;;  %s9577_s21 = smov 101  }
 0x2d3   :  { %v1342_v16 = vsel %vm15362_vm3, %v11001_v48, %v11721_v59  ;;  %15363 = vst [vmem:[#allocation75_spill] sm:$0xff] %v11896_v51  ;;  %v1430_v48 = vsel %vm1423_vm14, %v11027_v50, %v11740_v7  ;;  %v15368_v50 = vld [vmem:[#allocation65_spill] sm:$0xff]  ;;  %vm15381_vm4 = vcmask 818176   ;;  %vm15426_vm3 = vcmask 1031168  }
 0x2d4   :  { %v925_v23 = vadd.f32 %v902_v6, %v837_v14  ;;  %v926_v25 = vadd.f32 %v903_v52, %v838_v28  ;;  %v2129_v28 = vmul.f32 %v15264_v2, %v11607_v8  ;;  %vm15382_vm1 = vmmov %vm15381_vm4 }
 0x2d5   :  { %1977 = vrot.lane.b32.xlu0 %v1942_v0, %s15253_s28 }
 0x2d6   :  { %1886 = vrot.lane.b32.xlu1 %v1850_v36, %s15138_s20  ;;  %v1013_v4 = vadd.f32 %v990_v46, %v925_v23  ;;  %v1014_v29 = vadd.f32 %v991_v30, %v926_v25  ;;  %v1343_v36 = vsel %vm15364_vm2, %v11721_v59, %v11716_v49  ;;  %v1974_v52 = vpop.permute.xlu1 %1973  ;;  %v8954_v46 = vpack.c.bf16 %v2622_v53, %v2619_v3  ;;  %v15365_v23 = vld [vmem:[#allocation57_spill] sm:$0xff]  ;;  %v15366_v25 = vld [vmem:[#allocation68_spill] sm:$0xff]  ;;  %s9571_s20 = smov 114  }
 0x2d7   :  { %v1431_v30 = vsel %vm1423_vm14, %v11740_v7, %v15365_v23  ;;  %v15371_v7 = vld [vmem:[#allocation32_spill] sm:$0xff]  ;;  %v1714_v3 = vsel %vm1706_vm7, %v11816_v26, %v11805_v21  ;;  %vm15427_vm2 = vcmask 1022976  }
 0x2d8   :  { %v1101_v39 = vadd.f32 %v1078_v60, %v1013_v4  ;;  %v1102_v61 = vadd.f32 %v1079_v44, %v1014_v29  ;;  %v15367_v60 = vld [vmem:[#allocation50_spill] sm:$0xff]  ;;  %8955 = vmatprep.subr.bf16.mxu1 %v8954_v46  ;;  %v1528_v44 = vsel %vm1520_vm15, %v15366_v25, %v15368_v50 }
 0x2d9   :  { %2070 = vrot.lane.b32.xlu0 %v2035_v20, %s15259_s16 }
 0x2da   :  { %1979 = vrot.lane.b32.xlu1 %v1943_v19, %s15253_s28  ;;  %v1189_v0 = vadd.f32 %v1166_v13, %v1101_v39  ;;  %v1190_v12 = vadd.f32 %v1167_v58, %v1102_v61  ;;  %v1527_v19 = vsel %vm1520_vm15, %v15367_v60, %v15366_v25  ;;  %v15369_v13 = vld [vmem:[#allocation45_spill] sm:$0xff]  ;;  %v11926_v39 = vpop.permute.xlu0 %2068  ;;  %v2221_v58 = vmul.f32 %v15371_v7, %v11585_v1  ;;  %v15376_v25 = vld [vmem:[#allocation52_spill] sm:$0xff]  ;;  %s9582_s28 = smov 88  }
 0x2db   :  { %15370 = vst [vmem:[#allocation72_spill] sm:$0xff] %v11926_v39  ;;  %v1992_v60 = vsel %vm1985_vm10, %v15376_v25, %v1974_v52 }
 0x2dc   :  { %v1277_v6 = vadd.f32 %v1254_v45, %v1189_v0  ;;  %v1278_v14 = vadd.f32 %v1255_v24, %v1190_v12  ;;  %v1621_v45 = vsel %vm1613_vm6, %v11785_v43, %v11774_v9  ;;  %v15372_v0 = vld [vmem:[#allocation48_spill] sm:$0xff]  ;;  %v2067_v12 = vpop.permute.xlu1 %2066 }
 0x2dd   :  { %2163 = vrot.lane.b32.xlu0 %v2128_v35, %s15267_s15  ;;  %v1620_v35 = vsel %vm1613_vm6, %v15369_v13, %v11785_v43  ;;  %v1713_v24 = vsel %vm1706_vm7, %v15372_v0, %v11816_v26  ;;  %v1807_v43 = vsel %vm1799_vm8, %v11847_v18, %v11836_v22  ;;  %v1900_v26 = vsel %vm1892_vm5, %v1881_v17, %v11867_v38  ;;  %v15417_v22 = vld [vmem:[#allocation27_spill] sm:$0xff] }
 0x2de   :  { %2072 = vrot.lane.b32.xlu1 %v2036_v47, %s15259_s16  ;;  %v1365_v20 = vadd.f32 %v1342_v16, %v1277_v6  ;;  %v1366_v59 = vadd.f32 %v1343_v36, %v1278_v14  ;;  %v15373_v36 = vld [vmem:[#allocation56_spill] sm:$0xff]  ;;  %s9583_s16 = smov 80  }
 0x2df   :  { %v1806_v53 = vsel %vm1799_vm8, %v15373_v36, %v11847_v18  ;;  %v2576_v36 = vld [vmem:[%s14750_s5 + $0x338] sm:$0xff] }
 0x2e0   :  { %v1453_v4 = vadd.f32 %v1430_v48, %v1365_v20  ;;  %v1454_v29 = vadd.f32 %v1431_v30, %v1366_v59  ;;  %v11948_v20 = vpop.permute.xlu0 %2161 }
 0x2e1   :  { %15375 = vst [vmem:[#allocation76_spill] sm:$0xff] %v11948_v20 }
 0x2e2   :  { %2165 = vrot.lane.b32.xlu1 %v2129_v28, %s15267_s15  ;;  %v1551_v61 = vadd.f32 %v1527_v19, %v1453_v4  ;;  %v1552_v47 = vadd.f32 %v1528_v44, %v1454_v29  ;;  %v15374_v28 = vld [vmem:[#allocation53_spill] sm:$0xff]  ;;  %v2160_v19 = vpop.permute.xlu1 %2159  ;;  %v1993_v44 = vsel %vm1985_vm10, %v1974_v52, %v11896_v51  ;;  %v15377_v29 = vld [vmem:[#allocation59_spill] sm:$0xff] }
 0x2e3   :  { %v1899_v46 = vsel %vm1892_vm5, %v15374_v28, %v1881_v17  ;;  %v2085_v13 = vsel %vm2078_vm11, %v15377_v29, %v2067_v12  ;;  %v15378_v17 = vld [vmem:[#allocation60_spill] sm:$0xff]  ;;  %v2572_v52 = vld [vmem:[%s14750_s5 + $0x318] sm:$0xff]  ;;  %v2579_v28 = vld [vmem:[%s14750_s5 + $0x350] sm:$0xff] }
 0x2e4   :  { %v1644_v16 = vadd.f32 %v1620_v35, %v1551_v61  ;;  %v1645_v6 = vadd.f32 %v1621_v45, %v1552_v47  ;;  %v2086_v61 = vsel %vm2078_vm11, %v2067_v12, %v11926_v39  ;;  %v2178_v47 = vsel %vm2171_vm9, %v15378_v17, %v2160_v19  ;;  %v15384_v29 = vld [vmem:[#allocation62_spill] sm:$0xff]  ;;  %v2618_v39 = vld [vmem:[%s14750_s5 + $0x488] sm:$0xff] }
 0x2e6   :  { %2256 = vrot.lane.b32.xlu1 %v2221_v58, %s15305_s30  ;;  %v1737_v14 = vadd.f32 %v1713_v24, %v1644_v16  ;;  %v1738_v48 = vadd.f32 %v1714_v3, %v1645_v6  ;;  %v2569_v24 = vld [vmem:[%s14750_s5 + $0x300] sm:$0xff]  ;;  %v2179_v3 = vsel %vm2171_vm9, %v2160_v19, %v11948_v20 }
 0x2e8   :  { %v1830_v30 = vadd.f32 %v1806_v53, %v1737_v14  ;;  %v1831_v59 = vadd.f32 %v1807_v43, %v1738_v48  ;;  %v2571_v53 = vld [vmem:[%s14750_s5 + $0x310] sm:$0xff]  ;;  %v2574_v14 = vld [vmem:[%s14750_s5 + $0x328] sm:$0xff] }
 0x2ea   :  { %v1923_v4 = vadd.f32 %v1899_v46, %v1830_v30  ;;  %v1924_v18 = vadd.f32 %v1900_v26, %v1831_v59  ;;  %v2625_v46 = vld [vmem:[%s14750_s5 + $0x4c0] sm:$0xff]  ;;  %v2628_v30 = vld [vmem:[%s14750_s5 + $0x4d8] sm:$0xff] }
 0x2ec   :  { %v2016_v58 = vadd.f32 %v1992_v60, %v1923_v4  ;;  %v2017_v45 = vadd.f32 %v1993_v44, %v1924_v18  ;;  %v8630_v60 = vpack.c.bf16 %v2572_v52, %v2569_v24  ;;  %v15383_v44 = vld [vmem:[#allocation66_spill] sm:$0xff]  ;;  %v2582_v24 = vld [vmem:[%s14750_s5 + $0x368] sm:$0xff]  ;;  %v8958_v52 = vpack.c.bf16 %v2628_v30, %v2625_v46  ;;  %v15386_v30 = vld [vmem:[#allocation39_spill] sm:$0xff] }
 0x2ed   :  { %v2634_v46 = vld [vmem:[%s14750_s5 + $0x508] sm:$0xff] }
 0x2ee   :  { %v2109_v16 = vadd.f32 %v2085_v13, %v2016_v58  ;;  %v2110_v43 = vadd.f32 %v2086_v61, %v2017_v45  ;;  %v8956_v58 = vpack.c.bf16 %v2574_v14, %v2571_v53  ;;  %v15385_v61 = vld [vmem:[#allocation47_spill] sm:$0xff] }
 0x2ef   :  { %v2415_v35 = vpop.permute.xlu0 %2414  ;;  %v2577_v14 = vld [vmem:[%s14750_s5 + $0x340] sm:$0xff] }
 0x2f0   :  { %v11962_v0 = vpop.permute.xlu1 %9453  ;;  %v2202_v26 = vadd.f32 %v2178_v47, %v2109_v16  ;;  %v2203_v19 = vadd.f32 %v2179_v3, %v2110_v43  ;;  %v8632_v47 = vpack.c.bf16 %v2579_v28, %v2576_v36  ;;  %v2575_v16 = vld [vmem:[%s14750_s5 + $0x330] sm:$0xff]  ;;  %v2585_v36 = vld [vmem:[%s14750_s5 + $0x380] sm:$0xff]  ;;  %v2580_v43 = vld [vmem:[%s14750_s5 + $0x358] sm:$0xff] }
 0x2f1   :  { %15379 = vst [vmem:[#allocation74_spill] sm:$0xff] %v11962_v0  ;;  %v15014_v12 = vunpack.i.h.bf16 %v11962_v0  ;;  %v9455_v6 = vunpack.i.l.bf16 %v11962_v0  ;;  %v2631_v28 = vld [vmem:[%s14750_s5 + $0x4f0] sm:$0xff] }
 0x2f3   :  { %v11983_v48 = vpop.permute.xlu0 %2254  ;;  %v2439_v59 = vsel %vm15381_vm4, %v9455_v6, %v15014_v12  ;;  %v2438_v25 = vsel %vm15382_vm1, %v2415_v35, %v9455_v6  ;;  %v2578_v35 = vld [vmem:[%s14750_s5 + $0x348] sm:$0xff]  ;;  %vm15428_vm4 = vmmov %vm15426_vm3  ;;  %vm15429_vm1 = vcmask 1014784  }
 0x2f4   :  { %15380 = vst [vmem:[#allocation78_spill] sm:$0xff] %v11983_v48  ;;  %v2253_v4 = vpop.permute.xlu1 %2252  ;;  %v2462_v18 = vmax.f32 %v15383_v44, %v2439_v59  ;;  %v2461_v13 = vmax.f32 %v15384_v29, %v2438_v25  ;;  %v2581_v29 = vld [vmem:[%s14750_s5 + $0x360] sm:$0xff] }
 0x2f5   :  { %v2271_v45 = vsel %vm2264_vm13, %v15385_v61, %v2253_v4  ;;  %v2272_v17 = vsel %vm2264_vm13, %v2253_v4, %v11983_v48  ;;  %v2612_v48 = vld [vmem:[%s14750_s5 + $0x458] sm:$0xff] }
 0x2f6   :  { %v2295_v3 = vadd.f32 %v2271_v45, %v2202_v26  ;;  %v2296_v6 = vadd.f32 %v2272_v17, %v2203_v19  ;;  %3084 = vmatprep.mubr.f32.mxu0 %v2462_v18  ;;  %3510 = vmatprep.mubr.f32.mxu1 %v2462_v18  ;;  %v8634_v19 = vpack.c.bf16 %v2578_v35, %v2575_v16  ;;  %v2583_v35 = vld [vmem:[%s14750_s5 + $0x370] sm:$0xff] }
 0x2f7   :  { %v12013_v53 = vpop.permute.xlu0 %185  ;;  %3085 = vmatmul.mubr.f32.vlgmr.msra.gmra.mrb[0].mxu0 %v2461_v13  ;;  %3511 = vmatmul.mubr.f32.vlgmr.msra.gmra.mrb[0].mxu1 %v2461_v13  ;;  %v8636_v18 = vpack.c.bf16 %v2585_v36, %v2582_v24  ;;  %v2584_v13 = vld [vmem:[%s14750_s5 + $0x378] sm:$0xff]  ;;  %v8962_v16 = vpack.c.bf16 %v2634_v46, %v2631_v28  ;;  %v2586_v24 = vld [vmem:[%s14750_s5 + $0x388] sm:$0xff] }
 0x2f8   :  { %v12031_v26 = vadd.f32 %v15386_v30, %v2295_v3  ;;  %v12034_v59 = vadd.f32 %v15386_v30, %v2296_v6  ;;  %v12036_v25 = vpop.permute.xlu1 %9458  ;;  %8631 = vmatpush1.bf16.msra.mxu0 %v8630_v60  ;;  %8957 = vmatpush3.bf16.msra.mxu1 %v8956_v58  ;;  %v2588_v60 = vld [vmem:[%s14750_s5 + $0x398] sm:$0xff]  ;;  %v8960_v58 = vpack.c.bf16 %v2580_v43, %v2577_v14  ;;  %v2637_v14 = vld [vmem:[%s14750_s5 + $0x520] sm:$0xff]  ;;  %v15395_v45 = vld [vmem:[#allocation69_spill] sm:$0xff] }
 0x2f9   :  { %15389 = vst [vmem:[#allocation86_spill] sm:$0xff] %v12036_v25  ;;  %v15015_v4 = vunpack.i.h.bf16 %v12036_v25  ;;  %v9460_v44 = vunpack.i.l.bf16 %v12036_v25  ;;  %8633 = vmatprep.subr.bf16.mxu0 %v8632_v47  ;;  %8959 = vmatprep.subr.bf16.mxu1 %v8958_v52  ;;  %v2591_v47 = vld [vmem:[%s14750_s5 + $0x3b0] sm:$0xff]  ;;  %v15390_v52 = vld [vmem:[#allocation55_spill] sm:$0xff]  ;;  %v8638_v0 = vpack.c.bf16 %v2584_v13, %v2581_v29 }
 0x2fa   :  { %15387 = vst [vmem:[#allocation80_spill] sm:$0xff] %v12031_v26  ;;  %15388 = vst [vmem:[#allocation77_spill] sm:$0xff] %v12034_v59  ;;  %v15391_v3 = vunpack.i.l.bf16 %v15390_v52  ;;  %v2640_v43 = vld [vmem:[%s14750_s5 + $0x538] sm:$0xff]  ;;  %v15396_v52 = vmax.f32 %v15395_v45, 0.0  ;;  %v8640_v25 = vpack.c.bf16 %v2591_v47, %v2588_v60  ;;  %v2590_v45 = vld [vmem:[%s14750_s5 + $0x3a8] sm:$0xff] }
 0x2fb   :  { %v12051_v17 = vpop.permute.xlu0 %273  ;;  %v2371_v36 = vsel %vm15032_vm0, %v9460_v44, %v15015_v4  ;;  %v15392_v28 = vld [vmem:[#allocation46_spill] sm:$0xff]  ;;  %v15399_v4 = vmax.f32 %v12034_v59, 0.0  ;;  %v2597_v60 = vld [vmem:[%s14750_s5 + $0x3e0] sm:$0xff] }
 0x2fc   :  { %v2370_v6 = vsel %vm15032_vm0, %v15391_v3, %v9460_v44  ;;  %v15393_v46 = vmax.f32 %v15392_v28, 0.0  ;;  %v12080_v61 = vmax.f32 %v15396_v52, %v2371_v36  ;;  %v12082_v3 = vpop.permute.xlu1 %187  ;;  %v15398_v44 = vmax.f32 %v12031_v26, 0.0  ;;  %8635 = vmatpush1.bf16.msra.mxu0 %v8634_v19  ;;  %v2594_v36 = vld [vmem:[%s14750_s5 + $0x3c8] sm:$0xff]  ;;  %8961 = vmatpush3.bf16.msra.mxu1 %v8960_v58  ;;  %v2592_v47 = vld [vmem:[%s14750_s5 + $0x3b8] sm:$0xff] }
 0x2fd   :  { %8637 = vmatprep.subr.bf16.mxu0 %v8636_v18  ;;  %v8964_v28 = vpack.c.bf16 %v2586_v24, %v2583_v35  ;;  %v15400_v18 = vld [vmem:[#allocation5_spill] sm:$0xff]  ;;  %8963 = vmatprep.subr.bf16.mxu1 %v8962_v16  ;;  %v8966_v58 = vpack.c.bf16 %v2640_v43, %v2637_v14  ;;  %v15402_v16 = vld [vmem:[#allocation10_spill] sm:$0xff] }
 0x2fe   :  { %v12076_v12 = vmax.f32 %v15393_v46, %v2370_v6  ;;  %15397 = vst [vmem:[#allocation79_spill] sm:$0xff] %v12080_v61  ;;  %v9467_v30 = vpack.i.bf16 %v15399_v4, %v15398_v44  ;;  %v2587_v6 = vld [vmem:[%s14750_s5 + $0x390] sm:$0xff]  ;;  %v12105_v4 = vld [vmem:[%s14745_s0 + $0x8] sm:$0x1f]  ;;  %v15401_v29 = vsub.s32 3, %v15400_v18  ;;  %v8644_v44 = vpack.c.bf16 %v2597_v60, %v2594_v36  ;;  %v2596_v59 = vld [vmem:[%s14750_s5 + $0x3d8] sm:$0xff] }
 0x2ff   :  { %v12097_v46 = vpop.permute.xlu0 %361  ;;  %v2643_v35 = vld [vmem:[%s14750_s5 + $0x550] sm:$0xff]  ;;  %v2646_v24 = vld [vmem:[%s14750_s5 + $0x568] sm:$0xff]  ;;  %v8642_v43 = vpack.c.bf16 %v2590_v45, %v2587_v6  ;;  %v2652_v60 = vld [vmem:[%s14750_s5 + $0x598] sm:$0xff]  ;;  %v15418_v21 = vsub.s32 4, %v15400_v18 }
 0x300   :  { %15394 = vst [vmem:[#allocation87_spill] sm:$0xff] %v12076_v12  ;;  %9468 = vrot.lane.b32.xlu1 %v9467_v30, %s15307_s14  ;;  %v9462_v19 = vpack.i.bf16 %v12080_v61, %v12076_v12  ;;  %v12110_v13 = vrot.slane %v12105_v4, %v15401_v29  ;;  %v2589_v30 = vld [vmem:[%s14750_s5 + $0x3a0] sm:$0xff]  ;;  %v12127_v52 = vpop.permute.xlu1 %275  ;;  %8639 = vmatpush1.bf16.msra.mxu0 %v8638_v0  ;;  %v2600_v61 = vld [vmem:[%s14750_s5 + $0x3f8] sm:$0xff]  ;;  %v2595_v45 = vld [vmem:[%s14750_s5 + $0x3d0] sm:$0xff] }
 0x301   :  { %8641 = vmatprep.subr.bf16.mxu0 %v8640_v25  ;;  %v2593_v29 = vld [vmem:[%s14750_s5 + $0x3c0] sm:$0xff]  ;;  %8965 = vmatpush3.bf16.msra.mxu1 %v8964_v28  ;;  %v2222_v0 = vmul.f32 %v15371_v7, %v11607_v8  ;;  %v2603_v25 = vld [vmem:[%s14750_s5 + $0x410] sm:$0xff]  ;;  %v8970_v6 = vpack.c.bf16 %v2646_v24, %v2643_v35  ;;  %v2598_v36 = vld [vmem:[%s14750_s5 + $0x3e8] sm:$0xff] }
 0x302   :  { %9463 = vrot.lane.b32.xlu0 %v9462_v19, %s15299_s10  ;;  %v242_v14 = vmul.f32 %v15402_v16, %v12110_v13  ;;  %v8968_v19 = vpack.c.bf16 %v2592_v47, %v2589_v30  ;;  %8967 = vmatprep.subr.bf16.mxu1 %v8966_v58  ;;  %v2649_v28 = vld [vmem:[%s14750_s5 + $0x580] sm:$0xff]  ;;  %v8646_v35 = vpack.c.bf16 %v2596_v59, %v2593_v29  ;;  %v2599_v16 = vld [vmem:[%s14750_s5 + $0x3f0] sm:$0xff]  ;;  %v2606_v8 = vld [vmem:[%s14750_s5 + $0x428] sm:$0xff] }
 0x303   :  { %v12141_v12 = vpop.permute.xlu0 %449  ;;  %v15403_v58 = vld [vmem:[#allocation12_spill] sm:$0xff]  ;;  %v8648_v24 = vpack.c.bf16 %v2603_v25, %v2600_v61  ;;  %v2655_v25 = vld [vmem:[%s14750_s5 + $0x5b0] sm:$0xff] }
 0x304   :  { %277 = vrot.lane.b32.xlu1 %v242_v14, %s15311_s1  ;;  %v12161_v30 = vpop.permute.xlu1 %363  ;;  %v418_v47 = vmul.f32 %v15403_v58, %v12110_v13  ;;  %8643 = vmatpush1.bf16.msra.mxu0 %v8642_v43  ;;  %v2602_v14 = vld [vmem:[%s14750_s5 + $0x408] sm:$0xff]  ;;  %v2609_v43 = vld [vmem:[%s14750_s5 + $0x440] sm:$0xff]  ;;  %v2647_v18 = vld [vmem:[%s14750_s5 + $0x570] sm:$0xff] }
 0x305   :  { %8645 = vmatprep.subr.bf16.mxu0 %v8644_v44  ;;  %8969 = vmatpush3.bf16.msra.mxu1 %v8968_v19  ;;  %v15404_v59 = vld [vmem:[#allocation8_spill] sm:$0xff]  ;;  %v8974_v44 = vpack.c.bf16 %v2652_v60, %v2649_v28  ;;  %v2604_v19 = vld [vmem:[%s14750_s5 + $0x418] sm:$0xff]  ;;  %v8650_v60 = vpack.c.bf16 %v2602_v14, %v2599_v16  ;;  %v8652_v58 = vpack.c.bf16 %v2609_v43, %v2606_v8  ;;  %v2607_v14 = vld [vmem:[%s14750_s5 + $0x430] sm:$0xff] }
 0x306   :  { %2258 = vrot.lane.b32.xlu0 %v2222_v0, %s15305_s30  ;;  %v8972_v0 = vpack.c.bf16 %v2598_v36, %v2595_v45  ;;  %v154_v61 = vmul.f32 %v15404_v59, %v12110_v13  ;;  %8971 = vmatprep.subr.bf16.mxu1 %v8970_v6  ;;  %v2601_v29 = vld [vmem:[%s14750_s5 + $0x400] sm:$0xff]  ;;  %v2658_v45 = vld [vmem:[%s14750_s5 + $0x5c8] sm:$0xff]  ;;  %v2608_v59 = vld [vmem:[%s14750_s5 + $0x438] sm:$0xff] }
 0x307   :  { %v12175_v26 = vpop.permute.xlu0 %537  ;;  %v15405_v6 = vld [vmem:[#allocation15_spill] sm:$0xff]  ;;  %v8978_v16 = vpack.c.bf16 %v2658_v45, %v2655_v25 }
 0x308   :  { %453 = vrot.lane.b32.xlu1 %v418_v47, %s15315_s13  ;;  %v12195_v36 = vpop.permute.xlu1 %451  ;;  %v594_v28 = vmul.f32 %v15405_v6, %v12110_v13  ;;  %8647 = vmatpush1.bf16.msra.mxu0 %v8646_v35  ;;  %v2605_v47 = vld [vmem:[%s14750_s5 + $0x420] sm:$0xff] }
 0x309   :  { %8649 = vmatprep.subr.bf16.mxu0 %v8648_v24  ;;  %8973 = vmatpush3.bf16.msra.mxu1 %v8972_v0  ;;  %v15406_v8 = vld [vmem:[#allocation11_spill] sm:$0xff]  ;;  %v2615_v24 = vld [vmem:[%s14750_s5 + $0x470] sm:$0xff]  ;;  %v2610_v0 = vld [vmem:[%s14750_s5 + $0x448] sm:$0xff]  ;;  %v8654_v45 = vpack.c.bf16 %v2608_v59, %v2605_v47 }
 0x30a   :  { %189 = vrot.lane.b32.xlu0 %v154_v61, %s15307_s14  ;;  %v8976_v61 = vpack.c.bf16 %v2604_v19, %v2601_v29  ;;  %v330_v35 = vmul.f32 %v15406_v8, %v12110_v13  ;;  %8975 = vmatprep.subr.bf16.mxu1 %v8974_v44  ;;  %v2661_v43 = vld [vmem:[%s14750_s5 + $0x5e0] sm:$0xff]  ;;  %v2664_v29 = vld [vmem:[%s14750_s5 + $0x5f8] sm:$0xff]  ;;  %v8656_v6 = vpack.c.bf16 %v2615_v24, %v2612_v48  ;;  %v2614_v8 = vld [vmem:[%s14750_s5 + $0x468] sm:$0xff] }
 0x30b   :  { %v12209_v20 = vpop.permute.xlu0 %625  ;;  %v15407_v44 = vld [vmem:[#allocation16_spill] sm:$0xff]  ;;  %v15408_v48 = vld [vmem:[#allocation13_spill] sm:$0xff]  ;;  %v8982_v47 = vpack.c.bf16 %v2664_v29, %v2661_v43  ;;  %v2620_v29 = vld [vmem:[%s14750_s5 + $0x498] sm:$0xff] }
 0x30c   :  { %629 = vrot.lane.b32.xlu1 %v594_v28, %s15318_s12  ;;  %v12229_v19 = vpop.permute.xlu1 %539  ;;  %v770_v25 = vmul.f32 %v15407_v44, %v12110_v13  ;;  %8651 = vmatpush1.bf16.msra.mxu0 %v8650_v60  ;;  %v2611_v28 = vld [vmem:[%s14750_s5 + $0x450] sm:$0xff]  ;;  %v506_v60 = vmul.f32 %v15408_v48, %v12110_v13  ;;  %v2613_v59 = vld [vmem:[%s14750_s5 + $0x460] sm:$0xff]  ;;  %s9576_s12 = smov 102  }
 0x30d   :  { %8653 = vmatprep.subr.bf16.mxu0 %v8652_v58  ;;  %8977 = vmatpush3.bf16.msra.mxu1 %v8976_v61  ;;  %v2621_v58 = vld [vmem:[%s14750_s5 + $0x4a0] sm:$0xff]  ;;  %v2616_v61 = vld [vmem:[%s14750_s5 + $0x478] sm:$0xff]  ;;  %v8658_v44 = vpack.c.bf16 %v2614_v8, %v2611_v28  ;;  %v15411_v8 = vld [vmem:[#allocation25_spill] sm:$0xff] }
 0x30e   :  { %365 = vrot.lane.b32.xlu0 %v330_v35, %s15313_s27  ;;  %v8980_v35 = vpack.c.bf16 %v2610_v0, %v2607_v14  ;;  %8979 = vmatprep.subr.bf16.mxu1 %v8978_v16  ;;  %v15409_v14 = vld [vmem:[#allocation17_spill] sm:$0xff]  ;;  %v8660_v16 = vpack.c.bf16 %v2621_v58, %v2618_v39  ;;  %v2617_v43 = vld [vmem:[%s14750_s5 + $0x480] sm:$0xff]  ;;  %v2624_v39 = vld [vmem:[%s14750_s5 + $0x4b8] sm:$0xff] }
 0x30f   :  { %v12243_v51 = vpop.permute.xlu0 %713  ;;  %v946_v0 = vmul.f32 %v15409_v14, %v12110_v13  ;;  %v8662_v58 = vpack.c.bf16 %v2620_v29, %v2617_v43  ;;  %v2626_v14 = vld [vmem:[%s14750_s5 + $0x4c8] sm:$0xff] }
 0x310   :  { %805 = vrot.lane.b32.xlu1 %v770_v25, %s15322_s11  ;;  %v12257_v24 = vpop.permute.xlu1 %627  ;;  %8655 = vmatpush1.bf16.msra.mxu0 %v8654_v45  ;;  %v8984_v25 = vpack.c.bf16 %v2616_v61, %v2613_v59  ;;  %v2623_v61 = vld [vmem:[%s14750_s5 + $0x4b0] sm:$0xff]  ;;  %s9578_s11 = smov 92  }
 0x311   :  { %8657 = vmatprep.subr.bf16.mxu0 %v8656_v6  ;;  %8981 = vmatpush3.bf16.msra.mxu1 %v8980_v35  ;;  %v2627_v6 = vld [vmem:[%s14750_s5 + $0x4d0] sm:$0xff]  ;;  %v1122_v35 = vmul.f32 %v15411_v8, %v12110_v13  ;;  %v2632_v8 = vld [vmem:[%s14750_s5 + $0x4f8] sm:$0xff] }
 0x312   :  { %541 = vrot.lane.b32.xlu0 %v506_v60, %s15299_s10  ;;  %v15410_v60 = vld [vmem:[#allocation14_spill] sm:$0xff]  ;;  %8983 = vmatprep.subr.bf16.mxu1 %v8982_v47  ;;  %v8664_v59 = vpack.c.bf16 %v2627_v6, %v2624_v39  ;;  %v2629_v6 = vld [vmem:[%s14750_s5 + $0x4e0] sm:$0xff] }
 0x313   :  { %v12268_v48 = vpop.permute.xlu0 %801  ;;  %v682_v45 = vmul.f32 %v15410_v60, %v12110_v13  ;;  %v15412_v47 = vld [vmem:[#allocation22_spill] sm:$0xff] }
 0x314   :  { %981 = vrot.lane.b32.xlu1 %v946_v0, %s15227_s2  ;;  %v12279_v28 = vpop.permute.xlu1 %715  ;;  %8659 = vmatpush1.bf16.msra.mxu0 %v8658_v44  ;;  %v858_v0 = vmul.f32 %v15412_v47, %v12110_v13  ;;  %v2630_v44 = vld [vmem:[%s14750_s5 + $0x4e8] sm:$0xff] }
 0x315   :  { %8661 = vmatprep.subr.bf16.mxu0 %v8660_v16  ;;  %8985 = vmatpush3.bf16.msra.mxu1 %v8984_v25  ;;  %v2633_v16 = vld [vmem:[%s14750_s5 + $0x500] sm:$0xff] }
 0x316   :  { %717 = vrot.lane.b32.xlu0 %v682_v45, %s15320_s8  ;;  %v15413_v25 = vld [vmem:[#allocation20_spill] sm:$0xff]  ;;  %v8666_v45 = vpack.c.bf16 %v2626_v14, %v2623_v61  ;;  %v8668_v39 = vpack.c.bf16 %v2633_v16, %v2630_v44  ;;  %v15415_v14 = vld [vmem:[#allocation21_spill] sm:$0xff]  ;;  %v8670_v44 = vpack.c.bf16 %v2632_v8, %v2629_v6  ;;  %v1572_v8 = vmul.f32 %v15239_v54, %v12110_v13  ;;  %s15419_s8 = smov 40  }
 0x317   :  { %v12299_v43 = vpop.permute.xlu0 %889  ;;  %v1298_v60 = vmul.f32 %v15413_v25, %v12110_v13  ;;  %v2635_v25 = vld [vmem:[%s14750_s5 + $0x510] sm:$0xff] }
 0x318   :  { %1157 = vrot.lane.b32.xlu1 %v1122_v35, %s15231_s19  ;;  %v12301_v29 = vpop.permute.xlu1 %803  ;;  %8663 = vmatpush1.bf16.msra.mxu0 %v8662_v58  ;;  %v15414_v35 = vld [vmem:[#allocation18_spill] sm:$0xff]  ;;  %s9579_s19 = smov 91  }
 0x319   :  { %8665 = vmatprep.subr.bf16.mxu0 %v8664_v59  ;;  %v1034_v47 = vmul.f32 %v15414_v35, %v12110_v13  ;;  %v2636_v58 = vld [vmem:[%s14750_s5 + $0x518] sm:$0xff]  ;;  %v2639_v59 = vld [vmem:[%s14750_s5 + $0x530] sm:$0xff] }
 0x31a   :  { %893 = vrot.lane.b32.xlu0 %v858_v0, %s15324_s29  ;;  %v1479_v0 = vmul.f32 %v15415_v14, %v12110_v13  ;;  %v8672_v16 = vpack.c.bf16 %v2639_v59, %v2636_v58  ;;  %s9586_s29 = smov 77  }
 0x31b   :  { %v12332_v35 = vpop.permute.xlu0 %977 }
 0x31c   :  { %1333 = vrot.lane.b32.xlu1 %v1298_v60, %s15235_s17  ;;  %v12321_v61 = vpop.permute.xlu1 %891  ;;  %8667 = vmatpush1.bf16.msra.mxu0 %v8666_v45  ;;  %v2638_v60 = vld [vmem:[%s14750_s5 + $0x528] sm:$0xff]  ;;  %s9587_s17 = smov 76  }
 0x31d   :  { %8669 = vmatprep.subr.bf16.mxu0 %v8668_v39  ;;  %v2642_v45 = vld [vmem:[%s14750_s5 + $0x548] sm:$0xff]  ;;  %v2645_v39 = vld [vmem:[%s14750_s5 + $0x560] sm:$0xff]  ;;  %v8674_v58 = vpack.c.bf16 %v2638_v60, %v2635_v25  ;;  %v2651_v25 = vld [vmem:[%s14750_s5 + $0x590] sm:$0xff] }
 0x31e   :  { %1069 = vrot.lane.b32.xlu0 %v1034_v47, %s15229_s25  ;;  %v15416_v47 = vld [vmem:[#allocation19_spill] sm:$0xff]  ;;  %v8676_v59 = vpack.c.bf16 %v2645_v39, %v2642_v45  ;;  %v2650_v39 = vld [vmem:[%s14750_s5 + $0x588] sm:$0xff] }
 0x31f   :  { %v1210_v38 = vmul.f32 %v15416_v47, %v12110_v13  ;;  %v2644_v47 = vld [vmem:[%s14750_s5 + $0x558] sm:$0xff]  ;;  %v12368_v60 = vpop.permute.xlu0 %1065 }
 0x320   :  { %1516 = vrot.lane.b32.xlu1 %v1479_v0, %s15129_s23  ;;  %v12343_v6 = vpop.permute.xlu1 %979  ;;  %8671 = vmatpush1.bf16.msra.mxu0 %v8670_v44  ;;  %v2641_v0 = vld [vmem:[%s14750_s5 + $0x540] sm:$0xff]  ;;  %v12360_v44 = vrot.slane %v12105_v4, %v15418_v21 }
 0x321   :  { %8673 = vmatprep.subr.bf16.mxu0 %v8672_v16  ;;  %v2648_v16 = vld [vmem:[%s14750_s5 + $0x578] sm:$0xff]  ;;  %v8678_v21 = vpack.c.bf16 %v2644_v47, %v2641_v0  ;;  %v1758_v47 = vmul.f32 %v15244_v63, %v12110_v13 }
 0x322   :  { %1245 = vrot.lane.b32.xlu0 %v1210_v38, %s15233_s18  ;;  %v1386_v38 = vmul.f32 %v15417_v22, %v12110_v13  ;;  %v1665_v22 = vmul.f32 %v15340_v62, %v12110_v13  ;;  %v8680_v4 = vpack.c.bf16 %v2651_v25, %v2648_v16  ;;  %v2656_v25 = vld [vmem:[%s14750_s5 + $0x5b8] sm:$0xff]  ;;  %s9580_s18 = smov 90  }
 0x324   :  { %1609 = vrot.lane.b32.xlu1 %v1572_v8, %s15132_s24  ;;  %v12370_v45 = vpop.permute.xlu1 %1067  ;;  %8675 = vmatpush1.bf16.msra.mxu0 %v8674_v58  ;;  %v1480_v8 = vmul.f32 %v12360_v44, %v15415_v14  ;;  %v2654_v58 = vld [vmem:[%s14750_s5 + $0x5a8] sm:$0xff]  ;;  %v2653_v14 = vld [vmem:[%s14750_s5 + $0x5a0] sm:$0xff] }
 0x325   :  { %8677 = vmatprep.subr.bf16.mxu0 %v8676_v59  ;;  %v2657_v59 = vld [vmem:[%s14750_s5 + $0x5c0] sm:$0xff] }
 0x326   :  { %1421 = vrot.lane.b32.xlu0 %v1386_v38, %s15126_s26  ;;  %v8682_v38 = vpack.c.bf16 %v2650_v39, %v2647_v18  ;;  %v8684_v16 = vpack.c.bf16 %v2657_v59, %v2654_v58  ;;  %v1851_v39 = vmul.f32 %v15246_v15, %v12110_v13  ;;  %v8686_v58 = vpack.c.bf16 %v2656_v25, %v2653_v14  ;;  %v2666_v14 = vld [vmem:[%s14750_s5 + $0x608] sm:$0xff]  ;;  %v2669_v25 = vld [vmem:[%s14750_s5 + $0x620] sm:$0xff]  ;;  %s15423_s26 = smov 13  }
 0x328   :  { %1702 = vrot.lane.b32.xlu1 %v1665_v22, %s15134_s22  ;;  %v12390_v0 = vpop.permute.xlu1 %1155  ;;  %8679 = vmatpush1.bf16.msra.mxu0 %v8678_v21  ;;  %v12401_v22 = vpop.permute.xlu0 %1153  ;;  %v2660_v21 = vld [vmem:[%s14750_s5 + $0x5d8] sm:$0xff] }
 0x329   :  { %8681 = vmatprep.subr.bf16.mxu0 %v8680_v4  ;;  %v2663_v4 = vld [vmem:[%s14750_s5 + $0x5f0] sm:$0xff] }
 0x32a   :  { %1518 = vrot.lane.b32.xlu0 %v1480_v8, %s15129_s23  ;;  %v1573_v8 = vmul.f32 %v15239_v54, %v12360_v44  ;;  %v8688_v59 = vpack.c.bf16 %v2663_v4, %v2660_v21  ;;  %v2659_v54 = vld [vmem:[%s14750_s5 + $0x5d0] sm:$0xff]  ;;  %v1759_v21 = vmul.f32 %v15244_v63, %v12360_v44  ;;  %v2037_v4 = vmul.f32 %v9927_v5, %v12110_v13  ;;  %s9575_s23 = smov 103  }
 0x32b   :  { %v2130_v63 = vmul.f32 %v15264_v2, %v12110_v13 }
 0x32c   :  { %1795 = vrot.lane.b32.xlu1 %v1758_v47, %s15419_s8  ;;  %v12412_v18 = vpop.permute.xlu1 %1243  ;;  %8683 = vmatpush1.bf16.msra.mxu0 %v8682_v38  ;;  %v2662_v47 = vld [vmem:[%s14750_s5 + $0x5e8] sm:$0xff]  ;;  %v12426_v9 = vpop.permute.xlu0 %1241  ;;  %v1944_v38 = vmul.f32 %v15249_v34, %v12110_v13 }
 0x32d   :  { %8685 = vmatprep.subr.bf16.mxu0 %v8684_v16  ;;  %v8690_v16 = vpack.c.bf16 %v2662_v47, %v2659_v54  ;;  %v1945_v54 = vmul.f32 %v15249_v34, %v12360_v44  ;;  %v15424_v34 = vld [vmem:[#allocation54_spill] sm:$0xff] }
 0x32e   :  { %1611 = vrot.lane.b32.xlu0 %v1573_v8, %s15132_s24  ;;  %v1666_v8 = vmul.f32 %v15340_v62, %v12360_v44  ;;  %v8692_v62 = vpack.c.bf16 %v2669_v25, %v2666_v14  ;;  %v2131_v14 = vmul.f32 %v15264_v2, %v12360_v44  ;;  %v200_v25 = vsel %vm15032_vm0, %v15424_v34, %v12013_v53  ;;  %s9585_s24 = smov 78  }
 0x32f   :  { %v201_v2 = vsel %vm15032_vm0, %v12013_v53, %v12082_v3  ;;  %v464_v53 = vsel %vm15429_vm1, %v11611_v56, %v12141_v12  ;;  %vm15432_vm0 = vmmov %vm15429_vm1  ;;  %vm15435_vm1 = vcmask 801792  }
 0x330   :  { %1888 = vrot.lane.b32.xlu1 %v1851_v39, %s15420_s4  ;;  %v12428_v50 = vpop.permute.xlu1 %1331  ;;  %8687 = vmatpush1.bf16.msra.mxu0 %v8686_v58  ;;  %v12445_v39 = vpop.permute.xlu0 %1329 }
 0x331   :  { %8689 = vmatprep.subr.bf16.mxu0 %v8688_v59  ;;  %v1852_v59 = vmul.f32 %v15246_v15, %v12360_v44 }
 0x332   :  { %1704 = vrot.lane.b32.xlu0 %v1666_v8, %s15134_s22  ;;  %s15422_s22 = smov 14  }
 0x334   :  { %1981 = vrot.lane.b32.xlu1 %v1944_v38, %s15421_s7  ;;  %8691 = vmatpush1.bf16.msra.mxu0 %v8690_v16  ;;  %v12447_v58 = vpop.permute.xlu1 %1419  ;;  %v12458_v47 = vpop.permute.xlu0 %1417  ;;  %v2038_v38 = vmul.f32 %v9927_v5, %v12360_v44  ;;  %v288_v5 = vsel %vm15426_vm3, %v11577_v57, %v12051_v17  ;;  %v289_v57 = vsel %vm15428_vm4, %v12051_v17, %v12127_v52  ;;  %vm15430_vm3 = vmmov %vm15427_vm2  ;;  %vm15433_vm4 = vcmask 809984  }
 0x335   :  { %8693 = vmatprep.subr.bf16.mxu0 %v8692_v62  ;;  %v15425_v62 = vld [vmem:[#allocation49_spill] sm:$0xff]  ;;  %v465_v17 = vsel %vm15432_vm0, %v12141_v12, %v12195_v36  ;;  %v640_v56 = vsel %vm15433_vm4, %v11631_v42, %v12209_v20  ;;  %v728_v42 = vsel %vm15435_vm1, %v11641_v31, %v12243_v51 }
 0x336   :  { %1797 = vrot.lane.b32.xlu0 %v1759_v21, %s15419_s8  ;;  %v123_v21 = vmul.f32 %v15425_v62, %v15336_v33  ;;  %s9574_s8 = smov 104  }
 0x338   :  { %2074 = vrot.lane.b32.xlu1 %v2037_v4, %s15422_s22  ;;  %v12460_v8 = vpop.permute.xlu1 %1514  ;;  %v12466_v15 = vpop.permute.xlu0 %1512  ;;  %v223_v4 = vadd.f32 %v200_v25, %v123_v21 }
 0x33a   :  { %1890 = vrot.lane.b32.xlu0 %v1852_v59, %s15420_s4  ;;  %v2223_v59 = vmul.f32 %v15371_v7, %v12110_v13  ;;  %s9584_s4 = smov 79  }
 0x33c   :  { %2167 = vrot.lane.b32.xlu1 %v2130_v63, %s15423_s26  ;;  %v12468_v16 = vpop.permute.xlu1 %1607  ;;  %v376_v63 = vsel %vm15427_vm2, %v11594_v55, %v12097_v46  ;;  %vm15431_vm2 = vcmask 818176  }
 0x33d   :  { %v552_v62 = vsel %vm15431_vm2, %v11621_v37, %v12175_v26  ;;  %v2715_v37 = vld [vmem:[%s14750_s5 + $0x790] sm:$0xff]  ;;  %vm15434_vm0 = vmmov %vm15431_vm2  ;;  %vm15437_vm2 = vcmask 793600  }
 0x33e   :  { %1983 = vrot.lane.b32.xlu0 %v1945_v54, %s15421_s7  ;;  %v311_v54 = vadd.f32 %v288_v5, %v223_v4  ;;  %v553_v12 = vsel %vm15434_vm0, %v12175_v26, %v12229_v19  ;;  %vm15439_vm0 = vcmask 785408   ;;  %s15503_s7 = sld [smem:[#allocation95_spill]] }
 0x33f   :  { %v904_v31 = vsel %vm15439_vm0, %v11659_v40, %v12299_v43 }
 0x340   :  { %v12493_v34 = vpop.permute.xlu1 %1700  ;;  %v399_v55 = vadd.f32 %v376_v63, %v311_v54 }
 0x342   :  { %2076 = vrot.lane.b32.xlu0 %v2038_v38, %s15422_s22  ;;  %v124_v38 = vmul.f32 %v11585_v1, %v15336_v33  ;;  %v377_v1 = vsel %vm15430_vm3, %v12097_v46, %v12161_v30  ;;  %v487_v5 = vadd.f32 %v464_v53, %v399_v55  ;;  %v2718_v46 = vld [vmem:[%s14750_s5 + $0x7a8] sm:$0xff]  ;;  %vm15436_vm3 = vmmov %vm15433_vm4 }
 0x343   :  { %v8986_v54 = vpack.c.bf16 %v2718_v46, %v2715_v37  ;;  %v641_v53 = vsel %vm15436_vm3, %v12209_v20, %v12257_v24  ;;  %vm15438_vm4 = vmmov %vm15435_vm1  ;;  %vm15441_vm3 = vcmask 588800  }
 0x344   :  { %v224_v25 = vadd.f32 %v201_v2, %v124_v38  ;;  %v12516_v63 = vpop.permute.xlu1 %1793  ;;  %v729_v26 = vsel %vm15438_vm4, %v12243_v51, %v12279_v28  ;;  %vm15440_vm1 = vmmov %vm15437_vm2  ;;  %v992_v20 = vsel %vm15441_vm3, %v11669_v10, %v12332_v35  ;;  %vm15443_vm4 = vcmask 580608  }
 0x345   :  { %8987 = vmatprep.subr.bf16.mxu1 %v8986_v54  ;;  %v1080_v40 = vsel %vm15443_vm4, %v11677_v27, %v12368_v60  ;;  %v1256_v27 = vsel %vm1247_vm12, %v11703_v41, %v12426_v9  ;;  %v1432_v41 = vsel %vm1423_vm14, %v15365_v23, %v12458_v47  ;;  %v15451_v23 = vld [vmem:[#allocation64_spill] sm:$0xff] }
 0x346   :  { %2169 = vrot.lane.b32.xlu0 %v2131_v14, %s15423_s26  ;;  %v12491_v14 = vpop.permute.xlu0 %1605  ;;  %v312_v21 = vadd.f32 %v289_v57, %v224_v25  ;;  %v816_v25 = vsel %vm15437_vm2, %v11649_v11, %v12268_v48  ;;  %v817_v11 = vsel %vm15440_vm1, %v12268_v48, %v12301_v29  ;;  %vm15442_vm2 = vmmov %vm15439_vm0  ;;  %vm15445_vm1 = vcmask 572416  }
 0x347   :  { %v905_v51 = vsel %vm15442_vm2, %v12299_v43, %v12321_v61  ;;  %vm15444_vm0 = vmmov %vm15441_vm3  ;;  %v1168_v10 = vsel %vm15445_vm1, %v11690_v32, %v12401_v22 }
 0x348   :  { %v400_v4 = vadd.f32 %v377_v1, %v312_v21  ;;  %v993_v48 = vsel %vm15444_vm0, %v12332_v35, %v12343_v6  ;;  %vm15446_vm3 = vmmov %vm15443_vm4  ;;  %vm15448_vm4 = vcmask 556032  }
 0x349   :  { %v1081_v43 = vsel %vm15446_vm3, %v12368_v60, %v12370_v45  ;;  %vm15447_vm2 = vmmov %vm15445_vm1  ;;  %v1344_v32 = vsel %vm15448_vm4, %v11716_v49, %v12445_v39  ;;  %v1257_v60 = vsel %vm1247_vm12, %v12426_v9, %v12412_v18  ;;  %v15450_v49 = vld [vmem:[#allocation65_spill] sm:$0xff]  ;;  %v1433_v9 = vsel %vm1423_vm14, %v12458_v47, %v12447_v58 }
 0x34a   :  { %2260 = vrot.lane.b32.xlu0 %v2223_v59, %s15305_s30  ;;  %v575_v59 = vadd.f32 %v552_v62, %v487_v5  ;;  %v12514_v2 = vpop.permute.xlu0 %1698  ;;  %v488_v38 = vadd.f32 %v465_v17, %v400_v4  ;;  %v12542_v17 = vpop.permute.xlu1 %1886  ;;  %v1169_v35 = vsel %vm15447_vm2, %v12401_v22, %v12390_v0  ;;  %vm15449_vm0 = vmmov %vm15448_vm4  ;;  %v1623_v47 = vsel %vm1613_vm6, %v12491_v14, %v12468_v16 }
 0x34b   :  { %v1345_v22 = vsel %vm15449_vm0, %v12445_v39, %v12428_v50  ;;  %v1530_v39 = vsel %vm1520_vm15, %v12466_v15, %v12460_v8  ;;  %vm15461_vm1 = vcmask 1039360   ;;  %vm15469_vm2 = vcmask 818176  }
 0x34c   :  { %v663_v57 = vadd.f32 %v640_v56, %v575_v59  ;;  %v576_v55 = vadd.f32 %v553_v12, %v488_v38  ;;  %vm15462_vm3 = vmmov %vm15461_vm1 }
 0x34d   :  { %vm15470_vm4 = vmmov %vm15469_vm2 }
 0x34e   :  { %v751_v1 = vadd.f32 %v728_v42, %v663_v57  ;;  %v664_v62 = vadd.f32 %v641_v53, %v576_v55  ;;  %v1792_v5 = vpop.permute.xlu0 %1791  ;;  %v12562_v54 = vpop.permute.xlu1 %1979  ;;  %vm15475_vm0 = vmmov %vm15461_vm1 }
 0x350   :  { %v839_v21 = vadd.f32 %v816_v25, %v751_v1  ;;  %v752_v56 = vadd.f32 %v729_v26, %v664_v62  ;;  %v1529_v62 = vsel %vm1520_vm15, %v15450_v49, %v12466_v15  ;;  %v1716_v15 = vsel %vm1706_vm7, %v12514_v2, %v12493_v34  ;;  %v15456_v49 = vld [vmem:[#allocation72_spill] sm:$0xff] }
 0x352   :  { %v927_v4 = vadd.f32 %v904_v31, %v839_v21  ;;  %v840_v59 = vadd.f32 %v817_v11, %v752_v56  ;;  %v1885_v42 = vpop.permute.xlu0 %1884  ;;  %v12582_v31 = vpop.permute.xlu1 %2072 }
 0x354   :  { %v1015_v37 = vadd.f32 %v992_v20, %v927_v4  ;;  %v928_v46 = vadd.f32 %v905_v51, %v840_v59  ;;  %v1622_v20 = vsel %vm1613_vm6, %v15451_v23, %v12491_v14  ;;  %v15452_v51 = vld [vmem:[#allocation71_spill] sm:$0xff] }
 0x356   :  { %v1103_v12 = vadd.f32 %v1080_v40, %v1015_v37  ;;  %v1016_v38 = vadd.f32 %v993_v48, %v928_v46  ;;  %v1978_v26 = vpop.permute.xlu0 %1977  ;;  %v1715_v40 = vsel %vm1706_vm7, %v15452_v51, %v12514_v2  ;;  %v15453_v46 = vld [vmem:[#allocation67_spill] sm:$0xff] }
 0x358   :  { %v1191_v57 = vadd.f32 %v1168_v10, %v1103_v12  ;;  %v1104_v53 = vadd.f32 %v1081_v43, %v1016_v38  ;;  %v12602_v10 = vpop.permute.xlu1 %2165  ;;  %v1808_v12 = vsel %vm1799_vm8, %v15453_v46, %v1792_v5  ;;  %v15454_v38 = vld [vmem:[#allocation73_spill] sm:$0xff]  ;;  %v2665_v46 = vld [vmem:[%s14750_s5 + $0x600] sm:$0xff] }
 0x35a   :  { %v1279_v25 = vadd.f32 %v1256_v27, %v1191_v57  ;;  %v1192_v55 = vadd.f32 %v1169_v35, %v1104_v53  ;;  %v2071_v48 = vpop.permute.xlu0 %2070  ;;  %v1901_v57 = vsel %vm1892_vm5, %v15454_v38, %v1885_v42  ;;  %v1809_v53 = vsel %vm1799_vm8, %v1792_v5, %v12516_v63 }
 0x35b   :  { %v2087_v2 = vsel %vm2078_vm11, %v15456_v49, %v2071_v48 }
 0x35c   :  { %v1367_v1 = vadd.f32 %v1344_v32, %v1279_v25  ;;  %v1280_v21 = vadd.f32 %v1257_v60, %v1192_v55  ;;  %v15455_v25 = vld [vmem:[#allocation75_spill] sm:$0xff] }
 0x35d   :  { %v1994_v14 = vsel %vm1985_vm10, %v15455_v25, %v1978_v26  ;;  %v15463_v25 = vld [vmem:[#allocation61_spill] sm:$0xff] }
 0x35e   :  { %v1455_v11 = vadd.f32 %v1432_v41, %v1367_v1  ;;  %v1368_v56 = vadd.f32 %v1345_v22, %v1280_v21  ;;  %v2164_v55 = vpop.permute.xlu0 %2163  ;;  %v2257_v1 = vpop.permute.xlu1 %2256  ;;  %v1902_v22 = vsel %vm1892_vm5, %v1885_v42, %v12542_v17 }
 0x360   :  { %v1553_v4 = vadd.f32 %v1529_v62, %v1455_v11  ;;  %v1456_v59 = vadd.f32 %v1433_v9, %v1368_v56  ;;  %v1995_v11 = vsel %vm1985_vm10, %v1978_v26, %v12562_v54  ;;  %v15457_v9 = vld [vmem:[#allocation76_spill] sm:$0xff]  ;;  %v2181_v26 = vsel %vm2171_vm9, %v2164_v55, %v12602_v10 }
 0x361   :  { %v2180_v5 = vsel %vm2171_vm9, %v15457_v9, %v2164_v55 }
 0x362   :  { %v1646_v37 = vadd.f32 %v1622_v20, %v1553_v4  ;;  %v1554_v43 = vadd.f32 %v1530_v39, %v1456_v59  ;;  %v2088_v4 = vsel %vm2078_vm11, %v2071_v48, %v12582_v31  ;;  %v15458_v39 = vld [vmem:[#allocation78_spill] sm:$0xff] }
 0x363   :  { %v2273_v42 = vsel %vm2264_vm13, %v15458_v39, %v2257_v1  ;;  %v2668_v48 = vld [vmem:[%s14750_s5 + $0x618] sm:$0xff] }
 0x364   :  { %v1739_v27 = vadd.f32 %v1715_v40, %v1646_v37  ;;  %v1647_v35 = vadd.f32 %v1623_v47, %v1554_v43  ;;  %v2724_v39 = vld [vmem:[%s14750_s5 + $0x7d8] sm:$0xff] }
 0x366   :  { %v1832_v32 = vadd.f32 %v1808_v12, %v1739_v27  ;;  %v1740_v60 = vadd.f32 %v1716_v15, %v1647_v35  ;;  %v15459_v12 = vld [vmem:[#allocation86_spill] sm:$0xff] }
 0x367   :  { %v15460_v43 = vunpack.i.h.bf16 %v15459_v12  ;;  %v2672_v35 = vld [vmem:[%s14750_s5 + $0x638] sm:$0xff] }
 0x368   :  { %v1925_v41 = vadd.f32 %v1901_v57, %v1832_v32  ;;  %v1833_v62 = vadd.f32 %v1809_v53, %v1740_v60 }
 0x36a   :  { %v2018_v21 = vadd.f32 %v1994_v14, %v1925_v41  ;;  %v1926_v23 = vadd.f32 %v1902_v22, %v1833_v62  ;;  %v15464_v14 = vmax.f32 %v15463_v25, 0.0  ;;  %v15465_v41 = vld [vmem:[#allocation80_spill] sm:$0xff]  ;;  %v2667_v62 = vld [vmem:[%s14750_s5 + $0x610] sm:$0xff] }
 0x36b   :  { %v15466_v55 = vmax.f32 %v15465_v41, 0.0 }
 0x36c   :  { %v2111_v20 = vadd.f32 %v2087_v2, %v2018_v21  ;;  %v2019_v59 = vadd.f32 %v1995_v11, %v1926_v23  ;;  %v2675_v2 = vld [vmem:[%s14750_s5 + $0x650] sm:$0xff]  ;;  %v2670_v21 = vld [vmem:[%s14750_s5 + $0x628] sm:$0xff] }
 0x36d   :  { %v15467_v11 = vld [vmem:[#allocation74_spill] sm:$0xff]  ;;  %v8988_v25 = vpack.c.bf16 %v2670_v21, %v2667_v62  ;;  %v126_v21 = vmul.f32 %v12110_v13, %v15336_v33 }
 0x36e   :  { %v2204_v37 = vadd.f32 %v2180_v5, %v2111_v20  ;;  %v2112_v32 = vadd.f32 %v2088_v4, %v2019_v59  ;;  %v15468_v9 = vunpack.i.h.bf16 %v15467_v11  ;;  %v8694_v20 = vpack.c.bf16 %v2668_v48, %v2665_v46  ;;  %v2721_v4 = vld [vmem:[%s14750_s5 + $0x7c0] sm:$0xff]  ;;  %v2671_v46 = vld [vmem:[%s14750_s5 + $0x630] sm:$0xff] }
 0x370   :  { %v2297_v53 = vadd.f32 %v2273_v42, %v2204_v37  ;;  %v2205_v42 = vadd.f32 %v2181_v26, %v2112_v32  ;;  %v15471_v37 = vld [vmem:[#allocation87_spill] sm:$0xff]  ;;  %v2674_v26 = vld [vmem:[%s14750_s5 + $0x648] sm:$0xff] }
 0x371   :  { %v2681_v32 = vld [vmem:[%s14750_s5 + $0x680] sm:$0xff] }
 0x372   :  { %v12626_v56 = vpop.permute.xlu1 %9468 }
 0x373   :  { %v9471_v51 = vunpack.i.h.bf16 %v12626_v56  ;;  %v9470_v40 = vunpack.i.l.bf16 %v12626_v56 }
 0x374   :  { %v12636_v47 = vpop.permute.xlu0 %9463 }
 0x375   :  { %v2372_v27 = vsel %vm15461_vm1, %v15460_v43, %v9470_v40  ;;  %v2373_v15 = vsel %vm15462_vm3, %v9470_v40, %v9471_v51  ;;  %v9466_v38 = vunpack.i.h.bf16 %v12636_v47  ;;  %v9465_v57 = vunpack.i.l.bf16 %v12636_v47  ;;  %v15472_v43 = vld [vmem:[#allocation63_spill] sm:$0xff]  ;;  %v2770_v47 = vld [vmem:[%s14750_s5 + $0x948] sm:$0xff] }
 0x376   :  { %v12657_v60 = vmax.f32 %v15464_v14, %v2372_v27  ;;  %v12661_v22 = vmax.f32 %v15466_v55, %v2373_v15  ;;  %v278_v49 = vpop.permute.xlu1 %277  ;;  %v8696_v15 = vpack.c.bf16 %v2675_v2, %v2672_v35  ;;  %v15473_v14 = vld [vmem:[#allocation39_spill] sm:$0xff]  ;;  %vm15476_vm1 = vcmask 1031168  }
 0x377   :  { %v2440_v5 = vsel %vm15469_vm2, %v15468_v9, %v9465_v57  ;;  %v2441_v23 = vsel %vm15470_vm4, %v9465_v57, %v9466_v38  ;;  %v2678_v57 = vld [vmem:[%s14750_s5 + $0x668] sm:$0xff]  ;;  %v12705_v41 = vadd.f32 %v15473_v14, %v2297_v53  ;;  %v2673_v35 = vld [vmem:[%s14750_s5 + $0x640] sm:$0xff]  ;;  %v2676_v2 = vld [vmem:[%s14750_s5 + $0x658] sm:$0xff]  ;;  %v2224_v9 = vmul.f32 %v15371_v7, %v12360_v44 }
 0x378   :  { %v12684_v40 = vpop.permute.xlu0 %2258  ;;  %v9472_v59 = vpack.i.bf16 %v12661_v22, %v12657_v60  ;;  %v2464_v12 = vmax.f32 %v15471_v37, %v2441_v23  ;;  %v2463_v27 = vmax.f32 %v15472_v43, %v2440_v5  ;;  %v15474_v53 = vld [vmem:[#allocation70_spill] sm:$0xff]  ;;  %v2730_v23 = vld [vmem:[%s14750_s5 + $0x808] sm:$0xff]  ;;  %vm15477_vm3 = vcmask 1022976  }
 0x379   :  { %v2274_v48 = vsel %vm2264_vm13, %v2257_v1, %v12684_v40  ;;  %v8990_v1 = vpack.c.bf16 %v2724_v39, %v2721_v4  ;;  %v125_v62 = vmul.f32 %v15474_v53, %v15336_v33  ;;  %v2727_v5 = vld [vmem:[%s14750_s5 + $0x7f0] sm:$0xff]  ;;  %v2677_v33 = vld [vmem:[%s14750_s5 + $0x660] sm:$0xff]  ;;  %v2680_v44 = vld [vmem:[%s14750_s5 + $0x678] sm:$0xff]  ;;  %v2327_v43 = vmax.f32 %v12705_v41, 0.0 }
 0x37a   :  { %v2298_v55 = vadd.f32 %v2274_v48, %v2205_v42  ;;  %v12707_v11 = vpop.permute.xlu1 %453  ;;  %9473 = vrot.lane.b32.xlu1 %v9472_v59, %s15299_s10  ;;  %3155 = vmatprep.mubr.f32.mxu0 %v2464_v12  ;;  %v8698_v42 = vpack.c.bf16 %v2674_v26, %v2671_v46  ;;  %v8700_v59 = vpack.c.bf16 %v2681_v32, %v2678_v57  ;;  %v2684_v37 = vld [vmem:[%s14750_s5 + $0x698] sm:$0xff]  ;;  %v2682_v26 = vld [vmem:[%s14750_s5 + $0x688] sm:$0xff]  ;;  %vm15478_vm2 = vcmask 1014784  }
 0x37b   :  { %3580 = vmatprep.mubr.f32.mxu1 %v2464_v12  ;;  %3156 = vmatmul.mubr.f32.vlgmr.msra.gmra.mrb[0].mxu0 %v2463_v27  ;;  %v8992_v12 = vpack.c.bf16 %v2676_v2, %v2673_v35  ;;  %v8994_v48 = vpack.c.bf16 %v2730_v23, %v2727_v5  ;;  %v290_v57 = vsel %vm15476_vm1, %v12127_v52, %v278_v49  ;;  %v2683_v52 = vld [vmem:[%s14750_s5 + $0x690] sm:$0xff]  ;;  %v2690_v5 = vld [vmem:[%s14750_s5 + $0x6c8] sm:$0xff]  ;;  %v2693_v23 = vld [vmem:[%s14750_s5 + $0x6e0] sm:$0xff]  ;;  %vm15480_vm1 = vcmask 801792  }
 0x37c   :  { %v12729_v4 = vadd.f32 %v15473_v14, %v2298_v55  ;;  %3581 = vmatmul.mubr.f32.vlgmr.msra.gmra.mrb[2].mxu1 %v2463_v27  ;;  %v190_v39 = vpop.permute.xlu0 %189  ;;  %8695 = vmatpush1.bf16.msra.mxu0 %v8694_v20  ;;  %v2687_v20 = vld [vmem:[%s14750_s5 + $0x6b0] sm:$0xff]  ;;  %v2736_v55 = vld [vmem:[%s14750_s5 + $0x838] sm:$0xff]  ;;  %v8702_v53 = vpack.c.bf16 %v2680_v44, %v2677_v33 }
 0x37d   :  { %v202_v7 = vsel %vm15475_vm0, %v12082_v3, %v190_v39  ;;  %v226_v13 = vadd.f32 %v190_v39, %v126_v21  ;;  %8697 = vmatprep.subr.bf16.mxu0 %v8696_v15  ;;  %8989 = vmatpush3.bf16.msra.mxu1 %v8988_v25  ;;  %v2679_v15 = vld [vmem:[%s14750_s5 + $0x670] sm:$0xff]  ;;  %v2733_v25 = vld [vmem:[%s14750_s5 + $0x820] sm:$0xff]  ;;  %vm15479_vm0 = vcmask 809984  }
 0x37e   :  { %v2328_v3 = vmax.f32 %v12729_v4, 0.0  ;;  %v225_v27 = vadd.f32 %v202_v7, %v125_v62  ;;  %v630_v46 = vpop.permute.xlu1 %629  ;;  %2262 = vrot.lane.b32.xlu1 %v2224_v9, %s15305_s30  ;;  %8991 = vmatprep.subr.bf16.mxu1 %v8990_v1  ;;  %v8704_v62 = vpack.c.bf16 %v2687_v20, %v2684_v37  ;;  %v2686_v9 = vld [vmem:[%s14750_s5 + $0x6a8] sm:$0xff]  ;;  %v8996_v39 = vpack.c.bf16 %v2682_v26, %v2679_v15  ;;  %v2688_v7 = vld [vmem:[%s14750_s5 + $0x6b8] sm:$0xff]  ;;  %v2739_v37 = vld [vmem:[%s14750_s5 + $0x850] sm:$0xff]  ;;  %s15505_s30 = sld [smem:[#allocation96_spill]] }
 0x37f   :  { %v314_v32 = vadd.f32 %v278_v49, %v226_v13  ;;  %v466_v13 = vsel %vm15478_vm2, %v12195_v36, %v12707_v11  ;;  %v2742_v20 = vld [vmem:[%s14750_s5 + $0x868] sm:$0xff]  ;;  %v8708_v15 = vpack.c.bf16 %v2693_v23, %v2690_v5  ;;  %v2689_v26 = vld [vmem:[%s14750_s5 + $0x6c0] sm:$0xff]  ;;  %vm15482_vm2 = vcmask 785408   ;;  %v2868_v4 = vld [vmem:[%s14750_s5 + $0xc58] sm:$0xff] }
 0x380   :  { %v313_v1 = vadd.f32 %v290_v57, %v225_v27  ;;  %v366_v35 = vpop.permute.xlu0 %365  ;;  %v9477_v2 = vpack.i.bf16 %v2328_v3, %v2327_v43  ;;  %8699 = vmatpush1.bf16.msra.mxu0 %v8698_v42  ;;  %v2692_v57 = vld [vmem:[%s14750_s5 + $0x6d8] sm:$0xff] }
 0x381   :  { %v378_v49 = vsel %vm15477_vm3, %v12161_v30, %v366_v35  ;;  %v402_v21 = vadd.f32 %v366_v35, %v314_v32  ;;  %8701 = vmatprep.subr.bf16.mxu0 %v8700_v59  ;;  %8993 = vmatpush3.bf16.msra.mxu1 %v8992_v12  ;;  %v8998_v30 = vpack.c.bf16 %v2736_v55, %v2733_v25  ;;  %v2685_v59 = vld [vmem:[%s14750_s5 + $0x6a0] sm:$0xff]  ;;  %v2696_v32 = vld [vmem:[%s14750_s5 + $0x6f8] sm:$0xff]  ;;  %v2699_v25 = vld [vmem:[%s14750_s5 + $0x710] sm:$0xff]  ;;  %vm15481_vm3 = vcmask 793600  }
 0x382   :  { %v401_v42 = vadd.f32 %v378_v49, %v313_v1  ;;  %v806_v33 = vpop.permute.xlu1 %805  ;;  %9478 = vrot.lane.b32.xlu0 %v9477_v2, %s15307_s14  ;;  %8995 = vmatprep.subr.bf16.mxu1 %v8994_v48  ;;  %v8706_v48 = vpack.c.bf16 %v2686_v9, %v2683_v52  ;;  %v9000_v55 = vpack.c.bf16 %v2688_v7, %v2685_v59  ;;  %v2691_v2 = vld [vmem:[%s14750_s5 + $0x6d0] sm:$0xff]  ;;  %v2745_v49 = vld [vmem:[%s14750_s5 + $0x880] sm:$0xff]  ;;  %v2702_v59 = vld [vmem:[%s14750_s5 + $0x728] sm:$0xff] }
 0x383   :  { %v490_v44 = vadd.f32 %v12707_v11, %v402_v21  ;;  %v2748_v21 = vld [vmem:[%s14750_s5 + $0x898] sm:$0xff]  ;;  %v8710_v23 = vpack.c.bf16 %v2692_v57, %v2689_v26  ;;  %v2705_v7 = vld [vmem:[%s14750_s5 + $0x740] sm:$0xff]  ;;  %v2754_v26 = vld [vmem:[%s14750_s5 + $0x8c8] sm:$0xff] }
 0x384   :  { %v489_v12 = vadd.f32 %v466_v13, %v401_v42  ;;  %v542_v27 = vpop.permute.xlu0 %541  ;;  %8703 = vmatpush1.bf16.msra.mxu0 %v8702_v53  ;;  %v2694_v53 = vld [vmem:[%s14750_s5 + $0x6e8] sm:$0xff]  ;;  %v2695_v42 = vld [vmem:[%s14750_s5 + $0x6f0] sm:$0xff] }
 0x385   :  { %v554_v36 = vsel %vm15470_vm4, %v12229_v19, %v542_v27  ;;  %v578_v11 = vadd.f32 %v542_v27, %v490_v44  ;;  %8705 = vmatprep.subr.bf16.mxu0 %v8704_v62  ;;  %8997 = vmatpush3.bf16.msra.mxu1 %v8996_v39  ;;  %v9002_v19 = vpack.c.bf16 %v2742_v20, %v2739_v37  ;;  %v2697_v20 = vld [vmem:[%s14750_s5 + $0x700] sm:$0xff]  ;;  %vm15483_vm4 = vcmask 588800  }
 0x386   :  { %v577_v1 = vadd.f32 %v554_v36, %v489_v12  ;;  %v982_v35 = vpop.permute.xlu1 %981  ;;  %8999 = vmatprep.subr.bf16.mxu1 %v8998_v30  ;;  %v642_v62 = vsel %vm15479_vm0, %v12257_v24, %v630_v46  ;;  %v8712_v39 = vpack.c.bf16 %v2699_v25, %v2696_v32  ;;  %v2698_v30 = vld [vmem:[%s14750_s5 + $0x708] sm:$0xff]  ;;  %v9004_v13 = vpack.c.bf16 %v2694_v53, %v2691_v2  ;;  %v2700_v12 = vld [vmem:[%s14750_s5 + $0x718] sm:$0xff]  ;;  %v2701_v25 = vld [vmem:[%s14750_s5 + $0x720] sm:$0xff] }
 0x387   :  { %v666_v52 = vadd.f32 %v630_v46, %v578_v11  ;;  %v818_v27 = vsel %vm15481_vm3, %v12301_v29, %v806_v33  ;;  %v8714_v57 = vpack.c.bf16 %v2698_v30, %v2695_v42  ;;  %v8716_v32 = vpack.c.bf16 %v2705_v7, %v2702_v59  ;;  %v2707_v30 = vld [vmem:[%s14750_s5 + $0x750] sm:$0xff]  ;;  %v2710_v59 = vld [vmem:[%s14750_s5 + $0x768] sm:$0xff] }
 0x388   :  { %v665_v9 = vadd.f32 %v642_v62, %v577_v1  ;;  %v718_v5 = vpop.permute.xlu0 %717  ;;  %8707 = vmatpush1.bf16.msra.mxu0 %v8706_v48  ;;  %v2708_v1 = vld [vmem:[%s14750_s5 + $0x758] sm:$0xff]  ;;  %v9008_v2 = vpack.c.bf16 %v2700_v12, %v2697_v20  ;;  %vm15484_vm0 = vcmask 580608   ;;  %v2714_v7 = vld [vmem:[%s14750_s5 + $0x788] sm:$0xff]  ;;  %v2709_v12 = vld [vmem:[%s14750_s5 + $0x760] sm:$0xff] }
 0x389   :  { %v730_v24 = vsel %vm15480_vm1, %v12279_v28, %v718_v5  ;;  %v754_v46 = vadd.f32 %v718_v5, %v666_v52  ;;  %8709 = vmatprep.subr.bf16.mxu0 %v8708_v15  ;;  %9001 = vmatpush3.bf16.msra.mxu1 %v9000_v55  ;;  %v9006_v28 = vpack.c.bf16 %v2748_v21, %v2745_v49  ;;  %v2751_v15 = vld [vmem:[%s14750_s5 + $0x8b0] sm:$0xff]  ;;  %v2704_v55 = vld [vmem:[%s14750_s5 + $0x738] sm:$0xff]  ;;  %v2706_v49 = vld [vmem:[%s14750_s5 + $0x748] sm:$0xff]  ;;  %vm15485_vm1 = vcmask 572416  }
 0x38a   :  { %v753_v44 = vadd.f32 %v730_v24, %v665_v9  ;;  %v1158_v37 = vpop.permute.xlu1 %1157  ;;  %9003 = vmatprep.subr.bf16.mxu1 %v9002_v19  ;;  %v2711_v19 = vld [vmem:[%s14750_s5 + $0x770] sm:$0xff]  ;;  %v994_v21 = vsel %vm15483_vm4, %v12343_v6, %v982_v35  ;;  %v2757_v5 = vld [vmem:[%s14750_s5 + $0x8e0] sm:$0xff]  ;;  %v8718_v24 = vpack.c.bf16 %v2704_v55, %v2701_v25  ;;  %v2716_v25 = vld [vmem:[%s14750_s5 + $0x798] sm:$0xff]  ;;  %vm9567_vm4 = vmmov 1  }
 0x38b   :  { %v842_v48 = vadd.f32 %v806_v33, %v754_v46  ;;  %v2703_v52 = vld [vmem:[%s14750_s5 + $0x730] sm:$0xff]  ;;  %v8720_v46 = vpack.c.bf16 %v2711_v19, %v2708_v1  ;;  %v2720_v1 = vld [vmem:[%s14750_s5 + $0x7b8] sm:$0xff] }
 0x38c   :  { %v841_v36 = vadd.f32 %v818_v27, %v753_v44  ;;  %v894_v11 = vpop.permute.xlu0 %893  ;;  %8711 = vmatpush1.bf16.msra.mxu0 %v8710_v23  ;;  %v2760_v23 = vld [vmem:[%s14750_s5 + $0x8f8] sm:$0xff]  ;;  %v9012_v44 = vpack.c.bf16 %v2706_v49, %v2703_v52  ;;  %v2719_v52 = vld [vmem:[%s14750_s5 + $0x7b0] sm:$0xff]  ;;  %v2722_v49 = vld [vmem:[%s14750_s5 + $0x7c8] sm:$0xff] }
 0x38d   :  { %v906_v29 = vsel %vm15482_vm2, %v12321_v61, %v894_v11  ;;  %v930_v33 = vadd.f32 %v894_v11, %v842_v48  ;;  %8713 = vmatprep.subr.bf16.mxu0 %v8712_v39  ;;  %9005 = vmatpush3.bf16.msra.mxu1 %v9004_v13  ;;  %v9010_v61 = vpack.c.bf16 %v2754_v26, %v2751_v15  ;;  %v2717_v13 = vld [vmem:[%s14750_s5 + $0x7a0] sm:$0xff]  ;;  %v2712_v27 = vld [vmem:[%s14750_s5 + $0x778] sm:$0xff] }
 0x38e   :  { %v929_v53 = vadd.f32 %v906_v29, %v841_v36  ;;  %v12867_v62 = vpop.permute.xlu1 %1333  ;;  %9007 = vmatprep.subr.bf16.mxu1 %v9006_v28  ;;  %v8722_v26 = vpack.c.bf16 %v2710_v59, %v2707_v30  ;;  %v8724_v36 = vpack.c.bf16 %v2717_v13, %v2714_v7  ;;  %v1170_v11 = vsel %vm15485_vm1, %v12390_v0, %v1158_v37  ;;  %v2723_v0 = vld [vmem:[%s14750_s5 + $0x7d0] sm:$0xff] }
 0x38f   :  { %v1018_v9 = vadd.f32 %v982_v35, %v930_v33  ;;  %v9016_v29 = vpack.c.bf16 %v2712_v27, %v2709_v12 }
 0x390   :  { %v1017_v39 = vadd.f32 %v994_v21, %v929_v53  ;;  %v1070_v42 = vpop.permute.xlu0 %1069  ;;  %8715 = vmatpush1.bf16.msra.mxu0 %v8714_v57 }
 0x391   :  { %v1082_v6 = vsel %vm15484_vm0, %v12370_v45, %v1070_v42  ;;  %v1106_v35 = vadd.f32 %v1070_v42, %v1018_v9  ;;  %8717 = vmatprep.subr.bf16.mxu0 %v8716_v32  ;;  %9009 = vmatpush3.bf16.msra.mxu1 %v9008_v2  ;;  %v9014_v45 = vpack.c.bf16 %v2760_v23, %v2757_v5  ;;  %v2713_v32 = vld [vmem:[%s14750_s5 + $0x780] sm:$0xff] }
 0x392   :  { %v1105_v28 = vadd.f32 %v1082_v6, %v1017_v39  ;;  %v12897_v20 = vpop.permute.xlu1 %1516  ;;  %9011 = vmatprep.subr.bf16.mxu1 %v9010_v61  ;;  %v8726_v53 = vpack.c.bf16 %v2716_v25, %v2713_v32  ;;  %v8728_v61 = vpack.c.bf16 %v2723_v0, %v2720_v1  ;;  %v2729_v5 = vld [vmem:[%s14750_s5 + $0x800] sm:$0xff]  ;;  %v8730_v42 = vpack.c.bf16 %v2722_v49, %v2719_v52 }
 0x393   :  { %v1194_v48 = vadd.f32 %v1158_v37, %v1106_v35  ;;  %v2725_v6 = vld [vmem:[%s14750_s5 + $0x7e0] sm:$0xff]  ;;  %v2728_v35 = vld [vmem:[%s14750_s5 + $0x7f8] sm:$0xff] }
 0x394   :  { %v1246_v15 = vpop.permute.xlu0 %1245  ;;  %8719 = vmatpush1.bf16.msra.mxu0 %v8718_v24  ;;  %v1193_v33 = vadd.f32 %v1170_v11, %v1105_v28  ;;  %v2741_v11 = vld [vmem:[%s14750_s5 + $0x860] sm:$0xff] }
 0x395   :  { %v1282_v57 = vadd.f32 %v1246_v15, %v1194_v48  ;;  %8721 = vmatprep.subr.bf16.mxu0 %v8720_v46  ;;  %9013 = vmatpush3.bf16.msra.mxu1 %v9012_v44  ;;  %v1258_v37 = vsel %vm1247_vm12, %v12412_v18, %v1246_v15  ;;  %v2726_v18 = vld [vmem:[%s14750_s5 + $0x7e8] sm:$0xff]  ;;  %vm15486_vm12 = vcmask 556032   ;;  %v2731_v48 = vld [vmem:[%s14750_s5 + $0x810] sm:$0xff]  ;;  %v2737_v0 = vld [vmem:[%s14750_s5 + $0x840] sm:$0xff] }
 0x396   :  { %v12913_v55 = vpop.permute.xlu1 %1609  ;;  %9015 = vmatprep.subr.bf16.mxu1 %v9014_v45  ;;  %v1281_v21 = vadd.f32 %v1258_v37, %v1193_v33  ;;  %v1346_v24 = vsel %vm15486_vm12, %v12428_v50, %v12867_v62  ;;  %v8732_v30 = vpack.c.bf16 %v2729_v5, %v2726_v18  ;;  %v2732_v50 = vld [vmem:[%s14750_s5 + $0x818] sm:$0xff]  ;;  %v8734_v45 = vpack.c.bf16 %v2728_v35, %v2725_v6  ;;  %v2734_v15 = vld [vmem:[%s14750_s5 + $0x828] sm:$0xff]  ;;  %v2743_v18 = vld [vmem:[%s14750_s5 + $0x870] sm:$0xff] }
 0x397   :  { %v1370_v19 = vadd.f32 %v12867_v62, %v1282_v57  ;;  %v2735_v62 = vld [vmem:[%s14750_s5 + $0x830] sm:$0xff]  ;;  %v8738_v25 = vpack.c.bf16 %v2734_v15, %v2731_v48  ;;  %v2740_v37 = vld [vmem:[%s14750_s5 + $0x858] sm:$0xff]  ;;  %v1624_v52 = vsel %vm1613_vm6, %v12468_v16, %v12913_v55  ;;  %v2746_v5 = vld [vmem:[%s14750_s5 + $0x888] sm:$0xff]  ;;  %vm3930_vm12 = vcmask 1045504  }
 0x398   :  { %v1422_v2 = vpop.permute.xlu0 %1421  ;;  %8723 = vmatpush1.bf16.msra.mxu0 %v8722_v26  ;;  %v1369_v59 = vadd.f32 %v1346_v24, %v1281_v21  ;;  %v8736_v27 = vpack.c.bf16 %v2735_v62, %v2732_v50  ;;  %v2750_v24 = vld [vmem:[%s14750_s5 + $0x8a8] sm:$0xff]  ;;  %v2753_v16 = vld [vmem:[%s14750_s5 + $0x8c0] sm:$0xff]  ;;  %v2755_v15 = vld [vmem:[%s14750_s5 + $0x8d0] sm:$0xff] }
 0x399   :  { %8725 = vmatprep.subr.bf16.mxu0 %v8724_v36  ;;  %9017 = vmatpush3.bf16.msra.mxu1 %v9016_v29  ;;  %v1458_v23 = vadd.f32 %v1422_v2, %v1370_v19  ;;  %v1434_v44 = vsel %vm1423_vm14, %v12447_v58, %v1422_v2  ;;  %v2738_v58 = vld [vmem:[%s14750_s5 + $0x848] sm:$0xff]  ;;  %v1531_v29 = vsel %vm1520_vm15, %v12460_v8, %v12897_v20  ;;  %v2747_v8 = vld [vmem:[%s14750_s5 + $0x890] sm:$0xff] }
 0x39a   :  { %v12930_v9 = vpop.permute.xlu1 %1702  ;;  %v1457_v26 = vadd.f32 %v1434_v44, %v1369_v59  ;;  %v8740_v1 = vpack.c.bf16 %v2741_v11, %v2738_v58  ;;  %v8748_v35 = vpack.c.bf16 %v2753_v16, %v2750_v24  ;;  %v2749_v59 = vld [vmem:[%s14750_s5 + $0x8a0] sm:$0xff]  ;;  %v2756_v44 = vld [vmem:[%s14750_s5 + $0x8d8] sm:$0xff]  ;;  %v2762_v11 = vld [vmem:[%s14750_s5 + $0x908] sm:$0xff] }
 0x39b   :  { %v2764_v24 = vld [vmem:[%s14750_s5 + $0x918] sm:$0xff] }
 0x39c   :  { %v1519_v39 = vpop.permute.xlu0 %1518  ;;  %8727 = vmatpush1.bf16.msra.mxu0 %v8726_v53  ;;  %v1555_v19 = vadd.f32 %v1531_v29, %v1457_v26  ;;  %v2744_v53 = vld [vmem:[%s14750_s5 + $0x878] sm:$0xff]  ;;  %v2758_v26 = vld [vmem:[%s14750_s5 + $0x8e8] sm:$0xff] }
 0x39d   :  { %v1532_v46 = vsel %vm1520_vm15, %v12897_v20, %v1519_v39  ;;  %8729 = vmatprep.subr.bf16.mxu0 %v8728_v61  ;;  %v8742_v61 = vpack.c.bf16 %v2740_v37, %v2737_v0  ;;  %v8744_v21 = vpack.c.bf16 %v2747_v8, %v2744_v53 }
 0x39e   :  { %v1556_v7 = vadd.f32 %v1532_v46, %v1458_v23  ;;  %v1796_v13 = vpop.permute.xlu1 %1795  ;;  %v1648_v23 = vadd.f32 %v1624_v52, %v1555_v19  ;;  %v8746_v46 = vpack.c.bf16 %v2746_v5, %v2743_v18  ;;  %v2811_v5 = vld [vmem:[%s14750_s5 + $0xa90] sm:$0xff] }
 0x3a0   :  { %v1612_v28 = vpop.permute.xlu0 %1611  ;;  %8731 = vmatpush1.bf16.msra.mxu0 %v8730_v42 }
 0x3a1   :  { %v1625_v12 = vsel %vm1613_vm6, %v12913_v55, %v1612_v28  ;;  %8733 = vmatprep.subr.bf16.mxu0 %v8732_v30  ;;  %v1717_v30 = vsel %vm1706_vm7, %v12493_v34, %v12930_v9  ;;  %v2759_v34 = vld [vmem:[%s14750_s5 + $0x8f0] sm:$0xff]  ;;  %vm15487_vm6 = vcmask 818176  }
 0x3a2   :  { %v1649_v36 = vadd.f32 %v1625_v12, %v1556_v7  ;;  %v1889_v57 = vpop.permute.xlu1 %1888  ;;  %v2752_v7 = vld [vmem:[%s14750_s5 + $0x8b8] sm:$0xff]  ;;  %v1741_v50 = vadd.f32 %v1717_v30, %v1648_v23  ;;  %v1810_v12 = vsel %vm1799_vm8, %v12516_v63, %v1796_v13  ;;  %v8752_v48 = vpack.c.bf16 %v2759_v34, %v2756_v44  ;;  %v2765_v63 = vld [vmem:[%s14750_s5 + $0x920] sm:$0xff]  ;;  %v2763_v30 = vld [vmem:[%s14750_s5 + $0x910] sm:$0xff] }
 0x3a3   :  { %v15489_v44 = vld [vmem:[#allocation79_spill] sm:$0xff]  ;;  %vm15496_vm14 = vmmov %vm15487_vm6 }
 0x3a4   :  { %v1705_v32 = vpop.permute.xlu0 %1704  ;;  %8735 = vmatpush1.bf16.msra.mxu0 %v8734_v45  ;;  %v8750_v45 = vpack.c.bf16 %v2752_v7, %v2749_v59  ;;  %v2817_v59 = vld [vmem:[%s14750_s5 + $0xac0] sm:$0xff]  ;;  %v2820_v7 = vld [vmem:[%s14750_s5 + $0xad8] sm:$0xff]  ;;  %vm15498_vm3 = vmmov %vm15487_vm6 }
 0x3a5   :  { %v1718_v33 = vsel %vm1706_vm7, %v12930_v9, %v1705_v32  ;;  %8737 = vmatprep.subr.bf16.mxu0 %v8736_v27  ;;  %vm15488_vm7 = vmmov %vm15487_vm6 }
 0x3a6   :  { %v1742_v2 = vadd.f32 %v1718_v33, %v1649_v36  ;;  %v1982_v39 = vpop.permute.xlu1 %1981  ;;  %v1834_v36 = vadd.f32 %v1810_v12, %v1741_v50  ;;  %v2767_v12 = vld [vmem:[%s14750_s5 + $0x930] sm:$0xff]  ;;  %vm15499_vm2 = vmmov %vm15498_vm3 }
 0x3a7   :  { %v1996_v29 = vsel %vm1985_vm10, %v12562_v54, %v1982_v39  ;;  %vm15502_vm1 = vmmov %vm15499_vm2 }
 0x3a8   :  { %v1798_v20 = vpop.permute.xlu0 %1797  ;;  %8739 = vmatpush1.bf16.msra.mxu0 %v8738_v25  ;;  %v8754_v25 = vpack.c.bf16 %v2758_v26, %v2755_v15  ;;  %v2774_v15 = vld [vmem:[%s14750_s5 + $0x968] sm:$0xff]  ;;  %v9022_v26 = vpack.c.bf16 %v2820_v7, %v2817_v59  ;;  %v2781_v59 = vld [vmem:[%s14750_s5 + $0x9a0] sm:$0xff]  ;;  %v2784_v7 = vld [vmem:[%s14750_s5 + $0x9b8] sm:$0xff] }
 0x3a9   :  { %v1811_v49 = vsel %vm1799_vm8, %v1796_v13, %v1798_v20  ;;  %8741 = vmatprep.subr.bf16.mxu0 %v8740_v1  ;;  %v1903_v13 = vsel %vm1892_vm5, %v12542_v17, %v1889_v57  ;;  %v8756_v1 = vpack.c.bf16 %v2765_v63, %v2762_v11  ;;  %v2823_v11 = vld [vmem:[%s14750_s5 + $0xaf0] sm:$0xff]  ;;  %v2826_v63 = vld [vmem:[%s14750_s5 + $0xb08] sm:$0xff]  ;;  %vm15490_vm8 = vcmask 1039360  }
 0x3aa   :  { %v1835_v42 = vadd.f32 %v1811_v49, %v1742_v2  ;;  %v2075_v9 = vpop.permute.xlu1 %2074  ;;  %v1927_v0 = vadd.f32 %v1903_v13, %v1834_v36  ;;  %v2772_v36 = vld [vmem:[%s14750_s5 + $0x958] sm:$0xff]  ;;  %vm15497_vm15 = vmmov %vm15490_vm8 }
 0x3ab   :  { %v2089_v2 = vsel %vm2078_vm11, %v12582_v31, %v2075_v9 }
 0x3ac   :  { %v1891_v55 = vpop.permute.xlu0 %1890  ;;  %8743 = vmatpush1.bf16.msra.mxu0 %v8742_v61  ;;  %v2020_v53 = vadd.f32 %v1996_v29, %v1927_v0  ;;  %v8762_v29 = vpack.c.bf16 %v2770_v47, %v2767_v12  ;;  %v2795_v47 = vld [vmem:[%s14750_s5 + $0xa10] sm:$0xff] }
 0x3ad   :  { %v1904_v6 = vsel %vm1892_vm5, %v1889_v57, %v1891_v55  ;;  %8745 = vmatprep.subr.bf16.mxu0 %v8744_v21 }
 0x3ae   :  { %v1928_v62 = vadd.f32 %v1904_v6, %v1835_v42  ;;  %v2168_v37 = vpop.permute.xlu1 %2167  ;;  %v2113_v57 = vadd.f32 %v2089_v2, %v2020_v53  ;;  %v2761_v42 = vld [vmem:[%s14750_s5 + $0x900] sm:$0xff]  ;;  %v2766_v6 = vld [vmem:[%s14750_s5 + $0x928] sm:$0xff]  ;;  %v2780_v53 = vld [vmem:[%s14750_s5 + $0x998] sm:$0xff] }
 0x3af   :  { %v2182_v17 = vsel %vm2171_vm9, %v12602_v10, %v2168_v37  ;;  %v2773_v2 = vld [vmem:[%s14750_s5 + $0x960] sm:$0xff] }
 0x3b0   :  { %v1984_v28 = vpop.permute.xlu0 %1983  ;;  %8747 = vmatpush1.bf16.msra.mxu0 %v8746_v46  ;;  %v2206_v20 = vadd.f32 %v2182_v17, %v2113_v57  ;;  %v2768_v46 = vld [vmem:[%s14750_s5 + $0x938] sm:$0xff]  ;;  %v2783_v57 = vld [vmem:[%s14750_s5 + $0x9b0] sm:$0xff] }
 0x3b1   :  { %v1997_v27 = vsel %vm1985_vm10, %v1982_v39, %v1984_v28  ;;  %8749 = vmatprep.subr.bf16.mxu0 %v8748_v35  ;;  %v2771_v35 = vld [vmem:[%s14750_s5 + $0x950] sm:$0xff] }
 0x3b2   :  { %v2021_v58 = vadd.f32 %v1997_v27, %v1928_v62  ;;  %v9020_v27 = vpack.c.bf16 %v2766_v6, %v2763_v30  ;;  %v2789_v6 = vld [vmem:[%s14750_s5 + $0x9e0] sm:$0xff] }
 0x3b4   :  { %v2077_v32 = vpop.permute.xlu0 %2076  ;;  %8751 = vmatpush1.bf16.msra.mxu0 %v8750_v45  ;;  %v8758_v45 = vpack.c.bf16 %v2764_v24, %v2761_v42  ;;  %v8768_v42 = vpack.c.bf16 %v2783_v57, %v2780_v53  ;;  %v2779_v24 = vld [vmem:[%s14750_s5 + $0x990] sm:$0xff]  ;;  %v2804_v57 = vld [vmem:[%s14750_s5 + $0xa58] sm:$0xff] }
 0x3b5   :  { %v2090_v33 = vsel %vm2078_vm11, %v2075_v9, %v2077_v32  ;;  %8753 = vmatprep.subr.bf16.mxu0 %v8752_v48  ;;  %v8760_v48 = vpack.c.bf16 %v2771_v35, %v2768_v46  ;;  %v2786_v46 = vld [vmem:[%s14750_s5 + $0x9c8] sm:$0xff]  ;;  %vm15494_vm11 = vmmov %vm15490_vm8 }
 0x3b6   :  { %v2114_v19 = vadd.f32 %v2090_v33, %v2021_v58  ;;  %v2777_v58 = vld [vmem:[%s14750_s5 + $0x980] sm:$0xff] }
 0x3b8   :  { %v2170_v8 = vpop.permute.xlu0 %2169  ;;  %8755 = vmatpush1.bf16.msra.mxu0 %v8754_v25 }
 0x3b9   :  { %8757 = vmatprep.subr.bf16.mxu0 %v8756_v1 }
 0x3bc   :  { %v2261_v54 = vpop.permute.xlu0 %2260 }
 0x3bd   :  { %v2275_v61 = vsel %vm2264_vm13, %v12684_v40, %v2261_v54  ;;  %v2814_v40 = vld [vmem:[%s14750_s5 + $0xaa8] sm:$0xff] }
 0x3be   :  { %v2299_v52 = vadd.f32 %v2275_v61, %v2206_v20  ;;  %v9018_v23 = vpack.c.bf16 %v2814_v40, %v2811_v5  ;;  %v2775_v20 = vld [vmem:[%s14750_s5 + $0x970] sm:$0xff] }
 0x3bf   :  { %v15492_v5 = vld [vmem:[#allocation77_spill] sm:$0xff] }
 0x3c0   :  { %v13047_v49 = vadd.f32 %v15473_v14, %v2299_v52  ;;  %9019 = vmatprep.subr.bf16.mxu1 %v9018_v23  ;;  %v15493_v40 = vmax.f32 %v15492_v5, 0.0  ;;  %v2856_v5 = vld [vmem:[%s14750_s5 + $0xbf8] sm:$0xff] }
 0x3c2   :  { %v2329_v21 = vmax.f32 %v13047_v49, 0.0  ;;  %v2922_v49 = vld [vmem:[%s14750_s5 + $0xe08] sm:$0xff] }
 0x3c4   :  { %2363 = vrot.lane.b32.xlu0 %v2329_v21, %s15307_s14 }
 0x3ca   :  { %v8175_v31 = vpop.f32.mrb[0].mxu1 }
 0x3cb   :  { %v8176_v18 = vpop.f32.mrb[1].mxu1 }
 0x3cc   :  { %v13053_v10 = vadd.f32 %v8176_v18, %v8175_v31  ;;  %v2829_v31 = vld [vmem:[%s14750_s5 + $0xb20] sm:$0xff]  ;;  %v2832_v18 = vld [vmem:[%s14750_s5 + $0xb38] sm:$0xff] }
 0x3cd   :  { %v9030_v35 = vpack.c.bf16 %v2832_v18, %v2829_v31  ;;  %v2802_v31 = vld [vmem:[%s14750_s5 + $0xa48] sm:$0xff]  ;;  %v2853_v18 = vld [vmem:[%s14750_s5 + $0xbe0] sm:$0xff] }
 0x3ec   :  { %v13061_v39 = vpop.permute.xlu1 %9473 }
 0x3ed   :  { %v9476_v16 = vunpack.i.h.bf16 %v13061_v39  ;;  %v9475_v55 = vunpack.i.l.bf16 %v13061_v39 }
 0x3ef   :  { %v2442_v50 = vsel %vm15487_vm6, %v9466_v38, %v9475_v55  ;;  %v2443_v62 = vsel %vm15488_vm7, %v9475_v55, %v9476_v16  ;;  %v2183_v38 = vsel %vm2171_vm9, %v2168_v37, %v2170_v8  ;;  %v8764_v37 = vpack.c.bf16 %v2777_v58, %v2774_v15  ;;  %vm15491_vm9 = vmmov %vm15490_vm8  ;;  %v2782_v55 = vld [vmem:[%s14750_s5 + $0x9a8] sm:$0xff]  ;;  %v2841_v15 = vld [vmem:[%s14750_s5 + $0xb80] sm:$0xff] }
 0x3f0   :  { %v2465_v34 = vmax.f32 %v15489_v44, %v2442_v50  ;;  %v2263_v9 = vpop.permute.xlu1 %2262  ;;  %v2466_v28 = vmax.f32 %v12657_v60, %v2443_v62  ;;  %v2769_v60 = vld [vmem:[%s14750_s5 + $0x940] sm:$0xff]  ;;  %v2207_v32 = vadd.f32 %v2183_v38, %v2114_v19  ;;  %v2776_v19 = vld [vmem:[%s14750_s5 + $0x978] sm:$0xff]  ;;  %v9026_v8 = vpack.c.bf16 %v2826_v63, %v2823_v11  ;;  %v2838_v50 = vld [vmem:[%s14750_s5 + $0xb68] sm:$0xff] }
 0x3f1   :  { %v2276_v13 = vsel %vm2264_vm13, %v2261_v54, %v2263_v9  ;;  %v9024_v33 = vpack.c.bf16 %v2772_v36, %v2769_v60  ;;  %v2778_v54 = vld [vmem:[%s14750_s5 + $0x988] sm:$0xff]  ;;  %v8770_v62 = vpack.c.bf16 %v2782_v55, %v2779_v24  ;;  %v8772_v44 = vpack.c.bf16 %v2789_v6, %v2786_v46  ;;  %v2788_v9 = vld [vmem:[%s14750_s5 + $0x9d8] sm:$0xff]  ;;  %v2787_v38 = vld [vmem:[%s14750_s5 + $0x9d0] sm:$0xff] }
 0x3f2   :  { %3226 = vmatprep.mubr.f32.mxu0 %v2466_v28  ;;  %3650 = vmatprep.mubr.f32.mxu1 %v2466_v28  ;;  %v2300_v17 = vadd.f32 %v2276_v13, %v2207_v32  ;;  %v9028_v41 = vpack.c.bf16 %v2778_v54, %v2775_v20  ;;  %v2792_v28 = vld [vmem:[%s14750_s5 + $0x9f8] sm:$0xff]  ;;  %v2791_v58 = vld [vmem:[%s14750_s5 + $0x9f0] sm:$0xff]  ;;  %v2794_v11 = vld [vmem:[%s14750_s5 + $0xa08] sm:$0xff] }
 0x3f3   :  { %3227 = vmatmul.mubr.f32.vlgmr.msra.gmra.mrb[0].mxu0 %v2465_v34  ;;  %3651 = vmatmul.mubr.f32.vlgmr.msra.gmra.mrb[4].mxu1 %v2465_v34  ;;  %v2785_v34 = vld [vmem:[%s14750_s5 + $0x9c0] sm:$0xff]  ;;  %v8776_v36 = vpack.c.bf16 %v2795_v47, %v2792_v28  ;;  %v2798_v63 = vld [vmem:[%s14750_s5 + $0xa28] sm:$0xff]  ;;  %v2807_v54 = vld [vmem:[%s14750_s5 + $0xa70] sm:$0xff] }
 0x3f4   :  { %v13123_v25 = vpop.permute.xlu0 %9478  ;;  %8759 = vmatpush1.bf16.msra.mxu0 %v8758_v45  ;;  %9021 = vmatpush3.bf16.msra.mxu1 %v9020_v27  ;;  %v9032_v45 = vpack.c.bf16 %v2784_v7, %v2781_v59  ;;  %v8774_v60 = vpack.c.bf16 %v2788_v9, %v2785_v34  ;;  %v2801_v32 = vld [vmem:[%s14750_s5 + $0xa40] sm:$0xff]  ;;  %v2806_v24 = vld [vmem:[%s14750_s5 + $0xa68] sm:$0xff]  ;;  %v2819_v34 = vld [vmem:[%s14750_s5 + $0xad0] sm:$0xff] }
 0x3f5   :  { %v9481_v1 = vunpack.i.h.bf16 %v13123_v25  ;;  %v9480_v0 = vunpack.i.l.bf16 %v13123_v25  ;;  %8761 = vmatprep.subr.bf16.mxu0 %v8760_v48  ;;  %9023 = vmatprep.subr.bf16.mxu1 %v9022_v26  ;;  %v2790_v48 = vld [vmem:[%s14750_s5 + $0x9e8] sm:$0xff]  ;;  %v2844_v26 = vld [vmem:[%s14750_s5 + $0xb98] sm:$0xff]  ;;  %v8780_v53 = vpack.c.bf16 %v2801_v32, %v2798_v63  ;;  %v2805_v6 = vld [vmem:[%s14750_s5 + $0xa60] sm:$0xff] }
 0x3f6   :  { %v9036_v13 = vpack.c.bf16 %v2790_v48, %v2787_v38  ;;  %v2810_v55 = vld [vmem:[%s14750_s5 + $0xa88] sm:$0xff]  ;;  %v2825_v38 = vld [vmem:[%s14750_s5 + $0xb00] sm:$0xff]  ;;  %vm15495_vm13 = vmmov %vm15487_vm6  ;;  %vm3923_vm6 = vcmask 48128  }
 0x3f7   :  { %v2374_v61 = vsel %vm15490_vm8, %v9471_v51, %v9480_v0  ;;  %v2375_v52 = vsel %vm15491_vm9, %v9480_v0, %v9481_v1  ;;  %v8766_v51 = vpack.c.bf16 %v2776_v19, %v2773_v2  ;;  %v2796_v0 = vld [vmem:[%s14750_s5 + $0xa18] sm:$0xff]  ;;  %v2850_v2 = vld [vmem:[%s14750_s5 + $0xbc8] sm:$0xff]  ;;  %v8778_v19 = vpack.c.bf16 %v2794_v11, %v2791_v58  ;;  %v2831_v58 = vld [vmem:[%s14750_s5 + $0xb30] sm:$0xff] }
 0x3f8   :  { %v13159_v23 = vmax.f32 %v15493_v40, %v2374_v61  ;;  %v13163_v56 = vmax.f32 %v2327_v43, %v2375_v52  ;;  %8763 = vmatpush1.bf16.msra.mxu0 %v8762_v29  ;;  %9025 = vmatpush3.bf16.msra.mxu1 %v9024_v33  ;;  %v13175_v43 = vadd.f32 %v15473_v14, %v2300_v17  ;;  %v2835_v14 = vld [vmem:[%s14750_s5 + $0xb50] sm:$0xff]  ;;  %v2793_v33 = vld [vmem:[%s14750_s5 + $0xa00] sm:$0xff]  ;;  %v2800_v17 = vld [vmem:[%s14750_s5 + $0xa38] sm:$0xff]  ;;  %vm15507_vm9 = vcmask 1022976  }
 0x3f9   :  { %8765 = vmatprep.subr.bf16.mxu0 %v8764_v37  ;;  %9027 = vmatprep.subr.bf16.mxu1 %v9026_v8  ;;  %v9034_v27 = vpack.c.bf16 %v2838_v50, %v2835_v14  ;;  %v9038_v29 = vpack.c.bf16 %v2844_v26, %v2841_v15  ;;  %v2847_v37 = vld [vmem:[%s14750_s5 + $0xbb0] sm:$0xff]  ;;  %v2797_v8 = vld [vmem:[%s14750_s5 + $0xa20] sm:$0xff]  ;;  %v9040_v20 = vpack.c.bf16 %v2796_v0, %v2793_v33  ;;  %v2812_v50 = vld [vmem:[%s14750_s5 + $0xa98] sm:$0xff] }
 0x3fa   :  { %v9482_v30 = vpack.i.bf16 %v13163_v56, %v13159_v23  ;;  %v2330_v12 = vmax.f32 %v13175_v43, 0.0  ;;  %v9042_v61 = vpack.c.bf16 %v2850_v2, %v2847_v37  ;;  %v2799_v52 = vld [vmem:[%s14750_s5 + $0xa30] sm:$0xff]  ;;  %v8782_v40 = vpack.c.bf16 %v2800_v17, %v2797_v8  ;;  %v2809_v14 = vld [vmem:[%s14750_s5 + $0xa80] sm:$0xff]  ;;  %v2818_v47 = vld [vmem:[%s14750_s5 + $0xac8] sm:$0xff] }
 0x3fb   :  { %v9044_v46 = vpack.c.bf16 %v2802_v31, %v2799_v52  ;;  %v8790_v9 = vpack.c.bf16 %v2812_v50, %v2809_v14  ;;  %v2821_v26 = vld [vmem:[%s14750_s5 + $0xae0] sm:$0xff]  ;;  %v2830_v32 = vld [vmem:[%s14750_s5 + $0xb28] sm:$0xff]  ;;  %v2843_v8 = vld [vmem:[%s14750_s5 + $0xb90] sm:$0xff] }
 0x3fc   :  { %9483 = vrot.lane.b32.xlu1 %v9482_v30, %s15299_s10  ;;  %8767 = vmatpush1.bf16.msra.mxu0 %v8766_v51  ;;  %v8784_v51 = vpack.c.bf16 %v2807_v54, %v2804_v57  ;;  %v9046_v30 = vpack.c.bf16 %v2856_v5, %v2853_v18  ;;  %v2837_v33 = vld [vmem:[%s14750_s5 + $0xb60] sm:$0xff]  ;;  %v2842_v54 = vld [vmem:[%s14750_s5 + $0xb88] sm:$0xff]  ;;  %vm15504_vm7 = vmmov %vm15490_vm8  ;;  %vm15506_vm8 = vcmask 1031168  }
 0x3fd   :  { %8769 = vmatprep.subr.bf16.mxu0 %v8768_v42  ;;  %9029 = vmatpush3.bf16.msra.mxu1 %v9028_v41  ;;  %v2803_v42 = vld [vmem:[%s14750_s5 + $0xa50] sm:$0xff]  ;;  %v2813_v41 = vld [vmem:[%s14750_s5 + $0xaa0] sm:$0xff]  ;;  %v2910_v14 = vld [vmem:[%s14750_s5 + $0xda8] sm:$0xff] }
 0x3fe   :  { %9031 = vmatprep.subr.bf16.mxu1 %v9030_v35  ;;  %v2808_v35 = vld [vmem:[%s14750_s5 + $0xa78] sm:$0xff]  ;;  %v8786_v59 = vpack.c.bf16 %v2806_v24, %v2803_v42  ;;  %v8788_v7 = vpack.c.bf16 %v2813_v41, %v2810_v55  ;;  %v2833_v2 = vld [vmem:[%s14750_s5 + $0xb40] sm:$0xff]  ;;  %v2855_v42 = vld [vmem:[%s14750_s5 + $0xbf0] sm:$0xff] }
 0x3ff   :  { %v2849_v52 = vld [vmem:[%s14750_s5 + $0xbc0] sm:$0xff]  ;;  %v2854_v41 = vld [vmem:[%s14750_s5 + $0xbe8] sm:$0xff] }
 0x400   :  { %2365 = vrot.lane.b32.xlu1 %v2330_v12, %s15307_s14  ;;  %8771 = vmatpush1.bf16.msra.mxu0 %v8770_v62  ;;  %v9048_v62 = vpack.c.bf16 %v2808_v35, %v2805_v6  ;;  %v2845_v5 = vld [vmem:[%s14750_s5 + $0xba0] sm:$0xff] }
 0x401   :  { %8773 = vmatprep.subr.bf16.mxu0 %v8772_v44  ;;  %9033 = vmatpush3.bf16.msra.mxu1 %v9032_v45  ;;  %v2816_v44 = vld [vmem:[%s14750_s5 + $0xab8] sm:$0xff]  ;;  %v2815_v45 = vld [vmem:[%s14750_s5 + $0xab0] sm:$0xff]  ;;  %v2861_v6 = vld [vmem:[%s14750_s5 + $0xc20] sm:$0xff] }
 0x402   :  { %9035 = vmatprep.subr.bf16.mxu1 %v9034_v27  ;;  %v8792_v28 = vpack.c.bf16 %v2819_v34, %v2816_v44  ;;  %v2822_v27 = vld [vmem:[%s14750_s5 + $0xae8] sm:$0xff]  ;;  %v8794_v48 = vpack.c.bf16 %v2818_v47, %v2815_v45 }
 0x403   :  { %v8796_v15 = vpack.c.bf16 %v2825_v38, %v2822_v27  ;;  %v2857_v38 = vld [vmem:[%s14750_s5 + $0xc00] sm:$0xff] }
 0x404   :  { %8775 = vmatpush1.bf16.msra.mxu0 %v8774_v60  ;;  %v2824_v60 = vld [vmem:[%s14750_s5 + $0xaf8] sm:$0xff] }
 0x405   :  { %8777 = vmatprep.subr.bf16.mxu0 %v8776_v36  ;;  %9037 = vmatpush3.bf16.msra.mxu1 %v9036_v13  ;;  %v2828_v36 = vld [vmem:[%s14750_s5 + $0xb18] sm:$0xff]  ;;  %v8798_v11 = vpack.c.bf16 %v2824_v60, %v2821_v26  ;;  %v2827_v13 = vld [vmem:[%s14750_s5 + $0xb10] sm:$0xff]  ;;  %v2862_v60 = vld [vmem:[%s14750_s5 + $0xc28] sm:$0xff] }
 0x406   :  { %9039 = vmatprep.subr.bf16.mxu1 %v9038_v29  ;;  %v8800_v63 = vpack.c.bf16 %v2831_v58, %v2828_v36  ;;  %v2834_v29 = vld [vmem:[%s14750_s5 + $0xb48] sm:$0xff]  ;;  %v8802_v0 = vpack.c.bf16 %v2830_v32, %v2827_v13  ;;  %v2859_v26 = vld [vmem:[%s14750_s5 + $0xc10] sm:$0xff]  ;;  %v2916_v13 = vld [vmem:[%s14750_s5 + $0xdd8] sm:$0xff] }
 0x407   :  { %v8804_v37 = vpack.c.bf16 %v2837_v33, %v2834_v29 }
 0x408   :  { %8779 = vmatpush1.bf16.msra.mxu0 %v8778_v19  ;;  %v2836_v19 = vld [vmem:[%s14750_s5 + $0xb58] sm:$0xff] }
 0x409   :  { %8781 = vmatprep.subr.bf16.mxu0 %v8780_v53  ;;  %9041 = vmatpush3.bf16.msra.mxu1 %v9040_v20  ;;  %v2840_v53 = vld [vmem:[%s14750_s5 + $0xb78] sm:$0xff]  ;;  %v8806_v17 = vpack.c.bf16 %v2836_v19, %v2833_v2  ;;  %v2839_v20 = vld [vmem:[%s14750_s5 + $0xb70] sm:$0xff] }
 0x40a   :  { %9043 = vmatprep.subr.bf16.mxu1 %v9042_v61  ;;  %v8808_v57 = vpack.c.bf16 %v2843_v8, %v2840_v53  ;;  %v2846_v61 = vld [vmem:[%s14750_s5 + $0xba8] sm:$0xff]  ;;  %v8810_v31 = vpack.c.bf16 %v2842_v54, %v2839_v20  ;;  %v2865_v53 = vld [vmem:[%s14750_s5 + $0xc40] sm:$0xff]  ;;  %v2872_v20 = vld [vmem:[%s14750_s5 + $0xc78] sm:$0xff] }
 0x40b   :  { %v8812_v18 = vpack.c.bf16 %v2849_v52, %v2846_v61  ;;  %v2876_v54 = vld [vmem:[%s14750_s5 + $0xc98] sm:$0xff]  ;;  %v9056_v61 = vpack.c.bf16 %v2868_v4, %v2865_v53  ;;  %v2879_v52 = vld [vmem:[%s14750_s5 + $0xcb0] sm:$0xff] }
 0x40c   :  { %8783 = vmatpush1.bf16.msra.mxu0 %v8782_v40  ;;  %v2848_v40 = vld [vmem:[%s14750_s5 + $0xbb8] sm:$0xff] }
 0x40d   :  { %8785 = vmatprep.subr.bf16.mxu0 %v8784_v51  ;;  %9045 = vmatpush3.bf16.msra.mxu1 %v9044_v46  ;;  %v2852_v51 = vld [vmem:[%s14750_s5 + $0xbd8] sm:$0xff]  ;;  %v8814_v24 = vpack.c.bf16 %v2848_v40, %v2845_v5  ;;  %v2851_v46 = vld [vmem:[%s14750_s5 + $0xbd0] sm:$0xff]  ;;  %v2874_v5 = vld [vmem:[%s14750_s5 + $0xc88] sm:$0xff] }
 0x40e   :  { %9047 = vmatprep.subr.bf16.mxu1 %v9046_v30  ;;  %v8816_v55 = vpack.c.bf16 %v2855_v42, %v2852_v51  ;;  %v2858_v30 = vld [vmem:[%s14750_s5 + $0xc08] sm:$0xff]  ;;  %v8818_v35 = vpack.c.bf16 %v2854_v41, %v2851_v46  ;;  %v2925_v40 = vld [vmem:[%s14750_s5 + $0xe20] sm:$0xff]  ;;  %v2928_v51 = vld [vmem:[%s14750_s5 + $0xe38] sm:$0xff] }
 0x40f   :  { %v2878_v46 = vld [vmem:[%s14750_s5 + $0xca8] sm:$0xff]  ;;  %v2900_v53 = vld [vmem:[%s14750_s5 + $0xd58] sm:$0xff] }
 0x410   :  { %8787 = vmatpush1.bf16.msra.mxu0 %v8786_v59  ;;  %v8820_v59 = vpack.c.bf16 %v2861_v6, %v2858_v30  ;;  %v2882_v41 = vld [vmem:[%s14750_s5 + $0xcc8] sm:$0xff]  ;;  %v2885_v6 = vld [vmem:[%s14750_s5 + $0xce0] sm:$0xff] }
 0x411   :  { %8789 = vmatprep.subr.bf16.mxu0 %v8788_v7  ;;  %9049 = vmatpush3.bf16.msra.mxu1 %v9048_v62  ;;  %v2907_v7 = vld [vmem:[%s14750_s5 + $0xd90] sm:$0xff] }
 0x412   :  { %v9050_v50 = vpack.c.bf16 %v2910_v14, %v2907_v7  ;;  %v2880_v7 = vld [vmem:[%s14750_s5 + $0xcb8] sm:$0xff]  ;;  %v2931_v14 = vld [vmem:[%s14750_s5 + $0xe50] sm:$0xff] }
 0x414   :  { %8791 = vmatpush1.bf16.msra.mxu0 %v8790_v9  ;;  %9051 = vmatprep.subr.bf16.mxu1 %v9050_v50  ;;  %v2934_v50 = vld [vmem:[%s14750_s5 + $0xe68] sm:$0xff] }
 0x415   :  { %8793 = vmatprep.subr.bf16.mxu0 %v8792_v28 }
 0x418   :  { %8795 = vmatpush1.bf16.msra.mxu0 %v8794_v48  ;;  %v2860_v48 = vld [vmem:[%s14750_s5 + $0xc18] sm:$0xff] }
 0x419   :  { %8797 = vmatprep.subr.bf16.mxu0 %v8796_v15  ;;  %v2867_v15 = vld [vmem:[%s14750_s5 + $0xc50] sm:$0xff]  ;;  %v8822_v39 = vpack.c.bf16 %v2860_v48, %v2857_v38 }
 0x41a   :  { %v2891_v48 = vld [vmem:[%s14750_s5 + $0xd10] sm:$0xff] }
 0x41c   :  { %8799 = vmatpush1.bf16.msra.mxu0 %v8798_v11 }
 0x41d   :  { %8801 = vmatprep.subr.bf16.mxu0 %v8800_v63  ;;  %v2913_v63 = vld [vmem:[%s14750_s5 + $0xdc0] sm:$0xff] }
 0x41e   :  { %v9054_v19 = vpack.c.bf16 %v2916_v13, %v2913_v63  ;;  %v2887_v63 = vld [vmem:[%s14750_s5 + $0xcf0] sm:$0xff]  ;;  %v2890_v13 = vld [vmem:[%s14750_s5 + $0xd08] sm:$0xff] }
 0x420   :  { %8803 = vmatpush1.bf16.msra.mxu0 %v8802_v0  ;;  %v2863_v0 = vld [vmem:[%s14750_s5 + $0xc30] sm:$0xff] }
 0x421   :  { %8805 = vmatprep.subr.bf16.mxu0 %v8804_v37  ;;  %v2866_v37 = vld [vmem:[%s14750_s5 + $0xc48] sm:$0xff] }
 0x422   :  { %v8826_v8 = vpack.c.bf16 %v2866_v37, %v2863_v0  ;;  %v2943_v0 = vld [vmem:[%s14750_s5 + $0xeb0] sm:$0xff]  ;;  %v2946_v37 = vld [vmem:[%s14750_s5 + $0xec8] sm:$0xff] }
 0x424   :  { %8807 = vmatpush1.bf16.msra.mxu0 %v8806_v17 }
 0x425   :  { %8809 = vmatprep.subr.bf16.mxu0 %v8808_v57  ;;  %v2869_v57 = vld [vmem:[%s14750_s5 + $0xc60] sm:$0xff] }
 0x426   :  { %v8830_v42 = vpack.c.bf16 %v2872_v20, %v2869_v57  ;;  %v2952_v57 = vld [vmem:[%s14750_s5 + $0xef8] sm:$0xff] }
 0x428   :  { %8811 = vmatpush1.bf16.msra.mxu0 %v8810_v31 }
 0x429   :  { %8813 = vmatprep.subr.bf16.mxu0 %v8812_v18  ;;  %v2871_v18 = vld [vmem:[%s14750_s5 + $0xc70] sm:$0xff] }
 0x42a   :  { %v9060_v30 = vpack.c.bf16 %v2874_v5, %v2871_v18  ;;  %v2909_v5 = vld [vmem:[%s14750_s5 + $0xda0] sm:$0xff] }
 0x42c   :  { %8815 = vmatpush1.bf16.msra.mxu0 %v8814_v24  ;;  %v8832_v24 = vpack.c.bf16 %v2879_v52, %v2876_v54  ;;  %v2902_v52 = vld [vmem:[%s14750_s5 + $0xd68] sm:$0xff] }
 0x42d   :  { %8817 = vmatprep.subr.bf16.mxu0 %v8816_v55  ;;  %v2875_v55 = vld [vmem:[%s14750_s5 + $0xc90] sm:$0xff] }
 0x430   :  { %8819 = vmatpush1.bf16.msra.mxu0 %v8818_v35  ;;  %v9062_v35 = vpack.c.bf16 %v2928_v51, %v2925_v40  ;;  %v2901_v51 = vld [vmem:[%s14750_s5 + $0xd60] sm:$0xff] }
 0x431   :  { %8821 = vmatprep.subr.bf16.mxu0 %v8820_v59  ;;  %v2877_v59 = vld [vmem:[%s14750_s5 + $0xca0] sm:$0xff] }
 0x432   :  { %v9064_v38 = vpack.c.bf16 %v2880_v7, %v2877_v59 }
 0x436   :  { %v2364_v28 = vpop.permute.xlu0 %2363 }
 0x437   :  { %v2376_v36 = vsel %vm15494_vm11, %v9481_v1, %v2364_v28  ;;  %vm15508_vm11 = vcmask 1014784  }
 0x438   :  { %v13449_v2 = vmax.f32 %v2328_v3, %v2376_v36  ;;  %v2919_v3 = vld [vmem:[%s14750_s5 + $0xdf0] sm:$0xff]  ;;  %v2940_v36 = vld [vmem:[%s14750_s5 + $0xe98] sm:$0xff] }
 0x439   :  { %v9058_v31 = vpack.c.bf16 %v2922_v49, %v2919_v3  ;;  %v2903_v3 = vld [vmem:[%s14750_s5 + $0xd70] sm:$0xff]  ;;  %v9074_v49 = vpack.c.bf16 %v2946_v37, %v2943_v0 }
 0x43a   :  { %v8848_v54 = vpack.c.bf16 %v2903_v3, %v2900_v53  ;;  %v2935_v37 = vld [vmem:[%s14750_s5 + $0xe70] sm:$0xff]  ;;  %v2944_v3 = vld [vmem:[%s14750_s5 + $0xeb8] sm:$0xff] }
 0x44f   :  { %v8210_v62 = vpop.f32.mrb[2].mxu1 }
 0x450   :  { %v8211_v44 = vpop.f32.mrb[3].mxu1 }
 0x451   :  { %v8212_v34 = vadd.f32 %v8211_v44, %v8210_v62  ;;  %v8834_v62 = vpack.c.bf16 %v2878_v46, %v2875_v55  ;;  %v8836_v44 = vpack.c.bf16 %v2885_v6, %v2882_v41  ;;  %v2905_v46 = vld [vmem:[%s14750_s5 + $0xd80] sm:$0xff]  ;;  %v2908_v41 = vld [vmem:[%s14750_s5 + $0xd98] sm:$0xff] }
 0x452   :  { %v2912_v6 = vld [vmem:[%s14750_s5 + $0xdb8] sm:$0xff]  ;;  %v8854_v59 = vpack.c.bf16 %v2908_v41, %v2905_v46 }
 0x453   :  { %v13392_v9 = vadd.f32 %v8212_v34, %v13053_v10  ;;  %v2864_v10 = vld [vmem:[%s14750_s5 + $0xc38] sm:$0xff]  ;;  %v2881_v34 = vld [vmem:[%s14750_s5 + $0xcc0] sm:$0xff] }
 0x454   :  { %v8824_v33 = vpack.c.bf16 %v2867_v15, %v2864_v10  ;;  %v9066_v10 = vpack.c.bf16 %v2934_v50, %v2931_v14  ;;  %v2883_v15 = vld [vmem:[%s14750_s5 + $0xcd0] sm:$0xff]  ;;  %v2914_v50 = vld [vmem:[%s14750_s5 + $0xdc8] sm:$0xff]  ;;  %v2956_v41 = vld [vmem:[%s14750_s5 + $0xf18] sm:$0xff] }
 0x455   :  { %v2911_v14 = vld [vmem:[%s14750_s5 + $0xdb0] sm:$0xff] }
 0x46e   :  { %v13394_v45 = vpop.permute.xlu1 %9483 }
 0x46f   :  { %v9486_v47 = vunpack.i.h.bf16 %v13394_v45  ;;  %v9485_v27 = vunpack.i.l.bf16 %v13394_v45 }
 0x471   :  { %v2444_v58 = vsel %vm15495_vm13, %v9476_v16, %v9485_v27  ;;  %v2445_v11 = vsel %vm15496_vm14, %v9485_v27, %v9486_v47  ;;  %v2888_v27 = vld [vmem:[%s14750_s5 + $0xcf8] sm:$0xff]  ;;  %vm4391_vm13 = vcmask 949248   ;;  %vm4488_vm14 = vcmask 941056  }
 0x472   :  { %v2467_v25 = vmax.f32 %v12661_v22, %v2444_v58  ;;  %v2366_v32 = vpop.permute.xlu1 %2365  ;;  %v2468_v1 = vmax.f32 %v13159_v23, %v2445_v11  ;;  %v2870_v22 = vld [vmem:[%s14750_s5 + $0xc68] sm:$0xff]  ;;  %v9052_v23 = vpack.c.bf16 %v2862_v60, %v2859_v26  ;;  %v2937_v60 = vld [vmem:[%s14750_s5 + $0xe80] sm:$0xff]  ;;  %v8840_v11 = vpack.c.bf16 %v2891_v48, %v2888_v27  ;;  %v2920_v48 = vld [vmem:[%s14750_s5 + $0xdf8] sm:$0xff] }
 0x473   :  { %v2377_v16 = vsel %vm15497_vm15, %v2364_v28, %v2366_v32  ;;  %v13436_v29 = vmax.f32 %v2330_v12, %v2366_v32  ;;  %v2873_v12 = vld [vmem:[%s14750_s5 + $0xc80] sm:$0xff]  ;;  %v2884_v28 = vld [vmem:[%s14750_s5 + $0xcd8] sm:$0xff]  ;;  %v2886_v26 = vld [vmem:[%s14750_s5 + $0xce8] sm:$0xff]  ;;  %vm4585_vm15 = vcmask 932864  }
 0x474   :  { %v13453_v43 = vmax.f32 %v2329_v21, %v2377_v16  ;;  %3297 = vmatprep.mubr.f32.mxu0 %v2468_v1  ;;  %3720 = vmatprep.mubr.f32.mxu1 %v2468_v1  ;;  %v8828_v17 = vpack.c.bf16 %v2873_v12, %v2870_v22  ;;  %v8838_v58 = vpack.c.bf16 %v2884_v28, %v2881_v34  ;;  %v2897_v1 = vld [vmem:[%s14750_s5 + $0xd40] sm:$0xff]  ;;  %v9566_v34 = vmov 0.0|0.0  }
 0x475   :  { %2436 = vrot.lane.b32.xlu1 %v13436_v29, %s15299_s10  ;;  %3298 = vmatmul.mubr.f32.vlgmr.msra.gmra.mrb[0].mxu0 %v2467_v25  ;;  %v9068_v32 = vpack.c.bf16 %v2886_v26, %v2883_v15  ;;  %v2889_v16 = vld [vmem:[%s14750_s5 + $0xd00] sm:$0xff]  ;;  %v8842_v22 = vpack.c.bf16 %v2890_v13, %v2887_v63  ;;  %v8858_v28 = vpack.c.bf16 %v2914_v50, %v2911_v14  ;;  %v2927_v15 = vld [vmem:[%s14750_s5 + $0xe30] sm:$0xff] }
 0x476   :  { %v9487_v21 = vpack.i.bf16 %v13453_v43, %v13449_v2  ;;  %3721 = vmatmul.mubr.f32.vlgmr.msra.gmra.mrb[6].mxu1 %v2467_v25  ;;  %8823 = vmatpush1.bf16.msra.mxu0 %v8822_v39  ;;  %v2894_v25 = vld [vmem:[%s14750_s5 + $0xd28] sm:$0xff]  ;;  %v9070_v39 = vpack.c.bf16 %v2940_v36, %v2937_v60  ;;  %v2893_v12 = vld [vmem:[%s14750_s5 + $0xd20] sm:$0xff]  ;;  %v2923_v36 = vld [vmem:[%s14750_s5 + $0xe10] sm:$0xff] }
 0x477   :  { %8825 = vmatprep.subr.bf16.mxu0 %v8824_v33  ;;  %9053 = vmatpush3.bf16.msra.mxu1 %v9052_v23  ;;  %v2892_v33 = vld [vmem:[%s14750_s5 + $0xd18] sm:$0xff]  ;;  %v8844_v23 = vpack.c.bf16 %v2897_v1, %v2894_v25  ;;  %v2933_v63 = vld [vmem:[%s14750_s5 + $0xe60] sm:$0xff] }
 0x478   :  { %9488 = vrot.lane.b32.xlu0 %v9487_v21, %s15299_s10  ;;  %9055 = vmatprep.subr.bf16.mxu1 %v9054_v19  ;;  %v2896_v19 = vld [vmem:[%s14750_s5 + $0xd38] sm:$0xff]  ;;  %v9072_v4 = vpack.c.bf16 %v2892_v33, %v2889_v16  ;;  %v2895_v21 = vld [vmem:[%s14750_s5 + $0xd30] sm:$0xff] }
 0x479   :  { %v8846_v20 = vpack.c.bf16 %v2896_v19, %v2893_v12  ;;  %v2932_v1 = vld [vmem:[%s14750_s5 + $0xe58] sm:$0xff]  ;;  %v2939_v16 = vld [vmem:[%s14750_s5 + $0xe90] sm:$0xff]  ;;  %v2945_v12 = vld [vmem:[%s14750_s5 + $0xec0] sm:$0xff] }
 0x47a   :  { %8827 = vmatpush1.bf16.msra.mxu0 %v8826_v8  ;;  %v2898_v8 = vld [vmem:[%s14750_s5 + $0xd48] sm:$0xff] }
 0x47b   :  { %8829 = vmatprep.subr.bf16.mxu0 %v8828_v17  ;;  %9057 = vmatpush3.bf16.msra.mxu1 %v9056_v61  ;;  %v2949_v17 = vld [vmem:[%s14750_s5 + $0xee0] sm:$0xff]  ;;  %v2899_v61 = vld [vmem:[%s14750_s5 + $0xd50] sm:$0xff]  ;;  %v9076_v18 = vpack.c.bf16 %v2898_v8, %v2895_v21 }
 0x47c   :  { %9059 = vmatprep.subr.bf16.mxu1 %v9058_v31  ;;  %v2906_v31 = vld [vmem:[%s14750_s5 + $0xd88] sm:$0xff]  ;;  %v9078_v40 = vpack.c.bf16 %v2952_v57, %v2949_v17  ;;  %v2951_v21 = vld [vmem:[%s14750_s5 + $0xef0] sm:$0xff] }
 0x47d   :  { %v8852_v55 = vpack.c.bf16 %v2909_v5, %v2906_v31  ;;  %v2947_v57 = vld [vmem:[%s14750_s5 + $0xed0] sm:$0xff] }
 0x47e   :  { %8831 = vmatpush1.bf16.msra.mxu0 %v8830_v42  ;;  %v2904_v42 = vld [vmem:[%s14750_s5 + $0xd78] sm:$0xff] }
 0x47f   :  { %8833 = vmatprep.subr.bf16.mxu0 %v8832_v24  ;;  %9061 = vmatpush3.bf16.msra.mxu1 %v9060_v30  ;;  %v8850_v24 = vpack.c.bf16 %v2902_v52, %v2899_v61  ;;  %v9080_v30 = vpack.c.bf16 %v2904_v42, %v2901_v51  ;;  %v2957_v61 = vld [vmem:[%s14750_s5 + $0xf20] sm:$0xff] }
 0x480   :  { %9063 = vmatprep.subr.bf16.mxu1 %v9062_v35  ;;  %v2915_v35 = vld [vmem:[%s14750_s5 + $0xdd0] sm:$0xff] }
 0x481   :  { %v8856_v7 = vpack.c.bf16 %v2915_v35, %v2912_v6 }
 0x482   :  { %8835 = vmatpush1.bf16.msra.mxu0 %v8834_v62  ;;  %v2918_v62 = vld [vmem:[%s14750_s5 + $0xde8] sm:$0xff] }
 0x483   :  { %8837 = vmatprep.subr.bf16.mxu0 %v8836_v44  ;;  %9065 = vmatpush3.bf16.msra.mxu1 %v9064_v38  ;;  %v2921_v44 = vld [vmem:[%s14750_s5 + $0xe00] sm:$0xff] }
 0x484   :  { %9067 = vmatprep.subr.bf16.mxu1 %v9066_v10  ;;  %v8860_v27 = vpack.c.bf16 %v2921_v44, %v2918_v62  ;;  %v2917_v38 = vld [vmem:[%s14750_s5 + $0xde0] sm:$0xff]  ;;  %v2924_v10 = vld [vmem:[%s14750_s5 + $0xe18] sm:$0xff]  ;;  %v2959_v44 = vld [vmem:[%s14750_s5 + $0xf30] sm:$0xff] }
 0x485   :  { %v8862_v26 = vpack.c.bf16 %v2920_v48, %v2917_v38  ;;  %v8864_v60 = vpack.c.bf16 %v2927_v15, %v2924_v10  ;;  %v2966_v38 = vld [vmem:[%s14750_s5 + $0xf68] sm:$0xff]  ;;  %v2969_v48 = vld [vmem:[%s14750_s5 + $0xf80] sm:$0xff] }
 0x486   :  { %8839 = vmatpush1.bf16.msra.mxu0 %v8838_v58  ;;  %v2926_v58 = vld [vmem:[%s14750_s5 + $0xe28] sm:$0xff] }
 0x487   :  { %8841 = vmatprep.subr.bf16.mxu0 %v8840_v11  ;;  %9069 = vmatpush3.bf16.msra.mxu1 %v9068_v32  ;;  %v2930_v11 = vld [vmem:[%s14750_s5 + $0xe48] sm:$0xff]  ;;  %v8866_v13 = vpack.c.bf16 %v2926_v58, %v2923_v36  ;;  %v2929_v32 = vld [vmem:[%s14750_s5 + $0xe40] sm:$0xff]  ;;  %v8892_v36 = vpack.c.bf16 %v2969_v48, %v2966_v38  ;;  %v2968_v58 = vld [vmem:[%s14750_s5 + $0xf78] sm:$0xff] }
 0x488   :  { %9071 = vmatprep.subr.bf16.mxu1 %v9070_v39  ;;  %v8868_v25 = vpack.c.bf16 %v2933_v63, %v2930_v11  ;;  %v2936_v39 = vld [vmem:[%s14750_s5 + $0xe78] sm:$0xff]  ;;  %v8870_v33 = vpack.c.bf16 %v2932_v1, %v2929_v32  ;;  %v2970_v11 = vld [vmem:[%s14750_s5 + $0xf88] sm:$0xff]  ;;  %v2971_v1 = vld [vmem:[%s14750_s5 + $0xf90] sm:$0xff] }
 0x489   :  { %v8872_v0 = vpack.c.bf16 %v2939_v16, %v2936_v39  ;;  %v2972_v63 = vld [vmem:[%s14750_s5 + $0xf98] sm:$0xff]  ;;  %v2974_v16 = vld [vmem:[%s14750_s5 + $0xfa8] sm:$0xff]  ;;  %v3001_v48 = vld [vmem:[%s14750_s5 + $0x1080] sm:$0xff] }
 0x48a   :  { %8843 = vmatpush1.bf16.msra.mxu0 %v8842_v22  ;;  %v2938_v22 = vld [vmem:[%s14750_s5 + $0xe88] sm:$0xff] }
 0x48b   :  { %8845 = vmatprep.subr.bf16.mxu0 %v8844_v23  ;;  %9073 = vmatpush3.bf16.msra.mxu1 %v9072_v4  ;;  %v2942_v23 = vld [vmem:[%s14750_s5 + $0xea8] sm:$0xff]  ;;  %v8874_v19 = vpack.c.bf16 %v2938_v22, %v2935_v37  ;;  %v2941_v4 = vld [vmem:[%s14750_s5 + $0xea0] sm:$0xff] }
 0x48c   :  { %9075 = vmatprep.subr.bf16.mxu1 %v9074_v49  ;;  %v8876_v53 = vpack.c.bf16 %v2945_v12, %v2942_v23  ;;  %v2948_v49 = vld [vmem:[%s14750_s5 + $0xed8] sm:$0xff]  ;;  %v8878_v8 = vpack.c.bf16 %v2944_v3, %v2941_v4  ;;  %v2978_v37 = vld [vmem:[%s14750_s5 + $0xfc8] sm:$0xff]  ;;  %v2981_v22 = vld [vmem:[%s14750_s5 + $0xfe0] sm:$0xff]  ;;  %v8898_v23 = vpack.c.bf16 %v2974_v16, %v2971_v1  ;;  %v9568_v16 = vmov 0.0  }
 0x48d   :  { %v8880_v17 = vpack.c.bf16 %v2951_v21, %v2948_v49  ;;  %v2980_v4 = vld [vmem:[%s14750_s5 + $0xfd8] sm:$0xff]  ;;  %v2979_v3 = vld [vmem:[%s14750_s5 + $0xfd0] sm:$0xff]  ;;  %v2982_v49 = vld [vmem:[%s14750_s5 + $0xfe8] sm:$0xff] }
 0x48e   :  { %8847 = vmatpush1.bf16.msra.mxu0 %v8846_v20  ;;  %v2950_v20 = vld [vmem:[%s14750_s5 + $0xee8] sm:$0xff]  ;;  %v2984_v21 = vld [vmem:[%s14750_s5 + $0xff8] sm:$0xff] }
 0x48f   :  { %8849 = vmatprep.subr.bf16.mxu0 %v8848_v54  ;;  %9077 = vmatpush3.bf16.msra.mxu1 %v9076_v18  ;;  %v2954_v54 = vld [vmem:[%s14750_s5 + $0xf08] sm:$0xff]  ;;  %v8882_v52 = vpack.c.bf16 %v2950_v20, %v2947_v57  ;;  %v9095_v57 = vpack.c.bf16 %v2982_v49, %v2979_v3  ;;  %v2983_v20 = vld [vmem:[%s14750_s5 + $0xff0] sm:$0xff]  ;;  %v3869_v3 = vld [vmem:[%s15503_s7 + $0x18] sm:$0xff] }
 0x490   :  { %9079 = vmatprep.subr.bf16.mxu1 %v9078_v40  ;;  %v8884_v31 = vpack.c.bf16 %v2957_v61, %v2954_v54  ;;  %v2986_v61 = vld [vmem:[%s14750_s5 + $0x1008] sm:$0xff] }
 0x492   :  { %8851 = vmatpush1.bf16.msra.mxu0 %v8850_v24  ;;  %v2953_v24 = vld [vmem:[%s14750_s5 + $0xf00] sm:$0xff] }
 0x493   :  { %8853 = vmatprep.subr.bf16.mxu0 %v8852_v55  ;;  %9081 = vmatpush3.bf16.msra.mxu1 %v9080_v30  ;;  %v2955_v30 = vld [vmem:[%s14750_s5 + $0xf10] sm:$0xff]  ;;  %v8886_v62 = vpack.c.bf16 %v2956_v41, %v2953_v24 }
 0x494   :  { %9082 = vmatprep.subr.bf16.mxu1 %v9566_v34 }
 0x496   :  { %8855 = vmatpush1.bf16.msra.mxu0 %v8854_v59  ;;  %v2960_v59 = vld [vmem:[%s14750_s5 + $0xf38] sm:$0xff] }
 0x497   :  { %8857 = vmatprep.subr.bf16.mxu0 %v8856_v7  ;;  %v2963_v7 = vld [vmem:[%s14750_s5 + $0xf50] sm:$0xff] }
 0x49a   :  { %8859 = vmatpush1.bf16.msra.mxu0 %v8858_v28  ;;  %v2962_v28 = vld [vmem:[%s14750_s5 + $0xf48] sm:$0xff] }
 0x49b   :  { %8861 = vmatprep.subr.bf16.mxu0 %v8860_v27  ;;  %v2961_v27 = vld [vmem:[%s14750_s5 + $0xf40] sm:$0xff]  ;;  %v8890_v15 = vpack.c.bf16 %v2962_v28, %v2959_v44  ;;  %v3000_v28 = vld [vmem:[%s14750_s5 + $0x1078] sm:$0xff] }
 0x49c   :  { %v2997_v44 = vld [vmem:[%s14750_s5 + $0x1060] sm:$0xff] }
 0x49d   :  { %v9104_v38 = vpack.c.bf16 %v3000_v28, %v2997_v44  ;;  %v3876_v44 = vld [vmem:[%s15503_s7 + $0x50] sm:$0xff] }
 0x49e   :  { %8863 = vmatpush1.bf16.msra.mxu0 %v8862_v26 }
 0x49f   :  { %8865 = vmatprep.subr.bf16.mxu0 %v8864_v60  ;;  %v2965_v60 = vld [vmem:[%s14750_s5 + $0xf60] sm:$0xff] }
 0x4a2   :  { %8867 = vmatpush1.bf16.msra.mxu0 %v8866_v13  ;;  %v2975_v13 = vld [vmem:[%s14750_s5 + $0xfb0] sm:$0xff] }
 0x4a3   :  { %8869 = vmatprep.subr.bf16.mxu0 %v8868_v25  ;;  %v8894_v25 = vpack.c.bf16 %v2968_v58, %v2965_v60  ;;  %v8896_v39 = vpack.c.bf16 %v2975_v13, %v2972_v63  ;;  %v3006_v60 = vld [vmem:[%s14750_s5 + $0x10a8] sm:$0x7f] }
 0x4a6   :  { %8871 = vmatpush1.bf16.msra.mxu0 %v8870_v33  ;;  %v2973_v33 = vld [vmem:[%s14750_s5 + $0xfa0] sm:$0xff] }
 0x4a7   :  { %8873 = vmatprep.subr.bf16.mxu0 %v8872_v0  ;;  %v2976_v0 = vld [vmem:[%s14750_s5 + $0xfb8] sm:$0xff] }
 0x4a8   :  { %v9092_v12 = vpack.c.bf16 %v2976_v0, %v2973_v33 }
 0x4aa   :  { %8875 = vmatpush1.bf16.msra.mxu0 %v8874_v19  ;;  %v2977_v19 = vld [vmem:[%s14750_s5 + $0xfc0] sm:$0xff] }
 0x4ab   :  { %8877 = vmatprep.subr.bf16.mxu0 %v8876_v53  ;;  %v8900_v53 = vpack.c.bf16 %v2981_v22, %v2978_v37 }
 0x4ae   :  { %8879 = vmatpush1.bf16.msra.mxu0 %v8878_v8  ;;  %v2987_v8 = vld [vmem:[%s14750_s5 + $0x1010] sm:$0xff] }
 0x4af   :  { %8881 = vmatprep.subr.bf16.mxu0 %v8880_v17  ;;  %v8902_v17 = vpack.c.bf16 %v2980_v4, %v2977_v19  ;;  %v8904_v54 = vpack.c.bf16 %v2987_v8, %v2984_v21  ;;  %v6372_v21 = vld [vmem:[%s15505_s30] sm:$0xff] }
 0x4b0   :  { %v3866_v8 = vld [vmem:[%s15503_s7] sm:$0xff] }
 0x4b2   :  { %8883 = vmatpush1.bf16.msra.mxu0 %v8882_v52  ;;  %v2985_v52 = vld [vmem:[%s14750_s5 + $0x1000] sm:$0xff] }
 0x4b3   :  { %8885 = vmatprep.subr.bf16.mxu0 %v8884_v31  ;;  %v2988_v31 = vld [vmem:[%s14750_s5 + $0x1018] sm:$0xff] }
 0x4b4   :  { %v9098_v24 = vpack.c.bf16 %v2988_v31, %v2985_v52  ;;  %v3870_v31 = vld [vmem:[%s15503_s7 + $0x20] sm:$0xff] }
 0x4c6   :  { %v8245_v18 = vpop.f32.mrb[4].mxu1 }
 0x4c7   :  { %v8246_v5 = vpop.f32.mrb[5].mxu1 }
 0x4c8   :  { %v8247_v40 = vadd.f32 %v8246_v5, %v8245_v18  ;;  %v2990_v18 = vld [vmem:[%s14750_s5 + $0x1028] sm:$0xff]  ;;  %v2993_v5 = vld [vmem:[%s14750_s5 + $0x1040] sm:$0xff] }
 0x4c9   :  { %v8908_v41 = vpack.c.bf16 %v2993_v5, %v2990_v18 }
 0x4ca   :  { %v13711_v51 = vadd.f32 %v8247_v40, %v13392_v9  ;;  %v2958_v9 = vld [vmem:[%s14750_s5 + $0xf28] sm:$0xff]  ;;  %v8906_v40 = vpack.c.bf16 %v2986_v61, %v2983_v20 }
 0x4e7   :  { %v13741_v14 = vpop.permute.xlu1 %2436 }
 0x4e8   :  { %v2472_v10 = vmax.f32 %v13436_v29, %v13741_v14  ;;  %v2967_v29 = vld [vmem:[%s14750_s5 + $0xf70] sm:$0xff] }
 0x4e9   :  { %v9089_v32 = vpack.c.bf16 %v2970_v11, %v2967_v29 }
 0x4ea   :  { %v13713_v42 = vpop.permute.xlu0 %9488 }
 0x4eb   :  { %v9491_v55 = vunpack.i.h.bf16 %v13713_v42  ;;  %v9490_v46 = vunpack.i.l.bf16 %v13713_v42 }
 0x4ed   :  { %v2446_v6 = vsel %vm15498_vm3, %v9486_v47, %v9490_v46  ;;  %v2447_v35 = vsel %vm15499_vm2, %v9490_v46, %v9491_v55  ;;  %v9083_v47 = vpack.c.bf16 %v2958_v9, %v2955_v30  ;;  %v2989_v46 = vld [vmem:[%s14750_s5 + $0x1020] sm:$0xff]  ;;  %v2992_v30 = vld [vmem:[%s14750_s5 + $0x1038] sm:$0xff]  ;;  %v2991_v9 = vld [vmem:[%s14750_s5 + $0x1030] sm:$0xff]  ;;  %v2448_v11 = vsel %vm15502_vm1, %v9491_v55, %v13741_v14 }
 0x4ee   :  { %v2469_v50 = vmax.f32 %v13163_v56, %v2446_v6  ;;  %v2470_v45 = vmax.f32 %v13449_v2, %v2447_v35  ;;  %v2964_v56 = vld [vmem:[%s14750_s5 + $0xf58] sm:$0xff]  ;;  %v8888_v2 = vpack.c.bf16 %v2963_v7, %v2960_v59  ;;  %v2994_v6 = vld [vmem:[%s14750_s5 + $0x1048] sm:$0xff]  ;;  %v2999_v59 = vld [vmem:[%s14750_s5 + $0x1070] sm:$0xff]  ;;  %v8910_v7 = vpack.c.bf16 %v2992_v30, %v2989_v46 }
 0x4ef   :  { %v9086_v26 = vpack.c.bf16 %v2964_v56, %v2961_v27  ;;  %v2996_v35 = vld [vmem:[%s14750_s5 + $0x1058] sm:$0xff]  ;;  %v3002_v27 = vld [vmem:[%s14750_s5 + $0x1088] sm:$0xff]  ;;  %v3005_v56 = vld [vmem:[%s14750_s5 + $0x10a0] sm:$0x7f]  ;;  %v2471_v63 = vmax.f32 %v13453_v43, %v2448_v11  ;;  %vm4682_vm3 = vcmask 924672   ;;  %vm4779_vm2 = vcmask 916480  }
 0x4f0   :  { %3368 = vmatprep.mubr.f32.mxu0 %v2470_v45  ;;  %3790 = vmatprep.mubr.f32.mxu1 %v2470_v45  ;;  %v2995_v45 = vld [vmem:[%s14750_s5 + $0x1050] sm:$0xff]  ;;  %vm5079_vm1 = vcmask 834560  }
 0x4f1   :  { %3369 = vmatmul.mubr.f32.vlgmr.msra.gmra.mrb[0].mxu0 %v2469_v50  ;;  %3791 = vmatmul.mubr.f32.vlgmr.msra.gmra.mrb[8].mxu1 %v2469_v50  ;;  %v9101_v50 = vpack.c.bf16 %v2994_v6, %v2991_v9  ;;  %v3872_v46 = vld [vmem:[%s15503_s7 + $0x30] sm:$0xff]  ;;  %v3873_v6 = vld [vmem:[%s15503_s7 + $0x38] sm:$0xff] }
 0x4f2   :  { %8887 = vmatpush1.bf16.msra.mxu0 %v8886_v62  ;;  %9084 = vmatpush1.bf16.msra.mxu1 %v9083_v47  ;;  %v8912_v62 = vpack.c.bf16 %v2999_v59, %v2996_v35  ;;  %v2998_v47 = vld [vmem:[%s14750_s5 + $0x1068] sm:$0xff]  ;;  %v3874_v59 = vld [vmem:[%s15503_s7 + $0x40] sm:$0xff] }
 0x4f3   :  { %8015 = vmatprep.mubr.msk.f32.mxu0 %vm1985_vm10, %v2472_v10  ;;  %8017 = vmatprep.mubr.msk.f32.mxu1 %vm1985_vm10, %v2472_v10  ;;  %vm3010_vm10 = vcmask 1046528   ;;  %v8916_v10 = vpack.c.bf16 %v3005_v56, %v3002_v27  ;;  %v3877_v56 = vld [vmem:[%s15503_s7 + $0x58] sm:$0xff] }
 0x4f4   :  { %8889 = vmatprep.subr.bf16.mxu0 %v8888_v2  ;;  %9085 = vmatprep.subr.bf16.mxu1 %v9566_v34  ;;  %v8914_v2 = vpack.c.bf16 %v2998_v47, %v2995_v45  ;;  %vm13894_vm0 = vmpackc.low %vm3010_vm10, %vm9567_vm4  ;;  %v3875_v45 = vld [vmem:[%s15503_s7 + $0x48] sm:$0xff]  ;;  %vm4879_vm10 = vcmask 850944   ;;  %vm4979_vm4 = vcmask 842752  }
 0x4f6   :  { %8891 = vmatpush1.bf16.msra.mxu0 %v8890_v15  ;;  %9087 = vmatpush1.bf16.msra.mxu1 %v9086_v26  ;;  %v3004_v15 = vld [vmem:[%s14750_s5 + $0x1098] sm:$0x7f]  ;;  %v3003_v26 = vld [vmem:[%s14750_s5 + $0x1090] sm:$0xff]  ;;  %s9569_s5 = smov 116  }
 0x4f7   :  { %8893 = vmatprep.subr.bf16.mxu0 %v8892_v36  ;;  %9088 = vmatprep.subr.bf16.mxu1 %v9566_v34  ;;  %v8919_v58 = vpack.c.bf16 %v3004_v15, %v3001_v48  ;;  %v9107_v29 = vpack.c.bf16 %v3006_v60, %v3003_v26  ;;  %v3879_v26 = vld [vmem:[%s15503_s7 + $0x68] sm:$0xff] }
 0x4fa   :  { %8895 = vmatpush1.bf16.msra.mxu0 %v8894_v25  ;;  %9090 = vmatpush1.bf16.msra.mxu1 %v9089_v32 }
 0x4fb   :  { %8897 = vmatprep.subr.bf16.mxu0 %v8896_v39  ;;  %9091 = vmatprep.subr.bf16.mxu1 %v9566_v34 }
 0x4fe   :  { %8899 = vmatpush1.bf16.msra.mxu0 %v8898_v23  ;;  %9093 = vmatpush1.bf16.msra.mxu1 %v9092_v12  ;;  %v3868_v12 = vld [vmem:[%s15503_s7 + $0x10] sm:$0xff] }
 0x4ff   :  { %8901 = vmatprep.subr.bf16.mxu0 %v8900_v53  ;;  %9094 = vmatprep.subr.bf16.mxu1 %v9566_v34 }
 0x502   :  { %8903 = vmatpush1.bf16.msra.mxu0 %v8902_v17  ;;  %9096 = vmatpush1.bf16.msra.mxu1 %v9095_v57  ;;  %v6373_v57 = vld [vmem:[%s15505_s30 + $0x8] sm:$0xff] }
 0x503   :  { %8905 = vmatprep.subr.bf16.mxu0 %v8904_v54  ;;  %9097 = vmatprep.subr.bf16.mxu1 %v9566_v34  ;;  %v3867_v54 = vld [vmem:[%s15503_s7 + $0x8] sm:$0xff] }
 0x506   :  { %8907 = vmatpush1.bf16.msra.mxu0 %v8906_v40  ;;  %9099 = vmatpush1.bf16.msra.mxu1 %v9098_v24  ;;  %v3871_v40 = vld [vmem:[%s15503_s7 + $0x28] sm:$0xff] }
 0x507   :  { %8909 = vmatprep.subr.bf16.mxu0 %v8908_v41  ;;  %9100 = vmatprep.subr.bf16.mxu1 %v9566_v34 }
 0x50a   :  { %8911 = vmatpush1.bf16.msra.mxu0 %v8910_v7  ;;  %9102 = vmatpush1.bf16.msra.mxu1 %v9101_v50 }
 0x50b   :  { %8913 = vmatprep.subr.bf16.mxu0 %v8912_v62  ;;  %9103 = vmatprep.subr.bf16.mxu1 %v9566_v34 }
 0x50e   :  { %8915 = vmatpush1.bf16.msra.mxu0 %v8914_v2  ;;  %9105 = vmatpush1.bf16.msra.mxu1 %v9104_v38  ;;  %v3878_v38 = vld [vmem:[%s15503_s7 + $0x60] sm:$0xff] }
 0x50f   :  { %8918 = vmatprep.subr.msk.bf16.mxu0 %vm13894_vm0, %v8916_v10  ;;  %9106 = vmatprep.subr.bf16.mxu1 %v9566_v34 }
 0x512   :  { %8921 = vmatpush1.bf16.msk.msra.mxu0 %vm13894_vm0, %v8919_v58  ;;  %9109 = vmatpush1.bf16.msk.msra.mxu1 %vm13894_vm0, %v9107_v29  ;;  %v3880_v58 = vld [vmem:[%s15503_s7 + $0x70] sm:$0xff] }
 0x513   :  { %9110 = vmatprep.subr.bf16.mxu0 %v9566_v34 }
 0x515   :  { %3440 = vmatmul.mubr.f32.vlgmr.msra.gmra.mrb[0].mxu0 %v2471_v63  ;;  %3861 = vmatmul.mubr.f32.vlgmr.msra.gmra.mrb[10].mxu1 %v2471_v63  ;;  %v3881_v63 = vld [vmem:[%s15503_s7 + $0x78] sm:$0xff] }
 0x516   :  { %3999 = vmatprep.mubr.f32.mxu1 %v9568_v16 }
 0x549   :  { %v8280_v13 = vpop.f32.mrb[6].mxu1 }
 0x54a   :  { %v8281_v25 = vpop.f32.mrb[7].mxu1 }
 0x54b   :  { %v8282_v32 = vadd.f32 %v8281_v25, %v8280_v13 }
 0x54d   :  { %v3723_v1 = vadd.f32 %v8282_v32, %v13711_v51  ;;  %v3882_v32 = vld [vmem:[%s15503_s7 + $0x80] sm:$0xff] }
 0x5c4   :  { %v8315_v42 = vpop.f32.mrb[8].mxu1 }
 0x5c5   :  { %v8316_v39 = vpop.f32.mrb[9].mxu1 }
 0x5c6   :  { %v8317_v55 = vadd.f32 %v8316_v39, %v8315_v42 }
 0x5c8   :  { %v3793_v14 = vadd.f32 %v8317_v55, %v3723_v1  ;;  %v3883_v55 = vld [vmem:[%s15503_s7 + $0x88] sm:$0xff] }
 0x5e8   :  { %v13913_v33 = vpop.f32.mrb[0].mxu0  ;;  %v3862_v0 = vpop.f32.mrb[10].mxu1 }
 0x5e9   :  { %v13915_v43 = vadd.f32 %v3862_v0, %v3793_v14  ;;  %v3864_v37 = vpop.f32.mrb[11].mxu1  ;;  %3918 = vrot.lane.b32.xlu0 %v13913_v33, %s15307_s14  ;;  %v13919_v22 = vpop.f32.mrb[1].mxu0 }
 0x5ea   :  { %3920 = vrot.lane.b32.xlu1 %v13919_v22, %s15307_s14 }
 0x5ed   :  { %4099 = vrot.lane.b32.xlu0 %v13913_v33, %s15311_s1 }
 0x5ee   :  { %4101 = vrot.lane.b32.xlu1 %v13919_v22, %s15311_s1  ;;  %s9570_s1 = smov 115  }
 0x5f1   :  { %4195 = vrot.lane.b32.xlu0 %v13913_v33, %s15313_s27 }
 0x5f2   :  { %4197 = vrot.lane.b32.xlu1 %v13919_v22, %s15313_s27  ;;  %s9572_s27 = smov 113  }
 0x5f5   :  { %4291 = vrot.lane.b32.xlu0 %v13913_v33, %s15315_s13 }
 0x5f6   :  { %4293 = vrot.lane.b32.xlu1 %v13919_v22, %s15315_s13  ;;  %s9573_s13 = smov 112  }
 0x5f9   :  { %4387 = vrot.lane.b32.xlu0 %v13913_v33, %s9569_s5 }
 0x5fa   :  { %4389 = vrot.lane.b32.xlu1 %v13919_v22, %s9569_s5 }
 0x5fd   :  { %4484 = vrot.lane.b32.xlu0 %v13913_v33, %s9570_s1 }
 0x5fe   :  { %4486 = vrot.lane.b32.xlu1 %v13919_v22, %s9570_s1 }
 0x601   :  { %4581 = vrot.lane.b32.xlu0 %v13913_v33, %s9571_s20 }
 0x602   :  { %4583 = vrot.lane.b32.xlu1 %v13919_v22, %s9571_s20 }
 0x605   :  { %4678 = vrot.lane.b32.xlu0 %v13913_v33, %s9572_s27 }
 0x606   :  { %4680 = vrot.lane.b32.xlu1 %v13919_v22, %s9572_s27  ;;  %s15517_s27 = sld [smem:[#allocation99_spill]] }
 0x609   :  { %4775 = vrot.lane.b32.xlu0 %v13913_v33, %s9573_s13 }
 0x60a   :  { %4777 = vrot.lane.b32.xlu1 %v13919_v22, %s9573_s13 }
 0x60d   :  { %4875 = vrot.lane.b32.xlu0 %v13919_v22, %s9574_s8 }
 0x60e   :  { %4877 = vrot.lane.b32.xlu1 %v13915_v43, %s9574_s8 }
 0x611   :  { %4873 = vrot.lane.b32.xlu0 %v13913_v33, %s9574_s8 }
 0x612   :  { %4975 = vrot.lane.b32.xlu1 %v13919_v22, %s9575_s23 }
 0x615   :  { %4977 = vrot.lane.b32.xlu0 %v13915_v43, %s9575_s23 }
 0x616   :  { %4973 = vrot.lane.b32.xlu1 %v13913_v33, %s9575_s23 }
 0x619   :  { %5075 = vrot.lane.b32.xlu0 %v13919_v22, %s9576_s12 }
 0x61a   :  { %5077 = vrot.lane.b32.xlu1 %v13915_v43, %s9576_s12 }
 0x61d   :  { %5073 = vrot.lane.b32.xlu0 %v13913_v33, %s9576_s12 }
 0x61e   :  { %5175 = vrot.lane.b32.xlu1 %v13919_v22, %s9577_s21 }
 0x621   :  { %5177 = vrot.lane.b32.xlu0 %v13915_v43, %s9577_s21 }
 0x622   :  { %5173 = vrot.lane.b32.xlu1 %v13913_v33, %s9577_s21 }
 0x625   :  { %5275 = vrot.lane.b32.xlu0 %v13919_v22, %s15299_s10 }
 0x626   :  { %5277 = vrot.lane.b32.xlu1 %v13915_v43, %s15299_s10 }
 0x629   :  { %5273 = vrot.lane.b32.xlu0 %v13913_v33, %s15299_s10  ;;  %s9581_s10 = smov 89  }
 0x62a   :  { %5374 = vrot.lane.b32.xlu1 %v13919_v22, %s9578_s11 }
 0x62d   :  { %5376 = vrot.lane.b32.xlu0 %v13915_v43, %s9578_s11 }
 0x62e   :  { %5372 = vrot.lane.b32.xlu1 %v13913_v33, %s9578_s11 }
 0x631   :  { %5474 = vrot.lane.b32.xlu0 %v13919_v22, %s9579_s19 }
 0x632   :  { %5476 = vrot.lane.b32.xlu1 %v13915_v43, %s9579_s19 }
 0x635   :  { %5472 = vrot.lane.b32.xlu0 %v13913_v33, %s9579_s19  ;;  %s15518_s19 = sld [smem:[#allocation101_spill]] }
 0x636   :  { %5574 = vrot.lane.b32.xlu1 %v13919_v22, %s9580_s18 }
 0x639   :  { %5576 = vrot.lane.b32.xlu0 %v13915_v43, %s9580_s18 }
 0x63a   :  { %5572 = vrot.lane.b32.xlu1 %v13913_v33, %s9580_s18 }
 0x63d   :  { %5674 = vrot.lane.b32.xlu0 %v13919_v22, %s9581_s10 }
 0x63e   :  { %5676 = vrot.lane.b32.xlu1 %v13915_v43, %s9581_s10 }
 0x641   :  { %5672 = vrot.lane.b32.xlu0 %v13913_v33, %s9581_s10 }
 0x642   :  { %5774 = vrot.lane.b32.xlu1 %v13919_v22, %s9582_s28 }
 0x645   :  { %5776 = vrot.lane.b32.xlu0 %v13915_v43, %s9582_s28 }
 0x646   :  { %5772 = vrot.lane.b32.xlu1 %v13913_v33, %s9582_s28  ;;  %s15519_s28 = sld [smem:[#allocation103_spill]] }
 0x649   :  { %5874 = vrot.lane.b32.xlu0 %v13919_v22, %s9583_s16 }
 0x64a   :  { %5876 = vrot.lane.b32.xlu1 %v13915_v43, %s9583_s16 }
 0x64d   :  { %5872 = vrot.lane.b32.xlu0 %v13913_v33, %s9583_s16  ;;  %s15511_s16 = sld [smem:[#allocation97_spill]] }
 0x64e   :  { %5974 = vrot.lane.b32.xlu1 %v13919_v22, %s9584_s4 }
 0x651   :  { %5976 = vrot.lane.b32.xlu0 %v13915_v43, %s9584_s4 }
 0x652   :  { %5972 = vrot.lane.b32.xlu1 %v13913_v33, %s9584_s4  ;;  %s15515_s4 = sld [smem:[#allocation100_spill]] }
 0x655   :  { %6074 = vrot.lane.b32.xlu0 %v13919_v22, %s9585_s24 }
 0x656   :  { %6076 = vrot.lane.b32.xlu1 %v13915_v43, %s9585_s24 }
 0x659   :  { %6072 = vrot.lane.b32.xlu0 %v13913_v33, %s9585_s24  ;;  %s9589_s24 = smov [#allocation2]  }
 0x65a   :  { %6174 = vrot.lane.b32.xlu1 %v13919_v22, %s9586_s29 }
 0x65b   :  { %v3919_v51 = vpop.permute.xlu0 %3918 }
 0x65c   :  { %v3921_v23 = vpop.permute.xlu1 %3920 }
 0x65d   :  { %v3922_v19 = vsel %vm15504_vm7, %v3919_v51, %v3921_v23  ;;  %6176 = vrot.lane.b32.xlu0 %v13915_v43, %s9586_s29  ;;  %8018 = vmatprep.subr.msk.mxu1 %vm3930_vm12, %v3921_v23  ;;  %v3885_v51 = vld [vmem:[%s15503_s7 + $0x98] sm:$0xff]  ;;  %vm5179_vm7 = vcmask 826368  }
 0x65e   :  { %6172 = vrot.lane.b32.xlu1 %v13913_v33, %s9586_s29  ;;  %8019 = vmatpush1.msk.msra.mxu1 %vm3930_vm12, %v3922_v19  ;;  %s8005_s29 = sshll.u32 %s9589_s24, 4  ;;  %s8006_s29 = int_to_ptr.vmem [resolvable:$true] %s8005_s29 }
 0x65f   :  { %v4100_v53 = vpop.permute.xlu0 %4099  ;;  %8020 = vmatmul.mubr.msk.f32.vlgmr.msra.gmra.mrb[12].mxu1 %vm3923_vm6, %v3868_v12  ;;  %8022 = vmatprep.subr.msk.mxu1 %vm3930_vm12, %v13919_v22  ;;  %v3886_v12 = vld [vmem:[%s15503_s7 + $0xa0] sm:$0xff]  ;;  %p9498_p1 = scmp.lt.s32.totalorder %s8006_s29, %s8006_s29 }
 0x660   :  { %8023 = vmatpush1.msk.msra.mxu1 %vm3930_vm12, %v13913_v33  ;;  %v4102_v4 = vpop.permute.xlu1 %4101  ;;  %4005 = vmatprep.mubr.f32.mxu1 %v9568_v16 }
 0x661   :  { %6274 = vrot.lane.b32.xlu0 %v13919_v22, %s9587_s17  ;;  %8026 = vmatprep.subr.msk.mxu1 %vm3930_vm12, %v4102_v4  ;;  %v4103_v20 = vsel %vm15506_vm8, %v4100_v53, %v4102_v4  ;;  %vm15509_vm8 = vcmask 818176  }
 0x662   :  { %6276 = vrot.lane.b32.xlu1 %v13915_v43, %s9587_s17 }
 0x663   :  { %v4196_v49 = vpop.permute.xlu0 %4195  ;;  %8021 = vmatmul.mubr.msk.f32.gmra.mrb[14].mxu1 %vm3923_vm6, %v3869_v3  ;;  %v3887_v3 = vld [vmem:[%s15503_s7 + $0xa8] sm:$0xff] }
 0x664   :  { %4086 = vmatprep.mubr.f32.mxu1 %v9568_v16  ;;  %v4198_v17 = vpop.permute.xlu1 %4197 }
 0x665   :  { %6272 = vrot.lane.b32.xlu0 %v13913_v33, %s9587_s17  ;;  %v4199_v18 = vsel %vm15507_vm9, %v4196_v49, %v4198_v17  ;;  %v3884_v33 = vld [vmem:[%s15503_s7 + $0x90] sm:$0xff]  ;;  %vm5378_vm9 = vcmask 752640  }
 0x666   :  { %6376 = vperm.xlu1 %9440, %v6372_v21  }
 0x667   :  { %8024 = vmatmul.mubr.msk.f32.vlgmr.msra.gmra.mrb[12].mxu1 %vm3923_vm6, %v3866_v8  ;;  %v4292_v61 = vpop.permute.xlu0 %4291  ;;  %v3888_v8 = vld [vmem:[%s15503_s7 + $0xb0] sm:$0xff] }
 0x668   :  { %8027 = vmatpush1.msk.msra.mxu1 %vm3930_vm12, %v4103_v20  ;;  %4092 = vmatprep.mubr.f32.mxu1 %v9568_v16  ;;  %v4294_v52 = vpop.permute.xlu1 %4293 }
 0x669   :  { %8030 = vmatprep.subr.msk.mxu1 %vm3930_vm12, %v4198_v17  ;;  %6381 = vperm.xlu0 %9441, %v6373_v57   ;;  %v4295_v30 = vsel %vm15508_vm11, %v4292_v61, %v4294_v52  ;;  %vm15510_vm11 = vmmov %vm15509_vm8 }
 0x66b   :  { %8025 = vmatmul.mubr.msk.f32.gmra.mrb[14].mxu1 %vm3923_vm6, %v3867_v54  ;;  %v4388_v5 = vpop.permute.xlu0 %4387  ;;  %v3889_v54 = vld [vmem:[%s15503_s7 + $0xb8] sm:$0xff] }
 0x66c   :  { %4178 = vmatprep.mubr.f32.mxu1 %v9568_v16  ;;  %v4390_v24 = vpop.permute.xlu1 %4389 }
 0x66d   :  { %v4392_v50 = vsel %vm4391_vm13, %v4388_v5, %v4390_v24 }
 0x66f   :  { %8028 = vmatmul.mubr.msk.f32.vlgmr.msra.gmra.mrb[12].mxu1 %vm3923_vm6, %v3870_v31  ;;  %v4485_v41 = vpop.permute.xlu0 %4484 }
 0x670   :  { %8031 = vmatpush1.msk.msra.mxu1 %vm3930_vm12, %v4199_v18  ;;  %4184 = vmatprep.mubr.f32.mxu1 %v9568_v16  ;;  %v4487_v9 = vpop.permute.xlu1 %4486 }
 0x671   :  { %8034 = vmatprep.subr.msk.mxu1 %vm3930_vm12, %v4294_v52  ;;  %v4489_v28 = vsel %vm4488_vm14, %v4485_v41, %v4487_v9  ;;  %v3890_v52 = vld [vmem:[%s15503_s7 + $0xc0] sm:$0xff]  ;;  %v3892_v41 = vld [vmem:[%s15503_s7 + $0xd0] sm:$0xff]  ;;  %vm5478_vm14 = vcmask 744448  }
 0x673   :  { %8029 = vmatmul.mubr.msk.f32.gmra.mrb[14].mxu1 %vm3923_vm6, %v3871_v40  ;;  %v4582_v35 = vpop.permute.xlu0 %4581 }
 0x674   :  { %4274 = vmatprep.mubr.f32.mxu1 %v9568_v16  ;;  %v4584_v7 = vpop.permute.xlu1 %4583 }
 0x675   :  { %v4586_v10 = vsel %vm4585_vm15, %v4582_v35, %v4584_v7  ;;  %v3893_v35 = vld [vmem:[%s15503_s7 + $0xd8] sm:$0xff]  ;;  %vm5578_vm15 = vcmask 736256  }
 0x677   :  { %8032 = vmatmul.mubr.msk.f32.vlgmr.msra.gmra.mrb[12].mxu1 %vm3923_vm6, %v3872_v46  ;;  %v4679_v62 = vpop.permute.xlu0 %4678 }
 0x678   :  { %8035 = vmatpush1.msk.msra.mxu1 %vm3930_vm12, %v4295_v30  ;;  %4280 = vmatprep.mubr.f32.mxu1 %v9568_v16  ;;  %v4681_v47 = vpop.permute.xlu1 %4680 }
 0x679   :  { %8038 = vmatprep.subr.msk.mxu1 %vm3930_vm12, %v4390_v24  ;;  %v4683_v11 = vsel %vm4682_vm3, %v4679_v62, %v4681_v47  ;;  %v3891_v24 = vld [vmem:[%s15503_s7 + $0xc8] sm:$0xff]  ;;  %vm5678_vm3 = vcmask 728064  }
 0x67b   :  { %8033 = vmatmul.mubr.msk.f32.gmra.mrb[14].mxu1 %vm3923_vm6, %v3873_v6  ;;  %v4776_v27 = vpop.permute.xlu0 %4775 }
 0x67c   :  { %4370 = vmatprep.mubr.f32.mxu1 %v9568_v16  ;;  %v4778_v2 = vpop.permute.xlu1 %4777 }
 0x67d   :  { %v4780_v1 = vsel %vm4779_vm2, %v4776_v27, %v4778_v2  ;;  %v3896_v27 = vld [vmem:[%s15503_s7 + $0xf0] sm:$0xff]  ;;  %vm5778_vm2 = vcmask 719872  }
 0x67f   :  { %8036 = vmatmul.mubr.msk.f32.vlgmr.msra.gmra.mrb[12].mxu1 %vm3923_vm6, %v3874_v59  ;;  %v4876_v48 = vpop.permute.xlu0 %4875 }
 0x680   :  { %8039 = vmatpush1.msk.msra.mxu1 %vm3930_vm12, %v4392_v50  ;;  %4376 = vmatprep.mubr.f32.mxu1 %v9568_v16  ;;  %v4878_v15 = vpop.permute.xlu1 %4877  ;;  %v3894_v50 = vld [vmem:[%s15503_s7 + $0xe0] sm:$0xff] }
 0x681   :  { %8042 = vmatprep.subr.msk.mxu1 %vm3930_vm12, %v4487_v9  ;;  %v4881_v39 = vsel %vm4879_vm10, %v4876_v48, %v4878_v15 }
 0x683   :  { %8037 = vmatmul.mubr.msk.f32.gmra.mrb[14].mxu1 %vm3923_vm6, %v3875_v45  ;;  %v4874_v60 = vpop.permute.xlu0 %4873 }
 0x684   :  { %4467 = vmatprep.mubr.f32.mxu1 %v9568_v16  ;;  %v4976_v29 = vpop.permute.xlu1 %4975  ;;  %v4880_v43 = vsel %vm4879_vm10, %v4874_v60, %v4876_v48  ;;  %vm5878_vm10 = vcmask 654336  }
 0x687   :  { %8040 = vmatmul.mubr.msk.f32.vlgmr.msra.gmra.mrb[12].mxu1 %vm3923_vm6, %v3876_v44  ;;  %v4978_v13 = vpop.permute.xlu0 %4977  ;;  %v3895_v44 = vld [vmem:[%s15503_s7 + $0xe8] sm:$0xff] }
 0x688   :  { %8043 = vmatpush1.msk.msra.mxu1 %vm3930_vm12, %v4489_v28  ;;  %4473 = vmatprep.mubr.f32.mxu1 %v9568_v16  ;;  %v4974_v25 = vpop.permute.xlu1 %4973  ;;  %v4981_v22 = vsel %vm4979_vm4, %v4976_v29, %v4978_v13 }
 0x689   :  { %8046 = vmatprep.subr.msk.mxu1 %vm3930_vm12, %v4584_v7  ;;  %v4980_v53 = vsel %vm4979_vm4, %v4974_v25, %v4976_v29  ;;  %v3900_v25 = vld [vmem:[%s15503_s7 + $0x110] sm:$0xff]  ;;  %vm5978_vm4 = vcmask 646144  }
 0x68b   :  { %8041 = vmatmul.mubr.msk.f32.gmra.mrb[14].mxu1 %vm3923_vm6, %v3877_v56  ;;  %v5076_v42 = vpop.permute.xlu0 %5075 }
 0x68c   :  { %4564 = vmatprep.mubr.f32.mxu1 %v9568_v16  ;;  %v5078_v14 = vpop.permute.xlu1 %5077 }
 0x68d   :  { %v5081_v4 = vsel %vm5079_vm1, %v5076_v42, %v5078_v14  ;;  %v3902_v14 = vld [vmem:[%s15503_s7 + $0x120] sm:$0xff] }
 0x68f   :  { %8044 = vmatmul.mubr.msk.f32.vlgmr.msra.gmra.mrb[12].mxu1 %vm3923_vm6, %v3878_v38  ;;  %v5074_v0 = vpop.permute.xlu0 %5073 }
 0x690   :  { %8047 = vmatpush1.msk.msra.mxu1 %vm3930_vm12, %v4586_v10  ;;  %4570 = vmatprep.mubr.f32.mxu1 %v9568_v16  ;;  %v5176_v37 = vpop.permute.xlu1 %5175  ;;  %v5080_v17 = vsel %vm5079_vm1, %v5074_v0, %v5076_v42  ;;  %v3897_v10 = vld [vmem:[%s15503_s7 + $0xf8] sm:$0xff]  ;;  %vm6078_vm1 = vcmask 637952  }
 0x691   :  { %8050 = vmatprep.subr.msk.mxu1 %vm3930_vm12, %v4681_v47 }
 0x693   :  { %8045 = vmatmul.mubr.msk.f32.gmra.mrb[14].mxu1 %vm3923_vm6, %v3879_v26  ;;  %v5178_v23 = vpop.permute.xlu0 %5177  ;;  %v3898_v26 = vld [vmem:[%s15503_s7 + $0x100] sm:$0xff] }
 0x694   :  { %4661 = vmatprep.mubr.f32.mxu1 %v9568_v16  ;;  %v5174_v19 = vpop.permute.xlu1 %5173  ;;  %v5181_v20 = vsel %vm5179_vm7, %v5176_v37, %v5178_v23  ;;  %v3904_v23 = vld [vmem:[%s15503_s7 + $0x130] sm:$0xff] }
 0x695   :  { %v5180_v18 = vsel %vm5179_vm7, %v5174_v19, %v5176_v37  ;;  %vm6178_vm7 = vcmask 629760  }
 0x697   :  { %8048 = vmatmul.mubr.msk.f32.vlgmr.msra.gmra.mrb[12].mxu1 %vm3923_vm6, %v3880_v58  ;;  %v5276_v49 = vpop.permute.xlu0 %5275 }
 0x698   :  { %8051 = vmatpush1.msk.msra.mxu1 %vm3930_vm12, %v4683_v11  ;;  %4667 = vmatprep.mubr.f32.mxu1 %v9568_v16  ;;  %v5278_v21 = vpop.permute.xlu1 %5277  ;;  %v3899_v11 = vld [vmem:[%s15503_s7 + $0x108] sm:$0xff] }
 0x699   :  { %8054 = vmatprep.subr.msk.mxu1 %vm3930_vm12, %v4778_v2  ;;  %v5280_v40 = vsel %vm15509_vm8, %v5276_v49, %v5278_v21  ;;  %v3906_v21 = vld [vmem:[%s15503_s7 + $0x140] sm:$0xff]  ;;  %vm6278_vm8 = vcmask 621568  }
 0x69b   :  { %8049 = vmatmul.mubr.msk.f32.gmra.mrb[14].mxu1 %vm3923_vm6, %v3881_v63  ;;  %v5274_v57 = vpop.permute.xlu0 %5273 }
 0x69c   :  { %4758 = vmatprep.mubr.f32.mxu1 %v9568_v16  ;;  %v5375_v61 = vpop.permute.xlu1 %5374  ;;  %v5279_v9 = vsel %vm15510_vm11, %v5274_v57, %v5276_v49  ;;  %vm7919_vm11 = vcmask 687104  }
 0x69f   :  { %8052 = vmatmul.mubr.msk.f32.vlgmr.msra.gmra.mrb[12].mxu1 %vm3923_vm6, %v3882_v32  ;;  %v5377_v31 = vpop.permute.xlu0 %5376 }
 0x6a0   :  { %8055 = vmatpush1.msk.msra.mxu1 %vm3930_vm12, %v4780_v1  ;;  %4764 = vmatprep.mubr.f32.mxu1 %v9568_v16  ;;  %v5373_v5 = vpop.permute.xlu1 %5372  ;;  %v5380_v6 = vsel %vm5378_vm9, %v5375_v61, %v5377_v31 }
 0x6a1   :  { %8058 = vmatprep.subr.msk.mxu1 %vm3930_vm12, %v4881_v39  ;;  %v5379_v45 = vsel %vm5378_vm9, %v5373_v5, %v5375_v61  ;;  %v3901_v39 = vld [vmem:[%s15503_s7 + $0x118] sm:$0xff]  ;;  %v3908_v61 = vld [vmem:[%s15503_s7 + $0x150] sm:$0xff]  ;;  %vm9588_vm9 = vmmov 0  }
 0x6a3   :  { %8053 = vmatmul.mubr.msk.f32.gmra.mrb[14].mxu1 %vm3923_vm6, %v3883_v55  ;;  %v5475_v46 = vpop.permute.xlu0 %5474 }
 0x6a4   :  { %4855 = vmatprep.mubr.f32.mxu1 %v9568_v16  ;;  %v5477_v30 = vpop.permute.xlu1 %5476 }
 0x6a5   :  { %v5480_v47 = vsel %vm5478_vm14, %v5475_v46, %v5477_v30 }
 0x6a7   :  { %8056 = vmatmul.mubr.msk.f32.vlgmr.msra.gmra.mrb[12].mxu1 %vm3923_vm6, %v3884_v33  ;;  %v5473_v59 = vpop.permute.xlu0 %5472 }
 0x6a8   :  { %8059 = vmatpush1.msk.msra.mxu1 %vm3930_vm12, %v4880_v43  ;;  %4861 = vmatprep.mubr.f32.mxu1 %v9568_v16  ;;  %v5575_v7 = vpop.permute.xlu1 %5574  ;;  %v5479_v2 = vsel %vm5478_vm14, %v5473_v59, %v5475_v46  ;;  %v3912_v59 = vld [vmem:[%s15503_s7 + $0x170] sm:$0xff]  ;;  %vm7997_vm14 = vcmask 74752  }
 0x6a9   :  { %8062 = vmatprep.subr.msk.mxu1 %vm3930_vm12, %v4981_v22  ;;  %v3903_v22 = vld [vmem:[%s15503_s7 + $0x128] sm:$0xff] }
 0x6ab   :  { %8057 = vmatmul.mubr.msk.f32.gmra.mrb[14].mxu1 %vm3923_vm6, %v3885_v51  ;;  %v5577_v62 = vpop.permute.xlu0 %5576 }
 0x6ac   :  { %4956 = vmatprep.mubr.f32.mxu1 %v9568_v16  ;;  %v5573_v28 = vpop.permute.xlu1 %5572  ;;  %v5580_v48 = vsel %vm5578_vm15, %v5575_v7, %v5577_v62  ;;  %v3915_v62 = vld [vmem:[%s15503_s7 + $0x188] sm:$0xff] }
 0x6ad   :  { %v5579_v58 = vsel %vm5578_vm15, %v5573_v28, %v5575_v7  ;;  %v6436_v28 = vld [vmem:[%s15511_s16] sm:$0xff] }
 0x6af   :  { %8060 = vmatmul.mubr.msk.f32.vlgmr.msra.gmra.mrb[12].mxu1 %vm3923_vm6, %v3886_v12  ;;  %v5675_v56 = vpop.permute.xlu0 %5674 }
 0x6b0   :  { %8063 = vmatpush1.msk.msra.mxu1 %vm3930_vm12, %v4980_v53  ;;  %4962 = vmatprep.mubr.f32.mxu1 %v9568_v16  ;;  %v5677_v38 = vpop.permute.xlu1 %5676 }
 0x6b1   :  { %8066 = vmatprep.subr.msk.mxu1 %vm3930_vm12, %v5081_v4  ;;  %v5680_v29 = vsel %vm5678_vm3, %v5675_v56, %v5677_v38  ;;  %v3905_v4 = vld [vmem:[%s15503_s7 + $0x138] sm:$0xff] }
 0x6b3   :  { %8061 = vmatmul.mubr.msk.f32.gmra.mrb[14].mxu1 %vm3923_vm6, %v3887_v3  ;;  %v5673_v15 = vpop.permute.xlu0 %5672 }
 0x6b4   :  { %5056 = vmatprep.mubr.f32.mxu1 %v9568_v16  ;;  %v5775_v60 = vpop.permute.xlu1 %5774  ;;  %v5679_v32 = vsel %vm5678_vm3, %v5673_v15, %v5675_v56  ;;  %v6438_v56 = vld [vmem:[%s15511_s16 + $0x10] sm:$0xff] }
 0x6b7   :  { %8064 = vmatmul.mubr.msk.f32.vlgmr.msra.gmra.mrb[12].mxu1 %vm3923_vm6, %v3888_v8  ;;  %v5777_v63 = vpop.permute.xlu0 %5776 }
 0x6b8   :  { %8067 = vmatpush1.msk.msra.mxu1 %vm3930_vm12, %v5080_v17  ;;  %5062 = vmatprep.mubr.f32.mxu1 %v9568_v16  ;;  %v5773_v13 = vpop.permute.xlu1 %5772  ;;  %v5780_v42 = vsel %vm5778_vm2, %v5775_v60, %v5777_v63  ;;  %v6440_v63 = vld [vmem:[%s15511_s16 + $0x20] sm:$0xff] }
 0x6b9   :  { %8070 = vmatprep.subr.msk.mxu1 %vm3930_vm12, %v5181_v20  ;;  %v5779_v0 = vsel %vm5778_vm2, %v5773_v13, %v5775_v60  ;;  %v3907_v20 = vld [vmem:[%s15503_s7 + $0x148] sm:$0xff] }
 0x6ba   :  { %v6441_v13 = vld [vmem:[%s15511_s16 + $0x28] sm:$0xff] }
 0x6bb   :  { %8065 = vmatmul.mubr.msk.f32.gmra.mrb[14].mxu1 %vm3923_vm6, %v3889_v54  ;;  %v5875_v1 = vpop.permute.xlu0 %5874 }
 0x6bc   :  { %5156 = vmatprep.mubr.f32.mxu1 %v9568_v16  ;;  %v5877_v55 = vpop.permute.xlu1 %5876 }
 0x6bd   :  { %v5880_v37 = vsel %vm5878_vm10, %v5875_v1, %v5877_v55 }
 0x6bf   :  { %8068 = vmatmul.mubr.msk.f32.vlgmr.msra.gmra.mrb[12].mxu1 %vm3923_vm6, %v3890_v52  ;;  %v5873_v33 = vpop.permute.xlu0 %5872 }
 0x6c0   :  { %8071 = vmatpush1.msk.msra.mxu1 %vm3930_vm12, %v5180_v18  ;;  %5162 = vmatprep.mubr.f32.mxu1 %v9568_v16  ;;  %v5975_v43 = vpop.permute.xlu1 %5974  ;;  %v5879_v19 = vsel %vm5878_vm10, %v5873_v33, %v5875_v1  ;;  %v6443_v33 = vld [vmem:[%s15511_s16 + $0x38] sm:$0xff] }
 0x6c1   :  { %8074 = vmatprep.subr.msk.mxu1 %vm3930_vm12, %v5280_v40  ;;  %v3909_v40 = vld [vmem:[%s15503_s7 + $0x158] sm:$0xff] }
 0x6c3   :  { %8069 = vmatmul.mubr.msk.f32.gmra.mrb[14].mxu1 %vm3923_vm6, %v3891_v24  ;;  %v5977_v51 = vpop.permute.xlu0 %5976  ;;  %v3910_v24 = vld [vmem:[%s15503_s7 + $0x160] sm:$0xff] }
 0x6c4   :  { %5256 = vmatprep.mubr.f32.mxu1 %v9568_v16  ;;  %v5973_v12 = vpop.permute.xlu1 %5972  ;;  %v5980_v53 = vsel %vm5978_vm4, %v5975_v43, %v5977_v51  ;;  %v6446_v51 = vld [vmem:[%s15511_s16 + $0x50] sm:$0xff] }
 0x6c5   :  { %v5979_v8 = vsel %vm5978_vm4, %v5973_v12, %v5975_v43  ;;  %v6444_v43 = vld [vmem:[%s15511_s16 + $0x40] sm:$0xff] }
 0x6c7   :  { %8072 = vmatmul.mubr.msk.f32.vlgmr.msra.gmra.mrb[12].mxu1 %vm3923_vm6, %v3892_v41  ;;  %v6075_v3 = vpop.permute.xlu0 %6074 }
 0x6c8   :  { %8075 = vmatpush1.msk.msra.mxu1 %vm3930_vm12, %v5279_v9  ;;  %5262 = vmatprep.mubr.f32.mxu1 %v9568_v16  ;;  %v6077_v49 = vpop.permute.xlu1 %6076 }
 0x6c9   :  { %8078 = vmatprep.subr.msk.mxu1 %vm3930_vm12, %v5380_v6  ;;  %v6080_v57 = vsel %vm6078_vm1, %v6075_v3, %v6077_v49  ;;  %v3911_v6 = vld [vmem:[%s15503_s7 + $0x168] sm:$0xff]  ;;  %v6451_v49 = vld [vmem:[%s15511_s16 + $0x78] sm:$0xff] }
 0x6cb   :  { %8073 = vmatmul.mubr.msk.f32.gmra.mrb[14].mxu1 %vm3923_vm6, %v3893_v35  ;;  %v6073_v17 = vpop.permute.xlu0 %6072 }
 0x6cc   :  { %5355 = vmatprep.mubr.f32.mxu1 %v9568_v16  ;;  %v6175_v54 = vpop.permute.xlu1 %6174  ;;  %v6079_v31 = vsel %vm6078_vm1, %v6073_v17, %v6075_v3  ;;  %v6450_v3 = vld [vmem:[%s15511_s16 + $0x70] sm:$0xff]  ;;  %v6453_v17 = vld [vmem:[%s15511_s16 + $0x88] sm:$0xff] }
 0x6cf   :  { %8076 = vmatmul.mubr.msk.f32.vlgmr.msra.gmra.mrb[12].mxu1 %vm3923_vm6, %v3894_v50  ;;  %v6177_v52 = vpop.permute.xlu0 %6176  ;;  %v3913_v50 = vld [vmem:[%s15503_s7 + $0x178] sm:$0xff] }
 0x6d0   :  { %8079 = vmatpush1.msk.msra.mxu1 %vm3930_vm12, %v5379_v45  ;;  %5361 = vmatprep.mubr.f32.mxu1 %v9568_v16  ;;  %v6173_v18 = vpop.permute.xlu1 %6172  ;;  %v6180_v5 = vsel %vm6178_vm7, %v6175_v54, %v6177_v52  ;;  %v3914_v45 = vld [vmem:[%s15503_s7 + $0x180] sm:$0xff] }
 0x6d1   :  { %8082 = vmatprep.subr.msk.mxu1 %vm3930_vm12, %v5480_v47  ;;  %v6179_v30 = vsel %vm6178_vm7, %v6173_v18, %v6175_v54  ;;  %v6455_v54 = vld [vmem:[%s15511_s16 + $0x98] sm:$0xff]  ;;  %v6456_v52 = vld [vmem:[%s15511_s16 + $0xa0] sm:$0xff] }
 0x6d3   :  { %8077 = vmatmul.mubr.msk.f32.gmra.mrb[14].mxu1 %vm3923_vm6, %v3895_v44  ;;  %v6275_v46 = vpop.permute.xlu0 %6274 }
 0x6d4   :  { %5455 = vmatprep.mubr.f32.mxu1 %v9568_v16  ;;  %v6277_v41 = vpop.permute.xlu1 %6276 }
 0x6d5   :  { %v6280_v9 = vsel %vm6278_vm8, %v6275_v46, %v6277_v41  ;;  %v6461_v41 = vld [vmem:[%s15511_s16 + $0xc8] sm:$0xff] }
 0x6d7   :  { %8080 = vmatmul.mubr.msk.f32.vlgmr.msra.gmra.mrb[12].mxu1 %vm3923_vm6, %v3896_v27  ;;  %v6273_v35 = vpop.permute.xlu0 %6272  ;;  %v6437_v27 = vld [vmem:[%s15511_s16 + $0x8] sm:$0xff] }
 0x6d8   :  { %8083 = vmatpush1.msk.msra.mxu1 %vm3930_vm12, %v5479_v2  ;;  %5461 = vmatprep.mubr.f32.mxu1 %v9568_v16  ;;  %v6279_v7 = vsel %vm6278_vm8, %v6273_v35, %v6275_v46  ;;  %v6460_v46 = vld [vmem:[%s15511_s16 + $0xc0] sm:$0xff] }
 0x6d9   :  { %8086 = vmatprep.subr.msk.mxu1 %vm3930_vm12, %v5580_v48  ;;  %v9111_v48 = vpack.c.bf16 %v6437_v27, %v6436_v28 }
 0x6db   :  { %8081 = vmatmul.mubr.msk.f32.gmra.mrb[14].mxu1 %vm3923_vm6, %v3897_v10  ;;  %v6439_v10 = vld [vmem:[%s15511_s16 + $0x18] sm:$0xff]  ;;  %9112 = vmatpush1.bf16.msra.mxu0 %v9111_v48 }
 0x6dc   :  { %5555 = vmatprep.mubr.f32.mxu1 %v9568_v16  ;;  %v9114_v60 = vpack.c.bf16 %v6439_v10, %v6438_v56  ;;  %9113 = vmatprep.subr.bf16.mxu0 %v9566_v34 }
 0x6df   :  { %8084 = vmatmul.mubr.msk.f32.vlgmr.msra.gmra.mrb[12].mxu1 %vm3923_vm6, %v3898_v26  ;;  %9115 = vmatpush1.bf16.msra.mxu0 %v9114_v60 }
 0x6e0   :  { %8087 = vmatpush1.msk.msra.mxu1 %vm3930_vm12, %v5579_v58  ;;  %5561 = vmatprep.mubr.f32.mxu1 %v9568_v16 }
 0x6e1   :  { %8090 = vmatprep.subr.msk.mxu1 %vm3930_vm12, %v5680_v29  ;;  %9116 = vmatprep.subr.bf16.mxu0 %v9566_v34 }
 0x6e3   :  { %8085 = vmatmul.mubr.msk.f32.gmra.mrb[14].mxu1 %vm3923_vm6, %v3899_v11 }
 0x6e4   :  { %5655 = vmatprep.mubr.f32.mxu1 %v9568_v16 }
 0x6e5   :  { %v6377_v47 = vpop.permute.xlu1 %6376 }
 0x6e7   :  { %8088 = vmatmul.mubr.msk.f32.vlgmr.msra.gmra.mrb[12].mxu1 %vm3923_vm6, %v3900_v25 }
 0x6e8   :  { %8091 = vmatpush1.msk.msra.mxu1 %vm3930_vm12, %v5679_v32  ;;  %5661 = vmatprep.mubr.f32.mxu1 %v9568_v16  ;;  %v6382_v58 = vpop.permute.xlu0 %6381 }
 0x6e9   :  { %8094 = vmatprep.subr.msk.mxu1 %vm3930_vm12, %v5780_v42 }
 0x6eb   :  { %8089 = vmatmul.mubr.msk.f32.gmra.mrb[14].mxu1 %vm3923_vm6, %v3901_v39  ;;  %v9117_v39 = vpack.c.bf16 %v6441_v13, %v6440_v63 }
 0x6ec   :  { %5755 = vmatprep.mubr.f32.mxu1 %v9568_v16 }
 0x6ed   :  { %9118 = vmatpush1.bf16.msra.mxu0 %v9117_v39 }
 0x6ee   :  { %9119 = vmatprep.subr.bf16.mxu0 %v9566_v34 }
 0x6ef   :  { %8092 = vmatmul.mubr.msk.f32.vlgmr.msra.gmra.mrb[12].mxu1 %vm3923_vm6, %v3902_v14  ;;  %v6442_v14 = vld [vmem:[%s15511_s16 + $0x30] sm:$0xff] }
 0x6f0   :  { %8095 = vmatpush1.msk.msra.mxu1 %vm3930_vm12, %v5779_v0  ;;  %5761 = vmatprep.mubr.f32.mxu1 %v9568_v16  ;;  %v9120_v0 = vpack.c.bf16 %v6443_v33, %v6442_v14 }
 0x6f1   :  { %8098 = vmatprep.subr.msk.mxu1 %vm3930_vm12, %v5880_v37  ;;  %v6445_v37 = vld [vmem:[%s15511_s16 + $0x48] sm:$0xff] }
 0x6f2   :  { %9121 = vmatpush1.bf16.msra.mxu0 %v9120_v0 }
 0x6f3   :  { %8093 = vmatmul.mubr.msk.f32.gmra.mrb[14].mxu1 %vm3923_vm6, %v3903_v22  ;;  %v9123_v22 = vpack.c.bf16 %v6445_v37, %v6444_v43  ;;  %9122 = vmatprep.subr.bf16.mxu0 %v9566_v34 }
 0x6f4   :  { %5855 = vmatprep.mubr.f32.mxu1 %v9568_v16 }
 0x6f6   :  { %9124 = vmatpush1.bf16.msra.mxu0 %v9123_v22 }
 0x6f7   :  { %8096 = vmatmul.mubr.msk.f32.vlgmr.msra.gmra.mrb[12].mxu1 %vm3923_vm6, %v3904_v23  ;;  %v6447_v23 = vld [vmem:[%s15511_s16 + $0x58] sm:$0xff]  ;;  %9125 = vmatprep.subr.bf16.mxu0 %v9566_v34 }
 0x6f8   :  { %8099 = vmatpush1.msk.msra.mxu1 %vm3930_vm12, %v5879_v19  ;;  %5861 = vmatprep.mubr.f32.mxu1 %v9568_v16  ;;  %v9126_v12 = vpack.c.bf16 %v6447_v23, %v6446_v51  ;;  %v6448_v19 = vld [vmem:[%s15511_s16 + $0x60] sm:$0xff] }
 0x6f9   :  { %8102 = vmatprep.subr.msk.mxu1 %vm3930_vm12, %v5980_v53  ;;  %v6449_v53 = vld [vmem:[%s15511_s16 + $0x68] sm:$0xff] }
 0x6fa   :  { %9127 = vmatpush1.bf16.msra.mxu0 %v9126_v12 }
 0x6fb   :  { %8097 = vmatmul.mubr.msk.f32.gmra.mrb[14].mxu1 %vm3923_vm6, %v3905_v4  ;;  %v9129_v4 = vpack.c.bf16 %v6449_v53, %v6448_v19  ;;  %9128 = vmatprep.subr.bf16.mxu0 %v9566_v34 }
 0x6fc   :  { %5955 = vmatprep.mubr.f32.mxu1 %v9568_v16 }
 0x6fe   :  { %9130 = vmatpush1.bf16.msra.mxu0 %v9129_v4 }
 0x6ff   :  { %8100 = vmatmul.mubr.msk.f32.vlgmr.msra.gmra.mrb[12].mxu1 %vm3923_vm6, %v3906_v21  ;;  %v9132_v21 = vpack.c.bf16 %v6451_v49, %v6450_v3  ;;  %9131 = vmatprep.subr.bf16.mxu0 %v9566_v34 }
 0x700   :  { %8103 = vmatpush1.msk.msra.mxu1 %vm3930_vm12, %v5979_v8  ;;  %5961 = vmatprep.mubr.f32.mxu1 %v9568_v16  ;;  %v6452_v8 = vld [vmem:[%s15511_s16 + $0x80] sm:$0xff] }
 0x701   :  { %8106 = vmatprep.subr.msk.mxu1 %vm3930_vm12, %v6080_v57  ;;  %v9135_v57 = vpack.c.bf16 %v6453_v17, %v6452_v8 }
 0x702   :  { %9133 = vmatpush1.bf16.msra.mxu0 %v9132_v21 }
 0x703   :  { %8101 = vmatmul.mubr.msk.f32.gmra.mrb[14].mxu1 %vm3923_vm6, %v3907_v20  ;;  %9134 = vmatprep.subr.bf16.mxu0 %v9566_v34  ;;  %v6454_v20 = vld [vmem:[%s15511_s16 + $0x90] sm:$0xff] }
 0x704   :  { %6055 = vmatprep.mubr.f32.mxu1 %v9568_v16 }
 0x706   :  { %9136 = vmatpush1.bf16.msra.mxu0 %v9135_v57 }
 0x707   :  { %8104 = vmatmul.mubr.msk.f32.vlgmr.msra.gmra.mrb[12].mxu1 %vm3923_vm6, %v3908_v61  ;;  %v9138_v61 = vpack.c.bf16 %v6455_v54, %v6454_v20  ;;  %9137 = vmatprep.subr.bf16.mxu0 %v9566_v34 }
 0x708   :  { %8107 = vmatpush1.msk.msra.mxu1 %vm3930_vm12, %v6079_v31  ;;  %6061 = vmatprep.mubr.f32.mxu1 %v9568_v16  ;;  %v6457_v31 = vld [vmem:[%s15511_s16 + $0xa8] sm:$0xff] }
 0x709   :  { %8110 = vmatprep.subr.msk.mxu1 %vm3930_vm12, %v6180_v5  ;;  %v9141_v18 = vpack.c.bf16 %v6457_v31, %v6456_v52  ;;  %v6458_v5 = vld [vmem:[%s15511_s16 + $0xb0] sm:$0xff] }
 0x70a   :  { %9139 = vmatpush1.bf16.msra.mxu0 %v9138_v61 }
 0x70b   :  { %8105 = vmatmul.mubr.msk.f32.gmra.mrb[14].mxu1 %vm3923_vm6, %v3909_v40  ;;  %9140 = vmatprep.subr.bf16.mxu0 %v9566_v34  ;;  %v6459_v40 = vld [vmem:[%s15511_s16 + $0xb8] sm:$0xff] }
 0x70c   :  { %6155 = vmatprep.mubr.f32.mxu1 %v9568_v16 }
 0x70e   :  { %9142 = vmatpush1.bf16.msra.mxu0 %v9141_v18 }
 0x70f   :  { %8108 = vmatmul.mubr.msk.f32.vlgmr.msra.gmra.mrb[12].mxu1 %vm3923_vm6, %v3910_v24  ;;  %v9144_v24 = vpack.c.bf16 %v6459_v40, %v6458_v5  ;;  %9143 = vmatprep.subr.bf16.mxu0 %v9566_v34 }
 0x710   :  { %8111 = vmatpush1.msk.msra.mxu1 %vm3930_vm12, %v6179_v30  ;;  %6161 = vmatprep.mubr.f32.mxu1 %v9568_v16  ;;  %v9147_v30 = vpack.c.bf16 %v6461_v41, %v6460_v46 }
 0x711   :  { %8114 = vmatprep.subr.msk.mxu1 %vm3930_vm12, %v6280_v9  ;;  %v6462_v9 = vld [vmem:[%s15511_s16 + $0xd0] sm:$0xff] }
 0x712   :  { %9145 = vmatpush1.bf16.msra.mxu0 %v9144_v24 }
 0x713   :  { %8109 = vmatmul.mubr.msk.f32.gmra.mrb[14].mxu1 %vm3923_vm6, %v3911_v6  ;;  %9146 = vmatprep.subr.bf16.mxu0 %v9566_v34  ;;  %v6463_v6 = vld [vmem:[%s15511_s16 + $0xd8] sm:$0x7f] }
 0x714   :  { %6255 = vmatprep.mubr.f32.mxu1 %v9568_v16  ;;  %v9150_v35 = vpack.c.bf16 %v6463_v6, %v6462_v9 }
 0x716   :  { %9148 = vmatpush1.bf16.msra.mxu0 %v9147_v30 }
 0x717   :  { %8112 = vmatmul.mubr.msk.f32.vlgmr.msra.gmra.mrb[12].mxu1 %vm3923_vm6, %v3912_v59  ;;  %9149 = vmatprep.subr.bf16.mxu0 %v9566_v34 }
 0x718   :  { %8115 = vmatpush1.msk.msra.mxu1 %vm3930_vm12, %v6279_v7  ;;  %6261 = vmatprep.mubr.f32.mxu1 %v9568_v16  ;;  %vm15512_vm12 = vcmask 1039360  }
 0x719   :  { %9153 = vmatprep.subr.bf16.mxu1 %v9566_v34 }
 0x71a   :  { %9152 = vmatpush1.bf16.msk.msra.mxu0 %vm13894_vm0, %v9150_v35  ;;  %vm6464_vm0 = vcmask 777216  }
 0x71b   :  { %8113 = vmatmul.mubr.msk.f32.gmra.mrb[14].mxu1 %vm3923_vm6, %v3913_v50  ;;  %9168 = vmatprep.subr.bf16.mxu0 %v9566_v34 }
 0x71c   :  { %6355 = vmatprep.mubr.f32.mxu1 %v9568_v16 }
 0x71f   :  { %8116 = vmatmul.mubr.msk.f32.vlgmr.msra.gmra.mrb[12].mxu1 %vm3923_vm6, %v3914_v45 }
 0x720   :  { %6361 = vmatprep.mubr.f32.mxu1 %v9568_v16 }
 0x723   :  { %8117 = vmatmul.mubr.msk.f32.gmra.mrb[14].mxu1 %vm3923_vm6, %v3915_v62  ;;  %vm15513_vm6 = vmmov %vm15512_vm12 }
 0x724   :  { %8398 = vmatprep.mubr.msk.f32.mxu1 %vm9588_vm9, %v9568_v16 }
 0x7f2   :  { %v6357_v44 = vpop.f32.mrb[12].mxu1 }
 0x7f3   :  { %v14327_v2 = vadd.f32 %v6377_v47, %v6357_v44  ;;  %v6359_v38 = vpop.f32.mrb[13].mxu1 }
 0x7f4   :  { %v14332_v15 = vadd.f32 %v6377_v47, %v6359_v38 }
 0x7f5   :  { %v6388_v26 = vmax.f32 %v14327_v2, 0.0 }
 0x7f6   :  { %v6389_v29 = vmax.f32 %v14332_v15, 0.0  ;;  %v6363_v11 = vpop.f32.mrb[14].mxu1 }
 0x7f7   :  { %v14343_v25 = vadd.f32 %v6382_v58, %v6363_v11  ;;  %v6365_v32 = vpop.f32.mrb[15].mxu1  ;;  %6396 = vrot.lane.b32.xlu1 %v6388_v26, %s15307_s14 }
 0x7f8   :  { %v14348_v1 = vadd.f32 %v6382_v58, %v6365_v32  ;;  %6398 = vrot.lane.b32.xlu0 %v6389_v29, %s15307_s14 }
 0x7f9   :  { %v6390_v42 = vmax.f32 %v14343_v25, 0.0 }
 0x7fa   :  { %v6391_v55 = vmax.f32 %v14348_v1, 0.0 }
 0x7fb   :  { %6400 = vrot.lane.b32.xlu1 %v6390_v42, %s15307_s14 }
 0x7fc   :  { %6402 = vrot.lane.b32.xlu0 %v6391_v55, %s15307_s14 }
 0x869   :  { %v6397_v59 = vpop.permute.xlu1 %6396 }
 0x86a   :  { %v6399_v7 = vpop.permute.xlu0 %6398 }
 0x86b   :  { %v6404_v50 = vsel %vm15512_vm12, %v6397_v59, %v6399_v7  ;;  %v6411_v45 = vmax.f32 %v6389_v29, %v6399_v7 }
 0x86c   :  { %v6410_v62 = vmax.f32 %v6388_v26, %v6404_v50 }
 0x86d   :  { %6420 = vrot.lane.b32.xlu0 %v6411_v45, %s9569_s5  ;;  %v6401_v47 = vpop.permute.xlu1 %6400 }
 0x86e   :  { %v6403_v44 = vpop.permute.xlu0 %6402  ;;  %6418 = vrot.lane.b32.xlu1 %v6410_v62, %s9569_s5 }
 0x86f   :  { %v6405_v36 = vsel %vm15513_vm6, %v6401_v47, %v6403_v44  ;;  %v6413_v28 = vmax.f32 %v6391_v55, %v6403_v44 }
 0x870   :  { %v6412_v27 = vmax.f32 %v6390_v42, %v6405_v36 }
 0x871   :  { %6424 = vrot.lane.b32.xlu0 %v6413_v28, %s9569_s5 }
 0x872   :  { %6422 = vrot.lane.b32.xlu1 %v6412_v27, %s9569_s5  ;;  %s15514_s5 = sld [smem:[#allocation98_spill]] }
 0x878   :  { %v6583_v11 = vld [vmem:[%s15514_s5 + $0x10] sm:$0xff]  ;;  %v6584_v63 = vld [vmem:[%s15514_s5 + $0x18] sm:$0xff]  ;;  %v6581_v33 = vld [vmem:[%s15514_s5] sm:$0xff] }
 0x879   :  { %v9154_v13 = vpack.c.bf16 %v6584_v63, %v6583_v11  ;;  %v6591_v39 = vld [vmem:[%s15514_s5 + $0x50] sm:$0xff]  ;;  %v6592_v55 = vld [vmem:[%s15514_s5 + $0x58] sm:$0xff]  ;;  %v6582_v0 = vld [vmem:[%s15514_s5 + $0x8] sm:$0xff] }
 0x87a   :  { %v9169_v14 = vpack.c.bf16 %v6592_v55, %v6591_v39  ;;  %v9157_v37 = vpack.c.bf16 %v6582_v0, %v6581_v33  ;;  %v6585_v51 = vld [vmem:[%s15514_s5 + $0x20] sm:$0xff]  ;;  %v6586_v23 = vld [vmem:[%s15514_s5 + $0x28] sm:$0xff]  ;;  %v6595_v12 = vld [vmem:[%s15514_s5 + $0x70] sm:$0xff] }
 0x87b   :  { %9155 = vmatpush3.bf16.msra.mxu1 %v9154_v13  ;;  %v6596_v19 = vld [vmem:[%s15514_s5 + $0x78] sm:$0xff]  ;;  %v9160_v53 = vpack.c.bf16 %v6586_v23, %v6585_v51  ;;  %v6587_v3 = vld [vmem:[%s15514_s5 + $0x30] sm:$0xff]  ;;  %v6589_v61 = vld [vmem:[%s15514_s5 + $0x40] sm:$0xff] }
 0x87c   :  { %9156 = vmatprep.subr.bf16.mxu1 %v9566_v34  ;;  %v6588_v49 = vld [vmem:[%s15514_s5 + $0x38] sm:$0xff]  ;;  %v9175_v8 = vpack.c.bf16 %v6596_v19, %v6595_v12  ;;  %v6599_v17 = vld [vmem:[%s15514_s5 + $0x90] sm:$0xff]  ;;  %v6590_v52 = vld [vmem:[%s15514_s5 + $0x48] sm:$0xff] }
 0x87d   :  { %v6600_v57 = vld [vmem:[%s15514_s5 + $0x98] sm:$0xff]  ;;  %v9163_v20 = vpack.c.bf16 %v6588_v49, %v6587_v3  ;;  %v6603_v40 = vld [vmem:[%s15514_s5 + $0xb0] sm:$0xff]  ;;  %v9166_v46 = vpack.c.bf16 %v6590_v52, %v6589_v61  ;;  %v6593_v30 = vld [vmem:[%s15514_s5 + $0x60] sm:$0xff] }
 0x87e   :  { %v9181_v18 = vpack.c.bf16 %v6600_v57, %v6599_v17  ;;  %v6604_v24 = vld [vmem:[%s15514_s5 + $0xb8] sm:$0xff]  ;;  %v6594_v9 = vld [vmem:[%s15514_s5 + $0x68] sm:$0xff]  ;;  %v6607_v59 = vld [vmem:[%s15514_s5 + $0xd0] sm:$0xff] }
 0x87f   :  { %v9187_v35 = vpack.c.bf16 %v6604_v24, %v6603_v40  ;;  %v6608_v7 = vld [vmem:[%s15514_s5 + $0xd8] sm:$0xff]  ;;  %v9172_v50 = vpack.c.bf16 %v6594_v9, %v6593_v30  ;;  %v6609_v13 = vld [vmem:[%s15514_s5 + $0xe0] sm:$0xff]  ;;  %v7805_v39 = vld [vmem:[%s15515_s4 + $0x8] sm:$0xff] }
 0x880   :  { %v9193_v44 = vpack.c.bf16 %v6608_v7, %v6607_v59  ;;  %v7807_v33 = vld [vmem:[%s15515_s4 + $0x18] sm:$0xff]  ;;  %v7810_v51 = vld [vmem:[%s15515_s4 + $0x30] sm:$0xff]  ;;  %v7812_v19 = vld [vmem:[%s15515_s4 + $0x40] sm:$0xff] }
 0x881   :  { %v7811_v23 = vld [vmem:[%s15515_s4 + $0x38] sm:$0xff]  ;;  %v7814_v3 = vld [vmem:[%s15515_s4 + $0x50] sm:$0xff]  ;;  %v7817_v17 = vld [vmem:[%s15515_s4 + $0x68] sm:$0xff] }
 0x882   :  { %v9211_v12 = vpack.c.bf16 %v7811_v23, %v7810_v51  ;;  %v7815_v49 = vld [vmem:[%s15515_s4 + $0x58] sm:$0xff]  ;;  %v7818_v24 = vld [vmem:[%s15515_s4 + $0x70] sm:$0xff] }
 0x8df   :  { %v6421_v56 = vpop.permute.xlu0 %6420 }
 0x8e0   :  { %v6433_v2 = vmax.f32 %v6411_v45, %v6421_v56  ;;  %v6419_v38 = vpop.permute.xlu1 %6418  ;;  %v6597_v45 = vld [vmem:[%s15514_s5 + $0x80] sm:$0xff] }
 0x8e1   :  { %v6426_v48 = vsel %vm4391_vm13, %v6419_v38, %v6421_v56  ;;  %v6601_v38 = vld [vmem:[%s15514_s5 + $0xa0] sm:$0xff] }
 0x8e2   :  { %v6432_v10 = vmax.f32 %v6410_v62, %v6426_v48  ;;  %8119 = vmatprep.mubr.msk.f32.mxu0 %vm6464_vm0, %v6433_v2  ;;  %v6598_v62 = vld [vmem:[%s15514_s5 + $0x88] sm:$0xff] }
 0x8e3   :  { %v6425_v15 = vpop.permute.xlu0 %6424  ;;  %v9178_v56 = vpack.c.bf16 %v6598_v62, %v6597_v45  ;;  %v6602_v48 = vld [vmem:[%s15514_s5 + $0xa8] sm:$0xff] }
 0x8e4   :  { %v6435_v26 = vmax.f32 %v6413_v28, %v6425_v15  ;;  %6539 = vmatmul.mubr.f32.vlgmr.msra.gmra.mrb[2].mxu0 %v6432_v10  ;;  %v6423_v60 = vpop.permute.xlu1 %6422  ;;  %v6611_v28 = vld [vmem:[%s15514_s5 + $0xf0] sm:$0xff] }
 0x8e5   :  { %v6427_v58 = vsel %vm4391_vm13, %v6423_v60, %v6425_v15  ;;  %9170 = vmatpush3.bf16.msra.mxu0 %v9169_v14  ;;  %v6605_v60 = vld [vmem:[%s15514_s5 + $0xc0] sm:$0xff]  ;;  %v7806_v14 = vld [vmem:[%s15515_s4 + $0x10] sm:$0xff]  ;;  %vm7923_vm13 = vcmask 1043456  }
 0x8e6   :  { %v6434_v29 = vmax.f32 %v6412_v27, %v6427_v58  ;;  %8120 = vmatprep.mubr.msk.f32.mxu0 %vm6464_vm0, %v6435_v26  ;;  %9174 = vmatprep.subr.bf16.mxu0 %v9566_v34  ;;  %v6612_v27 = vld [vmem:[%s15514_s5 + $0xf8] sm:$0xff]  ;;  %v9184_v26 = vpack.c.bf16 %v6602_v48, %v6601_v38  ;;  %v6606_v58 = vld [vmem:[%s15514_s5 + $0xc8] sm:$0xff]  ;;  %v9205_v0 = vpack.c.bf16 %v7807_v33, %v7806_v14 }
 0x8e7   :  { %v9199_v15 = vpack.c.bf16 %v6612_v27, %v6611_v28  ;;  %v9190_v11 = vpack.c.bf16 %v6606_v58, %v6605_v60 }
 0x8e8   :  { %6544 = vmatmul.mubr.f32.gmra.mrb[4].mxu0 %v6434_v29 }
 0x8e9   :  { %8433 = vmatprep.mubr.msk.f32.mxu0 %vm9588_vm9, %v9568_v16 }
 0x9b7   :  { %v6540_v25 = vpop.f32.mrb[2].mxu0 }
 0x9b8   :  { %6549 = vxpose.xlu1.b32.start [1/2] (short) (narrow) %v6540_v25, 32  ;;  %v6542_v32 = vpop.f32.mrb[3].mxu0  ;;  %v6610_v25 = vld [vmem:[%s15514_s5 + $0xe8] sm:$0xff]  ;;  %s15516_s5 = sld [smem:[#allocation102_spill]] }
 0x9b9   :  { %v9196_v32 = vpack.c.bf16 %v6610_v25, %v6609_v13 }
 0x9bb   :  { %v6545_v1 = vpop.f32.mrb[4].mxu0 }
 0x9bc   :  { %6550 = vxpose.xlu1.b32.end [2/2] (short) (narrow) %v6545_v1, 32  ;;  %v6547_v42 = vpop.f32.mrb[5].mxu0 }
 0x9bd   :  { %v7804_v42 = vld [vmem:[%s15515_s4] sm:$0xff] }
 0x9be   :  { %v9202_v55 = vpack.c.bf16 %v7805_v39, %v7804_v42  ;;  %v7901_v57 = vld [vmem:[%s15516_s5] sm:$0xff]  ;;  %v7906_v40 = vld [vmem:[%s15516_s5 + $0x28] sm:$0xff]  ;;  %v7908_v30 = vld [vmem:[%s15516_s5 + $0x38] sm:$0xff] }
 0xa38   :  { %v6565_v43 = vpop.trf.xlu1 }
 0xa39   :  { %v6614_v22 = vrot.slane %v6565_v43, 2  ;;  %v6759_v54 = vrot.slane %v6565_v43, 4  ;;  %v6833_v41 = vrot.slane %v6565_v43, 6 }
 0xa3b   :  { %8399 = vmatmul.mubr.msk.f32.vlgmr.msra.gmra.mrb[16].mxu1 %vm1892_vm5, %v6614_v22 }
 0xa3c   :  { %9158 = vmatpush3.bf16.msra.mxu1 %v9157_v37  ;;  %8405 = vmatprep.mubr.msk.f32.mxu1 %vm9588_vm9, %v9568_v16  ;;  %v14497_v4 = vpop.trf.xlu1  ;;  %v7809_v37 = vld [vmem:[%s15515_s4 + $0x28] sm:$0xff] }
 0xa3d   :  { %9159 = vmatprep.subr.bf16.mxu1 %v9566_v34  ;;  %v6981_v21 = vrot.slane %v14497_v4, 2  ;;  %v7129_v31 = vrot.slane %v14497_v4, 6  ;;  %v7055_v2 = vrot.slane %v14497_v4, 4 }
 0xa3f   :  { %8406 = vmatmul.mubr.msk.f32.vlgmr.msra.gmra.mrb[18].mxu1 %vm1892_vm5, %v6565_v43  ;;  %8434 = vmatmul.mubr.msk.f32.vlgmr.msra.gmra.mrb[6].mxu0 %vm1892_vm5, %v6981_v21  ;;  %v7808_v43 = vld [vmem:[%s15515_s4 + $0x20] sm:$0xff] }
 0xa40   :  { %9161 = vmatpush3.bf16.msra.mxu1 %v9160_v53  ;;  %8412 = vmatprep.mubr.msk.f32.mxu1 %vm9588_vm9, %v9568_v16  ;;  %v14528_v5 = vpop.trf.xlu1  ;;  %v9208_v22 = vpack.c.bf16 %v7809_v37, %v7808_v43  ;;  %v7813_v53 = vld [vmem:[%s15515_s4 + $0x48] sm:$0xff]  ;;  %v7816_v21 = vld [vmem:[%s15515_s4 + $0x60] sm:$0xff] }
 0xa41   :  { %9162 = vmatprep.subr.bf16.mxu1 %v9566_v34  ;;  %9176 = vmatpush3.bf16.msra.mxu0 %v9175_v8  ;;  %v7277_v6 = vrot.slane %v14528_v5, 2  ;;  %v7425_v47 = vrot.slane %v14528_v5, 6  ;;  %v7351_v63 = vrot.slane %v14528_v5, 4  ;;  %v9217_v8 = vpack.c.bf16 %v7815_v49, %v7814_v3 }
 0xa42   :  { %8447 = vmatprep.mubr.msk.f32.mxu0 %vm9588_vm9, %v9568_v16  ;;  %9180 = vmatprep.subr.bf16.mxu0 %v9566_v34  ;;  %v9220_v61 = vpack.c.bf16 %v7817_v17, %v7816_v21  ;;  %v8137_v21 = vld [vmem:[%s15517_s27] ss:$0 sm:$0xff] }
 0xa43   :  { %8413 = vmatmul.mubr.msk.f32.vlgmr.msra.gmra.mrb[20].mxu1 %vm1892_vm5, %v6759_v54  ;;  %v7903_v54 = vld [vmem:[%s15516_s5 + $0x10] sm:$0xff] }
 0xa44   :  { %9164 = vmatpush3.bf16.msra.mxu1 %v9163_v20  ;;  %8419 = vmatprep.mubr.msk.f32.mxu1 %vm9588_vm9, %v9568_v16  ;;  %v6568_v36 = vpop.trf.xlu1  ;;  %v7902_v20 = vld [vmem:[%s15516_s5 + $0x8] sm:$0xff] }
 0xa45   :  { %9165 = vmatprep.subr.bf16.mxu1 %v9566_v34  ;;  %8448 = vmatmul.mubr.msk.f32.vlgmr.msra.gmra.mrb[8].mxu0 %vm1892_vm5, %v7129_v31  ;;  %v7573_v10 = vrot.slane %v6568_v36, 2  ;;  %v7721_v29 = vrot.slane %v6568_v36, 6  ;;  %v7647_v1 = vrot.slane %v6568_v36, 4  ;;  %v9223_v52 = vpack.c.bf16 %v7902_v20, %v7901_v57  ;;  %v7904_v31 = vld [vmem:[%s15516_s5 + $0x18] sm:$0xff]  ;;  %v7909_v20 = vld [vmem:[%s15516_s5 + $0x40] sm:$0xff] }
 0xa46   :  { %9182 = vmatpush3.bf16.msra.mxu0 %v9181_v18  ;;  %8461 = vmatprep.mubr.msk.f32.mxu0 %vm9588_vm9, %v9568_v16  ;;  %v9226_v18 = vpack.c.bf16 %v7904_v31, %v7903_v54  ;;  %v7910_v54 = vld [vmem:[%s15516_s5 + $0x48] sm:$0xff]  ;;  %v8138_v31 = vld [vmem:[%s15518_s19] ss:$0 sm:$0xff] }
 0xa47   :  { %8420 = vmatmul.mubr.msk.f32.vlgmr.msra.gmra.mrb[22].mxu1 %vm1892_vm5, %v6833_v41  ;;  %9186 = vmatprep.subr.bf16.mxu0 %v9566_v34  ;;  %v7907_v41 = vld [vmem:[%s15516_s5 + $0x30] sm:$0xff] }
 0xa48   :  { %9167 = vmatpush3.bf16.msra.mxu1 %v9166_v46  ;;  %8426 = vmatprep.mubr.msk.f32.mxu1 %vm9588_vm9, %v9568_v16  ;;  %v9232_v9 = vpack.c.bf16 %v7908_v30, %v7907_v41 }
 0xa49   :  { %9171 = vmatprep.subr.bf16.mxu1 %v9566_v34  ;;  %8462 = vmatmul.mubr.msk.f32.vlgmr.msra.gmra.mrb[10].mxu0 %vm1892_vm5, %v7277_v6 }
 0xa4a   :  { %9188 = vmatpush3.bf16.msra.mxu0 %v9187_v35  ;;  %8475 = vmatprep.mubr.msk.f32.mxu0 %vm9588_vm9, %v9568_v16 }
 0xa4b   :  { %8427 = vmatmul.mubr.msk.f32.vlgmr.msra.gmra.mrb[24].mxu1 %vm1892_vm5, %v14497_v4  ;;  %9192 = vmatprep.subr.bf16.mxu0 %v9566_v34  ;;  %v9214_v4 = vpack.c.bf16 %v7813_v53, %v7812_v19 }
 0xa4c   :  { %9173 = vmatpush3.bf16.msra.mxu1 %v9172_v50  ;;  %8440 = vmatprep.mubr.msk.f32.mxu1 %vm9588_vm9, %v9568_v16 }
 0xa4d   :  { %9177 = vmatprep.subr.bf16.mxu1 %v9566_v34  ;;  %8476 = vmatmul.mubr.msk.f32.vlgmr.msra.gmra.mrb[12].mxu0 %vm1892_vm5, %v7425_v47 }
 0xa4e   :  { %9194 = vmatpush3.bf16.msra.mxu0 %v9193_v44  ;;  %8489 = vmatprep.mubr.msk.f32.mxu0 %vm9588_vm9, %v9568_v16 }
 0xa4f   :  { %8441 = vmatmul.mubr.msk.f32.vlgmr.msra.gmra.mrb[26].mxu1 %vm1892_vm5, %v7055_v2  ;;  %9198 = vmatprep.subr.bf16.mxu0 %v9566_v34 }
 0xa50   :  { %9179 = vmatpush3.bf16.msra.mxu1 %v9178_v56  ;;  %8454 = vmatprep.mubr.msk.f32.mxu1 %vm9588_vm9, %v9568_v16 }
 0xa51   :  { %9183 = vmatprep.subr.bf16.mxu1 %v9566_v34  ;;  %8490 = vmatmul.mubr.msk.f32.vlgmr.msra.gmra.mrb[14].mxu0 %vm1892_vm5, %v7573_v10 }
 0xa52   :  { %9200 = vmatpush3.bf16.msra.mxu0 %v9199_v15  ;;  %8503 = vmatprep.mubr.msk.f32.mxu0 %vm9588_vm9, %v9568_v16 }
 0xa53   :  { %8455 = vmatmul.mubr.msk.f32.vlgmr.msra.gmra.mrb[28].mxu1 %vm1892_vm5, %v14528_v5  ;;  %9222 = vmatprep.subr.bf16.mxu0 %v9566_v34  ;;  %v7905_v5 = vld [vmem:[%s15516_s5 + $0x20] sm:$0xff] }
 0xa54   :  { %9185 = vmatpush3.bf16.msra.mxu1 %v9184_v26  ;;  %8468 = vmatprep.mubr.msk.f32.mxu1 %vm9588_vm9, %v9568_v16  ;;  %v9229_v46 = vpack.c.bf16 %v7906_v40, %v7905_v5 }
 0xa55   :  { %9189 = vmatprep.subr.bf16.mxu1 %v9566_v34  ;;  %8504 = vmatmul.mubr.msk.f32.vlgmr.msra.gmra.mrb[16].mxu0 %vm1892_vm5, %v7721_v29 }
 0xa56   :  { %8561 = vmatprep.mubr.msk.f32.mxu0 %vm9588_vm9, %v9568_v16  ;;  %9224 = vmatpush3.bf16.msra.mxu0 %v9223_v52  ;;  %v7911_v52 = vld [vmem:[%s15516_s5 + $0x50] sm:$0xf]  ;;  %s9493_s5 = scalar_lea.vmem %s8006_s29, 32 }
 0xa57   :  { %8469 = vmatmul.mubr.msk.f32.vlgmr.msra.gmra.mrb[30].mxu1 %vm1892_vm5, %v7351_v63  ;;  %9225 = vmatprep.subr.bf16.mxu0 %v9566_v34  ;;  %p9494_p0 = scmp.ne.s32.totalorder %s8006_s29, %s9493_s5  ;;  %p9499_p2 = scmp.lt.s32.totalorder %s9493_s5, %s9493_s5 }
 0xa58   :  { %9191 = vmatpush3.bf16.msra.mxu1 %v9190_v11  ;;  %8482 = vmatprep.mubr.msk.f32.mxu1 %vm9588_vm9, %v9568_v16 }
 0xa59   :  { %9195 = vmatprep.subr.bf16.mxu1 %v9566_v34  ;;  %p9500_p3 = por %p9499_p2, %p9498_p1 }
 0xa5a   :  { %9227 = vmatpush3.bf16.msra.mxu0 %v9226_v18 }
 0xa5b   :  { %8483 = vmatmul.mubr.msk.f32.vlgmr.msra.gmra.mrb[32].mxu1 %vm1892_vm5, %v6568_v36  ;;  %9228 = vmatprep.subr.bf16.mxu0 %v9566_v34  ;;  %p9501_p4 = pnand %p9500_p3, %p9494_p0 }
 0xa5c   :  { %9197 = vmatpush3.bf16.msra.mxu1 %v9196_v32  ;;  %8496 = vmatprep.mubr.msk.f32.mxu1 %vm9588_vm9, %v9568_v16 }
 0xa5d   :  { %9201 = vmatprep.subr.bf16.mxu1 %v9566_v34 }
 0xa5e   :  { %9230 = vmatpush3.bf16.msra.mxu0 %v9229_v46 }
 0xa5f   :  { %8497 = vmatmul.mubr.msk.f32.vlgmr.msra.gmra.mrb[34].mxu1 %vm1892_vm5, %v7647_v1  ;;  %9231 = vmatprep.subr.bf16.mxu0 %v9566_v34  ;;  %vm7826_vm5 = vcmask 982016  }
 0xa60   :  { %8536 = vmatprep.mubr.msk.f32.mxu1 %vm9588_vm9, %v9568_v16  ;;  %9203 = vmatpush3.bf16.msra.mxu1 %v9202_v55 }
 0xa61   :  { %9204 = vmatprep.subr.bf16.mxu1 %v9566_v34 }
 0xa62   :  { %9233 = vmatpush3.bf16.msra.mxu0 %v9232_v9 }
 0xa63   :  { %9234 = vmatprep.subr.bf16.mxu0 %v9566_v34 }
 0xa64   :  { %9206 = vmatpush3.bf16.msra.mxu1 %v9205_v0 }
 0xa65   :  { %9207 = vmatprep.subr.bf16.mxu1 %v9566_v34 }
 0xa68   :  { %9209 = vmatpush3.bf16.msra.mxu1 %v9208_v22 }
 0xa69   :  { %9210 = vmatprep.subr.bf16.mxu1 %v9566_v34 }
 0xa6c   :  { %9212 = vmatpush3.bf16.msra.mxu1 %v9211_v12 }
 0xa6d   :  { %9213 = vmatprep.subr.bf16.mxu1 %v9566_v34 }
 0xa70   :  { %9215 = vmatpush3.bf16.msra.mxu1 %v9214_v4 }
 0xa71   :  { %9216 = vmatprep.subr.bf16.mxu1 %v9566_v34 }
 0xa74   :  { %9218 = vmatpush3.bf16.msra.mxu1 %v9217_v8 }
 0xa75   :  { %9219 = vmatprep.subr.bf16.mxu1 %v9566_v34 }
 0xa78   :  { %9221 = vmatpush3.bf16.msra.mxu1 %v9220_v61  ;;  %v9235_v61 = vpack.c.bf16 %v7910_v54, %v7909_v20 }
 0xa79   :  { %8534 = vmatprep.subr.mxu1 %v9568_v16 }
 0xa7a   :  { %9236 = vmatpush3.bf16.msra.mxu0 %v9235_v61 }
 0xa7b   :  { %8559 = vmatprep.subr.mxu0 %v9568_v16  ;;  %v8140_v16 = vld [vmem:[%s15519_s28] ss:$0 sm:$0xff] }
 0xa7c   :  { %8535 = vmatpush3.msra.mxu1 %v7818_v24 }
 0xa7e   :  { %8560 = vmatpush3.msk.msra.mxu0 %vm7923_vm13, %v7911_v52 }
 0xb0e   :  { %v6683_v6 = vpop.f32.mrb[16].mxu1 }
 0xb0f   :  { %v8400_v35 = vpop.f32.mrb[17].mxu1 }
 0xb12   :  { %v6755_v59 = vpop.f32.mrb[18].mxu1  ;;  %v7050_v7 = vpop.f32.mrb[6].mxu0 }
 0xb13   :  { %v6756_v50 = vadd.f32 %v6755_v59, %v6683_v6  ;;  %v8407_v45 = vpop.f32.mrb[19].mxu1  ;;  %v8435_v62 = vpop.f32.mrb[7].mxu0 }
 0xb16   :  { %v6828_v47 = vpop.f32.mrb[20].mxu1 }
 0xb17   :  { %v6832_v44 = vadd.f32 %v6828_v47, %v6756_v50  ;;  %v8414_v36 = vpop.f32.mrb[21].mxu1 }
 0xb18   :  { %v7198_v28 = vpop.f32.mrb[8].mxu0 }
 0xb19   :  { %v8449_v27 = vpop.f32.mrb[9].mxu0 }
 0xb1a   :  { %v6902_v56 = vpop.f32.mrb[22].mxu1 }
 0xb1b   :  { %v6906_v2 = vadd.f32 %v6902_v56, %v6832_v44  ;;  %v8421_v38 = vpop.f32.mrb[23].mxu1 }
 0xb1c   :  { %v7346_v48 = vpop.f32.mrb[10].mxu0 }
 0xb1d   :  { %v8463_v10 = vpop.f32.mrb[11].mxu0 }
 0xb1e   :  { %v6976_v15 = vpop.f32.mrb[24].mxu1 }
 0xb1f   :  { %v6980_v26 = vadd.f32 %v6976_v15, %v6906_v2  ;;  %v8428_v34 = vpop.f32.mrb[25].mxu1 }
 0xb20   :  { %v7494_v60 = vpop.f32.mrb[12].mxu0 }
 0xb21   :  { %v7054_v58 = vadd.f32 %v7050_v7, %v6980_v26  ;;  %v8477_v29 = vpop.f32.mrb[13].mxu0 }
 0xb22   :  { %v7124_v11 = vpop.f32.mrb[26].mxu1 }
 0xb23   :  { %v7128_v63 = vadd.f32 %v7124_v11, %v7054_v58  ;;  %v8442_v13 = vpop.f32.mrb[27].mxu1 }
 0xb24   :  { %v7642_v25 = vpop.f32.mrb[14].mxu0 }
 0xb25   :  { %v7202_v32 = vadd.f32 %v7198_v28, %v7128_v63  ;;  %v8491_v1 = vpop.f32.mrb[15].mxu0 }
 0xb26   :  { %v7272_v42 = vpop.f32.mrb[28].mxu1 }
 0xb27   :  { %v7276_v39 = vadd.f32 %v7272_v42, %v7202_v32  ;;  %v8456_v55 = vpop.f32.mrb[29].mxu1 }
 0xb28   :  { %v7790_v14 = vpop.f32.mrb[16].mxu0 }
 0xb29   :  { %v7350_v33 = vadd.f32 %v7346_v48, %v7276_v39  ;;  %v8505_v0 = vpop.f32.mrb[17].mxu0 }
 0xb2a   :  { %v7420_v43 = vpop.f32.mrb[30].mxu1 }
 0xb2b   :  { %v7424_v37 = vadd.f32 %v7420_v43, %v7350_v33  ;;  %v8470_v22 = vpop.f32.mrb[31].mxu1 }
 0xb2d   :  { %v7498_v51 = vadd.f32 %v7494_v60, %v7424_v37 }
 0xb2e   :  { %v7568_v23 = vpop.f32.mrb[32].mxu1 }
 0xb2f   :  { %v7572_v12 = vadd.f32 %v7568_v23, %v7498_v51  ;;  %v8484_v19 = vpop.f32.mrb[33].mxu1 }
 0xb31   :  { %v7646_v53 = vadd.f32 %v7642_v25, %v7572_v12 }
 0xb32   :  { %v7716_v4 = vpop.f32.mrb[34].mxu1 }
 0xb33   :  { %v7720_v3 = vadd.f32 %v7716_v4, %v7646_v53  ;;  %v8498_v49 = vpop.f32.mrb[35].mxu1 }
 0xb35   :  { %v7794_v8 = vadd.f32 %v7790_v14, %v7720_v3 }
 0xb37   :  { %v7802_v17 = vadd.f32 %v8137_v21, %v7794_v8 }
 0xb39   :  { %v7803_v57 = vmax.f32 %v7802_v17, 0.0 }
 0xb3b   :  { %8537 = vmatmul.mubr.msk.f32.vlgmr.msra.gmra.mrb[36].mxu1 %vm7826_vm5, %v7803_v57 }
 0xc0e   :  { %v7896_v18 = vpop.f32.mrb[36].mxu1 }
 0xc0f   :  { %v7897_v5 = vadd.f32 %v8138_v31, %v7896_v18  ;;  %v8538_v40 = vpop.f32.mrb[37].mxu1 }
 0xc11   :  { %v7900_v24 = vmax.f32 %v7897_v5, 0.0 }
 0xc13   :  { %8562 = vmatmul.mubr.msk.f32.vlgmr.msra.gmra.mrb[18].mxu0 %vm7919_vm11, %v7900_v24 }
 0xce6   :  { %v7993_v46 = vpop.f32.mrb[18].mxu0 }
 0xce7   :  { %v7994_v41 = vadd.f32 %v8140_v16, %v7993_v46  ;;  %v8563_v30 = vpop.f32.mrb[19].mxu0 }
 0xce9   :  { %7998 = vst.msk [vmem:[#allocation2] sm:$0x3] %vm7997_vm14, %v7994_v41 }
 0xcea   :  { %9504 = shalt.err (!%p9501_p4)
}
 0xceb   :  { %s15520_s0 = sld [smem:[#allocation104_spill]] }
 0xcf1   :  { %s9505_s22 = scalar_lea.hbm %s15520_s0, 32 }
 0xcf2   :  { %p9506_p5 = scmp.ne.s32.totalorder %s15520_s0, %s9505_s22  ;;  %p9509_p6 = scmp.lt.u32.totalorder %s9505_s22, %s15520_s0 }
 0xcf4   :  { %p9511_p7 = pnand %p9509_p6, %p9506_p5 }
 0xcf6   :  { %9514 = shalt.err (!%p9511_p7)
}
 0xcf7   :  { %8008 = dma.vmem_to_hbm [thread:$0]  %s8006_s29, 32, %s15520_s0, [#allocation3]  }
 0xcf8   :  { %9515 = dma.done.wait [#allocation3], 32  }
 0xcf9   :  { %9516 = vsyncadd [#allocation3], 4294967264 }
 0xcfa   :  { %8012 = vsyncpa [#allocation3], 1 }

</bundles_post_ra>
